<compile_context>
chip_gen: v6e
topology: v6e:2x2x1
jax: 0.10.0
libtpu: 0.0.40
codegen_flags: <defaults>
</compile_context>

<pallas_src>
import functools
import math

import numpy as np

import jax
import jax.numpy as jnp
from jax.experimental import pallas as pl
from jax.experimental.pallas import tpu as pltpu


# --------------------------- fused head kernel -------------------------------
def _fused_head_kernel(x_ref, w1_ref, b1_ref, w2_ref, b2_ref, w3_ref, b3_ref,
                       ut_ref, o_ref, *, nb, hw):
    """Classifier head + x8 bilinear upsample for `nb` batch elements.

    x_ref : (nb*hw, K1)        bf16  im2col of the dilated conv's contributing taps
    w*_ref: matmul layout      bf16  weights;   b*_ref: (1, C) f32 biases
    ut_ref: (hw, OH*OW)        bf16  transposed bilinear operator (u^T)
    o_ref : (nb, NC_PAD, OH*OW) f32  channel-major output block
    """
    # conv_relu(512, 1024, 3, rate=12): zero-padding-only taps dropped statically
    # in the wrapper -> a single dense matmul. f32 accumulation on the MXU.
    h1 = jnp.dot(x_ref[...], w1_ref[...], preferred_element_type=jnp.float32)
    h1 = jnp.maximum(h1 + b1_ref[...], 0.0).astype(jnp.bfloat16)
    # Dropout2d(0.5): identity in eval/inference mode.
    # conv_relu(1024, 1024, 1)
    h2 = jnp.dot(h1, w2_ref[...], preferred_element_type=jnp.float32)
    h2 = jnp.maximum(h2 + b2_ref[...], 0.0).astype(jnp.bfloat16)
    # Dropout2d(0.5): identity in eval/inference mode.
    # Conv2d(1024, num_classes, 1) — classes zero-padded to NC_PAD (multiple of 8).
    logits = jnp.dot(h2, w3_ref[...], preferred_element_type=jnp.float32)
    logits = (logits + b3_ref[...]).astype(jnp.bfloat16)       # (nb*hw, NC_PAD)

    # F.interpolate(x8, bilinear, align_corners=False), fused and transposed:
    #   out[c, o] = sum_i logits[i, c] * u^T[i, o]   (channel-major, bf16 MXU op)
    ut = ut_ref[...]                                            # (hw, OHW) bf16
    for n in range(nb):                                         # static, tiny
        lg = logits[n * hw:(n + 1) * hw, :]                     # (hw, NC_PAD)
        o_ref[n] = jax.lax.dot_general(
            lg, ut,
            dimension_numbers=(((0,), (0,)), ((), ())),         # lhs^T @ rhs
            preferred_element_type=jnp.float32)                 # (NC_PAD, OHW)


# ------------------------------ host helpers ---------------------------------
def _bilinear_matrix(in_size, out_size):
    """1-D weights matching F.interpolate(mode='bilinear', align_corners=False)."""
    scale = in_size / out_size
    A = np.zeros((out_size, in_size), np.float32)
    for i in range(out_size):
        src = max((i + 0.5) * scale - 0.5, 0.0)
        i0 = min(int(np.floor(src)), in_size - 1)
        i1 = min(i0 + 1, in_size - 1)
        lam = src - i0
        A[i, i0] += 1.0 - lam
        A[i, i1] += lam
    return A


def _contributing_taps(H, W, rate):
    """Taps of the dilated 3x3 kernel that overlap the valid (non-padding) region."""
    keep = []
    for ky in range(3):
        for kx in range(3):
            dy, dx = (ky - 1) * rate, (kx - 1) * rate
            if abs(dy) < H and abs(dx) < W:
                keep.append((ky, kx))
    return keep


def _im2col_taps(x_nhwc, rate, keep):
    """Im2col of the dilated 3x3 'same' conv, restricted to contributing taps."""
    N, H, W, C = x_nhwc.shape
    if keep == [(1, 1)]:           # only the center tap -> plain reshape, no pad
        taps = [x_nhwc]
    else:
        xp = jnp.pad(x_nhwc, ((0, 0), (rate, rate), (rate, rate), (0, 0)))
        taps = [xp[:, ky * rate:ky * rate + H, kx * rate:kx * rate + W, :]
                for (ky, kx) in keep]
    xcol = taps[0] if len(taps) == 1 else jnp.concatenate(taps, axis=-1)
    return xcol.reshape(N, H * W, len(keep) * C)


def _tensorcores_per_chip():
    """2 on v7x (two TensorCores per chip), 1 otherwise / unknown."""
    try:
        kind = jax.devices()[0].device_kind.lower()
    except Exception:
        return 1
    return 2 if "v7" in kind else 1


def init_params(key, in_ch=512, mid_ch=1024, num_classes=21):
    """Deterministic synthetic weights with the module's shapes (f32 master copy).
      w1: (3, 3, in_ch, mid_ch)  ~ torch (mid_ch, in_ch, 3, 3)
      w2: (mid_ch, mid_ch)       ~ torch (mid_ch, mid_ch, 1, 1)
      w3: (mid_ch, num_classes)  ~ torch (num_classes, mid_ch, 1, 1)
    """
    k1, k2, k3, k4, k5, k6 = jax.random.split(key, 6)
    w1 = jax.random.normal(k1, (3, 3, in_ch, mid_ch), jnp.float32) / math.sqrt(9 * in_ch)
    b1 = jax.random.normal(k2, (mid_ch,), jnp.float32) * 0.01
    w2 = jax.random.normal(k3, (mid_ch, mid_ch), jnp.float32) / math.sqrt(mid_ch)
    b2 = jax.random.normal(k4, (mid_ch,), jnp.float32) * 0.01
    w3 = jax.random.normal(k5, (mid_ch, num_classes), jnp.float32) / math.sqrt(mid_ch)
    b3 = jax.random.normal(k6, (num_classes,), jnp.float32) * 0.01
    return dict(w1=w1, b1=b1, w2=w2, b2=b2, w3=w3, b3=b3)


# -------------------------------- forward ------------------------------------
def deeplab_v1_forward(x_nchw, params, *, num_classes=21, upsampling=8, rate=12):
    # backbone: identity passthrough (external constructor argument in PyTorch).
    feat = x_nchw
    N, C, H, W = feat.shape
    OH, OW = H * upsampling, W * upsampling
    HW, OHW = H * W, OH * OW

    x_nhwc = jnp.transpose(feat, (0, 2, 3, 1))

    # Statically drop dilation taps that read only zero 'same' padding (exact).
    keep = _contributing_taps(H, W, rate)
    xcol = _im2col_taps(x_nhwc, rate, keep)                      # (N, HW, K1)
    xcol = xcol.reshape(N * HW, -1).astype(jnp.bfloat16)         # (N*HW, K1)
    K1 = xcol.shape[-1]

    # Weights in matmul layout, bf16 operands (f32 accumulation in the kernel).
    w1 = jnp.concatenate([params["w1"][ky, kx] for (ky, kx) in keep], axis=0)
    w1 = w1.astype(jnp.bfloat16)                                 # (K1, MID)
    w2 = params["w2"].astype(jnp.bfloat16)                       # (MID, MID)
    MID = w2.shape[0]
    b1 = params["b1"].reshape(1, MID).astype(jnp.float32)
    b2 = params["b2"].reshape(1, MID).astype(jnp.float32)

    # Classes padded only to a sublane multiple (8 -> 24 for 21 classes): the
    # output is stored channel-major so no 128-lane class padding is needed.
    NC_PAD = 8 * int(pl.cdiv(num_classes, 8))
    w3 = jnp.zeros((MID, NC_PAD), jnp.bfloat16).at[:, :num_classes].set(
        params["w3"].astype(jnp.bfloat16))
    b3 = jnp.zeros((1, NC_PAD), jnp.float32).at[:, :num_classes].set(
        params["b3"].astype(jnp.float32))

    # Separable bilinear (align_corners=False) as one Kronecker operator, passed
    # pre-transposed as u^T (HW, OHW). Entries are multiples of 1/256 for x8, so
    # the bf16 cast is exact.
    ut_np = np.kron(_bilinear_matrix(H, OH), _bilinear_matrix(W, OW)).T
    ut = jnp.asarray(ut_np, jnp.bfloat16)                        # (HW, OHW)

    # Grid structure (generation dependent): one batch element per TensorCore on
    # 2-TC chips (v7x); otherwise fold the batch into M (single matmul, no serial
    # grid steps on single-TC v5e/v6e).
    ncores = _tensorcores_per_chip()
    G = ncores if (ncores > 1 and N % ncores == 0) else 1
    NB = N // G

    kernel = functools.partial(_fused_head_kernel, nb=NB, hw=HW)

    out = pl.pallas_call(
        kernel,
        out_shape=jax.ShapeDtypeStruct((N, NC_PAD, OHW), jnp.float32),
        grid_spec=pltpu.PrefetchScalarGridSpec(
            num_scalar_prefetch=0,
            grid=(G,),
            in_specs=[
                pl.BlockSpec((NB * HW, K1), lambda g: (g, 0)),   # xcol rows
                pl.BlockSpec((K1, MID), lambda g: (0, 0)),       # w1
                pl.BlockSpec((1, MID), lambda g: (0, 0)),        # b1
                pl.BlockSpec((MID, MID), lambda g: (0, 0)),      # w2
                pl.BlockSpec((1, MID), lambda g: (0, 0)),        # b2
                pl.BlockSpec((MID, NC_PAD), lambda g: (0, 0)),   # w3 (padded)
                pl.BlockSpec((1, NC_PAD), lambda g: (0, 0)),     # b3 (padded)
                pl.BlockSpec((HW, OHW), lambda g: (0, 0)),       # upsample op^T
            ],
            out_specs=pl.BlockSpec((NB, NC_PAD, OHW), lambda g: (g, 0, 0)),
        ),
        compiler_params=pltpu.CompilerParams(
            dimension_semantics=("parallel",),
            vmem_limit_bytes=24 * 1024 * 1024,
        ),
    )(xcol, w1, b1, w2, b2, w3, b3, ut)

    # Output is already channel-major: drop class padding and reshape to NCHW.
    return out[:, :num_classes, :].reshape(N, num_classes, OH, OW)


# ------------------------- pure-JAX f32 reference ----------------------------
def _reference_forward(x_nchw, params, *, num_classes=21, upsampling=8, rate=12):
    N, C, H, W = x_nchw.shape
    OH, OW = H * upsampling, W * upsampling
    hp = jax.lax.Precision.HIGHEST
    x_nhwc = jnp.transpose(x_nchw, (0, 2, 3, 1))
    keep = _contributing_taps(H, W, rate)
    xcol = _im2col_taps(x_nhwc, rate, keep).astype(jnp.float32)          # (N,HW,K1)
    w1 = jnp.concatenate([params["w1"][ky, kx] for (ky, kx) in keep], axis=0)
    h1 = jnp.maximum(jnp.einsum("nmk,kc->nmc", xcol, w1, precision=hp)
                     + params["b1"], 0.0)
    h2 = jnp.maximum(jnp.einsum("nmk,kc->nmc", h1, params["w2"], precision=hp)
                     + params["b2"], 0.0)
    logits = jnp.einsum("nmk,kc->nmc", h2, params["w3"], precision=hp) + params["b3"]
    u = jnp.asarray(np.kron(_bilinear_matrix(H, OH), _bilinear_matrix(W, OW)))
    out = jnp.einsum("om,nmc->noc", u, logits, precision=hp)             # (N,OHW,C)
    out = out.reshape(N, OH, OW, num_classes)
    return jnp.transpose(out, (0, 3, 1, 2))


if __name__ == "__main__":
    num_classes = 21
    key = jax.random.PRNGKey(0)
    pkey, xkey = jax.random.split(key)

    params = init_params(pkey, in_ch=512, mid_ch=1024, num_classes=num_classes)
    # 512-channel backbone feature map, small spatial size / batch (NCHW).
    x = jax.random.normal(xkey, (2, 512, 8, 8), jnp.float32)

    fwd = jax.jit(functools.partial(deeplab_v1_forward,
                                    num_classes=num_classes, upsampling=8))
    out = fwd(x, params)
    jax.block_until_ready(out)
    assert out.shape == (2, num_classes, 64, 64), out.shape
    assert out.dtype == jnp.float32

    # Tolerance-checked reference (bf16 operands in the kernel vs f32 reference).
    ref = _reference_forward(x, params, num_classes=num_classes, upsampling=8)
    rel = float(jnp.linalg.norm(out - ref) / jnp.linalg.norm(ref))
    assert rel < 5e-2, f"relative error too large: {rel}"
    print("KERNEL_OK")
</pallas_src>

<mosaic_0001>
module attributes {stable_mosaic.version = 11 : i64} {
  func.func @_fused_head_kernel(%arg0: i32, %arg1: memref<128x512xbf16, #tpu.memory_space<vmem>>, %arg2: memref<512x1024xbf16, #tpu.memory_space<vmem>>, %arg3: memref<1x1024xf32, #tpu.memory_space<vmem>>, %arg4: memref<1024x1024xbf16, #tpu.memory_space<vmem>>, %arg5: memref<1x1024xf32, #tpu.memory_space<vmem>>, %arg6: memref<1024x24xbf16, #tpu.memory_space<vmem>>, %arg7: memref<1x24xf32, #tpu.memory_space<vmem>>, %arg8: memref<64x4096xbf16, #tpu.memory_space<vmem>>, %arg9: memref<2x24x4096xf32, #tpu.memory_space<vmem>>) attributes {dimension_semantics = [#tpu.dimension_semantics<parallel>], iteration_bounds = array<i64: 1>, scalar_prefetch = 0 : i64, scratch_operands = 0 : i64, tpu.core_type = #tpu.core_type<tc>, window_params = [{transform_indices = @transform_0, window_bounds = array<i64: 128, 512>}, {pipeline_mode = #tpu.pipeline_mode<synchronous>, transform_indices = @transform_1, window_bounds = array<i64: 512, 1024>}, {pipeline_mode = #tpu.pipeline_mode<synchronous>, transform_indices = @transform_2, window_bounds = array<i64: 1, 1024>}, {pipeline_mode = #tpu.pipeline_mode<synchronous>, transform_indices = @transform_3, window_bounds = array<i64: 1024, 1024>}, {pipeline_mode = #tpu.pipeline_mode<synchronous>, transform_indices = @transform_4, window_bounds = array<i64: 1, 1024>}, {pipeline_mode = #tpu.pipeline_mode<synchronous>, transform_indices = @transform_5, window_bounds = array<i64: 1024, 24>}, {pipeline_mode = #tpu.pipeline_mode<synchronous>, transform_indices = @transform_6, window_bounds = array<i64: 1, 24>}, {pipeline_mode = #tpu.pipeline_mode<synchronous>, transform_indices = @transform_7, window_bounds = array<i64: 64, 4096>}, {transform_indices = @transform_8, window_bounds = array<i64: 2, 24, 4096>}]} {
    %c0 = arith.constant 0 : index
    %c0_0 = arith.constant 0 : index
    %0 = vector.load %arg1[%c0, %c0_0] : memref<128x512xbf16, #tpu.memory_space<vmem>>, vector<128x512xbf16>
    %c0_1 = arith.constant 0 : index
    %c0_2 = arith.constant 0 : index
    %1 = vector.load %arg2[%c0_1, %c0_2] : memref<512x1024xbf16, #tpu.memory_space<vmem>>, vector<512x1024xbf16>
    %cst = arith.constant dense<0.000000e+00> : vector<128x1024xf32>
    %2 = tpu.matmul %0, %1, %cst {dimension_numbers = #tpu.dot_dimension_numbers<[1], [0], [0], [1], [0, 0, 1, 1], [], []>} : vector<128x512xbf16>, vector<512x1024xbf16>, vector<128x1024xf32> -> vector<128x1024xf32>
    %c0_3 = arith.constant 0 : index
    %c0_4 = arith.constant 0 : index
    %3 = vector.load %arg3[%c0_3, %c0_4] : memref<1x1024xf32, #tpu.memory_space<vmem>>, vector<1x1024xf32>
    %4 = vector.broadcast %3 : vector<1x1024xf32> to vector<128x1024xf32>
    %5 = arith.addf %2, %4 : vector<128x1024xf32>
    %cst_5 = arith.constant 0.000000e+00 : f32
    %6 = vector.broadcast %cst_5 : f32 to vector<128x1024xf32>
    %7 = arith.maximumf %5, %6 : vector<128x1024xf32>
    %8 = arith.truncf %7 : vector<128x1024xf32> to vector<128x1024xbf16>
    %c0_6 = arith.constant 0 : index
    %c0_7 = arith.constant 0 : index
    %9 = vector.load %arg4[%c0_6, %c0_7] : memref<1024x1024xbf16, #tpu.memory_space<vmem>>, vector<1024x1024xbf16>
    %cst_8 = arith.constant dense<0.000000e+00> : vector<128x1024xf32>
    %10 = tpu.matmul %8, %9, %cst_8 {dimension_numbers = #tpu.dot_dimension_numbers<[1], [0], [0], [1], [0, 0, 1, 1], [], []>} : vector<128x1024xbf16>, vector<1024x1024xbf16>, vector<128x1024xf32> -> vector<128x1024xf32>
    %c0_9 = arith.constant 0 : index
    %c0_10 = arith.constant 0 : index
    %11 = vector.load %arg5[%c0_9, %c0_10] : memref<1x1024xf32, #tpu.memory_space<vmem>>, vector<1x1024xf32>
    %12 = vector.broadcast %11 : vector<1x1024xf32> to vector<128x1024xf32>
    %13 = arith.addf %10, %12 : vector<128x1024xf32>
    %cst_11 = arith.constant 0.000000e+00 : f32
    %14 = vector.broadcast %cst_11 : f32 to vector<128x1024xf32>
    %15 = arith.maximumf %13, %14 : vector<128x1024xf32>
    %16 = arith.truncf %15 : vector<128x1024xf32> to vector<128x1024xbf16>
    %c0_12 = arith.constant 0 : index
    %c0_13 = arith.constant 0 : index
    %17 = vector.load %arg6[%c0_12, %c0_13] : memref<1024x24xbf16, #tpu.memory_space<vmem>>, vector<1024x24xbf16>
    %cst_14 = arith.constant dense<0.000000e+00> : vector<128x24xf32>
    %18 = tpu.matmul %16, %17, %cst_14 {dimension_numbers = #tpu.dot_dimension_numbers<[1], [0], [0], [1], [0, 0, 1, 1], [], []>} : vector<128x1024xbf16>, vector<1024x24xbf16>, vector<128x24xf32> -> vector<128x24xf32>
    %c0_15 = arith.constant 0 : index
    %c0_16 = arith.constant 0 : index
    %19 = vector.load %arg7[%c0_15, %c0_16] : memref<1x24xf32, #tpu.memory_space<vmem>>, vector<1x24xf32>
    %20 = vector.broadcast %19 : vector<1x24xf32> to vector<128x24xf32>
    %21 = arith.addf %18, %20 : vector<128x24xf32>
    %22 = arith.truncf %21 : vector<128x24xf32> to vector<128x24xbf16>
    %c0_17 = arith.constant 0 : index
    %c0_18 = arith.constant 0 : index
    %23 = vector.load %arg8[%c0_17, %c0_18] : memref<64x4096xbf16, #tpu.memory_space<vmem>>, vector<64x4096xbf16>
    %24 = vector.extract_strided_slice %22 {offsets = [0, 0], sizes = [64, 24], strides = [1, 1]} : vector<128x24xbf16> to vector<64x24xbf16>
    %cst_19 = arith.constant dense<0.000000e+00> : vector<24x4096xf32>
    %25 = tpu.matmul %24, %23, %cst_19 {dimension_numbers = #tpu.dot_dimension_numbers<[0], [0], [1], [1], [0, 1, 1, 1], [], []>} : vector<64x24xbf16>, vector<64x4096xbf16>, vector<24x4096xf32> -> vector<24x4096xf32>
    %c0_20 = arith.constant 0 : index
    %c0_21 = arith.constant 0 : index
    %c0_22 = arith.constant 0 : index
    %26 = vector.load %arg9[%c0_20, %c0_21, %c0_22] : memref<2x24x4096xf32, #tpu.memory_space<vmem>>, vector<1x24x4096xf32>
    %27 = vector.shape_cast %26 : vector<1x24x4096xf32> to vector<24x4096xf32>
    %28 = vector.shape_cast %25 : vector<24x4096xf32> to vector<1x24x4096xf32>
    tpu.vector_store %arg9[%c0_20, %c0_21, %c0_22], %28 {strides = array<i32>} : memref<2x24x4096xf32, #tpu.memory_space<vmem>>, vector<1x24x4096xf32>,
    %29 = vector.extract_strided_slice %22 {offsets = [64, 0], sizes = [64, 24], strides = [1, 1]} : vector<128x24xbf16> to vector<64x24xbf16>
    %cst_23 = arith.constant dense<0.000000e+00> : vector<24x4096xf32>
    %30 = tpu.matmul %29, %23, %cst_23 {dimension_numbers = #tpu.dot_dimension_numbers<[0], [0], [1], [1], [0, 1, 1, 1], [], []>} : vector<64x24xbf16>, vector<64x4096xbf16>, vector<24x4096xf32> -> vector<24x4096xf32>
    %c1 = arith.constant 1 : index
    %c0_24 = arith.constant 0 : index
    %c0_25 = arith.constant 0 : index
    %31 = vector.load %arg9[%c1, %c0_24, %c0_25] : memref<2x24x4096xf32, #tpu.memory_space<vmem>>, vector<1x24x4096xf32>
    %32 = vector.shape_cast %31 : vector<1x24x4096xf32> to vector<24x4096xf32>
    %33 = vector.shape_cast %30 : vector<24x4096xf32> to vector<1x24x4096xf32>
    tpu.vector_store %arg9[%c1, %c0_24, %c0_25], %33 {strides = array<i32>} : memref<2x24x4096xf32, #tpu.memory_space<vmem>>, vector<1x24x4096xf32>,
    return
  }
  func.func @transform_0(%arg0: i32) -> (i32, i32) {
    %c0_i32 = arith.constant 0 : i32
    %c0_i32_0 = arith.constant 0 : i32
    return %arg0, %c0_i32 : i32, i32
  }
  func.func @transform_1(%arg0: i32) -> (i32, i32) {
    %c0_i32 = arith.constant 0 : i32
    %c0_i32_0 = arith.constant 0 : i32
    %c0_i32_1 = arith.constant 0 : i32
    return %c0_i32, %c0_i32_0 : i32, i32
  }
  func.func @transform_2(%arg0: i32) -> (i32, i32) {
    %c0_i32 = arith.constant 0 : i32
    %c0_i32_0 = arith.constant 0 : i32
    %c0_i32_1 = arith.constant 0 : i32
    return %c0_i32, %c0_i32_0 : i32, i32
  }
  func.func @transform_3(%arg0: i32) -> (i32, i32) {
    %c0_i32 = arith.constant 0 : i32
    %c0_i32_0 = arith.constant 0 : i32
    %c0_i32_1 = arith.constant 0 : i32
    return %c0_i32, %c0_i32_0 : i32, i32
  }
  func.func @transform_4(%arg0: i32) -> (i32, i32) {
    %c0_i32 = arith.constant 0 : i32
    %c0_i32_0 = arith.constant 0 : i32
    %c0_i32_1 = arith.constant 0 : i32
    return %c0_i32, %c0_i32_0 : i32, i32
  }
  func.func @transform_5(%arg0: i32) -> (i32, i32) {
    %c0_i32 = arith.constant 0 : i32
    %c0_i32_0 = arith.constant 0 : i32
    %c0_i32_1 = arith.constant 0 : i32
    return %c0_i32, %c0_i32_0 : i32, i32
  }
  func.func @transform_6(%arg0: i32) -> (i32, i32) {
    %c0_i32 = arith.constant 0 : i32
    %c0_i32_0 = arith.constant 0 : i32
    %c0_i32_1 = arith.constant 0 : i32
    return %c0_i32, %c0_i32_0 : i32, i32
  }
  func.func @transform_7(%arg0: i32) -> (i32, i32) {
    %c0_i32 = arith.constant 0 : i32
    %c0_i32_0 = arith.constant 0 : i32
    %c0_i32_1 = arith.constant 0 : i32
    return %c0_i32, %c0_i32_0 : i32, i32
  }
  func.func @transform_8(%arg0: i32) -> (i32, i32, i32) {
    %c0_i32 = arith.constant 0 : i32
    %c0_i32_0 = arith.constant 0 : i32
    %c0_i32_1 = arith.constant 0 : i32
    return %arg0, %c0_i32, %c0_i32_0 : i32, i32, i32
  }
}

</mosaic_0001>

<bundles_post_ra>
// kernel: deeplab_v1_forward.1
= control target key start
LH: loop header
LB: loop body
LE: loop exit
PB: predicated region body
PF: predicated region fallthrough
CT: control target
= control target key end

     0   :  { %vm9709_vm0 = vcmask 523264   ;;  %s20610_s1 = inlined_call_operand.vmem [shape: bf16[512,1024], index: 1, kind: input, shape index: {}]   ;;  %s20611_s0 = inlined_call_operand.vmem [shape: bf16[128,512], index: 0, kind: input, shape index: {}]   ;;  %s20612_s3 = inlined_call_operand.vmem [shape: bf16[1024,1024], index: 3, kind: input, shape index: {}]   ;;  %s20613_s2 = inlined_call_operand.vmem [shape: f32[1,1024], index: 2, kind: input, shape index: {}]   ;;  %s20614_s4 = inlined_call_operand.vmem [shape: f32[1,1024], index: 4, kind: input, shape index: {}]   ;;  %s20615_s5 = inlined_call_operand.vmem [shape: bf16[1024,24], index: 5, kind: input, shape index: {}]   ;;  %s20616_s6 = inlined_call_operand.vmem [shape: f32[1,24], index: 6, kind: input, shape index: {}]   ;;  %s20617_s7 = inlined_call_operand.vmem [shape: bf16[64,4096], index: 7, kind: input, shape index: {}]   ;;  %s20618_s8 = inlined_call_operand.vmem [shape: f32[2,24,4096], index: 8, kind: output, shape index: {}]  }
   0x1   :  { %v118_v0 = vld [vmem:[%s20610_s1 + $0x1c0] sm:$0xff]  ;;  %v13274_v59 = vld [vmem:[%s20611_s0 + $0xc] ss:$16 sps:$4 sm:$0xff]  }
   0x2   :  { %v122_v1 = vld [vmem:[%s20610_s1 + $0x1e0] sm:$0xff]  ;;  %1945 = vmatprep.mubr.bf16.mxu1 %v13274_v59 }
   0x3   :  { %v246_v2 = vld [vmem:[%s20610_s1 + $0x5c0] sm:$0xff]  ;;  %v11656_v3 = vcombine.high %v118_v0, %v122_v1  ;;  %v11655_v5 = vcombine.low %v118_v0, %v122_v1 }
   0x4   :  { %v250_v4 = vld [vmem:[%s20610_s1 + $0x5e0] sm:$0xff] }
   0x5   :  { %v110_v6 = vld [vmem:[%s20610_s1 + $0x180] sm:$0xff]  ;;  %v11784_v8 = vcombine.high %v246_v2, %v250_v4  ;;  %v11783_v9 = vcombine.low %v246_v2, %v250_v4  ;;  %1800 = vmatprep.subr.bf16.mxu0 %v11656_v3 }
   0x6   :  { %v114_v7 = vld [vmem:[%s20610_s1 + $0x1a0] sm:$0xff]  ;;  %1801 = vmatpush1.bf16.msra.mxu0 %v11655_v5 }
   0x7   :  { %v11648_v10 = vcombine.high %v110_v6, %v114_v7  ;;  %v238_v11 = vld [vmem:[%s20610_s1 + $0x580] sm:$0xff]  ;;  %1913 = vmatprep.subr.bf16.mxu1 %v11784_v8  ;;  %v11647_v18 = vcombine.low %v110_v6, %v114_v7 }
   0x8   :  { %v242_v12 = vld [vmem:[%s20610_s1 + $0x5a0] sm:$0xff]  ;;  %1914 = vmatpush1.bf16.msra.mxu1 %v11783_v9 }
   0x9   :  { %v102_v13 = vld [vmem:[%s20610_s1 + $0x140] sm:$0xff]  ;;  %v11776_v14 = vcombine.high %v238_v11, %v242_v12  ;;  %1802 = vmatprep.subr.bf16.mxu0 %v11648_v10  ;;  %v11775_v19 = vcombine.low %v238_v11, %v242_v12 }
   0xa   :  { %v106_v15 = vld [vmem:[%s20610_s1 + $0x160] sm:$0xff]  ;;  %1803 = vmatpush1.bf16.msra.mxu0 %v11647_v18 }
   0xb   :  { %v230_v16 = vld [vmem:[%s20610_s1 + $0x540] sm:$0xff]  ;;  %v11640_v20 = vcombine.high %v102_v13, %v106_v15  ;;  %1915 = vmatprep.subr.bf16.mxu1 %v11776_v14  ;;  %v11639_v26 = vcombine.low %v102_v13, %v106_v15 }
   0xc   :  { %v234_v17 = vld [vmem:[%s20610_s1 + $0x560] sm:$0xff]  ;;  %1916 = vmatpush1.bf16.msra.mxu1 %v11775_v19 }
   0xd   :  { %v11768_v21 = vcombine.high %v230_v16, %v234_v17  ;;  %v94_v22 = vld [vmem:[%s20610_s1 + $0x100] sm:$0xff]  ;;  %1804 = vmatprep.subr.bf16.mxu0 %v11640_v20  ;;  %v11767_v27 = vcombine.low %v230_v16, %v234_v17 }
   0xe   :  { %v98_v23 = vld [vmem:[%s20610_s1 + $0x120] sm:$0xff]  ;;  %1805 = vmatpush1.bf16.msra.mxu0 %v11639_v26 }
   0xf   :  { %v222_v24 = vld [vmem:[%s20610_s1 + $0x500] sm:$0xff]  ;;  %v11632_v28 = vcombine.high %v94_v22, %v98_v23  ;;  %1917 = vmatprep.subr.bf16.mxu1 %v11768_v21  ;;  %v11631_v34 = vcombine.low %v94_v22, %v98_v23 }
  0x10   :  { %v226_v25 = vld [vmem:[%s20610_s1 + $0x520] sm:$0xff]  ;;  %1918 = vmatpush1.bf16.msra.mxu1 %v11767_v27 }
  0x11   :  { %v11760_v29 = vcombine.high %v222_v24, %v226_v25  ;;  %v86_v30 = vld [vmem:[%s20610_s1 + $0xc0] sm:$0xff]  ;;  %1806 = vmatprep.subr.bf16.mxu0 %v11632_v28  ;;  %v11759_v35 = vcombine.low %v222_v24, %v226_v25 }
  0x12   :  { %v90_v31 = vld [vmem:[%s20610_s1 + $0xe0] sm:$0xff]  ;;  %1807 = vmatpush1.bf16.msra.mxu0 %v11631_v34 }
  0x13   :  { %v214_v32 = vld [vmem:[%s20610_s1 + $0x4c0] sm:$0xff]  ;;  %v11624_v36 = vcombine.high %v86_v30, %v90_v31  ;;  %1919 = vmatprep.subr.bf16.mxu1 %v11760_v29  ;;  %v11623_v42 = vcombine.low %v86_v30, %v90_v31 }
  0x14   :  { %v218_v33 = vld [vmem:[%s20610_s1 + $0x4e0] sm:$0xff]  ;;  %1920 = vmatpush1.bf16.msra.mxu1 %v11759_v35 }
  0x15   :  { %v11752_v37 = vcombine.high %v214_v32, %v218_v33  ;;  %v78_v38 = vld [vmem:[%s20610_s1 + $0x80] sm:$0xff]  ;;  %1808 = vmatprep.subr.bf16.mxu0 %v11624_v36  ;;  %v11751_v43 = vcombine.low %v214_v32, %v218_v33 }
  0x16   :  { %v82_v39 = vld [vmem:[%s20610_s1 + $0xa0] sm:$0xff]  ;;  %1809 = vmatpush1.bf16.msra.mxu0 %v11623_v42 }
  0x17   :  { %v206_v40 = vld [vmem:[%s20610_s1 + $0x480] sm:$0xff]  ;;  %v11616_v44 = vcombine.high %v78_v38, %v82_v39  ;;  %1921 = vmatprep.subr.bf16.mxu1 %v11752_v37  ;;  %v11615_v50 = vcombine.low %v78_v38, %v82_v39 }
  0x18   :  { %v210_v41 = vld [vmem:[%s20610_s1 + $0x4a0] sm:$0xff]  ;;  %1922 = vmatpush1.bf16.msra.mxu1 %v11751_v43 }
  0x19   :  { %v11744_v45 = vcombine.high %v206_v40, %v210_v41  ;;  %v70_v46 = vld [vmem:[%s20610_s1 + $0x40] sm:$0xff]  ;;  %1810 = vmatprep.subr.bf16.mxu0 %v11616_v44  ;;  %v11743_v52 = vcombine.low %v206_v40, %v210_v41 }
  0x1a   :  { %v74_v47 = vld [vmem:[%s20610_s1 + $0x60] sm:$0xff]  ;;  %1811 = vmatpush1.bf16.msra.mxu0 %v11615_v50 }
  0x1b   :  { %v198_v48 = vld [vmem:[%s20610_s1 + $0x440] sm:$0xff]  ;;  %v11608_v53 = vcombine.high %v70_v46, %v74_v47  ;;  %1923 = vmatprep.subr.bf16.mxu1 %v11744_v45  ;;  %v11607_v60 = vcombine.low %v70_v46, %v74_v47 }
  0x1c   :  { %v202_v49 = vld [vmem:[%s20610_s1 + $0x460] sm:$0xff]  ;;  %1924 = vmatpush1.bf16.msra.mxu1 %v11743_v52 }
  0x1d   :  { %v62_v51 = vld [vmem:[%s20610_s1] sm:$0xff]  ;;  %v11736_v55 = vcombine.high %v198_v48, %v202_v49  ;;  %1812 = vmatprep.subr.bf16.mxu0 %v11608_v53  ;;  %v11735_v61 = vcombine.low %v198_v48, %v202_v49 }
  0x1e   :  { %v66_v54 = vld [vmem:[%s20610_s1 + $0x20] sm:$0xff]  ;;  %1813 = vmatpush1.bf16.msra.mxu0 %v11607_v60 }
  0x1f   :  { %v13263_v56 = vld [vmem:[%s20611_s0 + $0x4] ss:$16 sps:$4 sm:$0xff]   ;;  %v11600_v62 = vcombine.high %v62_v51, %v66_v54  ;;  %1925 = vmatprep.subr.bf16.mxu1 %v11736_v55  ;;  %v11599_v4 = vcombine.low %v62_v51, %v66_v54 }
  0x20   :  { %v190_v57 = vld [vmem:[%s20610_s1 + $0x400] sm:$0xff]  ;;  %1832 = vmatprep.mubr.bf16.mxu0 %v13263_v56  ;;  %1926 = vmatpush1.bf16.msra.mxu1 %v11735_v61 }
  0x21   :  { %v194_v58 = vld [vmem:[%s20610_s1 + $0x420] sm:$0xff]  ;;  %1814 = vmatprep.subr.bf16.mxu0 %v11600_v62 }
  0x22   :  { %v182_v63 = vld [vmem:[%s20610_s1 + $0x3c0] sm:$0xff]  ;;  %v11728_v0 = vcombine.high %v190_v57, %v194_v58  ;;  %v11727_v5 = vcombine.low %v190_v57, %v194_v58  ;;  %1815 = vmatpush1.bf16.msra.mxu0 %v11599_v4  ;;  %v247_v4 = vld [vmem:[%s20610_s1 + $0x5c8] sm:$0xff] }
  0x23   :  { %v186_v1 = vld [vmem:[%s20610_s1 + $0x3e0] sm:$0xff] }
  0x24   :  { %v310_v2 = vld [vmem:[%s20610_s1 + $0x7c0] sm:$0xff]  ;;  %v11720_v6 = vcombine.high %v182_v63, %v186_v1  ;;  %1927 = vmatprep.subr.bf16.mxu1 %v11728_v0  ;;  %v11719_v12 = vcombine.low %v182_v63, %v186_v1  ;;  %v119_v1 = vld [vmem:[%s20610_s1 + $0x1c8] sm:$0xff] }
  0x25   :  { %v314_v3 = vld [vmem:[%s20610_s1 + $0x7e0] sm:$0xff]  ;;  %1928 = vmatpush1.bf16.msra.mxu1 %v11727_v5  ;;  %v251_v5 = vld [vmem:[%s20610_s1 + $0x5e8] sm:$0xff] }
  0x26   :  { %v11848_v7 = vcombine.high %v310_v2, %v314_v3  ;;  %v174_v8 = vld [vmem:[%s20610_s1 + $0x380] sm:$0xff]  ;;  %1816 = vmatprep.subr.bf16.mxu0 %v11720_v6  ;;  %v11847_v13 = vcombine.low %v310_v2, %v314_v3  ;;  %v123_v3 = vld [vmem:[%s20610_s1 + $0x1e8] sm:$0xff] }
  0x27   :  { %v178_v9 = vld [vmem:[%s20610_s1 + $0x3a0] sm:$0xff]  ;;  %1817 = vmatpush2.bf16.msra.mxu0 %v11719_v12 }
  0x28   :  { %v302_v10 = vld [vmem:[%s20610_s1 + $0x780] sm:$0xff]  ;;  %v11712_v14 = vcombine.high %v174_v8, %v178_v9  ;;  %1929 = vmatprep.subr.bf16.mxu1 %v11848_v7  ;;  %v11711_v20 = vcombine.low %v174_v8, %v178_v9  ;;  %v11658_v8 = vcombine.high %v119_v1, %v123_v3  ;;  %v11786_v9 = vcombine.high %v247_v4, %v251_v5 }
  0x29   :  { %v306_v11 = vld [vmem:[%s20610_s1 + $0x7a0] sm:$0xff]  ;;  %1930 = vmatpush2.bf16.msra.mxu1 %v11847_v13  ;;  %v239_v13 = vld [vmem:[%s20610_s1 + $0x588] sm:$0xff] }
  0x2a   :  { %v11840_v15 = vcombine.high %v302_v10, %v306_v11  ;;  %v166_v16 = vld [vmem:[%s20610_s1 + $0x340] sm:$0xff]  ;;  %1818 = vmatprep.subr.bf16.mxu0 %v11712_v14  ;;  %v11839_v21 = vcombine.low %v302_v10, %v306_v11  ;;  %v111_v10 = vld [vmem:[%s20610_s1 + $0x188] sm:$0xff] }
  0x2b   :  { %v170_v17 = vld [vmem:[%s20610_s1 + $0x360] sm:$0xff]  ;;  %1819 = vmatpush2.bf16.msra.mxu0 %v11711_v20  ;;  %v115_v11 = vld [vmem:[%s20610_s1 + $0x1a8] sm:$0xff] }
  0x2c   :  { %v294_v18 = vld [vmem:[%s20610_s1 + $0x740] sm:$0xff]  ;;  %v11704_v22 = vcombine.high %v166_v16, %v170_v17  ;;  %1931 = vmatprep.subr.bf16.mxu1 %v11840_v15  ;;  %v11703_v28 = vcombine.low %v166_v16, %v170_v17  ;;  %v243_v14 = vld [vmem:[%s20610_s1 + $0x5a8] sm:$0xff]  ;;  %v11657_v16 = vcombine.low %v119_v1, %v123_v3  ;;  %v11785_v17 = vcombine.low %v247_v4, %v251_v5 }
  0x2d   :  { %v298_v19 = vld [vmem:[%s20610_s1 + $0x760] sm:$0xff]  ;;  %1932 = vmatpush2.bf16.msra.mxu1 %v11839_v21  ;;  %v13406_v15 = vld [vmem:[%s20611_s0 + $0x8] ss:$16 sps:$4 sm:$0xff]   ;;  %v13519_v1 = vld [vmem:[%s20611_s0 + $0x6c] ss:$16 sps:$4 sm:$0xff]  }
  0x2e   :  { %v158_v23 = vld [vmem:[%s20610_s1 + $0x300] sm:$0xff]  ;;  %v11832_v24 = vcombine.high %v294_v18, %v298_v19  ;;  %1820 = vmatprep.subr.bf16.mxu0 %v11704_v22  ;;  %v11831_v29 = vcombine.low %v294_v18, %v298_v19  ;;  %v11650_v18 = vcombine.high %v111_v10, %v115_v11  ;;  %v11778_v19 = vcombine.high %v239_v13, %v243_v14  ;;  %v103_v21 = vld [vmem:[%s20610_s1 + $0x148] sm:$0xff] }
  0x2f   :  { %v162_v25 = vld [vmem:[%s20610_s1 + $0x320] sm:$0xff]  ;;  %1821 = vmatpush2.bf16.msra.mxu0 %v11703_v28  ;;  %v107_v22 = vld [vmem:[%s20610_s1 + $0x168] sm:$0xff] }
  0x30   :  { %v286_v26 = vld [vmem:[%s20610_s1 + $0x700] sm:$0xff]  ;;  %v11696_v30 = vcombine.high %v158_v23, %v162_v25  ;;  %1933 = vmatprep.subr.bf16.mxu1 %v11832_v24  ;;  %v11695_v36 = vcombine.low %v158_v23, %v162_v25  ;;  %v13423_v23 = vld [vmem:[%s20611_s0 + $0x2c] ss:$16 sps:$4 sm:$0xff]   ;;  %v11642_v28 = vcombine.high %v103_v21, %v107_v22 }
  0x31   :  { %v290_v27 = vld [vmem:[%s20610_s1 + $0x720] sm:$0xff]  ;;  %1934 = vmatpush2.bf16.msra.mxu1 %v11831_v29  ;;  %v231_v24 = vld [vmem:[%s20610_s1 + $0x548] sm:$0xff] }
  0x32   :  { %v150_v31 = vld [vmem:[%s20610_s1 + $0x2c0] sm:$0xff]  ;;  %v11824_v32 = vcombine.high %v286_v26, %v290_v27  ;;  %1822 = vmatprep.subr.bf16.mxu0 %v11696_v30  ;;  %v11823_v37 = vcombine.low %v286_v26, %v290_v27  ;;  %v235_v25 = vld [vmem:[%s20610_s1 + $0x568] sm:$0xff]  ;;  %v11649_v26 = vcombine.low %v111_v10, %v115_v11  ;;  %v11777_v27 = vcombine.low %v239_v13, %v243_v14 }
  0x33   :  { %v154_v33 = vld [vmem:[%s20610_s1 + $0x2e0] sm:$0xff]  ;;  %1823 = vmatpush2.bf16.msra.mxu0 %v11695_v36  ;;  %v11770_v29 = vcombine.high %v231_v24, %v235_v25  ;;  %v95_v30 = vld [vmem:[%s20610_s1 + $0x108] sm:$0xff]  ;;  %v11641_v36 = vcombine.low %v103_v21, %v107_v22 }
  0x34   :  { %v278_v34 = vld [vmem:[%s20610_s1 + $0x6c0] sm:$0xff]  ;;  %v11688_v38 = vcombine.high %v150_v31, %v154_v33  ;;  %1935 = vmatprep.subr.bf16.mxu1 %v11824_v32  ;;  %v11687_v44 = vcombine.low %v150_v31, %v154_v33  ;;  %v99_v31 = vld [vmem:[%s20610_s1 + $0x128] sm:$0xff] }
  0x35   :  { %v282_v35 = vld [vmem:[%s20610_s1 + $0x6e0] sm:$0xff]  ;;  %1936 = vmatpush2.bf16.msra.mxu1 %v11823_v37  ;;  %v223_v33 = vld [vmem:[%s20610_s1 + $0x508] sm:$0xff]  ;;  %v11769_v37 = vcombine.low %v231_v24, %v235_v25 }
  0x36   :  { %v11816_v39 = vcombine.high %v278_v34, %v282_v35  ;;  %v142_v40 = vld [vmem:[%s20610_s1 + $0x280] sm:$0xff]  ;;  %1824 = vmatprep.subr.bf16.mxu0 %v11688_v38  ;;  %v11815_v45 = vcombine.low %v278_v34, %v282_v35  ;;  %v227_v34 = vld [vmem:[%s20610_s1 + $0x528] sm:$0xff]  ;;  %v11634_v38 = vcombine.high %v95_v30, %v99_v31 }
  0x37   :  { %v146_v41 = vld [vmem:[%s20610_s1 + $0x2a0] sm:$0xff]  ;;  %1825 = vmatpush2.bf16.msra.mxu0 %v11687_v44  ;;  %v13454_v35 = vld [vmem:[%s20611_s0 + $0x28] ss:$16 sps:$4 sm:$0xff]   ;;  %v13567_v25 = vld [vmem:[%s20611_s0 + $0x8c] ss:$16 sps:$4 sm:$0xff]  }
  0x38   :  { %v270_v42 = vld [vmem:[%s20610_s1 + $0x680] sm:$0xff]  ;;  %v11680_v46 = vcombine.high %v142_v40, %v146_v41  ;;  %1937 = vmatprep.subr.bf16.mxu1 %v11816_v39  ;;  %v11679_v52 = vcombine.low %v142_v40, %v146_v41  ;;  %v11762_v39 = vcombine.high %v223_v33, %v227_v34  ;;  %v87_v41 = vld [vmem:[%s20610_s1 + $0xc8] sm:$0xff] }
  0x39   :  { %v274_v43 = vld [vmem:[%s20610_s1 + $0x6a0] sm:$0xff]  ;;  %1938 = vmatpush2.bf16.msra.mxu1 %v11815_v45  ;;  %v215_v44 = vld [vmem:[%s20610_s1 + $0x4c8] sm:$0xff] }
  0x3a   :  { %v11808_v47 = vcombine.high %v270_v42, %v274_v43  ;;  %v134_v48 = vld [vmem:[%s20610_s1 + $0x240] sm:$0xff]  ;;  %1826 = vmatprep.subr.bf16.mxu0 %v11680_v46  ;;  %v11807_v53 = vcombine.low %v270_v42, %v274_v43  ;;  %v91_v42 = vld [vmem:[%s20610_s1 + $0xe8] sm:$0xff]  ;;  %v11633_v46 = vcombine.low %v95_v30, %v99_v31 }
  0x3b   :  { %v138_v49 = vld [vmem:[%s20610_s1 + $0x260] sm:$0xff]  ;;  %1827 = vmatpush2.bf16.msra.mxu0 %v11679_v52  ;;  %v13471_v43 = vld [vmem:[%s20611_s0 + $0x4c] ss:$16 sps:$4 sm:$0xff]   ;;  %v13550_v14 = vld [vmem:[%s20611_s0 + $0x68] ss:$16 sps:$4 sm:$0xff]  }
  0x3c   :  { %v262_v50 = vld [vmem:[%s20610_s1 + $0x640] sm:$0xff]  ;;  %v11672_v54 = vcombine.high %v134_v48, %v138_v49  ;;  %1939 = vmatprep.subr.bf16.mxu1 %v11808_v47  ;;  %v11671_v62 = vcombine.low %v134_v48, %v138_v49  ;;  %v219_v45 = vld [vmem:[%s20610_s1 + $0x4e8] sm:$0xff]  ;;  %v11761_v47 = vcombine.low %v223_v33, %v227_v34  ;;  %v11626_v48 = vcombine.high %v87_v41, %v91_v42 }
  0x3d   :  { %v266_v51 = vld [vmem:[%s20610_s1 + $0x660] sm:$0xff]  ;;  %1940 = vmatpush2.bf16.msra.mxu1 %v11807_v53  ;;  %v11754_v49 = vcombine.high %v215_v44, %v219_v45  ;;  %v207_v53 = vld [vmem:[%s20610_s1 + $0x488] sm:$0xff] }
  0x3e   :  { %v126_v55 = vld [vmem:[%s20610_s1 + $0x200] sm:$0xff]  ;;  %v11800_v57 = vcombine.high %v262_v50, %v266_v51  ;;  %1828 = vmatprep.subr.bf16.mxu0 %v11672_v54  ;;  %v11799_v63 = vcombine.low %v262_v50, %v266_v51  ;;  %v79_v50 = vld [vmem:[%s20610_s1 + $0x88] sm:$0xff] }
  0x3f   :  { %v130_v58 = vld [vmem:[%s20610_s1 + $0x220] sm:$0xff]  ;;  %1829 = vmatpush2.bf16.msra.mxu0 %v11671_v62  ;;  %v83_v51 = vld [vmem:[%s20610_s1 + $0xa8] sm:$0xff] }
  0x40   :  { %v254_v60 = vld [vmem:[%s20610_s1 + $0x600] sm:$0xff]  ;;  %v11664_v0 = vcombine.high %v126_v55, %v130_v58  ;;  %1941 = vmatprep.subr.bf16.mxu1 %v11800_v57  ;;  %v11663_v6 = vcombine.low %v126_v55, %v130_v58  ;;  %v211_v54 = vld [vmem:[%s20610_s1 + $0x4a8] sm:$0xff]  ;;  %v11625_v57 = vcombine.low %v87_v41, %v91_v42  ;;  %v11753_v58 = vcombine.low %v215_v44, %v219_v45 }
  0x41   :  { %v258_v61 = vld [vmem:[%s20610_s1 + $0x620] sm:$0xff]  ;;  %1942 = vmatpush2.bf16.msra.mxu1 %v11799_v63  ;;  %v13502_v55 = vld [vmem:[%s20611_s0 + $0x48] ss:$16 sps:$4 sm:$0xff]   ;;  %v11617_v4 = vcombine.low %v79_v50, %v83_v51  ;;  %v11745_v5 = vcombine.low %v207_v53, %v211_v54 }
  0x42   :  { %v11792_v2 = vcombine.high %v254_v60, %v258_v61  ;;  %1830 = vmatprep.subr.bf16.mxu0 %v11664_v0  ;;  %v11791_v7 = vcombine.low %v254_v60, %v258_v61  ;;  %v13395_v12 = vld [vmem:[%s20611_s0] ss:$16 sps:$4 sm:$0xff]   ;;  %v13411_v20 = vld [vmem:[%s20611_s0 + $0x24] ss:$16 sps:$4 sm:$0xff]   ;;  %v11618_v60 = vcombine.high %v79_v50, %v83_v51  ;;  %v11746_v61 = vcombine.high %v207_v53, %v211_v54  ;;  %v71_v63 = vld [vmem:[%s20610_s1 + $0x48] sm:$0xff] }
  0x43   :  { %1831 = vmatpush2.bf16.msra.mxu0 %v11663_v6  ;;  %v13443_v32 = vld [vmem:[%s20611_s0 + $0x20] ss:$16 sps:$4 sm:$0xff]   ;;  %v13459_v40 = vld [vmem:[%s20611_s0 + $0x44] ss:$16 sps:$4 sm:$0xff]   ;;  %v75_v0 = vld [vmem:[%s20610_s1 + $0x68] sm:$0xff] }
  0x44   :  { %1943 = vmatprep.subr.bf16.mxu1 %v11792_v2  ;;  %2026 = vmatprep.subr.bf16.mxu0 %v11658_v8  ;;  %v13491_v52 = vld [vmem:[%s20611_s0 + $0x40] ss:$16 sps:$4 sm:$0xff]   ;;  %v13507_v62 = vld [vmem:[%s20611_s0 + $0x64] ss:$16 sps:$4 sm:$0xff]   ;;  %v199_v2 = vld [vmem:[%s20610_s1 + $0x448] sm:$0xff]  ;;  %v11610_v6 = vcombine.high %v71_v63, %v75_v0 }
  0x45   :  { %1944 = vmatpush2.bf16.msra.mxu1 %v11791_v7  ;;  %v203_v3 = vld [vmem:[%s20610_s1 + $0x468] sm:$0xff]  ;;  %v13539_v10 = vld [vmem:[%s20611_s0 + $0x60] ss:$16 sps:$4 sm:$0xff]   ;;  %v13555_v21 = vld [vmem:[%s20611_s0 + $0x84] ss:$16 sps:$4 sm:$0xff]  }
  0x46   :  { %2139 = vmatprep.subr.bf16.mxu1 %v11786_v9  ;;  %1833 = vmatmul.mubr.bf16.vlgmr.msra.gmra.mxu0 %v13395_v12  ;;  %v11738_v7 = vcombine.high %v199_v2, %v203_v3  ;;  %v63_v8 = vld [vmem:[%s20610_s1 + $0x8] sm:$0xff] }
  0x47   :  { %2027 = vmatpush1.bf16.msra.mxu0 %v11657_v16  ;;  %1842 = vmatprep.mubr.bf16.mxu0 %v13411_v20  ;;  %v67_v9 = vld [vmem:[%s20610_s1 + $0x28] sm:$0xff]  ;;  %v11609_v16 = vcombine.low %v71_v63, %v75_v0  ;;  %v13635_v63 = vld [vmem:[%s20611_s0 + $0xa0] ss:$16 sps:$4 sm:$0xff]  }
  0x48   :  { %1946 = vmatmul.mubr.bf16.vlgmr.msra.gmra.mxu1 %v13406_v15  ;;  %2028 = vmatprep.subr.bf16.mxu0 %v11650_v18  ;;  %v191_v11 = vld [vmem:[%s20610_s1 + $0x408] sm:$0xff]  ;;  %v11602_v18 = vcombine.high %v63_v8, %v67_v9 }
  0x49   :  { %2140 = vmatpush1.bf16.msra.mxu1 %v11785_v17  ;;  %1955 = vmatprep.mubr.bf16.mxu1 %v13423_v23  ;;  %v195_v13 = vld [vmem:[%s20610_s1 + $0x428] sm:$0xff]  ;;  %v11737_v17 = vcombine.low %v199_v2, %v203_v3 }
  0x4a   :  { %2141 = vmatprep.subr.bf16.mxu1 %v11778_v19  ;;  %v11730_v19 = vcombine.high %v191_v11, %v195_v13  ;;  %v183_v22 = vld [vmem:[%s20610_s1 + $0x3c8] sm:$0xff] }
  0x4b   :  { %2029 = vmatpush1.bf16.msra.mxu0 %v11649_v26  ;;  %v187_v24 = vld [vmem:[%s20610_s1 + $0x3e8] sm:$0xff] }
  0x4c   :  { %2030 = vmatprep.subr.bf16.mxu0 %v11642_v28  ;;  %v311_v26 = vld [vmem:[%s20610_s1 + $0x7c8] sm:$0xff]  ;;  %v11601_v28 = vcombine.low %v63_v8, %v67_v9  ;;  %v11722_v30 = vcombine.high %v183_v22, %v187_v24  ;;  %v11721_v41 = vcombine.low %v183_v22, %v187_v24  ;;  %v13651_v8 = vld [vmem:[%s20611_s0 + $0xc4] ss:$16 sps:$4 sm:$0xff]  }
  0x4d   :  { %2142 = vmatpush1.bf16.msra.mxu1 %v11777_v27  ;;  %v315_v27 = vld [vmem:[%s20610_s1 + $0x7e8] sm:$0xff] }
  0x4e   :  { %2143 = vmatprep.subr.bf16.mxu1 %v11770_v29  ;;  %1843 = vmatmul.mubr.bf16.gmra.mxu0 %v13443_v32  ;;  %v11729_v29 = vcombine.low %v191_v11, %v195_v13  ;;  %v11850_v31 = vcombine.high %v311_v26, %v315_v27  ;;  %v175_v33 = vld [vmem:[%s20610_s1 + $0x388] sm:$0xff]  ;;  %v11849_v42 = vcombine.low %v311_v26, %v315_v27 }
  0x4f   :  { %2031 = vmatpush1.bf16.msra.mxu0 %v11641_v36  ;;  %1852 = vmatprep.mubr.bf16.mxu0 %v13459_v40  ;;  %v179_v34 = vld [vmem:[%s20610_s1 + $0x3a8] sm:$0xff]  ;;  %v13587_v36 = vld [vmem:[%s20611_s0 + $0x80] ss:$16 sps:$4 sm:$0xff]  }
  0x50   :  { %1956 = vmatmul.mubr.bf16.gmra.mxu1 %v13454_v35  ;;  %2032 = vmatprep.subr.bf16.mxu0 %v11634_v38  ;;  %v307_v38 = vld [vmem:[%s20610_s1 + $0x7a8] sm:$0xff]  ;;  %v11714_v44 = vcombine.high %v175_v33, %v179_v34  ;;  %v11713_v53 = vcombine.low %v175_v33, %v179_v34 }
  0x51   :  { %2144 = vmatpush1.bf16.msra.mxu1 %v11769_v37  ;;  %1965 = vmatprep.mubr.bf16.mxu1 %v13471_v43  ;;  %v303_v37 = vld [vmem:[%s20610_s1 + $0x788] sm:$0xff] }
  0x52   :  { %2145 = vmatprep.subr.bf16.mxu1 %v11762_v39  ;;  %v13598_v39 = vld [vmem:[%s20611_s0 + $0x88] ss:$16 sps:$4 sm:$0xff]   ;;  %v11842_v45 = vcombine.high %v303_v37, %v307_v38  ;;  %v11841_v54 = vcombine.low %v303_v37, %v307_v38  ;;  %v13663_v13 = vld [vmem:[%s20611_s0 + $0xcc] ss:$16 sps:$4 sm:$0xff]  }
  0x53   :  { %2033 = vmatpush1.bf16.msra.mxu0 %v11633_v46  ;;  %v13603_v46 = vld [vmem:[%s20611_s0 + $0xa4] ss:$16 sps:$4 sm:$0xff]   ;;  %v295_v50 = vld [vmem:[%s20610_s1 + $0x748] sm:$0xff] }
  0x54   :  { %2034 = vmatprep.subr.bf16.mxu0 %v11626_v48  ;;  %v171_v48 = vld [vmem:[%s20610_s1 + $0x368] sm:$0xff] }
  0x55   :  { %2146 = vmatpush1.bf16.msra.mxu1 %v11761_v47  ;;  %v167_v47 = vld [vmem:[%s20610_s1 + $0x348] sm:$0xff] }
  0x56   :  { %2147 = vmatprep.subr.bf16.mxu1 %v11754_v49  ;;  %1853 = vmatmul.mubr.bf16.gmra.mxu0 %v13491_v52  ;;  %v13615_v49 = vld [vmem:[%s20611_s0 + $0xac] ss:$16 sps:$4 sm:$0xff]   ;;  %v13646_v3 = vld [vmem:[%s20611_s0 + $0xa8] ss:$16 sps:$4 sm:$0xff]  }
  0x57   :  { %2035 = vmatpush1.bf16.msra.mxu0 %v11625_v57  ;;  %1862 = vmatprep.mubr.bf16.mxu0 %v13507_v62  ;;  %v299_v51 = vld [vmem:[%s20610_s1 + $0x768] sm:$0xff]  ;;  %v11706_v57 = vcombine.high %v167_v47, %v171_v48 }
  0x58   :  { %1966 = vmatmul.mubr.bf16.gmra.mxu1 %v13502_v55  ;;  %2036 = vmatprep.subr.bf16.mxu0 %v11618_v60  ;;  %v159_v60 = vld [vmem:[%s20610_s1 + $0x308] sm:$0xff] }
  0x59   :  { %2148 = vmatpush1.bf16.msra.mxu1 %v11753_v58  ;;  %1975 = vmatprep.mubr.bf16.mxu1 %v13519_v1  ;;  %v11834_v58 = vcombine.high %v295_v50, %v299_v51  ;;  %v287_v0 = vld [vmem:[%s20610_s1 + $0x708] sm:$0xff] }
  0x5a   :  { %2149 = vmatprep.subr.bf16.mxu1 %v11746_v61  ;;  %v163_v61 = vld [vmem:[%s20610_s1 + $0x328] sm:$0xff] }
  0x5b   :  { %2037 = vmatpush1.bf16.msra.mxu0 %v11617_v4  ;;  %v291_v2 = vld [vmem:[%s20610_s1 + $0x728] sm:$0xff]  ;;  %v11705_v4 = vcombine.low %v167_v47, %v171_v48 }
  0x5c   :  { %2038 = vmatprep.subr.bf16.mxu0 %v11610_v6  ;;  %v11698_v6 = vcombine.high %v159_v60, %v163_v61  ;;  %v151_v9 = vld [vmem:[%s20610_s1 + $0x2c8] sm:$0xff] }
  0x5d   :  { %2150 = vmatpush1.bf16.msra.mxu1 %v11745_v5  ;;  %v11833_v5 = vcombine.low %v295_v50, %v299_v51  ;;  %v155_v11 = vld [vmem:[%s20610_s1 + $0x2e8] sm:$0xff] }
  0x5e   :  { %2151 = vmatprep.subr.bf16.mxu1 %v11738_v7  ;;  %1863 = vmatmul.mubr.bf16.gmra.mxu0 %v13539_v10  ;;  %v11826_v7 = vcombine.high %v287_v0, %v291_v2  ;;  %v11690_v22 = vcombine.high %v151_v9, %v155_v11  ;;  %v143_v26 = vld [vmem:[%s20610_s1 + $0x288] sm:$0xff]  ;;  %v11689_v33 = vcombine.low %v151_v9, %v155_v11  ;;  %v120_v9 = vld [vmem:[%s20610_s1 + $0x1d0] sm:$0xff] }
  0x5f   :  { %2039 = vmatpush1.bf16.msra.mxu0 %v11609_v16  ;;  %1872 = vmatprep.mubr.bf16.mxu0 %v13555_v21  ;;  %v279_v16 = vld [vmem:[%s20610_s1 + $0x6c8] sm:$0xff]  ;;  %v124_v11 = vld [vmem:[%s20610_s1 + $0x1f0] sm:$0xff] }
  0x60   :  { %1976 = vmatmul.mubr.bf16.gmra.mxu1 %v13550_v14  ;;  %2040 = vmatprep.subr.bf16.mxu0 %v11602_v18  ;;  %v11697_v18 = vcombine.low %v159_v60, %v163_v61  ;;  %v147_v27 = vld [vmem:[%s20610_s1 + $0x2a8] sm:$0xff]  ;;  %v13731_v60 = vld [vmem:[%s20611_s0 + $0xe0] ss:$16 sps:$4 sm:$0xff]  }
  0x61   :  { %2152 = vmatpush1.bf16.msra.mxu1 %v11737_v17  ;;  %1985 = vmatprep.mubr.bf16.mxu1 %v13567_v25  ;;  %v283_v17 = vld [vmem:[%s20610_s1 + $0x6e8] sm:$0xff]  ;;  %v11682_v37 = vcombine.high %v143_v26, %v147_v27  ;;  %v11681_v50 = vcombine.low %v143_v26, %v147_v27  ;;  %v112_v26 = vld [vmem:[%s20610_s1 + $0x190] sm:$0xff] }
  0x62   :  { %2153 = vmatprep.subr.bf16.mxu1 %v11730_v19  ;;  %v11825_v19 = vcombine.low %v287_v0, %v291_v2  ;;  %v11818_v24 = vcombine.high %v279_v16, %v283_v17  ;;  %v11817_v34 = vcombine.low %v279_v16, %v283_v17  ;;  %v263_v47 = vld [vmem:[%s20610_s1 + $0x648] sm:$0xff]  ;;  %v248_v16 = vld [vmem:[%s20610_s1 + $0x5d0] sm:$0xff] }
  0x63   :  { %2041 = vmatpush1.bf16.msra.mxu0 %v11601_v28  ;;  %v13683_v28 = vld [vmem:[%s20611_s0 + $0xc0] ss:$16 sps:$4 sm:$0xff]   ;;  %v267_v48 = vld [vmem:[%s20610_s1 + $0x668] sm:$0xff] }
  0x64   :  { %2042 = vmatprep.subr.bf16.mxu0 %v11722_v30  ;;  %v275_v30 = vld [vmem:[%s20610_s1 + $0x6a8] sm:$0xff]  ;;  %v252_v17 = vld [vmem:[%s20610_s1 + $0x5f0] sm:$0xff] }
  0x65   :  { %2154 = vmatpush1.bf16.msra.mxu1 %v11729_v29  ;;  %v271_v29 = vld [vmem:[%s20610_s1 + $0x688] sm:$0xff]  ;;  %v116_v27 = vld [vmem:[%s20610_s1 + $0x1b0] sm:$0xff] }
  0x66   :  { %2155 = vmatprep.subr.bf16.mxu1 %v11850_v31  ;;  %1873 = vmatmul.mubr.bf16.gmra.mxu0 %v13587_v36  ;;  %v13694_v31 = vld [vmem:[%s20611_s0 + $0xc8] ss:$16 sps:$4 sm:$0xff]   ;;  %v11810_v38 = vcombine.high %v271_v29, %v275_v30  ;;  %v11809_v51 = vcombine.low %v271_v29, %v275_v30  ;;  %v240_v29 = vld [vmem:[%s20610_s1 + $0x590] sm:$0xff] }
  0x67   :  { %2043 = vmatpush2.bf16.msra.mxu0 %v11721_v41  ;;  %1882 = vmatprep.mubr.bf16.mxu0 %v13603_v46  ;;  %v13699_v41 = vld [vmem:[%s20611_s0 + $0xe4] ss:$16 sps:$4 sm:$0xff]   ;;  %v255_v61 = vld [vmem:[%s20610_s1 + $0x608] sm:$0xff] }
  0x68   :  { %1986 = vmatmul.mubr.bf16.gmra.mxu1 %v13598_v39  ;;  %2044 = vmatprep.subr.bf16.mxu0 %v11714_v44  ;;  %v139_v44 = vld [vmem:[%s20610_s1 + $0x268] sm:$0xff]  ;;  %v244_v30 = vld [vmem:[%s20610_s1 + $0x5b0] sm:$0xff] }
  0x69   :  { %2156 = vmatpush2.bf16.msra.mxu1 %v11849_v42  ;;  %1995 = vmatprep.mubr.bf16.mxu1 %v13615_v49  ;;  %v135_v42 = vld [vmem:[%s20610_s1 + $0x248] sm:$0xff] }
  0x6a   :  { %2157 = vmatprep.subr.bf16.mxu1 %v11842_v45  ;;  %v13711_v45 = vld [vmem:[%s20611_s0 + $0xec] ss:$16 sps:$4 sm:$0xff]   ;;  %v13742_v2 = vld [vmem:[%s20611_s0 + $0xe8] ss:$16 sps:$4 sm:$0xff]  }
  0x6b   :  { %2045 = vmatpush2.bf16.msra.mxu0 %v11713_v53  ;;  %v11674_v53 = vcombine.high %v135_v42, %v139_v44  ;;  %v259_v0 = vld [vmem:[%s20610_s1 + $0x628] sm:$0xff] }
  0x6c   :  { %2046 = vmatprep.subr.bf16.mxu0 %v11706_v57  ;;  %v127_v57 = vld [vmem:[%s20610_s1 + $0x208] sm:$0xff] }
  0x6d   :  { %2158 = vmatpush2.bf16.msra.mxu1 %v11841_v54  ;;  %v11802_v54 = vcombine.high %v263_v47, %v267_v48 }
  0x6e   :  { %2159 = vmatprep.subr.bf16.mxu1 %v11834_v58  ;;  %1883 = vmatmul.mubr.bf16.gmra.mxu0 %v13635_v63  ;;  %v131_v58 = vld [vmem:[%s20610_s1 + $0x228] sm:$0xff] }
  0x6f   :  { %2047 = vmatpush2.bf16.msra.mxu0 %v11705_v4  ;;  %1892 = vmatprep.mubr.bf16.mxu0 %v13651_v8  ;;  %v11673_v4 = vcombine.low %v135_v42, %v139_v44  ;;  %v232_v42 = vld [vmem:[%s20610_s1 + $0x550] sm:$0xff] }
  0x70   :  { %1996 = vmatmul.mubr.bf16.gmra.mxu1 %v13646_v3  ;;  %2048 = vmatprep.subr.bf16.mxu0 %v11698_v6  ;;  %v11666_v6 = vcombine.high %v127_v57, %v131_v58  ;;  %v236_v44 = vld [vmem:[%s20610_s1 + $0x570] sm:$0xff] }
  0x71   :  { %2160 = vmatpush2.bf16.msra.mxu1 %v11833_v5  ;;  %2005 = vmatprep.mubr.bf16.mxu1 %v13663_v13  ;;  %v11801_v5 = vcombine.low %v263_v47, %v267_v48  ;;  %v11651_v47 = vcombine.low %v112_v26, %v116_v27  ;;  %v11779_v48 = vcombine.low %v240_v29, %v244_v30 }
  0x72   :  { %2161 = vmatprep.subr.bf16.mxu1 %v11826_v7  ;;  %v11794_v7 = vcombine.high %v255_v61, %v259_v0 }
  0x73   :  { %2049 = vmatpush2.bf16.msra.mxu0 %v11697_v18  ;;  %v11665_v18 = vcombine.low %v127_v57, %v131_v58  ;;  %v224_v57 = vld [vmem:[%s20610_s1 + $0x510] sm:$0xff] }
  0x74   :  { %2050 = vmatprep.subr.bf16.mxu0 %v11690_v22  ;;  %v11660_v22 = vcombine.high %v120_v9, %v124_v11  ;;  %v228_v58 = vld [vmem:[%s20610_s1 + $0x530] sm:$0xff] }
  0x75   :  { %2162 = vmatpush2.bf16.msra.mxu1 %v11825_v19  ;;  %v11793_v19 = vcombine.low %v255_v61, %v259_v0  ;;  %v11771_v0 = vcombine.low %v232_v42, %v236_v44 }
  0x76   :  { %2163 = vmatprep.subr.bf16.mxu1 %v11818_v24  ;;  %1893 = vmatmul.mubr.bf16.gmra.mxu0 %v13683_v28  ;;  %v11788_v24 = vcombine.high %v248_v16, %v252_v17 }
  0x77   :  { %2051 = vmatpush2.bf16.msra.mxu0 %v11689_v33  ;;  %1902 = vmatprep.mubr.bf16.mxu0 %v13699_v41  ;;  %v11787_v33 = vcombine.low %v248_v16, %v252_v17  ;;  %v11763_v17 = vcombine.low %v224_v57, %v228_v58 }
  0x78   :  { %2006 = vmatmul.mubr.bf16.gmra.mxu1 %v13694_v31  ;;  %2052 = vmatprep.subr.bf16.mxu0 %v11682_v37  ;;  %v11780_v37 = vcombine.high %v240_v29, %v244_v30 }
  0x79   :  { %2164 = vmatpush2.bf16.msra.mxu1 %v11817_v34  ;;  %2015 = vmatprep.mubr.bf16.mxu1 %v13711_v45  ;;  %v11652_v34 = vcombine.high %v112_v26, %v116_v27  ;;  %v208_v26 = vld [vmem:[%s20610_s1 + $0x490] sm:$0xff] }
  0x7a   :  { %2165 = vmatprep.subr.bf16.mxu1 %v11810_v38  ;;  %v108_v38 = vld [vmem:[%s20610_s1 + $0x170] sm:$0xff] }
  0x7b   :  { %2053 = vmatpush2.bf16.msra.mxu0 %v11681_v50  ;;  %v212_v27 = vld [vmem:[%s20610_s1 + $0x4b0] sm:$0xff] }
  0x7c   :  { %2054 = vmatprep.subr.bf16.mxu0 %v11674_v53  ;;  %v96_v53 = vld [vmem:[%s20610_s1 + $0x110] sm:$0xff] }
  0x7d   :  { %2166 = vmatpush2.bf16.msra.mxu1 %v11809_v51  ;;  %v11772_v51 = vcombine.high %v232_v42, %v236_v44  ;;  %v11747_v44 = vcombine.low %v208_v26, %v212_v27 }
  0x7e   :  { %2167 = vmatprep.subr.bf16.mxu1 %v11802_v54  ;;  %1903 = vmatmul.mubr.bf16.gmra.mxu0 %v13731_v60  ;;  %v100_v54 = vld [vmem:[%s20610_s1 + $0x130] sm:$0xff] }
  0x7f   :  { %2055 = vmatpush2.bf16.msra.mxu0 %v11673_v4  ;;  %2058 = vmatprep.mubr.bf16.mxu0 %v13263_v56  ;;  %v11659_v56 = vcombine.low %v120_v9, %v124_v11  ;;  %v11636_v4 = vcombine.high %v96_v53, %v100_v54  ;;  %v216_v9 = vld [vmem:[%s20610_s1 + $0x4d0] sm:$0xff]  ;;  %v11635_v16 = vcombine.low %v96_v53, %v100_v54 }
  0x80   :  { %2016 = vmatmul.mubr.bf16.gmra.mxu1 %v13742_v2  ;;  %2056 = vmatprep.subr.bf16.mxu0 %v11666_v6  ;;  %v88_v6 = vld [vmem:[%s20610_s1 + $0xd0] sm:$0xff] }
  0x81   :  { %2168 = vmatpush2.bf16.msra.mxu1 %v11801_v5  ;;  %2171 = vmatprep.mubr.bf16.mxu1 %v13274_v59  ;;  %v104_v59 = vld [vmem:[%s20610_s1 + $0x150] sm:$0xff]  ;;  %v11764_v5 = vcombine.high %v224_v57, %v228_v58 }
  0x82   :  { %2169 = vmatprep.subr.bf16.mxu1 %v11794_v7  ;;  %v11644_v50 = vcombine.high %v104_v59, %v108_v38  ;;  %v11643_v61 = vcombine.low %v104_v59, %v108_v38  ;;  %v92_v7 = vld [vmem:[%s20610_s1 + $0xf0] sm:$0xff] }
  0x83   :  { %2057 = vmatpush2.bf16.msra.mxu0 %v11665_v18  ;;  %v220_v11 = vld [vmem:[%s20610_s1 + $0x4f0] sm:$0xff]  ;;  %v11628_v18 = vcombine.high %v88_v6, %v92_v7  ;;  %v11627_v29 = vcombine.low %v88_v6, %v92_v7 }
  0x84   :  { %2252 = vmatprep.subr.bf16.mxu0 %v11660_v22  ;;  %v80_v22 = vld [vmem:[%s20610_s1 + $0x90] sm:$0xff]  ;;  %v11755_v30 = vcombine.low %v216_v9, %v220_v11 }
  0x85   :  { %2170 = vmatpush2.bf16.msra.mxu1 %v11793_v19  ;;  %v11756_v19 = vcombine.high %v216_v9, %v220_v11  ;;  %v200_v59 = vld [vmem:[%s20610_s1 + $0x450] sm:$0xff] }
  0x86   :  { %2365 = vmatprep.subr.bf16.mxu1 %v11788_v24  ;;  %2059 = vmatmul.mubr.bf16.vlgmr.msra.gmra.mxu0 %v13395_v12  ;;  %v84_v24 = vld [vmem:[%s20610_s1 + $0xb0] sm:$0xff] }
  0x87   :  { %2253 = vmatpush1.bf16.msra.mxu0 %v11659_v56  ;;  %2068 = vmatprep.mubr.bf16.mxu0 %v13411_v20  ;;  %v11620_v56 = vcombine.high %v80_v22, %v84_v24  ;;  %v204_v38 = vld [vmem:[%s20610_s1 + $0x470] sm:$0xff]  ;;  %v11619_v42 = vcombine.low %v80_v22, %v84_v24 }
  0x88   :  { %2172 = vmatmul.mubr.bf16.vlgmr.msra.gmra.mxu1 %v13406_v15  ;;  %2254 = vmatprep.subr.bf16.mxu0 %v11652_v34  ;;  %v72_v34 = vld [vmem:[%s20610_s1 + $0x50] sm:$0xff]  ;;  %v11739_v58 = vcombine.low %v200_v59, %v204_v38 }
  0x89   :  { %2366 = vmatpush1.bf16.msra.mxu1 %v11787_v33  ;;  %2181 = vmatprep.mubr.bf16.mxu1 %v13423_v23  ;;  %v11748_v33 = vcombine.high %v208_v26, %v212_v27  ;;  %v192_v53 = vld [vmem:[%s20610_s1 + $0x410] sm:$0xff] }
  0x8a   :  { %2367 = vmatprep.subr.bf16.mxu1 %v11780_v37  ;;  %v76_v37 = vld [vmem:[%s20610_s1 + $0x70] sm:$0xff] }
  0x8b   :  { %2255 = vmatpush1.bf16.msra.mxu0 %v11651_v47  ;;  %v11612_v47 = vcombine.high %v72_v34, %v76_v37  ;;  %v196_v54 = vld [vmem:[%s20610_s1 + $0x430] sm:$0xff]  ;;  %v11611_v57 = vcombine.low %v72_v34, %v76_v37 }
  0x8c   :  { %2256 = vmatprep.subr.bf16.mxu0 %v11644_v50  ;;  %v64_v50 = vld [vmem:[%s20610_s1 + $0x10] sm:$0xff]  ;;  %v11731_v11 = vcombine.low %v192_v53, %v196_v54 }
  0x8d   :  { %2368 = vmatpush1.bf16.msra.mxu1 %v11779_v48  ;;  %v11740_v48 = vcombine.high %v200_v59, %v204_v38  ;;  %v312_v6 = vld [vmem:[%s20610_s1 + $0x7d0] sm:$0xff] }
  0x8e   :  { %2369 = vmatprep.subr.bf16.mxu1 %v11772_v51  ;;  %2069 = vmatmul.mubr.bf16.gmra.mxu0 %v13443_v32  ;;  %v68_v51 = vld [vmem:[%s20610_s1 + $0x30] sm:$0xff] }
  0x8f   :  { %2257 = vmatpush1.bf16.msra.mxu0 %v11643_v61  ;;  %2078 = vmatprep.mubr.bf16.mxu0 %v13459_v40  ;;  %v11604_v61 = vcombine.high %v64_v50, %v68_v51  ;;  %v316_v7 = vld [vmem:[%s20610_s1 + $0x7f0] sm:$0xff]  ;;  %v11603_v9 = vcombine.low %v64_v50, %v68_v51 }
  0x90   :  { %2182 = vmatmul.mubr.bf16.gmra.mxu1 %v13454_v35  ;;  %2258 = vmatprep.subr.bf16.mxu0 %v11636_v4  ;;  %v184_v4 = vld [vmem:[%s20610_s1 + $0x3d0] sm:$0xff]  ;;  %v11851_v27 = vcombine.low %v312_v6, %v316_v7 }
  0x91   :  { %2370 = vmatpush1.bf16.msra.mxu1 %v11771_v0  ;;  %2191 = vmatprep.mubr.bf16.mxu1 %v13471_v43  ;;  %v11732_v0 = vcombine.high %v192_v53, %v196_v54  ;;  %v304_v22 = vld [vmem:[%s20610_s1 + $0x790] sm:$0xff] }
  0x92   :  { %2371 = vmatprep.subr.bf16.mxu1 %v11764_v5  ;;  %v188_v5 = vld [vmem:[%s20610_s1 + $0x3f0] sm:$0xff] }
  0x93   :  { %2259 = vmatpush1.bf16.msra.mxu0 %v11635_v16  ;;  %v11724_v16 = vcombine.high %v184_v4, %v188_v5  ;;  %v308_v24 = vld [vmem:[%s20610_s1 + $0x7b0] sm:$0xff]  ;;  %v11723_v26 = vcombine.low %v184_v4, %v188_v5 }
  0x94   :  { %2260 = vmatprep.subr.bf16.mxu0 %v11628_v18  ;;  %v176_v18 = vld [vmem:[%s20610_s1 + $0x390] sm:$0xff]  ;;  %v11843_v38 = vcombine.low %v304_v22, %v308_v24 }
  0x95   :  { %2372 = vmatpush1.bf16.msra.mxu1 %v11763_v17  ;;  %v11852_v17 = vcombine.high %v312_v6, %v316_v7  ;;  %v296_v34 = vld [vmem:[%s20610_s1 + $0x750] sm:$0xff] }
  0x96   :  { %2373 = vmatprep.subr.bf16.mxu1 %v11756_v19  ;;  %2079 = vmatmul.mubr.bf16.gmra.mxu0 %v13491_v52  ;;  %v180_v19 = vld [vmem:[%s20610_s1 + $0x3b0] sm:$0xff] }
  0x97   :  { %2261 = vmatpush1.bf16.msra.mxu0 %v11627_v29  ;;  %2088 = vmatprep.mubr.bf16.mxu0 %v13507_v62  ;;  %v11716_v29 = vcombine.high %v176_v18, %v180_v19  ;;  %v300_v37 = vld [vmem:[%s20610_s1 + $0x770] sm:$0xff]  ;;  %v11715_v59 = vcombine.low %v176_v18, %v180_v19 }
  0x98   :  { %2192 = vmatmul.mubr.bf16.gmra.mxu1 %v13502_v55  ;;  %2262 = vmatprep.subr.bf16.mxu0 %v11620_v56  ;;  %v168_v56 = vld [vmem:[%s20610_s1 + $0x350] sm:$0xff]  ;;  %v11835_v54 = vcombine.low %v296_v34, %v300_v37 }
  0x99   :  { %2374 = vmatpush1.bf16.msra.mxu1 %v11755_v30  ;;  %2201 = vmatprep.mubr.bf16.mxu1 %v13519_v1  ;;  %v11844_v30 = vcombine.high %v304_v22, %v308_v24  ;;  %v288_v50 = vld [vmem:[%s20610_s1 + $0x710] sm:$0xff] }
  0x9a   :  { %2375 = vmatprep.subr.bf16.mxu1 %v11748_v33  ;;  %v172_v33 = vld [vmem:[%s20610_s1 + $0x370] sm:$0xff] }
  0x9b   :  { %2263 = vmatpush1.bf16.msra.mxu0 %v11619_v42  ;;  %v11708_v42 = vcombine.high %v168_v56, %v172_v33  ;;  %v292_v51 = vld [vmem:[%s20610_s1 + $0x730] sm:$0xff]  ;;  %v11707_v53 = vcombine.low %v168_v56, %v172_v33 }
  0x9c   :  { %2264 = vmatprep.subr.bf16.mxu0 %v11612_v47  ;;  %v160_v47 = vld [vmem:[%s20610_s1 + $0x310] sm:$0xff]  ;;  %v11827_v7 = vcombine.low %v288_v50, %v292_v51 }
  0x9d   :  { %2376 = vmatpush1.bf16.msra.mxu1 %v11747_v44  ;;  %v11836_v44 = vcombine.high %v296_v34, %v300_v37  ;;  %v280_v4 = vld [vmem:[%s20610_s1 + $0x6d0] sm:$0xff] }
  0x9e   :  { %2377 = vmatprep.subr.bf16.mxu1 %v11740_v48  ;;  %2089 = vmatmul.mubr.bf16.gmra.mxu0 %v13539_v10  ;;  %v164_v48 = vld [vmem:[%s20610_s1 + $0x330] sm:$0xff] }
  0x9f   :  { %2265 = vmatpush1.bf16.msra.mxu0 %v11611_v57  ;;  %2098 = vmatprep.mubr.bf16.mxu0 %v13555_v21  ;;  %v11700_v57 = vcombine.high %v160_v47, %v164_v48  ;;  %v284_v5 = vld [vmem:[%s20610_s1 + $0x6f0] sm:$0xff]  ;;  %v11699_v6 = vcombine.low %v160_v47, %v164_v48 }
  0xa0   :  { %2202 = vmatmul.mubr.bf16.gmra.mxu1 %v13550_v14  ;;  %2266 = vmatprep.subr.bf16.mxu0 %v11604_v61  ;;  %v152_v61 = vld [vmem:[%s20610_s1 + $0x2d0] sm:$0xff]  ;;  %v11819_v24 = vcombine.low %v280_v4, %v284_v5 }
  0xa1   :  { %2378 = vmatpush1.bf16.msra.mxu1 %v11739_v58  ;;  %2211 = vmatprep.mubr.bf16.mxu1 %v13567_v25  ;;  %v11828_v58 = vcombine.high %v288_v50, %v292_v51  ;;  %v272_v18 = vld [vmem:[%s20610_s1 + $0x690] sm:$0xff] }
  0xa2   :  { %2379 = vmatprep.subr.bf16.mxu1 %v11732_v0  ;;  %v156_v0 = vld [vmem:[%s20610_s1 + $0x2f0] sm:$0xff] }
  0xa3   :  { %2267 = vmatpush1.bf16.msra.mxu0 %v11603_v9  ;;  %v11692_v9 = vcombine.high %v152_v61, %v156_v0  ;;  %v276_v19 = vld [vmem:[%s20610_s1 + $0x6b0] sm:$0xff]  ;;  %v11691_v22 = vcombine.low %v152_v61, %v156_v0  ;;  %v249_v61 = vld [vmem:[%s20610_s1 + $0x5d8] sm:$0xff] }
  0xa4   :  { %2268 = vmatprep.subr.bf16.mxu0 %v11724_v16  ;;  %v144_v16 = vld [vmem:[%s20610_s1 + $0x290] sm:$0xff]  ;;  %v11811_v37 = vcombine.low %v272_v18, %v276_v19  ;;  %v253_v0 = vld [vmem:[%s20610_s1 + $0x5f8] sm:$0xff] }
  0xa5   :  { %2380 = vmatpush1.bf16.msra.mxu1 %v11731_v11  ;;  %v11820_v11 = vcombine.high %v280_v4, %v284_v5  ;;  %v264_v56 = vld [vmem:[%s20610_s1 + $0x650] sm:$0xff] }
  0xa6   :  { %2381 = vmatprep.subr.bf16.mxu1 %v11852_v17  ;;  %2099 = vmatmul.mubr.bf16.gmra.mxu0 %v13587_v36  ;;  %v148_v17 = vld [vmem:[%s20610_s1 + $0x2b0] sm:$0xff] }
  0xa7   :  { %2269 = vmatpush2.bf16.msra.mxu0 %v11723_v26  ;;  %2108 = vmatprep.mubr.bf16.mxu0 %v13603_v46  ;;  %v11684_v26 = vcombine.high %v144_v16, %v148_v17  ;;  %v268_v33 = vld [vmem:[%s20610_s1 + $0x670] sm:$0xff]  ;;  %v11683_v34 = vcombine.low %v144_v16, %v148_v17  ;;  %v117_v16 = vld [vmem:[%s20610_s1 + $0x1b8] sm:$0xff] }
  0xa8   :  { %2212 = vmatmul.mubr.bf16.gmra.mxu1 %v13598_v39  ;;  %2270 = vmatprep.subr.bf16.mxu0 %v11716_v29  ;;  %v136_v29 = vld [vmem:[%s20610_s1 + $0x250] sm:$0xff]  ;;  %v11803_v51 = vcombine.low %v264_v56, %v268_v33  ;;  %v13997_v17 = vld [vmem:[%s20611_s0 + $0xc] ss:$16 sps:$4 sm:$0xff]  }
  0xa9   :  { %2382 = vmatpush2.bf16.msra.mxu1 %v11851_v27  ;;  %2221 = vmatprep.mubr.bf16.mxu1 %v13615_v49  ;;  %v11812_v27 = vcombine.high %v272_v18, %v276_v19  ;;  %v256_v47 = vld [vmem:[%s20610_s1 + $0x610] sm:$0xff]  ;;  %v241_v18 = vld [vmem:[%s20610_s1 + $0x598] sm:$0xff] }
  0xaa   :  { %2383 = vmatprep.subr.bf16.mxu1 %v11844_v30  ;;  %v140_v30 = vld [vmem:[%s20610_s1 + $0x270] sm:$0xff]  ;;  %v245_v19 = vld [vmem:[%s20610_s1 + $0x5b8] sm:$0xff] }
  0xab   :  { %2271 = vmatpush2.bf16.msra.mxu0 %v11715_v59  ;;  %v11676_v59 = vcombine.high %v136_v29, %v140_v30  ;;  %v260_v48 = vld [vmem:[%s20610_s1 + $0x630] sm:$0xff]  ;;  %v11675_v50 = vcombine.low %v136_v29, %v140_v30  ;;  %v105_v29 = vld [vmem:[%s20610_s1 + $0x158] sm:$0xff] }
  0xac   :  { %2272 = vmatprep.subr.bf16.mxu0 %v11708_v42  ;;  %v128_v42 = vld [vmem:[%s20610_s1 + $0x210] sm:$0xff]  ;;  %v11795_v5 = vcombine.low %v256_v47, %v260_v48  ;;  %v109_v30 = vld [vmem:[%s20610_s1 + $0x178] sm:$0xff] }
  0xad   :  { %2384 = vmatpush2.bf16.msra.mxu1 %v11843_v38  ;;  %v11804_v38 = vcombine.high %v264_v56, %v268_v33  ;;  %v233_v56 = vld [vmem:[%s20610_s1 + $0x558] sm:$0xff] }
  0xae   :  { %2385 = vmatprep.subr.bf16.mxu1 %v11836_v44  ;;  %2109 = vmatmul.mubr.bf16.gmra.mxu0 %v13635_v63  ;;  %v132_v44 = vld [vmem:[%s20610_s1 + $0x230] sm:$0xff]  ;;  %v237_v33 = vld [vmem:[%s20610_s1 + $0x578] sm:$0xff] }
  0xaf   :  { %2273 = vmatpush2.bf16.msra.mxu0 %v11707_v53  ;;  %2118 = vmatprep.mubr.bf16.mxu0 %v13651_v8  ;;  %v11668_v53 = vcombine.high %v128_v42, %v132_v44  ;;  %v11667_v4 = vcombine.low %v128_v42, %v132_v44  ;;  %v101_v42 = vld [vmem:[%s20610_s1 + $0x138] sm:$0xff] }
  0xb0   :  { %2222 = vmatmul.mubr.bf16.gmra.mxu1 %v13646_v3  ;;  %2274 = vmatprep.subr.bf16.mxu0 %v11700_v57  ;;  %v121_v57 = vld [vmem:[%s20610_s1 + $0x1d8] sm:$0xff] }
  0xb1   :  { %2386 = vmatpush2.bf16.msra.mxu1 %v11835_v54  ;;  %2231 = vmatprep.mubr.bf16.mxu1 %v13663_v13  ;;  %v11796_v54 = vcombine.high %v256_v47, %v260_v48  ;;  %v229_v44 = vld [vmem:[%s20610_s1 + $0x538] sm:$0xff]  ;;  %v11773_v47 = vcombine.low %v233_v56, %v237_v33 }
  0xb2   :  { %2387 = vmatprep.subr.bf16.mxu1 %v11828_v58  ;;  %v125_v58 = vld [vmem:[%s20610_s1 + $0x1f8] sm:$0xff] }
  0xb3   :  { %2275 = vmatpush2.bf16.msra.mxu0 %v11699_v6  ;;  %v11662_v6 = vcombine.high %v121_v57, %v125_v58 }
  0xb4   :  { %2276 = vmatprep.subr.bf16.mxu0 %v11692_v9  ;;  %v11790_v9 = vcombine.high %v249_v61, %v253_v0 }
  0xb5   :  { %2388 = vmatpush2.bf16.msra.mxu1 %v11827_v7  ;;  %v13985_v7 = vld [vmem:[%s20611_s0 + $0x4] ss:$16 sps:$4 sm:$0xff]  }
  0xb6   :  { %2389 = vmatprep.subr.bf16.mxu1 %v11820_v11  ;;  %2119 = vmatmul.mubr.bf16.gmra.mxu0 %v13683_v28  ;;  %v113_v11 = vld [vmem:[%s20610_s1 + $0x198] sm:$0xff] }
  0xb7   :  { %2277 = vmatpush2.bf16.msra.mxu0 %v11691_v22  ;;  %2128 = vmatprep.mubr.bf16.mxu0 %v13699_v41  ;;  %v11661_v22 = vcombine.low %v121_v57, %v125_v58 }
  0xb8   :  { %2232 = vmatmul.mubr.bf16.gmra.mxu1 %v13694_v31  ;;  %2278 = vmatprep.subr.bf16.mxu0 %v11684_v26  ;;  %v11654_v26 = vcombine.high %v113_v11, %v117_v16 }
  0xb9   :  { %2390 = vmatpush2.bf16.msra.mxu1 %v11819_v24  ;;  %2241 = vmatprep.mubr.bf16.mxu1 %v13711_v45  ;;  %v11789_v24 = vcombine.low %v249_v61, %v253_v0  ;;  %v81_v0 = vld [vmem:[%s20610_s1 + $0x98] sm:$0xff] }
  0xba   :  { %2391 = vmatprep.subr.bf16.mxu1 %v11812_v27  ;;  %v11782_v27 = vcombine.high %v241_v18, %v245_v19 }
  0xbb   :  { %2279 = vmatpush2.bf16.msra.mxu0 %v11683_v34  ;;  %v11653_v34 = vcombine.low %v113_v11, %v117_v16  ;;  %v77_v16 = vld [vmem:[%s20610_s1 + $0x78] sm:$0xff] }
  0xbc   :  { %2280 = vmatprep.subr.bf16.mxu0 %v11676_v59  ;;  %v11646_v59 = vcombine.high %v105_v29, %v109_v30 }
  0xbd   :  { %2392 = vmatpush2.bf16.msra.mxu1 %v11811_v37  ;;  %v11781_v37 = vcombine.low %v241_v18, %v245_v19  ;;  %v201_v18 = vld [vmem:[%s20610_s1 + $0x458] sm:$0xff] }
  0xbe   :  { %2393 = vmatprep.subr.bf16.mxu1 %v11804_v38  ;;  %2129 = vmatmul.mubr.bf16.gmra.mxu0 %v13731_v60  ;;  %v97_v38 = vld [vmem:[%s20610_s1 + $0x118] sm:$0xff] }
  0xbf   :  { %2281 = vmatpush2.bf16.msra.mxu0 %v11675_v50  ;;  %2284 = vmatprep.mubr.bf16.mxu0 %v13985_v7  ;;  %v11638_v48 = vcombine.high %v97_v38, %v101_v42  ;;  %v11637_v57 = vcombine.low %v97_v38, %v101_v42  ;;  %v205_v19 = vld [vmem:[%s20610_s1 + $0x478] sm:$0xff] }
  0xc0   :  { %2242 = vmatmul.mubr.bf16.gmra.mxu1 %v13742_v2  ;;  %2282 = vmatprep.subr.bf16.mxu0 %v11668_v53  ;;  %v217_v53 = vld [vmem:[%s20610_s1 + $0x4d8] sm:$0xff] }
  0xc1   :  { %2394 = vmatpush2.bf16.msra.mxu1 %v11803_v51  ;;  %2397 = vmatprep.mubr.bf16.mxu1 %v13997_v17  ;;  %v93_v51 = vld [vmem:[%s20610_s1 + $0xf8] sm:$0xff] }
  0xc2   :  { %2395 = vmatprep.subr.bf16.mxu1 %v11796_v54  ;;  %v221_v54 = vld [vmem:[%s20610_s1 + $0x4f8] sm:$0xff] }
  0xc3   :  { %2283 = vmatpush2.bf16.msra.mxu0 %v11667_v4  ;;  %v85_v4 = vld [vmem:[%s20610_s1 + $0xb8] sm:$0xff] }
  0xc4   :  { %2478 = vmatprep.subr.bf16.mxu0 %v11662_v6  ;;  %v11757_v6 = vcombine.low %v217_v53, %v221_v54 }
  0xc5   :  { %2396 = vmatpush2.bf16.msra.mxu1 %v11795_v5  ;;  %v213_v5 = vld [vmem:[%s20610_s1 + $0x4b8] sm:$0xff] }
  0xc6   :  { %2591 = vmatprep.subr.bf16.mxu1 %v11790_v9  ;;  %2285 = vmatmul.mubr.bf16.vlgmr.msra.gmra.mxu0 %v13395_v12  ;;  %v11774_v12 = vcombine.high %v233_v56, %v237_v33  ;;  %v11622_v9 = vcombine.high %v81_v0, %v85_v4  ;;  %v11741_v56 = vcombine.low %v201_v18, %v205_v19 }
  0xc7   :  { %2479 = vmatpush1.bf16.msra.mxu0 %v11661_v22  ;;  %2294 = vmatprep.mubr.bf16.mxu0 %v13411_v20  ;;  %v11645_v20 = vcombine.low %v105_v29, %v109_v30  ;;  %v11621_v22 = vcombine.low %v81_v0, %v85_v4  ;;  %v69_v29 = vld [vmem:[%s20610_s1 + $0x38] sm:$0xff] }
  0xc8   :  { %2398 = vmatmul.mubr.bf16.vlgmr.msra.gmra.mxu1 %v13406_v15  ;;  %2480 = vmatprep.subr.bf16.mxu0 %v11654_v26  ;;  %v225_v15 = vld [vmem:[%s20610_s1 + $0x518] sm:$0xff] }
  0xc9   :  { %2592 = vmatpush1.bf16.msra.mxu1 %v11789_v24  ;;  %2407 = vmatprep.mubr.bf16.mxu1 %v13423_v23  ;;  %v11766_v50 = vcombine.high %v225_v15, %v229_v44  ;;  %v89_v23 = vld [vmem:[%s20610_s1 + $0xd8] sm:$0xff]  ;;  %v11765_v58 = vcombine.low %v225_v15, %v229_v44 }
  0xca   :  { %2593 = vmatprep.subr.bf16.mxu1 %v11782_v27  ;;  %v11630_v61 = vcombine.high %v89_v23, %v93_v51  ;;  %v65_v27 = vld [vmem:[%s20610_s1 + $0x18] sm:$0xff] }
  0xcb   :  { %2481 = vmatpush1.bf16.msra.mxu0 %v11653_v34  ;;  %v197_v30 = vld [vmem:[%s20610_s1 + $0x438] sm:$0xff]  ;;  %v11606_v33 = vcombine.high %v65_v27, %v69_v29  ;;  %v11605_v38 = vcombine.low %v65_v27, %v69_v29 }
  0xcc   :  { %2482 = vmatprep.subr.bf16.mxu0 %v11646_v59  ;;  %v313_v59 = vld [vmem:[%s20610_s1 + $0x7d8] sm:$0xff] }
  0xcd   :  { %2594 = vmatpush1.bf16.msra.mxu1 %v11781_v37  ;;  %v189_v37 = vld [vmem:[%s20610_s1 + $0x3f8] sm:$0xff] }
  0xce   :  { %2595 = vmatprep.subr.bf16.mxu1 %v11774_v12  ;;  %2295 = vmatmul.mubr.bf16.gmra.mxu0 %v13443_v32  ;;  %v11758_v32 = vcombine.high %v217_v53, %v221_v54  ;;  %v317_v12 = vld [vmem:[%s20610_s1 + $0x7f8] sm:$0xff] }
  0xcf   :  { %2483 = vmatpush1.bf16.msra.mxu0 %v11645_v20  ;;  %2304 = vmatprep.mubr.bf16.mxu0 %v13459_v40  ;;  %v11629_v40 = vcombine.low %v89_v23, %v93_v51  ;;  %v177_v44 = vld [vmem:[%s20610_s1 + $0x398] sm:$0xff] }
  0xd0   :  { %2408 = vmatmul.mubr.bf16.gmra.mxu1 %v13454_v35  ;;  %2484 = vmatprep.subr.bf16.mxu0 %v11638_v48  ;;  %v209_v35 = vld [vmem:[%s20610_s1 + $0x498] sm:$0xff]  ;;  %v11853_v48 = vcombine.low %v313_v59, %v317_v12 }
  0xd1   :  { %2596 = vmatpush1.bf16.msra.mxu1 %v11773_v47  ;;  %2417 = vmatprep.mubr.bf16.mxu1 %v13471_v43  ;;  %v11750_v11 = vcombine.high %v209_v35, %v213_v5  ;;  %v73_v43 = vld [vmem:[%s20610_s1 + $0x58] sm:$0xff]  ;;  %v11749_v24 = vcombine.low %v209_v35, %v213_v5 }
  0xd2   :  { %2597 = vmatprep.subr.bf16.mxu1 %v11766_v50  ;;  %v11614_v26 = vcombine.high %v73_v43, %v77_v16  ;;  %v181_v20 = vld [vmem:[%s20610_s1 + $0x3b8] sm:$0xff] }
  0xd3   :  { %2485 = vmatpush1.bf16.msra.mxu0 %v11637_v57  ;;  %v309_v47 = vld [vmem:[%s20610_s1 + $0x7b8] sm:$0xff]  ;;  %v11718_v50 = vcombine.high %v177_v44, %v181_v20  ;;  %v11717_v57 = vcombine.low %v177_v44, %v181_v20 }
  0xd4   :  { %2486 = vmatprep.subr.bf16.mxu0 %v11630_v61  ;;  %v173_v51 = vld [vmem:[%s20610_s1 + $0x378] sm:$0xff] }
  0xd5   :  { %2598 = vmatpush1.bf16.msra.mxu1 %v11765_v58  ;;  %v297_v53 = vld [vmem:[%s20610_s1 + $0x758] sm:$0xff] }
  0xd6   :  { %2599 = vmatprep.subr.bf16.mxu1 %v11758_v32  ;;  %2305 = vmatmul.mubr.bf16.gmra.mxu0 %v13491_v52  ;;  %v11742_v52 = vcombine.high %v201_v18, %v205_v19  ;;  %v301_v54 = vld [vmem:[%s20610_s1 + $0x778] sm:$0xff] }
  0xd7   :  { %2487 = vmatpush1.bf16.msra.mxu0 %v11629_v40  ;;  %2314 = vmatprep.mubr.bf16.mxu0 %v13507_v62  ;;  %v11613_v62 = vcombine.low %v73_v43, %v77_v16  ;;  %v161_v32 = vld [vmem:[%s20610_s1 + $0x318] sm:$0xff]  ;;  %v11837_v35 = vcombine.low %v297_v53, %v301_v54 }
  0xd8   :  { %2418 = vmatmul.mubr.bf16.gmra.mxu1 %v13502_v55  ;;  %2488 = vmatprep.subr.bf16.mxu0 %v11622_v9  ;;  %v193_v55 = vld [vmem:[%s20610_s1 + $0x418] sm:$0xff] }
  0xd9   :  { %2600 = vmatpush1.bf16.msra.mxu1 %v11757_v6  ;;  %2427 = vmatprep.mubr.bf16.mxu1 %v13519_v1  ;;  %v11734_v34 = vcombine.high %v193_v55, %v197_v30  ;;  %v185_v1 = vld [vmem:[%s20610_s1 + $0x3d8] sm:$0xff]  ;;  %v11733_v42 = vcombine.low %v193_v55, %v197_v30 }
  0xda   :  { %2601 = vmatprep.subr.bf16.mxu1 %v11750_v11  ;;  %v11726_v15 = vcombine.high %v185_v1, %v189_v37  ;;  %v165_v0 = vld [vmem:[%s20610_s1 + $0x338] sm:$0xff] }
  0xdb   :  { %2489 = vmatpush1.bf16.msra.mxu0 %v11621_v22  ;;  %v293_v4 = vld [vmem:[%s20610_s1 + $0x738] sm:$0xff]  ;;  %v11702_v5 = vcombine.high %v161_v32, %v165_v0  ;;  %v11701_v43 = vcombine.low %v161_v32, %v165_v0  ;;  %v3068_v32 = vld [vmem:[%s20612_s3 + $0x560] sm:$0xff] }
  0xdc   :  { %2490 = vmatprep.subr.bf16.mxu0 %v11614_v26  ;;  %v157_v6 = vld [vmem:[%s20610_s1 + $0x2f8] sm:$0xff] }
  0xdd   :  { %2602 = vmatpush1.bf16.msra.mxu1 %v11749_v24  ;;  %v281_v9 = vld [vmem:[%s20610_s1 + $0x6d8] sm:$0xff] }
  0xde   :  { %2603 = vmatprep.subr.bf16.mxu1 %v11742_v52  ;;  %2315 = vmatmul.mubr.bf16.gmra.mxu0 %v13539_v10  ;;  %v11854_v10 = vcombine.high %v313_v59, %v317_v12  ;;  %v285_v11 = vld [vmem:[%s20610_s1 + $0x6f8] sm:$0xff] }
  0xdf   :  { %2491 = vmatpush1.bf16.msra.mxu0 %v11613_v62  ;;  %2324 = vmatprep.mubr.bf16.mxu0 %v13555_v21  ;;  %v11725_v21 = vcombine.low %v185_v1, %v189_v37  ;;  %v145_v19 = vld [vmem:[%s20610_s1 + $0x298] sm:$0xff]  ;;  %v11821_v26 = vcombine.low %v281_v9, %v285_v11 }
  0xe0   :  { %2428 = vmatmul.mubr.bf16.gmra.mxu1 %v13550_v14  ;;  %2492 = vmatprep.subr.bf16.mxu0 %v11606_v33  ;;  %v305_v14 = vld [vmem:[%s20610_s1 + $0x798] sm:$0xff] }
  0xe1   :  { %2604 = vmatpush1.bf16.msra.mxu1 %v11741_v56  ;;  %2437 = vmatprep.mubr.bf16.mxu1 %v13567_v25  ;;  %v11846_v23 = vcombine.high %v305_v14, %v309_v47  ;;  %v169_v25 = vld [vmem:[%s20610_s1 + $0x358] sm:$0xff]  ;;  %v11845_v58 = vcombine.low %v305_v14, %v309_v47  ;;  %v2948_v47 = vld [vmem:[%s20612_s3 + $0x1a0] sm:$0xff] }
  0xe2   :  { %2605 = vmatprep.subr.bf16.mxu1 %v11734_v34  ;;  %v11710_v61 = vcombine.high %v169_v25, %v173_v51  ;;  %v149_v22 = vld [vmem:[%s20610_s1 + $0x2b8] sm:$0xff] }
  0xe3   :  { %2493 = vmatpush1.bf16.msra.mxu0 %v11605_v38  ;;  %v277_v24 = vld [vmem:[%s20610_s1 + $0x6b8] sm:$0xff]  ;;  %v11686_v52 = vcombine.high %v145_v19, %v149_v22  ;;  %v11685_v62 = vcombine.low %v145_v19, %v149_v22 }
  0xe4   :  { %2494 = vmatprep.subr.bf16.mxu0 %v11726_v15  ;;  %v141_v29 = vld [vmem:[%s20610_s1 + $0x278] sm:$0xff]  ;;  %v3080_v15 = vld [vmem:[%s20612_s3 + $0x5c0] sm:$0xff] }
  0xe5   :  { %2606 = vmatpush1.bf16.msra.mxu1 %v11733_v42  ;;  %v265_v55 = vld [vmem:[%s20610_s1 + $0x658] sm:$0xff]  ;;  %v2956_v42 = vld [vmem:[%s20612_s3 + $0x1e0] sm:$0xff] }
  0xe6   :  { %2607 = vmatprep.subr.bf16.mxu1 %v11854_v10  ;;  %2325 = vmatmul.mubr.bf16.gmra.mxu0 %v13587_v36  ;;  %v11838_v36 = vcombine.high %v297_v53, %v301_v54  ;;  %v269_v30 = vld [vmem:[%s20610_s1 + $0x678] sm:$0xff]  ;;  %v3084_v10 = vld [vmem:[%s20612_s3 + $0x5e0] sm:$0xff] }
  0xe7   :  { %2495 = vmatpush2.bf16.msra.mxu0 %v11725_v21  ;;  %2334 = vmatprep.mubr.bf16.mxu0 %v13603_v46  ;;  %v11709_v46 = vcombine.low %v169_v25, %v173_v51  ;;  %v129_v34 = vld [vmem:[%s20610_s1 + $0x218] sm:$0xff]  ;;  %v11805_v59 = vcombine.low %v265_v55, %v269_v30  ;;  %v12040_v21 = vcombine.high %v3080_v15, %v3084_v10  ;;  %v13091_v53 = vld [vmem:[%s20611_s0] ss:$16 sps:$4 sm:$0xff]  }
  0xe8   :  { %2438 = vmatmul.mubr.bf16.gmra.mxu1 %v13598_v39  ;;  %2496 = vmatprep.subr.bf16.mxu0 %v11718_v50  ;;  %v289_v39 = vld [vmem:[%s20610_s1 + $0x718] sm:$0xff]  ;;  %v12039_v25 = vcombine.low %v3080_v15, %v3084_v10  ;;  %v3044_v15 = vld [vmem:[%s20612_s3 + $0x4a0] sm:$0xff] }
  0xe9   :  { %2608 = vmatpush2.bf16.msra.mxu1 %v11853_v48  ;;  %2447 = vmatprep.mubr.bf16.mxu1 %v13615_v49  ;;  %v11830_v40 = vcombine.high %v289_v39, %v293_v4  ;;  %v153_v49 = vld [vmem:[%s20610_s1 + $0x2d8] sm:$0xff]  ;;  %v11829_v16 = vcombine.low %v289_v39, %v293_v4  ;;  %v3072_v48 = vld [vmem:[%s20612_s3 + $0x580] sm:$0xff] }
  0xea   :  { %2609 = vmatprep.subr.bf16.mxu1 %v11846_v23  ;;  %v11694_v18 = vcombine.high %v153_v49, %v157_v6  ;;  %v133_v1 = vld [vmem:[%s20610_s1 + $0x238] sm:$0xff]  ;;  %v2936_v23 = vld [vmem:[%s20612_s3 + $0x140] sm:$0xff] }
  0xeb   :  { %2497 = vmatpush2.bf16.msra.mxu0 %v11717_v57  ;;  %v261_v37 = vld [vmem:[%s20610_s1 + $0x638] sm:$0xff]  ;;  %v11670_v12 = vcombine.high %v129_v34, %v133_v1  ;;  %v11669_v44 = vcombine.low %v129_v34, %v133_v1  ;;  %v13093_v39 = vld [vmem:[%s20611_s0 + $0x24] ss:$16 sps:$4 sm:$0xff]  }
  0xec   :  { %2498 = vmatprep.subr.bf16.mxu0 %v11710_v61  ;;  %v13098_v1 = vld [vmem:[%s20611_s0 + $0x4c] ss:$16 sps:$4 sm:$0xff]  }
  0xed   :  { %2610 = vmatpush2.bf16.msra.mxu1 %v11845_v58  ;;  %v13092_v58 = vld [vmem:[%s20611_s0 + $0x8] ss:$16 sps:$4 sm:$0xff]  }
  0xee   :  { %2611 = vmatprep.subr.bf16.mxu1 %v11838_v36  ;;  %2335 = vmatmul.mubr.bf16.gmra.mxu0 %v13635_v63  ;;  %v11822_v63 = vcombine.high %v281_v9, %v285_v11  ;;  %v3064_v36 = vld [vmem:[%s20612_s3 + $0x540] sm:$0xff] }
  0xef   :  { %2499 = vmatpush2.bf16.msra.mxu0 %v11709_v46  ;;  %2344 = vmatprep.mubr.bf16.mxu0 %v13651_v8  ;;  %v11693_v8 = vcombine.low %v153_v49, %v157_v6  ;;  %v12024_v9 = vcombine.high %v3064_v36, %v3068_v32 }
  0xf0   :  { %2448 = vmatmul.mubr.bf16.gmra.mxu1 %v13646_v3  ;;  %2500 = vmatprep.subr.bf16.mxu0 %v11702_v5  ;;  %v273_v3 = vld [vmem:[%s20610_s1 + $0x698] sm:$0xff]  ;;  %v2928_v5 = vld [vmem:[%s20612_s3 + $0x100] sm:$0xff] }
  0xf1   :  { %2612 = vmatpush2.bf16.msra.mxu1 %v11837_v35  ;;  %2457 = vmatprep.mubr.bf16.mxu1 %v13663_v13  ;;  %v11814_v27 = vcombine.high %v273_v3, %v277_v24  ;;  %v137_v13 = vld [vmem:[%s20610_s1 + $0x258] sm:$0xff]  ;;  %v11813_v56 = vcombine.low %v273_v3, %v277_v24  ;;  %v2920_v3 = vld [vmem:[%s20612_s3 + $0xc0] sm:$0xff] }
  0xf2   :  { %2613 = vmatprep.subr.bf16.mxu1 %v11830_v40  ;;  %v11678_v33 = vcombine.high %v137_v13, %v141_v29  ;;  %v13094_v35 = vld [vmem:[%s20611_s0 + $0x2c] ss:$16 sps:$4 sm:$0xff]   ;;  %v2932_v40 = vld [vmem:[%s20612_s3 + $0x120] sm:$0xff] }
  0xf3   :  { %2501 = vmatpush2.bf16.msra.mxu0 %v11701_v43  ;;  %v11888_v19 = vcombine.high %v2928_v5, %v2932_v40  ;;  %v2924_v24 = vld [vmem:[%s20612_s3 + $0xe0] sm:$0xff] }
  0xf4   :  { %2502 = vmatprep.subr.bf16.mxu0 %v11694_v18  ;;  %v3060_v18 = vld [vmem:[%s20612_s3 + $0x520] sm:$0xff] }
  0xf5   :  { %2614 = vmatpush2.bf16.msra.mxu1 %v11829_v16  ;;  %v3056_v16 = vld [vmem:[%s20612_s3 + $0x500] sm:$0xff] }
  0xf6   :  { %2615 = vmatprep.subr.bf16.mxu1 %v11822_v63  ;;  %2345 = vmatmul.mubr.bf16.gmra.mxu0 %v13683_v28  ;;  %v11806_v28 = vcombine.high %v265_v55, %v269_v30  ;;  %v11887_v55 = vcombine.low %v2928_v5, %v2932_v40  ;;  %v3048_v30 = vld [vmem:[%s20612_s3 + $0x4c0] sm:$0xff] }
  0xf7   :  { %2503 = vmatpush2.bf16.msra.mxu0 %v11693_v8  ;;  %2354 = vmatprep.mubr.bf16.mxu0 %v13699_v41  ;;  %v11677_v41 = vcombine.low %v137_v13, %v141_v29  ;;  %v12023_v8 = vcombine.low %v3064_v36, %v3068_v32  ;;  %v13096_v29 = vld [vmem:[%s20611_s0 + $0x28] ss:$16 sps:$4 sm:$0xff]   ;;  %v13102_v36 = vld [vmem:[%s20611_s0 + $0x6c] ss:$16 sps:$4 sm:$0xff]   ;;  %v2896_v32 = vld [vmem:[%s20612_s3] sm:$0xff] }
  0xf8   :  { %2458 = vmatmul.mubr.bf16.gmra.mxu1 %v13694_v31  ;;  %2504 = vmatprep.subr.bf16.mxu0 %v11686_v52  ;;  %v257_v31 = vld [vmem:[%s20610_s1 + $0x618] sm:$0xff]  ;;  %v13095_v52 = vld [vmem:[%s20611_s0 + $0x20] ss:$16 sps:$4 sm:$0xff]  }
  0xf9   :  { %2616 = vmatpush2.bf16.msra.mxu1 %v11821_v26  ;;  %2467 = vmatprep.mubr.bf16.mxu1 %v13711_v45  ;;  %v11798_v38 = vcombine.high %v257_v31, %v261_v37  ;;  %v2952_v45 = vld [vmem:[%s20612_s3 + $0x1c0] sm:$0xff]  ;;  %v11797_v20 = vcombine.low %v257_v31, %v261_v37 }
  0xfa   :  { %2617 = vmatprep.subr.bf16.mxu1 %v11814_v27  ;;  %v11912_v14 = vcombine.high %v2952_v45, %v2956_v42  ;;  %v12016_v27 = vcombine.high %v3056_v16, %v3060_v18  ;;  %v2912_v31 = vld [vmem:[%s20612_s3 + $0x80] sm:$0xff] }
  0xfb   :  { %2505 = vmatpush2.bf16.msra.mxu0 %v11685_v62  ;;  %v3052_v62 = vld [vmem:[%s20612_s3 + $0x4e0] sm:$0xff] }
  0xfc   :  { %2506 = vmatprep.subr.bf16.mxu0 %v11678_v33  ;;  %v13097_v33 = vld [vmem:[%s20611_s0 + $0x44] ss:$16 sps:$4 sm:$0xff]  }
  0xfd   :  { %2618 = vmatpush2.bf16.msra.mxu1 %v11813_v56  ;;  %v2916_v37 = vld [vmem:[%s20612_s3 + $0xa0] sm:$0xff] }
  0xfe   :  { %2619 = vmatprep.subr.bf16.mxu1 %v11806_v28  ;;  %2355 = vmatmul.mubr.bf16.gmra.mxu0 %v13731_v60  ;;  %v2944_v60 = vld [vmem:[%s20612_s3 + $0x180] sm:$0xff]  ;;  %v11880_v28 = vcombine.high %v2920_v3, %v2924_v24 }
  0xff   :  { %2507 = vmatpush2.bf16.msra.mxu0 %v11677_v41  ;;  %2510 = vmatprep.mubr.bf16.mxu0 %v13985_v7  ;;  %v3076_v7 = vld [vmem:[%s20612_s3 + $0x5a0] sm:$0xff]  ;;  %v11904_v50 = vcombine.high %v2944_v60, %v2948_v47  ;;  %v11903_v61 = vcombine.low %v2944_v60, %v2948_v47  ;;  %v12015_v41 = vcombine.low %v3056_v16, %v3060_v18 }
 0x100   :  { %2468 = vmatmul.mubr.bf16.gmra.mxu1 %v13742_v2  ;;  %2508 = vmatprep.subr.bf16.mxu0 %v11670_v12  ;;  %v11911_v2 = vcombine.low %v2952_v45, %v2956_v42  ;;  %v12032_v54 = vcombine.high %v3072_v48, %v3076_v7  ;;  %v12031_v49 = vcombine.low %v3072_v48, %v3076_v7  ;;  %v3040_v42 = vld [vmem:[%s20612_s3 + $0x480] sm:$0xff] }
 0x101   :  { %2620 = vmatpush2.bf16.msra.mxu1 %v11805_v59  ;;  %2623 = vmatprep.mubr.bf16.mxu1 %v13997_v17  ;;  %v2940_v17 = vld [vmem:[%s20612_s3 + $0x160] sm:$0xff]  ;;  %v12008_v12 = vcombine.high %v3048_v30, %v3052_v62  ;;  %v11879_v45 = vcombine.low %v2920_v3, %v2924_v24  ;;  %v12007_v47 = vcombine.low %v3048_v30, %v3052_v62  ;;  %v13104_v30 = vld [vmem:[%s20611_s0 + $0x68] ss:$16 sps:$4 sm:$0xff]  }
 0x102   :  { %2621 = vmatprep.subr.bf16.mxu1 %v11798_v38  ;;  %v11896_v4 = vcombine.high %v2936_v23, %v2940_v17  ;;  %v11895_v43 = vcombine.low %v2936_v23, %v2940_v17  ;;  %v2908_v60 = vld [vmem:[%s20612_s3 + $0x60] sm:$0xff]  ;;  %v12000_v48 = vcombine.high %v3040_v42, %v3044_v15  ;;  %v11871_v23 = vcombine.low %v2912_v31, %v2916_v37 }
 0x103   :  { %2509 = vmatpush2.bf16.msra.mxu0 %v11669_v44  ;;  %v11872_v44 = vcombine.high %v2912_v31, %v2916_v37  ;;  %v3032_v17 = vld [vmem:[%s20612_s3 + $0x440] sm:$0xff] }
 0x104   :  { %6010 = vmatprep.subr.bf16.mxu0 %v11912_v14  ;;  %v2904_v14 = vld [vmem:[%s20612_s3 + $0x40] sm:$0xff] }
 0x105   :  { %2622 = vmatpush2.bf16.msra.mxu1 %v11797_v20  ;;  %v3016_v3 = vld [vmem:[%s20612_s3 + $0x3c0] sm:$0xff] }
 0x106   :  { %6123 = vmatprep.subr.bf16.mxu1 %v12040_v21  ;;  %v14236_v51 = vpop.f32.mrf.mxu0  ;;  %2511 = vmatmul.mubr.bf16.vlgmr.msra.gmra.mxu0 %v13091_v53  ;;  %v3020_v24 = vld [vmem:[%s20612_s3 + $0x3e0] sm:$0xff] }
 0x107   :  { %6011 = vmatpush1.bf16.msra.mxu0 %v11911_v2  ;;  %2520 = vmatprep.mubr.bf16.mxu0 %v13093_v39  ;;  %v13099_v2 = vld [vmem:[%s20611_s0 + $0x40] ss:$16 sps:$4 sm:$0xff]   ;;  %v13105_v31 = vld [vmem:[%s20611_s0 + $0x84] ss:$16 sps:$4 sm:$0xff]   ;;  %v11976_v37 = vcombine.high %v3016_v3, %v3020_v24 }
 0x108   :  { %v14241_v57 = vpop.f32.mrf.mxu1  ;;  %2624 = vmatmul.mubr.bf16.vlgmr.msra.gmra.mxu1 %v13092_v58  ;;  %v14252_v0 = vpop.f32.mrf.mxu0  ;;  %6012 = vmatprep.subr.bf16.mxu0 %v11904_v50  ;;  %v13100_v50 = vld [vmem:[%s20611_s0 + $0x48] ss:$16 sps:$4 sm:$0xff]   ;;  %v11864_v58 = vcombine.high %v2904_v14, %v2908_v60  ;;  %v2900_v39 = vld [vmem:[%s20612_s3 + $0x20] sm:$0xff] }
 0x109   :  { %2633 = vmatprep.mubr.bf16.mxu1 %v13094_v35  ;;  %6124 = vmatpush1.bf16.msra.mxu1 %v12039_v25  ;;  %v3036_v25 = vld [vmem:[%s20612_s3 + $0x460] sm:$0xff]  ;;  %v11856_v18 = vcombine.high %v2896_v32, %v2900_v39  ;;  %v11855_v62 = vcombine.low %v2896_v32, %v2900_v39 }
 0x10a   :  { %v14257_v46 = vpop.f32.mrf.mxu1  ;;  %v14268_v6 = vpop.f32.mrf.mxu0  ;;  %6125 = vmatprep.subr.bf16.mxu1 %v12032_v54  ;;  %v13101_v54 = vld [vmem:[%s20611_s0 + $0x64] ss:$16 sps:$4 sm:$0xff]   ;;  %v11992_v5 = vcombine.high %v3032_v17, %v3036_v25  ;;  %v13107_v39 = vld [vmem:[%s20611_s0 + $0x80] ss:$16 sps:$4 sm:$0xff]  }
 0x10b   :  { %6013 = vmatpush1.bf16.msra.mxu0 %v11903_v61 }
 0x10c   :  { %v14270_v11 = vpop.f32.mrf.mxu1  ;;  %v14278_v63 = vpop.f32.mrf.mxu0  ;;  %6014 = vmatprep.subr.bf16.mxu0 %v11896_v4  ;;  %v11999_v4 = vcombine.low %v3040_v42, %v3044_v15  ;;  %v3012_v42 = vld [vmem:[%s20612_s3 + $0x3a0] sm:$0xff] }
 0x10d   :  { %6126 = vmatpush1.bf16.msra.mxu1 %v12031_v49  ;;  %v11863_v49 = vcombine.low %v2904_v14, %v2908_v60 }
 0x10e   :  { %v14280_v22 = vpop.f32.mrf.mxu1  ;;  %v14288_v26 = vpop.f32.mrf.mxu0  ;;  %2521 = vmatmul.mubr.bf16.gmra.mxu0 %v13095_v52  ;;  %6127 = vmatprep.subr.bf16.mxu1 %v12024_v9  ;;  %v3024_v9 = vld [vmem:[%s20612_s3 + $0x400] sm:$0xff] }
 0x10f   :  { %6015 = vmatpush1.bf16.msra.mxu0 %v11895_v43  ;;  %2530 = vmatprep.mubr.bf16.mxu0 %v13097_v33  ;;  %v3028_v43 = vld [vmem:[%s20612_s3 + $0x420] sm:$0xff] }
 0x110   :  { %v14293_v13 = vpop.f32.mrf.mxu1  ;;  %2634 = vmatmul.mubr.bf16.gmra.mxu1 %v13096_v29  ;;  %v14304_v56 = vpop.f32.mrf.mxu0  ;;  %6016 = vmatprep.subr.bf16.mxu0 %v11888_v19  ;;  %v11984_v29 = vcombine.high %v3024_v9, %v3028_v43  ;;  %v3144_v33 = vld [vmem:[%s20612_s3 + $0x7c0] sm:$0xff]  ;;  %v11983_v15 = vcombine.low %v3024_v9, %v3028_v43 }
 0x111   :  { %2643 = vmatprep.mubr.bf16.mxu1 %v13098_v1  ;;  %6128 = vmatpush1.bf16.msra.mxu1 %v12023_v8  ;;  %v11991_v8 = vcombine.low %v3032_v17, %v3036_v25  ;;  %v3000_v25 = vld [vmem:[%s20612_s3 + $0x340] sm:$0xff] }
 0x112   :  { %v14309_v34 = vpop.f32.mrf.mxu1  ;;  %v14320_v59 = vpop.f32.mrf.mxu0  ;;  %6129 = vmatprep.subr.bf16.mxu1 %v12016_v27  ;;  %v13103_v27 = vld [vmem:[%s20611_s0 + $0x60] ss:$16 sps:$4 sm:$0xff]  }
 0x113   :  { %6017 = vmatpush1.bf16.msra.mxu0 %v11887_v55  ;;  %v3128_v43 = vld [vmem:[%s20612_s3 + $0x740] sm:$0xff] }
 0x114   :  { %v14322_v38 = vpop.f32.mrf.mxu1  ;;  %v14330_v10 = vpop.f32.mrf.mxu0  ;;  %6018 = vmatprep.subr.bf16.mxu0 %v11880_v28  ;;  %v3148_v28 = vld [vmem:[%s20612_s3 + $0x7e0] sm:$0xff] }
 0x115   :  { %6130 = vmatpush1.bf16.msra.mxu1 %v12015_v41  ;;  %v12104_v14 = vcombine.high %v3144_v33, %v3148_v28 }
 0x116   :  { %v14332_v20 = vpop.f32.mrf.mxu1  ;;  %v14340_v21 = vpop.f32.mrf.mxu0  ;;  %2531 = vmatmul.mubr.bf16.gmra.mxu0 %v13099_v2  ;;  %6131 = vmatprep.subr.bf16.mxu1 %v12008_v12  ;;  %v13106_v12 = vld [vmem:[%s20611_s0 + $0x8c] ss:$16 sps:$4 sm:$0xff]   ;;  %v3136_v2 = vld [vmem:[%s20612_s3 + $0x780] sm:$0xff] }
 0x117   :  { %6019 = vmatpush1.bf16.msra.mxu0 %v11879_v45  ;;  %2540 = vmatprep.mubr.bf16.mxu0 %v13101_v54  ;;  %v3008_v45 = vld [vmem:[%s20612_s3 + $0x380] sm:$0xff] }
 0x118   :  { %v14345_v7 = vpop.f32.mrf.mxu1  ;;  %2644 = vmatmul.mubr.bf16.gmra.mxu1 %v13100_v50  ;;  %v14356_v53 = vpop.f32.mrf.mxu0  ;;  %6020 = vmatprep.subr.bf16.mxu0 %v11872_v44  ;;  %v3004_v54 = vld [vmem:[%s20612_s3 + $0x360] sm:$0xff]  ;;  %v11967_v9 = vcombine.low %v3008_v45, %v3012_v42 }
 0x119   :  { %2653 = vmatprep.mubr.bf16.mxu1 %v13102_v36  ;;  %6132 = vmatpush1.bf16.msra.mxu1 %v12007_v47  ;;  %v11975_v47 = vcombine.low %v3016_v3, %v3020_v24  ;;  %v320_v36 = vlaneseq  ;;  %v13109_v24 = vld [vmem:[%s20611_s0 + $0xa4] ss:$16 sps:$4 sm:$0xff]  }
 0x11a   :  { %v14361_v61 = vpop.f32.mrf.mxu1  ;;  %v14372_v35 = vpop.f32.mrf.mxu0  ;;  %6133 = vmatprep.subr.bf16.mxu1 %v12000_v48  ;;  %v3140_v48 = vld [vmem:[%s20612_s3 + $0x7a0] sm:$0xff] }
 0x11b   :  { %6021 = vmatpush1.bf16.msra.mxu0 %v11871_v23  ;;  %v11968_v23 = vcombine.high %v3008_v45, %v3012_v42  ;;  %v11959_v45 = vcombine.low %v3000_v25, %v3004_v54  ;;  %v14485_v42 = vld [vmem:[%s20612_s3 + $0x700] sm:$0xff] }
 0x11c   :  { %v14374_v40 = vpop.f32.mrf.mxu1  ;;  %v14382_v16 = vpop.f32.mrf.mxu0  ;;  %6022 = vmatprep.subr.bf16.mxu0 %v11864_v58  ;;  %v12103_v58 = vcombine.low %v3144_v33, %v3148_v28  ;;  %v12095_v33 = vcombine.low %v3136_v2, %v3140_v48  ;;  %v14476_v28 = vshrl.u32 %v320_v36, 7  ;;  %v13111_v36 = vld [vmem:[%s20611_s0 + $0xa0] ss:$16 sps:$4 sm:$0xff]  }
 0x11d   :  { %6134 = vmatpush1.bf16.msra.mxu1 %v11999_v4  ;;  %v12096_v4 = vcombine.high %v3136_v2, %v3140_v48 }
 0x11e   :  { %v14384_v19 = vpop.f32.mrf.mxu1  ;;  %v14392_v52 = vpop.f32.mrf.mxu0  ;;  %2541 = vmatmul.mubr.bf16.gmra.mxu0 %v13103_v27  ;;  %6135 = vmatprep.subr.bf16.mxu1 %v11992_v5  ;;  %20844 = vst [vmem:[#allocation7_spill] sm:$0xff] %v14476_v28 }
 0x11f   :  { %6023 = vmatpush1.bf16.msra.mxu0 %v11863_v49  ;;  %2550 = vmatprep.mubr.bf16.mxu0 %v13105_v31  ;;  %v13108_v49 = vld [vmem:[%s20611_s0 + $0x88] ss:$16 sps:$4 sm:$0xff]  }
 0x120   :  { %v14397_v55 = vpop.f32.mrf.mxu1  ;;  %2654 = vmatmul.mubr.bf16.gmra.mxu1 %v13104_v30  ;;  %v14408_v1 = vpop.f32.mrf.mxu0  ;;  %6024 = vmatprep.subr.bf16.mxu0 %v11856_v18  ;;  %v3132_v18 = vld [vmem:[%s20612_s3 + $0x760] sm:$0xff] }
 0x121   :  { %2663 = vmatprep.mubr.bf16.mxu1 %v13106_v12  ;;  %6136 = vmatpush1.bf16.msra.mxu1 %v11991_v8  ;;  %v11960_v8 = vcombine.high %v3000_v25, %v3004_v54  ;;  %v2992_v30 = vld [vmem:[%s20612_s3 + $0x300] sm:$0xff]  ;;  %v12087_v54 = vcombine.low %v3128_v43, %v3132_v18 }
 0x122   :  { %v14413_v41 = vpop.f32.mrf.mxu1  ;;  %v14424_v44 = vpop.f32.mrf.mxu0  ;;  %6137 = vmatprep.subr.bf16.mxu1 %v11984_v29  ;;  %v13110_v29 = vld [vmem:[%s20611_s0 + $0xac] ss:$16 sps:$4 sm:$0xff]   ;;  %v14505_v25 = vld [vmem:[%s20612_s3 + $0x2e0] sm:$0xff] }
 0x123   :  { %6025 = vmatpush1.bf16.msra.mxu0 %v11855_v62  ;;  %v2996_v62 = vld [vmem:[%s20612_s3 + $0x320] sm:$0xff] }
 0x124   :  { %v14426_v60 = vpop.f32.mrf.mxu1  ;;  %v14434_v50 = vpop.f32.mrf.mxu0  ;;  %6026 = vmatprep.subr.bf16.mxu0 %v11976_v37  ;;  %v12088_v37 = vcombine.high %v3128_v43, %v3132_v18  ;;  %v11952_v2 = vcombine.high %v2992_v30, %v2996_v62  ;;  %v11951_v43 = vcombine.low %v2992_v30, %v2996_v62  ;;  %v14527_v18 = vld [vmem:[%s20612_s3 + $0x6c0] sm:$0xff] }
 0x125   :  { %20839 = vst [vmem:[#allocation2_spill] sm:$0xff] %v14426_v60  ;;  %6138 = vmatpush1.bf16.msra.mxu1 %v11983_v15  ;;  %v14490_v15 = vld [vmem:[%s20612_s3 + $0x720] sm:$0xff] }
 0x126   :  { %v14436_v17 = vpop.f32.mrf.mxu1  ;;  %v14444_v32 = vpop.f32.mrf.mxu0  ;;  %2551 = vmatmul.mubr.bf16.gmra.mxu0 %v13107_v39  ;;  %6139 = vmatprep.subr.bf16.mxu1 %v12104_v14  ;;  %v20619_v14 = vsub.s32 1, %v14476_v28  ;;  %v12080_v39 = vcombine.high %v14485_v42, %v14490_v15  ;;  %v13113_v30 = vld [vmem:[%s20611_s0 + $0xc4] ss:$16 sps:$4 sm:$0xff]  }
 0x127   :  { %20840 = vst [vmem:[#allocation3_spill] sm:$0xff] %v14444_v32  ;;  %6027 = vmatpush2.bf16.msra.mxu0 %v11975_v47  ;;  %2560 = vmatprep.mubr.bf16.mxu0 %v13109_v24  ;;  %v14532_v24 = vld [vmem:[%s20612_s3 + $0x6e0] sm:$0xff] }
 0x128   :  { %v14449_v5 = vpop.f32.mrf.mxu1  ;;  %2664 = vmatmul.mubr.bf16.gmra.mxu1 %v13108_v49  ;;  %v14460_v3 = vpop.f32.mrf.mxu0  ;;  %6028 = vmatprep.subr.bf16.mxu0 %v11968_v23  ;;  %v14500_v23 = vld [vmem:[%s20612_s3 + $0x2c0] sm:$0xff] }
 0x129   :  { %20841 = vst [vmem:[#allocation4_spill] sm:$0xff] %v14449_v5  ;;  %20842 = vst [vmem:[#allocation5_spill] sm:$0xff] %v14460_v3  ;;  %2673 = vmatprep.mubr.bf16.mxu1 %v13110_v29  ;;  %6140 = vmatpush2.bf16.msra.mxu1 %v12103_v58  ;;  %v11944_v62 = vcombine.high %v14500_v23, %v14505_v25  ;;  %v14801_v32 = vld [vmem:[%s20612_s3 + $0x840] sm:$0xff] }
 0x12a   :  { %v14465_v27 = vpop.f32.mrf.mxu1  ;;  %v14478_v31 = vpop.f32.mrf.mxu0  ;;  %6141 = vmatprep.subr.bf16.mxu1 %v12096_v4  ;;  %v14517_v4 = vld [vmem:[%s20613_s2] sm:$0xff] }
 0x12b   :  { %20843 = vst [vmem:[#allocation6_spill] sm:$0xff] %v14465_v27  ;;  %20845 = vst [vmem:[#allocation8_spill] sm:$0xff] %v14478_v31  ;;  %6029 = vmatpush2.bf16.msra.mxu0 %v11967_v9  ;;  %v13112_v9 = vld [vmem:[%s20611_s0 + $0xa8] ss:$16 sps:$4 sm:$0xff]   ;;  %v14538_v29 = vrot.slane %v14517_v4, %v20619_v14  ;;  %v14746_v27 = vld [vmem:[%s20612_s3 + $0x920] sm:$0xff] }
 0x12c   :  { %v14480_v12 = vpop.f32.mrf.mxu1  ;;  %v14493_v47 = vpop.f32.mrf.mxu0  ;;  %6030 = vmatprep.subr.bf16.mxu0 %v11960_v8  ;;  %v14576_v8 = vld [vmem:[%s20612_s3 + $0x260] sm:$0xff] }
 0x12d   :  { %20846 = vst [vmem:[#allocation9_spill] sm:$0xff] %v14480_v12  ;;  %6142 = vmatpush2.bf16.msra.mxu1 %v12095_v33  ;;  %v14821_v31 = vld [vmem:[%s20612_s3 + $0x800] sm:$0xff] }
 0x12e   :  { %v14495_v48 = vpop.f32.mrf.mxu1  ;;  %v14507_v58 = vpop.f32.mrf.mxu0  ;;  %2561 = vmatmul.mubr.bf16.gmra.mxu0 %v13111_v36  ;;  %6143 = vmatprep.subr.bf16.mxu1 %v12088_v37  ;;  %v14555_v36 = vld [vmem:[%s20612_s3 + $0x280] sm:$0xff] }
 0x12f   :  { %20847 = vst [vmem:[#allocation10_spill] sm:$0xff] %v14495_v48  ;;  %20848 = vst [vmem:[#allocation11_spill] sm:$0xff] %v14507_v58  ;;  %6031 = vmatpush2.bf16.msra.mxu0 %v11959_v45  ;;  %2570 = vmatprep.mubr.bf16.mxu0 %v13113_v30  ;;  %v13114_v45 = vld [vmem:[%s20611_s0 + $0xcc] ss:$16 sps:$4 sm:$0xff]   ;;  %v12079_v30 = vcombine.low %v14485_v42, %v14490_v15  ;;  %v11943_v15 = vcombine.low %v14500_v23, %v14505_v25 }
 0x130   :  { %v14519_v49 = vpop.f32.mrf.mxu1  ;;  %2674 = vmatmul.mubr.bf16.gmra.mxu1 %v13112_v9  ;;  %v14540_v33 = vpop.f32.mrf.mxu0  ;;  %6032 = vmatprep.subr.bf16.mxu0 %v11952_v2  ;;  %v14560_v2 = vld [vmem:[%s20612_s3 + $0x2a0] sm:$0xff]  ;;  %v1837_v23 = vadd.f32 %v14252_v0, %v14538_v29 }
 0x131   :  { %20849 = vst [vmem:[#allocation12_spill] sm:$0xff] %v14519_v49  ;;  %20850 = vst [vmem:[#allocation13_spill] sm:$0xff] %v14540_v33  ;;  %2683 = vmatprep.mubr.bf16.mxu1 %v13114_v45  ;;  %v14565_v9 = vld [vmem:[%s20612_s3 + $0x240] sm:$0xff]  ;;  %6144 = vmatpush2.bf16.msra.mxu1 %v12087_v54  ;;  %v1841_v45 = vadd.f32 %v14278_v63, %v14538_v29  ;;  %v12072_v63 = vcombine.high %v14527_v18, %v14532_v24 }
 0x132   :  { %v14547_v37 = vpop.f32.mrf.mxu1  ;;  %v14571_v14 = vpop.f32.mrf.mxu0  ;;  %v14581_v49 = vld [vmem:[%s20612_s3 + $0x200] sm:$0xff]  ;;  %6145 = vmatprep.subr.bf16.mxu1 %v12080_v39  ;;  %v11936_v58 = vcombine.high %v14555_v36, %v14560_v2 }
 0x133   :  { %20851 = vst [vmem:[#allocation14_spill] sm:$0xff] %v14547_v37  ;;  %20852 = vst [vmem:[#allocation15_spill] sm:$0xff] %v14571_v14  ;;  %v14586_v54 = vld [vmem:[%s20612_s3 + $0x220] sm:$0xff]  ;;  %6033 = vmatpush2.bf16.msra.mxu0 %v11951_v43  ;;  %v11935_v37 = vcombine.low %v14555_v36, %v14560_v2  ;;  %v14640_v2 = vadd.f32 %v14280_v22, %v1841_v45 }
 0x134   :  { %v14590_v42 = vpop.f32.mrf.mxu1  ;;  %v14599_v14 = vld [vmem:[%s20612_s3 + $0x680] sm:$0xff]  ;;  %v14613_v25 = vpop.f32.mrf.mxu0  ;;  %6034 = vmatprep.subr.bf16.mxu0 %v11944_v62  ;;  %v12071_v62 = vcombine.low %v14527_v18, %v14532_v24 }
 0x135   :  { %20853 = vst [vmem:[#allocation16_spill] sm:$0xff] %v14590_v42  ;;  %v14604_v39 = vld [vmem:[%s20612_s3 + $0x6a0] sm:$0xff]  ;;  %v20854_v42 = vsub.s32 0, %v14476_v28  ;;  %20855 = vst [vmem:[#allocation17_spill] sm:$0xff] %v14613_v25  ;;  %6146 = vmatpush2.bf16.msra.mxu1 %v12079_v30 }
 0x136   :  { %v14619_v12 = vpop.f32.mrf.mxu1  ;;  %v14632_v25 = vld [vmem:[%s20612_s3 + $0x640] sm:$0xff]  ;;  %v14642_v33 = vpop.f32.mrf.mxu0  ;;  %6147 = vmatprep.subr.bf16.mxu1 %v12072_v63  ;;  %v12064_v24 = vcombine.high %v14599_v14, %v14604_v39  ;;  %v20859_v63 = vsub.s32 2, %v14476_v28  ;;  %v12063_v5 = vcombine.low %v14599_v14, %v14604_v39 }
 0x137   :  { %v14609_v43 = vrot.slane %v14517_v4, %v20854_v42  ;;  %20856 = vst [vmem:[#allocation18_spill] sm:$0xff] %v14619_v12  ;;  %v11928_v42 = vcombine.high %v14565_v9, %v14576_v8  ;;  %v14637_v36 = vld [vmem:[%s20612_s3 + $0x660] sm:$0xff]  ;;  %20857 = vst [vmem:[#allocation19_spill] sm:$0xff] %v14642_v33  ;;  %6035 = vmatpush2.bf16.msra.mxu0 %v11943_v15  ;;  %v20860_v33 = vsub.s32 3, %v14476_v28  ;;  %v2713_v28 = vmax.f32 %v14640_v2, 0.0 }
 0x138   :  { %v13115_v30 = vld [vmem:[%s20611_s0 + $0xc0] ss:$16 sps:$4 sm:$0xff]   ;;  %v14661_v45 = vpop.f32.mrf.mxu1  ;;  %v14669_v18 = vrot.slane %v14517_v4, %v20859_v63  ;;  %6036 = vmatprep.subr.bf16.mxu0 %v11936_v58  ;;  %v13117_v14 = vld [vmem:[%s20611_s0 + $0xe4] ss:$16 sps:$4 sm:$0xff]  }
 0x139   :  { %2571 = vmatmul.mubr.bf16.gmra.mxu0 %v13115_v30  ;;  %v14654_v0 = vld [vmem:[%s20612_s3 + $0x600] sm:$0xff]  ;;  %20858 = vst [vmem:[#allocation20_spill] sm:$0xff] %v14661_v45  ;;  %v13116_v30 = vld [vmem:[%s20611_s0 + $0xc8] ss:$16 sps:$4 sm:$0xff]   ;;  %v14674_v12 = vrot.slane %v14517_v4, %v20860_v33  ;;  %v1839_v63 = vadd.f32 %v14268_v6, %v14609_v43  ;;  %v14691_v4 = vpop.f32.mrf.mxu0  ;;  %v12056_v33 = vcombine.high %v14632_v25, %v14637_v36 }
 0x13a   :  { %v14659_v22 = vld [vmem:[%s20612_s3 + $0x620] sm:$0xff]  ;;  %2684 = vmatmul.mubr.bf16.gmra.mxu1 %v13116_v30  ;;  %v1950_v30 = vadd.f32 %v14257_v46, %v1837_v23  ;;  %20861 = vst [vmem:[#allocation21_spill] sm:$0xff] %v14691_v4  ;;  %2580 = vmatprep.mubr.bf16.mxu0 %v13117_v14  ;;  %v1851_v6 = vadd.f32 %v14330_v10, %v14538_v29  ;;  %v14710_v58 = vpop.f32.mrf.mxu1  ;;  %v13118_v23 = vld [vmem:[%s20611_s0 + $0xec] ss:$16 sps:$4 sm:$0xff]  }
 0x13b   :  { %v14681_v45 = vld [vmem:[%s20612_s3 + $0x9c0] sm:$0xff]  ;;  %20862 = vst [vmem:[#allocation22_spill] sm:$0xff] %v14710_v58  ;;  %2693 = vmatprep.mubr.bf16.mxu1 %v13118_v23  ;;  %6148 = vmatpush2.bf16.msra.mxu1 %v12071_v62  ;;  %v1835_v23 = vadd.f32 %v14236_v51, %v14609_v43  ;;  %v14737_v14 = vpop.f32.mrf.mxu0  ;;  %v14769_v3 = vadd.f32 %v14270_v11, %v1839_v63 }
 0x13c   :  { %v14686_v15 = vld [vmem:[%s20612_s3 + $0x9e0] sm:$0xff]  ;;  %20863 = vst [vmem:[#allocation23_spill] sm:$0xff] %v14737_v14  ;;  %6149 = vmatprep.subr.bf16.mxu1 %v12064_v24  ;;  %v1847_v24 = vadd.f32 %v14304_v56, %v14538_v29  ;;  %v14760_v58 = vpop.f32.mrf.mxu1  ;;  %6037 = vmatpush2.bf16.msra.mxu0 %v11935_v37  ;;  %v2705_v48 = vmax.f32 %v1950_v30, 0.0  ;;  %v14788_v11 = vadd.f32 %v14332_v20, %v1851_v6 }
 0x13d   :  { %v14701_v39 = vld [vmem:[%s20612_s3 + $0x980] sm:$0xff]  ;;  %20864 = vst [vmem:[#allocation24_spill] sm:$0xff] %v14760_v58  ;;  %v14771_v60 = vpop.f32.mrf.mxu0  ;;  %6038 = vmatprep.subr.bf16.mxu0 %v11928_v42  ;;  %v1849_v63 = vadd.f32 %v14320_v59, %v14609_v43 }
 0x13e   :  { %v14706_v46 = vld [vmem:[%s20612_s3 + $0x9a0] sm:$0xff]  ;;  %v14790_v42 = vpop.f32.mrf.mxu1  ;;  %v14809_v6 = vpack.c.bf16 %v2713_v28, %v2705_v48  ;;  %v1960_v59 = vadd.f32 %v14309_v34, %v1847_v24  ;;  %v13120_v48 = vld [vmem:[%s20611_s0 + $0xe8] ss:$16 sps:$4 sm:$0xff]  }
 0x13f   :  { %v14722_v4 = vld [vmem:[%s20612_s3 + $0x940] sm:$0xff]  ;;  %20865 = vst [vmem:[#allocation25_spill] sm:$0xff] %v14790_v42  ;;  %6150 = vmatpush2.bf16.msra.mxu1 %v12063_v5  ;;  %v1948_v5 = vadd.f32 %v14241_v57, %v1835_v23  ;;  %v14813_v56 = vpop.f32.mrf.mxu0  ;;  %v20874_v23 = vcombine.low %v14632_v25, %v14637_v36 }
 0x140   :  { %v14727_v10 = vld [vmem:[%s20612_s3 + $0x960] sm:$0xff]  ;;  %20866 = vst [vmem:[#allocation26_spill] sm:$0xff] %v14809_v6  ;;  %20867 = vst [vmem:[#allocation27_spill] sm:$0xff] %v14813_v56  ;;  %6151 = vmatprep.subr.bf16.mxu1 %v12056_v33  ;;  %v14829_v28 = vpop.f32.mrf.mxu1  ;;  %v20870_v33 = vcombine.low %v14565_v9, %v14576_v8  ;;  %v1845_v8 = vadd.f32 %v14288_v26, %v14609_v43  ;;  %v20878_v56 = vcombine.low %v14581_v49, %v14586_v54 }
 0x141   :  { %v14732_v62 = vld [vmem:[%s20612_s3 + $0x900] sm:$0xff]  ;;  %20869 = vst [vmem:[#allocation29_spill] sm:$0xff] %v14829_v28  ;;  %v14855_v9 = vpop.f32.mrf.mxu0  ;;  %v2704_v58 = vmax.f32 %v1948_v5, 0.0  ;;  %v2721_v5 = vmax.f32 %v1960_v59, 0.0 }
 0x142   :  { %v14751_v51 = vld [vmem:[%s20612_s3 + $0x8c0] sm:$0xff]  ;;  %2694 = vmatmul.mubr.bf16.gmra.mxu1 %v13120_v48  ;;  %6039 = vmatpush2.bf16.msra.mxu0 %v20870_v33  ;;  %v2712_v48 = vmax.f32 %v14769_v3, 0.0  ;;  %20871 = vst [vmem:[#allocation30_spill] sm:$0xff] %v14855_v9  ;;  %v20872_v33 = vcombine.high %v14581_v49, %v14586_v54  ;;  %v14877_v28 = vpop.f32.mrf.mxu1  ;;  %v1962_v9 = vadd.f32 %v14322_v38, %v1849_v63 }
 0x143   :  { %v14756_v2 = vld [vmem:[%s20612_s3 + $0x8e0] sm:$0xff]  ;;  %20873 = vst [vmem:[#allocation31_spill] sm:$0xff] %v14877_v28  ;;  %6152 = vmatpush2.bf16.msra.mxu1 %v20874_v23  ;;  %v14887_v42 = vpop.f32.mrf.mxu0  ;;  %v1857_v23 = vadd.f32 %v14356_v53, %v14538_v29  ;;  %v1958_v54 = vadd.f32 %v14293_v13, %v1845_v8  ;;  %v20882_v13 = vcombine.low %v14654_v0, %v14659_v22 }
 0x144   :  { %v14780_v14 = vld [vmem:[%s20612_s3 + $0x880] sm:$0xff]  ;;  %6040 = vmatprep.subr.bf16.mxu0 %v20872_v33  ;;  %v1861_v33 = vadd.f32 %v14382_v16, %v14538_v29  ;;  %20875 = vst [vmem:[#allocation32_spill] sm:$0xff] %v14887_v42  ;;  %v20876_v16 = vcombine.high %v14654_v0, %v14659_v22  ;;  %v14937_v49 = vpack.c.bf16 %v2712_v48, %v2704_v58 }
 0x145   :  { %v14785_v30 = vld [vmem:[%s20612_s3 + $0x8a0] sm:$0xff]  ;;  %v14942_v59 = vpop.f32.mrf.mxu0 }
 0x146   :  { %v14806_v20 = vld [vmem:[%s20612_s3 + $0x860] sm:$0xff]  ;;  %6153 = vmatprep.subr.bf16.mxu1 %v20876_v16  ;;  %v1859_v16 = vadd.f32 %v14372_v35, %v14609_v43  ;;  %6041 = vmatpush2.bf16.msra.mxu0 %v20878_v56  ;;  %20879 = vst [vmem:[#allocation34_spill] sm:$0xff] %v14937_v49  ;;  %v1855_v56 = vadd.f32 %v14340_v21, %v14609_v43 }
 0x147   :  { %v13119_v37 = vld [vmem:[%s20611_s0 + $0xe0] ss:$16 sps:$4 sm:$0xff]   ;;  %6154 = vmatpush2.bf16.msra.mxu1 %v20882_v13  ;;  %v2060_v8 = vpop.f32.mrf.mxu0 }
 0x148   :  { %2581 = vmatmul.mubr.bf16.gmra.mxu0 %v13119_v37  ;;  %v14826_v57 = vld [vmem:[%s20612_s3 + $0x820] sm:$0xff]  ;;  %v20880_v37 = vcombine.high %v14681_v45, %v14686_v15  ;;  %v1972_v13 = vadd.f32 %v14374_v40, %v1859_v16  ;;  %v2720_v40 = vmax.f32 %v1958_v54, 0.0  ;;  %v20887_v54 = vcombine.low %v14701_v39, %v14706_v46 }
 0x149   :  { %20868 = vst [vmem:[#allocation28_spill] sm:$0xff] %v14826_v57  ;;  %v14844_v34 = vld [vmem:[%s20612_s3 + $0xdc0] sm:$0xff]  ;;  %6042 = vmatprep.mubr.bf16.mxu0 %v14809_v6  ;;  %v2729_v6 = vmax.f32 %v14788_v11, 0.0  ;;  %v14915_v11 = vpop.f32.mrf.mxu1  ;;  %v1974_v57 = vadd.f32 %v14384_v19, %v1861_v33 }
 0x14a   :  { %v14849_v24 = vld [vmem:[%s20612_s3 + $0xde0] sm:$0xff]  ;;  %20877 = vst [vmem:[#allocation33_spill] sm:$0xff] %v14915_v11  ;;  %6236 = vmatprep.subr.bf16.mxu0 %v20880_v37 }
 0x14b   :  { %v14867_v3 = vld [vmem:[%s20612_s3 + $0xbc0] sm:$0xff]  ;;  %v12296_v63 = vcombine.high %v14844_v34, %v14849_v24  ;;  %v14949_v28 = vpack.c.bf16 %v2729_v6, %v2721_v5  ;;  %v14952_v58 = vpop.f32.mrf.mxu1  ;;  %v2728_v6 = vmax.f32 %v1962_v9, 0.0  ;;  %v1970_v5 = vadd.f32 %v14361_v61, %v1857_v23 }
 0x14c   :  { %v14872_v26 = vld [vmem:[%s20612_s3 + $0xbe0] sm:$0xff]  ;;  %v20884_v9 = vcombine.low %v14681_v45, %v14686_v15  ;;  %v1871_v45 = vadd.f32 %v14434_v50, %v14538_v29  ;;  %v2062_v15 = vpop.f32.mrf.mxu0  ;;  %v20885_v23 = vcombine.high %v14701_v39, %v14706_v46  ;;  %v1867_v50 = vadd.f32 %v14408_v1, %v14538_v29 }
 0x14d   :  { %v14897_v25 = vld [vmem:[%s20612_s3 + $0xb80] sm:$0xff]  ;;  %20881 = vst [vmem:[#allocation35_spill] sm:$0xff] %v14949_v28  ;;  %6349 = vmatprep.subr.bf16.mxu1 %v12296_v63  ;;  %v2173_v21 = vpop.f32.mrf.mxu1  ;;  %v1968_v63 = vadd.f32 %v14345_v7, %v1855_v56  ;;  %v2063_v0 = vadd.f32 %v2062_v15, %v14674_v12  ;;  %v15009_v56 = vpack.c.bf16 %v2728_v6, %v2720_v40  ;;  %v2737_v16 = vmax.f32 %v1970_v5, 0.0 }
 0x14e   :  { %v14902_v36 = vld [vmem:[%s20612_s3 + $0xba0] sm:$0xff]  ;;  %v2064_v48 = vpop.f32.mrf.mxu0  ;;  %v2744_v15 = vmax.f32 %v1972_v13, 0.0  ;;  %v1869_v39 = vadd.f32 %v14424_v44, %v14609_v43  ;;  %v1984_v46 = vadd.f32 %v14436_v17, %v1871_v45  ;;  %v20888_v40 = vcombine.high %v14722_v4, %v14727_v10 }
 0x14f   :  { %v14907_v38 = vld [vmem:[%s20612_s3 + $0xb40] sm:$0xff]  ;;  %v2175_v33 = vpop.f32.mrf.mxu1  ;;  %20886 = vst [vmem:[#allocation37_spill] sm:$0xff] %v15009_v56  ;;  %v2065_v11 = vadd.f32 %v2064_v48, %v14669_v18  ;;  %v2736_v5 = vmax.f32 %v1968_v63, 0.0  ;;  %v1865_v48 = vadd.f32 %v14392_v52, %v14609_v43 }
 0x150   :  { %v14925_v42 = vld [vmem:[%s20612_s3 + $0xb60] sm:$0xff]  ;;  %6043 = vmatmul.mubr.bf16.vlgmr.msra.gmra.mxu0 %v14937_v49  ;;  %v2066_v13 = vpop.f32.mrf.mxu0  ;;  %v1980_v49 = vadd.f32 %v14413_v41, %v1867_v50  ;;  %v20891_v41 = vcombine.low %v14722_v4, %v14727_v10  ;;  %v20893_v4 = vcombine.high %v14732_v62, %v14746_v27  ;;  %v20894_v10 = vld [vmem:[#allocation5_spill] sm:$0xff] }
 0x151   :  { %v14930_v53 = vld [vmem:[%s20612_s3 + $0xb00] sm:$0xff]  ;;  %6052 = vmatprep.mubr.bf16.mxu0 %v14949_v28  ;;  %6237 = vmatpush1.bf16.msra.mxu0 %v20884_v9  ;;  %v2745_v9 = vmax.f32 %v1974_v57, 0.0  ;;  %v2177_v28 = vpop.f32.mrf.mxu1  ;;  %v2176_v57 = vadd.f32 %v2175_v33, %v2063_v0  ;;  %v2067_v7 = vadd.f32 %v2066_v13, %v14674_v12  ;;  %v15049_v45 = vpack.c.bf16 %v2744_v15, %v2736_v5 }
 0x152   :  { %v14935_v35 = vld [vmem:[%s20612_s3 + $0xb20] sm:$0xff]  ;;  %6238 = vmatprep.subr.bf16.mxu0 %v20885_v23  ;;  %v2061_v23 = vadd.f32 %v2060_v8, %v14669_v18  ;;  %v2178_v6 = vadd.f32 %v2177_v28, %v2065_v11  ;;  %v1881_v28 = vadd.f32 %v14493_v47, %v14538_v29  ;;  %v1978_v47 = vadd.f32 %v14397_v55, %v1865_v48 }
 0x153   :  { %v14964_v37 = vld [vmem:[%s20612_s3 + $0xac0] sm:$0xff]  ;;  %v2179_v63 = vpop.f32.mrf.mxu1  ;;  %20890 = vst [vmem:[#allocation39_spill] sm:$0xff] %v15049_v45  ;;  %v1877_v15 = vadd.f32 %v20894_v10, %v14538_v29  ;;  %v2707_v5 = vmax.f32 %v2176_v57, 0.0  ;;  %v20897_v57 = vcombine.low %v14732_v62, %v14746_v27 }
 0x154   :  { %v14969_v19 = vld [vmem:[%s20612_s3 + $0xae0] sm:$0xff]  ;;  %v2174_v52 = vadd.f32 %v2173_v21, %v2061_v23  ;;  %v2180_v11 = vadd.f32 %v2179_v63, %v2067_v7  ;;  %v2761_v7 = vmax.f32 %v1984_v46, 0.0  ;;  %v2714_v50 = vmax.f32 %v2178_v6, 0.0 }
 0x155   :  { %20883 = vst [vmem:[#allocation36_spill] sm:$0xff] %v14969_v19  ;;  %v14989_v22 = vld [vmem:[%s20612_s3 + $0xd80] sm:$0xff]  ;;  %6239 = vmatpush1.bf16.msra.mxu0 %v20887_v54  ;;  %v15040_v54 = vpack.c.bf16 %v2745_v9, %v2737_v16  ;;  %v2070_v19 = vpop.f32.mrf.mxu0  ;;  %v2183_v0 = vpop.f32.mrf.mxu1 }
 0x156   :  { %v14994_v61 = vld [vmem:[%s20612_s3 + $0xda0] sm:$0xff]  ;;  %6240 = vmatprep.subr.bf16.mxu0 %v20888_v40  ;;  %v2715_v13 = vmax.f32 %v2180_v11, 0.0  ;;  %v2706_v44 = vmax.f32 %v2174_v52, 0.0  ;;  %v2071_v55 = vadd.f32 %v2070_v19, %v14669_v18 }
 0x157   :  { %v15025_v1 = vld [vmem:[%s20612_s3 + $0xd40] sm:$0xff]  ;;  %20889 = vst [vmem:[#allocation38_spill] sm:$0xff] %v15040_v54  ;;  %v2072_v23 = vpop.f32.mrf.mxu0  ;;  %v2185_v63 = vpop.f32.mrf.mxu1 }
 0x158   :  { %v15030_v8 = vld [vmem:[%s20612_s3 + $0xd60] sm:$0xff]  ;;  %6053 = vmatmul.mubr.bf16.gmra.mxu0 %v15009_v56  ;;  %v2073_v40 = vadd.f32 %v2072_v23, %v14674_v12  ;;  %v20899_v23 = vld [vmem:[#allocation3_spill] sm:$0xff]  ;;  %v15101_v62 = vpack.c.bf16 %v2714_v50, %v2706_v44 }
 0x159   :  { %6062 = vmatprep.mubr.bf16.mxu0 %v15040_v54  ;;  %6241 = vmatpush1.bf16.msra.mxu0 %v20891_v41  ;;  %v15060_v21 = vld [vmem:[%s20612_s3 + $0xd00] sm:$0xff]  ;;  %v2753_v41 = vmax.f32 %v1980_v49, 0.0  ;;  %v2074_v48 = vpop.f32.mrf.mxu0  ;;  %v2187_v10 = vpop.f32.mrf.mxu1  ;;  %v1875_v27 = vadd.f32 %v20899_v23, %v14609_v43  ;;  %v2752_v23 = vmax.f32 %v1978_v47, 0.0  ;;  %v20909_v47 = vcombine.low %v14844_v34, %v14849_v24  ;;  %v20912_v24 = vld [vmem:[#allocation9_spill] sm:$0xff] }
 0x15a   :  { %v15065_v33 = vld [vmem:[%s20612_s3 + $0xd20] sm:$0xff]  ;;  %6242 = vmatprep.subr.bf16.mxu0 %v20893_v4  ;;  %v2075_v4 = vadd.f32 %v2074_v48, %v14669_v18  ;;  %v15109_v48 = vld [vmem:[%s20612_s3 + $0x5c8] sm:$0xff] }
 0x15b   :  { %v20892_v16 = vld [vmem:[#allocation2_spill] sm:$0xff]  ;;  %v15097_v11 = vpack.c.bf16 %v2761_v7, %v2753_v41 }
 0x15c   :  { %v1982_v9 = vadd.f32 %v20892_v16, %v1869_v39  ;;  %v20895_v39 = vld [vmem:[#allocation10_spill] sm:$0xff]  ;;  %v15079_v16 = vpack.c.bf16 %v2715_v13, %v2707_v5  ;;  %v2076_v5 = vpop.f32.mrf.mxu0  ;;  %v20901_v13 = vcombine.high %v14751_v51, %v14756_v2  ;;  %v2188_v44 = vadd.f32 %v2187_v10, %v2075_v4 }
 0x15d   :  { %v1994_v46 = vadd.f32 %v20895_v39, %v1881_v28  ;;  %6243 = vmatpush1.bf16.msra.mxu0 %v20897_v57  ;;  %v15090_v19 = vld [vmem:[%s20612_s3 + $0xcc0] sm:$0xff]  ;;  %20898 = vst [vmem:[#allocation5_spill] sm:$0xff] %v15097_v11  ;;  %20900 = vst [vmem:[#allocation10_spill] sm:$0xff] %v15101_v62  ;;  %v2186_v39 = vadd.f32 %v2185_v63, %v2073_v40  ;;  %v2077_v50 = vadd.f32 %v2076_v5, %v14674_v12  ;;  %v2189_v57 = vpop.f32.mrf.mxu1  ;;  %v20903_v40 = vld [vmem:[#allocation8_spill] sm:$0xff] }
 0x15e   :  { %20896 = vst [vmem:[#allocation2_spill] sm:$0xff] %v15079_v16  ;;  %v15095_v52 = vld [vmem:[%s20612_s3 + $0xce0] sm:$0xff]  ;;  %v2760_v28 = vmax.f32 %v1982_v9, 0.0  ;;  %6244 = vmatprep.subr.bf16.mxu0 %v20901_v13  ;;  %v15114_v9 = vld [vmem:[%s20612_s3 + $0x5e8] sm:$0xff]  ;;  %6155 = vmatprep.mubr.bf16.mxu1 %v15079_v16  ;;  %v2184_v13 = vadd.f32 %v2183_v0, %v2071_v55  ;;  %v2080_v6 = vpop.f32.mrf.mxu0  ;;  %v1879_v63 = vadd.f32 %v20903_v40, %v14609_v43  ;;  %v2730_v40 = vmax.f32 %v2188_v44, 0.0  ;;  %v20911_v44 = vld [vmem:[#allocation13_spill] sm:$0xff] }
 0x15f   :  { %v20902_v7 = vld [vmem:[#allocation6_spill] sm:$0xff]  ;;  %6156 = vmatmul.mubr.bf16.vlgmr.msra.gmra.mxu1 %v15101_v62  ;;  %v2777_v4 = vmax.f32 %v1994_v46, 0.0  ;;  %v2190_v10 = vadd.f32 %v2189_v57, %v2077_v50  ;;  %v2193_v5 = vpop.f32.mrf.mxu1  ;;  %v20904_v0 = vcombine.low %v14751_v51, %v14756_v2  ;;  %v20906_v50 = vld [vmem:[#allocation4_spill] sm:$0xff]  ;;  %v20907_v51 = vld [vmem:[#allocation17_spill] sm:$0xff]  ;;  %v2723_v17 = vmax.f32 %v2186_v39, 0.0 }
 0x160   :  { %v1990_v41 = vadd.f32 %v20902_v7, %v1877_v15  ;;  %6063 = vmatmul.mubr.bf16.gmra.mxu0 %v15049_v45  ;;  %v15136_v55 = vld [vmem:[%s20612_s3 + $0xc80] sm:$0xff]  ;;  %v15143_v7 = vpack.c.bf16 %v2760_v28, %v2752_v23  ;;  %v15146_v57 = vadd.f32 %v20906_v50, %v1875_v27  ;;  %v1891_v2 = vadd.f32 %v20907_v51, %v14538_v29 }
 0x161   :  { %6072 = vmatprep.mubr.bf16.mxu0 %v15097_v11  ;;  %6245 = vmatpush1.bf16.msra.mxu0 %v20904_v0  ;;  %v15141_v46 = vld [vmem:[%s20612_s3 + $0xca0] sm:$0xff]  ;;  %v2082_v0 = vpop.f32.mrf.mxu0  ;;  %v20908_v15 = vcombine.high %v14780_v14, %v14785_v30  ;;  %v2731_v28 = vmax.f32 %v2190_v10, 0.0  ;;  %v2195_v27 = vpop.f32.mrf.mxu1  ;;  %v20910_v50 = vcombine.high %v14989_v22, %v14994_v61  ;;  %v1887_v51 = vadd.f32 %v20911_v44, %v14538_v29 }
 0x162   :  { %20905 = vst [vmem:[#allocation3_spill] sm:$0xff] %v15143_v7  ;;  %6350 = vmatpush1.bf16.msra.mxu1 %v20909_v47  ;;  %v2769_v49 = vmax.f32 %v1990_v41, 0.0  ;;  %v2083_v23 = vadd.f32 %v2082_v0, %v14674_v12  ;;  %v2722_v62 = vmax.f32 %v2184_v13, 0.0  ;;  %v1992_v41 = vadd.f32 %v20912_v24, %v1879_v63  ;;  %v20916_v13 = vld [vmem:[#allocation15_spill] sm:$0xff]  ;;  %v20917_v44 = vld [vmem:[#allocation18_spill] sm:$0xff] }
 0x163   :  { %6246 = vmatprep.subr.bf16.mxu0 %v20908_v15  ;;  %6351 = vmatprep.subr.bf16.mxu1 %v20910_v50  ;;  %v2081_v15 = vadd.f32 %v2080_v6, %v14669_v18  ;;  %v2084_v16 = vpop.f32.mrf.mxu0  ;;  %v15168_v10 = vpack.c.bf16 %v2731_v28, %v2723_v17  ;;  %v2197_v0 = vpop.f32.mrf.mxu1  ;;  %v20915_v50 = vcombine.low %v14780_v14, %v14785_v30  ;;  %v20923_v24 = vld [vmem:[#allocation11_spill] sm:$0xff] }
 0x164   :  { %v15166_v39 = vpack.c.bf16 %v2777_v4, %v2769_v49  ;;  %v2085_v47 = vadd.f32 %v2084_v16, %v14669_v18  ;;  %v1889_v6 = vadd.f32 %v20916_v13, %v14609_v43  ;;  %v2004_v11 = vadd.f32 %v20917_v44, %v1891_v2  ;;  %v15193_v4 = vld [vmem:[%s20612_s3 + $0xc40] sm:$0xff] }
 0x165   :  { %20914 = vst [vmem:[#allocation8_spill] sm:$0xff] %v15168_v10  ;;  %6247 = vmatpush1.bf16.msra.mxu0 %v20915_v50  ;;  %v15177_v45 = vpack.c.bf16 %v2730_v40, %v2722_v62  ;;  %v2086_v34 = vpop.f32.mrf.mxu0  ;;  %v20919_v49 = vcombine.high %v14801_v32, %v14806_v20  ;;  %v20920_v17 = vcombine.low %v14989_v22, %v14994_v61  ;;  %v2199_v30 = vpop.f32.mrf.mxu1  ;;  %v15198_v22 = vld [vmem:[%s20612_s3 + $0xc60] sm:$0xff] }
 0x166   :  { %20913 = vst [vmem:[#allocation6_spill] sm:$0xff] %v15166_v39  ;;  %v2196_v16 = vadd.f32 %v2195_v27, %v2083_v23  ;;  %v2198_v63 = vadd.f32 %v2197_v0, %v2085_v47  ;;  %v2087_v14 = vadd.f32 %v2086_v34, %v14674_v12  ;;  %6165 = vmatprep.mubr.bf16.mxu1 %v15168_v10  ;;  %v20922_v61 = vld [vmem:[#allocation14_spill] sm:$0xff]  ;;  %v2768_v27 = vmax.f32 %v15146_v57, 0.0  ;;  %v20925_v57 = vld [vmem:[#allocation28_spill] sm:$0xff] }
 0x167   :  { %20918 = vst [vmem:[#allocation4_spill] sm:$0xff] %v15177_v45  ;;  %6248 = vmatprep.subr.bf16.mxu0 %v20919_v49  ;;  %6352 = vmatpush1.bf16.msra.mxu1 %v20920_v17  ;;  %v20921_v62 = vcombine.high %v15025_v1, %v15030_v8  ;;  %v2000_v2 = vadd.f32 %v20922_v61, %v1887_v51  ;;  %v2090_v28 = vpop.f32.mrf.mxu0  ;;  %v2776_v34 = vmax.f32 %v1992_v41, 0.0  ;;  %v2203_v50 = vpop.f32.mrf.mxu1  ;;  %v2793_v51 = vmax.f32 %v2004_v11, 0.0  ;;  %v20930_v61 = vld [vmem:[#allocation21_spill] sm:$0xff] }
 0x168   :  { %v2194_v40 = vadd.f32 %v2193_v5, %v2081_v15  ;;  %6073 = vmatmul.mubr.bf16.gmra.mxu0 %v15143_v7  ;;  %6166 = vmatmul.mubr.bf16.gmra.mxu1 %v15177_v45  ;;  %v12256_v23 = vcombine.high %v15136_v55, %v15141_v46  ;;  %v1885_v47 = vadd.f32 %v20923_v24, %v14609_v43  ;;  %v2746_v13 = vmax.f32 %v2198_v63, 0.0 }
 0x169   :  { %6353 = vmatprep.subr.bf16.mxu1 %v20921_v62  ;;  %v2200_v0 = vadd.f32 %v2199_v30, %v2087_v14  ;;  %6082 = vmatprep.mubr.bf16.mxu0 %v15166_v39  ;;  %v20924_v5 = vcombine.low %v14801_v32, %v14806_v20  ;;  %v1901_v15 = vadd.f32 %v14771_v60, %v14538_v29  ;;  %v2092_v44 = vpop.f32.mrf.mxu0  ;;  %v20928_v14 = vld [vmem:[#allocation16_spill] sm:$0xff]  ;;  %v2739_v20 = vmax.f32 %v2196_v16, 0.0  ;;  %v2205_v60 = vpop.f32.mrf.mxu1 }
 0x16a   :  { %v20926_v41 = vcombine.high %v14821_v31, %v20925_v57  ;;  %v20927_v49 = vcombine.low %v15025_v1, %v15030_v8  ;;  %v12248_v17 = vcombine.high %v15193_v4, %v15198_v22  ;;  %v2002_v32 = vadd.f32 %v20928_v14, %v1889_v6  ;;  %v20932_v6 = vld [vmem:[#allocation12_spill] sm:$0xff] }
 0x16b   :  { %6249 = vmatpush1.bf16.msra.mxu0 %v20924_v5  ;;  %v2747_v11 = vmax.f32 %v2200_v0, 0.0  ;;  %v2093_v30 = vadd.f32 %v2092_v44, %v14674_v12  ;;  %v20929_v63 = vcombine.high %v15060_v21, %v15065_v33  ;;  %v2785_v62 = vmax.f32 %v2000_v2, 0.0  ;;  %v2094_v5 = vpop.f32.mrf.mxu0 }
 0x16c   :  { %6250 = vmatprep.subr.bf16.mxu0 %v20926_v41  ;;  %6354 = vmatpush1.bf16.msra.mxu1 %v20927_v49  ;;  %v1897_v24 = vadd.f32 %v20930_v61, %v14538_v29  ;;  %v2738_v1 = vmax.f32 %v2194_v40, 0.0  ;;  %v2091_v8 = vadd.f32 %v2090_v28, %v14669_v18  ;;  %v15230_v41 = vpack.c.bf16 %v2776_v34, %v2768_v27  ;;  %v2207_v49 = vpop.f32.mrf.mxu1 }
 0x16d   :  { %6355 = vmatprep.subr.bf16.mxu1 %v20929_v63  ;;  %v1998_v16 = vadd.f32 %v20932_v6, %v1885_v47  ;;  %v15233_v0 = vpack.c.bf16 %v2747_v11, %v2739_v20  ;;  %v2095_v44 = vadd.f32 %v2094_v5, %v14669_v18  ;;  %v20934_v14 = vcombine.low %v14821_v31, %v20925_v57  ;;  %v20936_v63 = vld [vmem:[#allocation25_spill] sm:$0xff]  ;;  %v2096_v28 = vpop.f32.mrf.mxu0  ;;  %v20943_v6 = vld [vmem:[#allocation23_spill] sm:$0xff] }
 0x16e   :  { %20931 = vst [vmem:[#allocation17_spill] sm:$0xff] %v15230_v41  ;;  %v15239_v2 = vpack.c.bf16 %v2793_v51, %v2785_v62  ;;  %v2014_v40 = vadd.f32 %v20936_v63, %v1901_v15  ;;  %v15242_v61 = vpack.c.bf16 %v2746_v13, %v2738_v1  ;;  %v20938_v27 = vcombine.high %v14867_v3, %v14872_v26  ;;  %v2209_v51 = vpop.f32.mrf.mxu1  ;;  %v15258_v13 = vld [vmem:[%s20612_s3 + $0xc00] sm:$0xff]  ;;  %v20942_v1 = vld [vmem:[#allocation19_spill] sm:$0xff] }
 0x16f   :  { %20933 = vst [vmem:[#allocation13_spill] sm:$0xff] %v15233_v0  ;;  %6251 = vmatpush1.bf16.msra.mxu0 %v20934_v14  ;;  %v20939_v34 = vcombine.low %v15060_v21, %v15065_v33  ;;  %v2792_v47 = vmax.f32 %v2002_v32, 0.0  ;;  %v2206_v20 = vadd.f32 %v2205_v60, %v2093_v30  ;;  %v2208_v11 = vadd.f32 %v2207_v49, %v2095_v44  ;;  %v15263_v21 = vld [vmem:[%s20612_s3 + $0xc20] sm:$0xff]  ;;  %v2100_v30 = vpop.f32.mrf.mxu0 }
 0x170   :  { %20935 = vst [vmem:[#allocation9_spill] sm:$0xff] %v15239_v2  ;;  %20937 = vst [vmem:[#allocation15_spill] sm:$0xff] %v15242_v61  ;;  %6252 = vmatprep.subr.bf16.mxu0 %v20938_v27  ;;  %v2097_v31 = vadd.f32 %v2096_v28, %v14674_v12  ;;  %6175 = vmatprep.mubr.bf16.mxu1 %v15233_v0  ;;  %v20940_v15 = vcombine.high %v15090_v19, %v15095_v52  ;;  %v20941_v33 = vld [vmem:[#allocation22_spill] sm:$0xff]  ;;  %v2784_v62 = vmax.f32 %v1998_v16, 0.0  ;;  %v2213_v14 = vpop.f32.mrf.mxu1 }
 0x171   :  { %6356 = vmatpush1.bf16.msra.mxu1 %v20939_v34  ;;  %v2010_v57 = vadd.f32 %v20941_v33, %v1897_v24  ;;  %v2204_v32 = vadd.f32 %v2203_v50, %v2091_v8  ;;  %6083 = vmatmul.mubr.bf16.gmra.mxu0 %v15230_v41  ;;  %v12247_v60 = vcombine.low %v15193_v4, %v15198_v22  ;;  %v2809_v24 = vmax.f32 %v2014_v40, 0.0  ;;  %v2102_v16 = vpop.f32.mrf.mxu0  ;;  %v20961_v22 = vld [vmem:[#allocation27_spill] sm:$0xff] }
 0x172   :  { %6357 = vmatprep.subr.bf16.mxu1 %v20940_v15  ;;  %6176 = vmatmul.mubr.bf16.gmra.mxu1 %v15242_v61  ;;  %v1895_v5 = vadd.f32 %v20942_v1, %v14609_v43  ;;  %v1899_v44 = vadd.f32 %v20943_v6, %v14609_v43  ;;  %v2210_v49 = vadd.f32 %v2209_v51, %v2097_v31  ;;  %v2762_v63 = vmax.f32 %v2208_v11, 0.0  ;;  %v20948_v51 = vld [vmem:[#allocation30_spill] sm:$0xff]  ;;  %v20949_v1 = vld [vmem:[#allocation20_spill] sm:$0xff] }
 0x173   :  { %6092 = vmatprep.mubr.bf16.mxu0 %v15239_v2  ;;  %v20944_v50 = vcombine.low %v14867_v3, %v14872_v26  ;;  %v1911_v8 = vadd.f32 %v14942_v59, %v14538_v29  ;;  %v20945_v28 = vcombine.high %v14897_v25, %v14902_v36  ;;  %v20946_v27 = vcombine.low %v15090_v19, %v15095_v52  ;;  %v2215_v59 = vpop.f32.mrf.mxu1  ;;  %v2104_v33 = vpop.f32.mrf.mxu0 }
 0x174   :  { %v12240_v34 = vcombine.high %v15258_v13, %v15263_v21  ;;  %v15288_v31 = vpack.c.bf16 %v2792_v47, %v2784_v62  ;;  %v2755_v3 = vmax.f32 %v2206_v20, 0.0  ;;  %v2763_v26 = vmax.f32 %v2210_v49, 0.0  ;;  %v20950_v62 = vld [vmem:[#allocation24_spill] sm:$0xff] }
 0x175   :  { %6253 = vmatpush2.bf16.msra.mxu0 %v20944_v50  ;;  %6358 = vmatpush1.bf16.msra.mxu1 %v20946_v27  ;;  %v2103_v40 = vadd.f32 %v2102_v16, %v14674_v12  ;;  %v2801_v11 = vmax.f32 %v2010_v57, 0.0  ;;  %v1907_v15 = vadd.f32 %v20948_v51, %v14538_v29  ;;  %v2754_v19 = vmax.f32 %v2204_v32, 0.0  ;;  %v2217_v50 = vpop.f32.mrf.mxu1  ;;  %v15308_v29 = vld [vmem:[%s20612_s3 + $0xa80] sm:$0xff] }
 0x176   :  { %6254 = vmatprep.subr.bf16.mxu0 %v20945_v28  ;;  %20947 = vst [vmem:[#allocation18_spill] sm:$0xff] %v15288_v31  ;;  %6359 = vmatprep.subr.bf16.mxu1 %v12256_v23  ;;  %v2101_v52 = vadd.f32 %v2100_v30, %v14669_v18  ;;  %v2008_v47 = vadd.f32 %v20949_v1, %v1895_v5  ;;  %v15313_v57 = vld [vmem:[%s20612_s3 + $0xaa0] sm:$0xff] }
 0x177   :  { %v2012_v20 = vadd.f32 %v20950_v62, %v1899_v44  ;;  %v15299_v6 = vpack.c.bf16 %v2763_v26, %v2755_v3  ;;  %v2105_v49 = vadd.f32 %v2104_v33, %v14669_v18  ;;  %v20952_v23 = vcombine.low %v14897_v25, %v14902_v36  ;;  %v2106_v44 = vpop.f32.mrf.mxu0  ;;  %v15329_v16 = vld [vmem:[%s20612_s3 + $0xfc0] sm:$0xff]  ;;  %v2219_v28 = vpop.f32.mrf.mxu1 }
 0x178   :  { %v15315_v32 = vpack.c.bf16 %v2809_v24, %v2801_v11  ;;  %v2024_v30 = vadd.f32 %v14952_v58, %v1911_v8  ;;  %v15318_v5 = vpack.c.bf16 %v2762_v63, %v2754_v19  ;;  %v20955_v25 = vcombine.high %v14907_v38, %v14925_v42  ;;  %v15334_v58 = vld [vmem:[%s20612_s3 + $0xfe0] sm:$0xff] }
 0x179   :  { %20951 = vst [vmem:[#allocation14_spill] sm:$0xff] %v15299_v6  ;;  %6255 = vmatpush2.bf16.msra.mxu0 %v20952_v23  ;;  %v20956_v36 = vcombine.low %v15136_v55, %v15141_v46  ;;  %v2216_v24 = vadd.f32 %v2215_v59, %v2103_v40  ;;  %v2218_v8 = vadd.f32 %v2217_v50, %v2105_v49  ;;  %v20957_v55 = vld [vmem:[#allocation31_spill] sm:$0xff]  ;;  %v2110_v3 = vpop.f32.mrf.mxu0  ;;  %v2808_v40 = vmax.f32 %v2012_v20, 0.0  ;;  %v2223_v11 = vpop.f32.mrf.mxu1 }
 0x17a   :  { %20953 = vst [vmem:[#allocation11_spill] sm:$0xff] %v15315_v32  ;;  %20954 = vst [vmem:[#allocation28_spill] sm:$0xff] %v15318_v5  ;;  %6256 = vmatprep.subr.bf16.mxu0 %v20955_v25  ;;  %v2107_v63 = vadd.f32 %v2106_v44, %v14674_v12  ;;  %6185 = vmatprep.mubr.bf16.mxu1 %v15299_v6  ;;  %v2020_v46 = vadd.f32 %v20957_v55, %v1907_v15  ;;  %v20959_v15 = vld [vmem:[#allocation32_spill] sm:$0xff] }
 0x17b   :  { %6360 = vmatpush1.bf16.msra.mxu1 %v20956_v36  ;;  %v2214_v27 = vadd.f32 %v2213_v14, %v2101_v52  ;;  %6093 = vmatmul.mubr.bf16.gmra.mxu0 %v15288_v31  ;;  %v12192_v26 = vcombine.high %v15308_v29, %v15313_v57  ;;  %v20958_v51 = vcombine.low %v14907_v38, %v14925_v42  ;;  %v2825_v52 = vmax.f32 %v2024_v30, 0.0  ;;  %v2112_v1 = vpop.f32.mrf.mxu0  ;;  %v15367_v38 = vld [vmem:[%s20612_s3 + $0xf80] sm:$0xff]  ;;  %v2225_v4 = vpop.f32.mrf.mxu1 }
 0x17c   :  { %6361 = vmatprep.subr.bf16.mxu1 %v12248_v17  ;;  %6186 = vmatmul.mubr.bf16.gmra.mxu1 %v15318_v5  ;;  %v2220_v59 = vadd.f32 %v2219_v28, %v2107_v63  ;;  %v12239_v17 = vcombine.low %v15258_v13, %v15263_v21  ;;  %v12360_v14 = vcombine.high %v15329_v16, %v15334_v58  ;;  %v2778_v33 = vmax.f32 %v2218_v8, 0.0  ;;  %v15372_v13 = vld [vmem:[%s20612_s3 + $0xfa0] sm:$0xff] }
 0x17d   :  { %6102 = vmatprep.mubr.bf16.mxu0 %v15315_v32  ;;  %6257 = vmatpush2.bf16.msra.mxu0 %v20958_v51  ;;  %v1909_v19 = vadd.f32 %v20959_v15, %v14609_v43  ;;  %v20960_v62 = vcombine.high %v14930_v53, %v14935_v35  ;;  %v12359_v42 = vcombine.low %v15329_v16, %v15334_v58  ;;  %v2800_v21 = vmax.f32 %v2008_v47, 0.0  ;;  %v2114_v25 = vpop.f32.mrf.mxu0  ;;  %v2227_v58 = vpop.f32.mrf.mxu1  ;;  %v15406_v51 = vld [vmem:[%s20612_s3 + $0xa60] sm:$0xff]  ;;  %v20970_v15 = vld [vmem:[#allocation29_spill] sm:$0xff] }
 0x17e   :  { %v2771_v20 = vmax.f32 %v2216_v24, 0.0  ;;  %v2779_v49 = vmax.f32 %v2220_v59, 0.0  ;;  %v2113_v50 = vadd.f32 %v2112_v1, %v14674_v12  ;;  %v2817_v23 = vmax.f32 %v2020_v46, 0.0  ;;  %v20968_v46 = vld [vmem:[#allocation36_spill] sm:$0xff]  ;;  %v15401_v59 = vld [vmem:[%s20612_s3 + $0xa40] sm:$0xff] }
 0x17f   :  { %6258 = vmatprep.subr.bf16.mxu0 %v20960_v62  ;;  %6362 = vmatpush1.bf16.msra.mxu1 %v12247_v60  ;;  %v1905_v60 = vadd.f32 %v20961_v22, %v14609_v43  ;;  %v2770_v30 = vmax.f32 %v2214_v27, 0.0  ;;  %v2111_v44 = vadd.f32 %v2110_v3, %v14669_v18  ;;  %v15378_v36 = vpack.c.bf16 %v2808_v40, %v2800_v21  ;;  %v20965_v43 = vld [vmem:[#allocation33_spill] sm:$0xff]  ;;  %v2116_v55 = vpop.f32.mrf.mxu0  ;;  %v15419_v1 = vld [vmem:[%s20612_s3 + $0xf60] sm:$0xff] }
 0x180   :  { %6363 = vmatprep.subr.bf16.mxu1 %v12240_v34  ;;  %v15380_v16 = vpack.c.bf16 %v2779_v49, %v2771_v20  ;;  %v2115_v47 = vadd.f32 %v2114_v25, %v14669_v18  ;;  %v20964_v24 = vcombine.low %v14930_v53, %v14935_v35  ;;  %v12352_v34 = vcombine.high %v15367_v38, %v15372_v13  ;;  %v2229_v35 = vpop.f32.mrf.mxu1  ;;  %v15432_v22 = vld [vmem:[%s20612_s3 + $0xa00] sm:$0xff] }
 0x181   :  { %20962 = vst [vmem:[#allocation16_spill] sm:$0xff] %v15378_v36  ;;  %v2022_v8 = vadd.f32 %v20965_v43, %v1909_v19  ;;  %v15389_v63 = vpack.c.bf16 %v2825_v52, %v2817_v23  ;;  %v15391_v28 = vpack.c.bf16 %v2778_v33, %v2770_v30  ;;  %v20969_v27 = vcombine.high %v14964_v37, %v20968_v46  ;;  %v2120_v52 = vpop.f32.mrf.mxu0  ;;  %v15414_v33 = vld [vmem:[%s20612_s3 + $0xf40] sm:$0xff] }
 0x182   :  { %20963 = vst [vmem:[#allocation21_spill] sm:$0xff] %v15380_v16  ;;  %6259 = vmatpush2.bf16.msra.mxu0 %v20964_v24  ;;  %v2226_v3 = vadd.f32 %v2225_v4, %v2113_v50  ;;  %v2228_v40 = vadd.f32 %v2227_v58, %v2115_v47  ;;  %v2117_v53 = vadd.f32 %v2116_v55, %v14674_v12 }
 0x183   :  { %20966 = vst [vmem:[#allocation12_spill] sm:$0xff] %v15389_v63  ;;  %20967 = vst [vmem:[#allocation25_spill] sm:$0xff] %v15391_v28  ;;  %6260 = vmatprep.subr.bf16.mxu0 %v20969_v27  ;;  %6364 = vmatpush1.bf16.msra.mxu1 %v12239_v17  ;;  %v2018_v17 = vadd.f32 %v20970_v15, %v1905_v60  ;;  %v2224_v19 = vadd.f32 %v2223_v11, %v2111_v44  ;;  %v2824_v20 = vmax.f32 %v2022_v8, 0.0  ;;  %v2122_v50 = vpop.f32.mrf.mxu0  ;;  %v15447_v44 = vld [vmem:[%s20612_s3 + $0xf00] sm:$0xff]  ;;  %v15475_v15 = vld [vmem:[%s20612_s3 + $0x1c8] sm:$0xff] }
 0x184   :  { %6195 = vmatprep.mubr.bf16.mxu1 %v15380_v16  ;;  %6365 = vmatprep.subr.bf16.mxu1 %v12360_v14  ;;  %v2230_v62 = vadd.f32 %v2229_v35, %v2117_v53  ;;  %v2233_v14 = vpop.f32.mrf.mxu1  ;;  %v20971_v11 = vcombine.low %v14964_v37, %v20968_v46  ;;  %v12191_v21 = vcombine.low %v15308_v29, %v15313_v57  ;;  %v2794_v49 = vmax.f32 %v2228_v40, 0.0  ;;  %v15437_v37 = vld [vmem:[%s20612_s3 + $0xa20] sm:$0xff] }
 0x185   :  { %6103 = vmatmul.mubr.bf16.gmra.mxu0 %v15378_v36  ;;  %6196 = vmatmul.mubr.bf16.gmra.mxu1 %v15391_v28  ;;  %v12184_v4 = vcombine.high %v15401_v59, %v15406_v51  ;;  %v12351_v29 = vcombine.low %v15367_v38, %v15372_v13  ;;  %v2787_v57 = vmax.f32 %v2226_v3, 0.0  ;;  %v12344_v30 = vcombine.high %v15414_v33, %v15419_v1  ;;  %v2124_v47 = vpop.f32.mrf.mxu0 }
 0x186   :  { %6112 = vmatprep.mubr.bf16.mxu0 %v15389_v63  ;;  %6261 = vmatpush2.bf16.msra.mxu0 %v20971_v11  ;;  %v2795_v60 = vmax.f32 %v2230_v62, 0.0  ;;  %v2235_v23 = vpop.f32.mrf.mxu1  ;;  %v2816_v38 = vmax.f32 %v2018_v17, 0.0  ;;  %v2786_v13 = vmax.f32 %v2224_v19, 0.0  ;;  %v2121_v25 = vadd.f32 %v2120_v52, %v14669_v18  ;;  %v15480_v17 = vld [vmem:[%s20612_s3 + $0x1e8] sm:$0xff] }
 0x187   :  { %6262 = vmatprep.subr.bf16.mxu0 %v12192_v26  ;;  %6366 = vmatpush2.bf16.msra.mxu1 %v12359_v42  ;;  %v2123_v26 = vadd.f32 %v2122_v50, %v14674_v12  ;;  %v15452_v42 = vld [vmem:[%s20612_s3 + $0xf20] sm:$0xff]  ;;  %v12183_v58 = vcombine.low %v15401_v59, %v15406_v51  ;;  %v12176_v8 = vcombine.high %v15432_v22, %v15437_v37  ;;  %v2126_v3 = vpop.f32.mrf.mxu0 }
 0x188   :  { %6367 = vmatprep.subr.bf16.mxu1 %v12352_v34  ;;  %v15457_v24 = vpack.c.bf16 %v2795_v60, %v2787_v57  ;;  %v2125_v34 = vadd.f32 %v2124_v47, %v14669_v18  ;;  %v2237_v43 = vpop.f32.mrf.mxu1  ;;  %v12343_v55 = vcombine.low %v15414_v33, %v15419_v1  ;;  %v15464_v46 = vpack.c.bf16 %v2824_v20, %v2816_v38  ;;  %v3368_v33 = vld [vmem:[%s20612_s3 + $0xec0] sm:$0xff] }
 0x189   :  { %v15466_v27 = vpack.c.bf16 %v2794_v49, %v2786_v13  ;;  %v12336_v40 = vcombine.high %v15447_v44, %v15452_v42  ;;  %v2236_v53 = vadd.f32 %v2235_v23, %v2123_v26  ;;  %v2127_v59 = vadd.f32 %v2126_v3, %v14674_v12  ;;  %v2130_v52 = vpop.f32.mrf.mxu0  ;;  %v3372_v1 = vld [vmem:[%s20612_s3 + $0xee0] sm:$0xff] }
 0x18a   :  { %20972 = vst [vmem:[#allocation22_spill] sm:$0xff] %v15457_v24  ;;  %6263 = vmatpush2.bf16.msra.mxu0 %v12191_v21  ;;  %20973 = vst [vmem:[#allocation19_spill] sm:$0xff] %v15464_v46  ;;  %v2238_v35 = vadd.f32 %v2237_v43, %v2125_v34  ;;  %v2239_v51 = vpop.f32.mrf.mxu1  ;;  %6205 = vmatprep.mubr.bf16.mxu1 %v15457_v24  ;;  %v2234_v19 = vadd.f32 %v2233_v14, %v2121_v25  ;;  %v20975_v21 = vld [vmem:[#allocation7_spill] sm:$0xff]  ;;  %v15512_v34 = vld [vmem:[%s20613_s2] sm:$0xff] }
 0x18b   :  { %20974 = vst [vmem:[#allocation23_spill] sm:$0xff] %v15466_v27  ;;  %6264 = vmatprep.subr.bf16.mxu0 %v12184_v4  ;;  %6368 = vmatpush2.bf16.msra.mxu1 %v12351_v29  ;;  %v2240_v62 = vadd.f32 %v2239_v51, %v2127_v59  ;;  %v20640_v20 = vsub.s32 5, %v20975_v21  ;;  %v12175_v14 = vcombine.low %v15432_v22, %v15437_v37  ;;  %v2132_v50 = vpop.f32.mrf.mxu0  ;;  %v2803_v57 = vmax.f32 %v2236_v53, 0.0  ;;  %v3360_v22 = vld [vmem:[%s20612_s3 + $0xe80] sm:$0xff] }
 0x18c   :  { %6369 = vmatprep.subr.bf16.mxu1 %v12344_v30  ;;  %v2243_v11 = vpop.f32.mrf.mxu1  ;;  %v2810_v49 = vmax.f32 %v2238_v35, 0.0  ;;  %v11914_v4 = vcombine.high %v15475_v15, %v15480_v17  ;;  %v12335_v29 = vcombine.low %v15447_v44, %v15452_v42  ;;  %v2133_v26 = vadd.f32 %v2132_v50, %v14674_v12  ;;  %v3364_v37 = vld [vmem:[%s20612_s3 + $0xea0] sm:$0xff] }
 0x18d   :  { %6113 = vmatmul.mubr.bf16.gmra.mxu0 %v15464_v46  ;;  %6206 = vmatmul.mubr.bf16.gmra.mxu1 %v15466_v27  ;;  %v2811_v60 = vmax.f32 %v2240_v62, 0.0  ;;  %v12328_v30 = vcombine.high %v3368_v33, %v3372_v1  ;;  %v2802_v38 = vmax.f32 %v2234_v19, 0.0  ;;  %v2131_v13 = vadd.f32 %v2130_v52, %v14669_v18  ;;  %v2134_v25 = vpop.f32.mrf.mxu0 }
 0x18e   :  { %6265 = vmatpush2.bf16.msra.mxu0 %v12183_v58  ;;  %v2245_v23 = vpop.f32.mrf.mxu1  ;;  %v20641_v44 = vsub.s32 4, %v20975_v21  ;;  %v2135_v47 = vadd.f32 %v2134_v25, %v14669_v18  ;;  %v15517_v43 = vrot.slane %v15512_v34, %v20640_v20  ;;  %v12327_v3 = vcombine.low %v3368_v33, %v3372_v1  ;;  %v3352_v33 = vld [vmem:[%s20612_s3 + $0xe40] sm:$0xff] }
 0x18f   :  { %6266 = vmatprep.subr.bf16.mxu0 %v12176_v8  ;;  %6370 = vmatpush2.bf16.msra.mxu1 %v12343_v55  ;;  %v15506_v42 = vpack.c.bf16 %v2811_v60, %v2803_v57  ;;  %v15519_v8 = vpack.c.bf16 %v2810_v49, %v2802_v38  ;;  %v2136_v55 = vpop.f32.mrf.mxu0  ;;  %v2246_v18 = vadd.f32 %v2245_v23, %v2133_v26  ;;  %v3344_v26 = vld [vmem:[%s20612_s3 + $0xe00] sm:$0xff] }
 0x190   :  { %6371 = vmatprep.subr.bf16.mxu1 %v12336_v40  ;;  %v2247_v58 = vpop.f32.mrf.mxu1  ;;  %v12320_v40 = vcombine.high %v3360_v22, %v3364_v37  ;;  %v2137_v35 = vadd.f32 %v2136_v55, %v14674_v12  ;;  %v2244_v51 = vadd.f32 %v2243_v11, %v2131_v13  ;;  %v15526_v19 = vrot.slane %v15512_v34, %v20641_v44  ;;  %v3356_v12 = vld [vmem:[%s20612_s3 + $0xe60] sm:$0xff] }
 0x191   :  { %20976 = vst [vmem:[#allocation30_spill] sm:$0xff] %v15506_v42  ;;  %20977 = vst [vmem:[#allocation20_spill] sm:$0xff] %v15519_v8  ;;  %v2248_v53 = vadd.f32 %v2247_v58, %v2135_v47  ;;  %6215 = vmatprep.mubr.bf16.mxu1 %v15506_v42  ;;  %v2286_v52 = vpop.f32.mrf.mxu0  ;;  %v12319_v49 = vcombine.low %v3360_v22, %v3364_v37  ;;  %v2819_v50 = vmax.f32 %v2246_v18, 0.0  ;;  %v3348_v23 = vld [vmem:[%s20612_s3 + $0xe20] sm:$0xff] }
 0x192   :  { %6267 = vmatpush2.bf16.msra.mxu0 %v12175_v14  ;;  %v2249_v59 = vpop.f32.mrf.mxu1  ;;  %v12312_v60 = vcombine.high %v3352_v33, %v3356_v12  ;;  %v2287_v38 = vadd.f32 %v2286_v52, %v15526_v19  ;;  %v12311_v55 = vcombine.low %v3352_v33, %v3356_v12 }
 0x193   :  { %6462 = vmatprep.subr.bf16.mxu0 %v11914_v4  ;;  %6372 = vmatpush2.bf16.msra.mxu1 %v12335_v29  ;;  %v2250_v1 = vadd.f32 %v2249_v59, %v2137_v35  ;;  %v2826_v14 = vmax.f32 %v2248_v53, 0.0  ;;  %v2288_v11 = vpop.f32.mrf.mxu0 }
 0x194   :  { %6373 = vmatprep.subr.bf16.mxu1 %v12328_v30  ;;  %v2399_v62 = vpop.f32.mrf.mxu1  ;;  %v2289_v29 = vadd.f32 %v2288_v11, %v15517_v43  ;;  %v2818_v30 = vmax.f32 %v2244_v51, 0.0 }
 0x195   :  { %6216 = vmatmul.mubr.bf16.gmra.mxu1 %v15519_v8  ;;  %v2827_v4 = vmax.f32 %v2250_v1, 0.0  ;;  %v2290_v13 = vpop.f32.mrf.mxu0  ;;  %v2400_v59 = vadd.f32 %v2399_v62, %v2287_v38  ;;  %v2949_v62 = vld [vmem:[%s20612_s3 + $0x1a8] sm:$0xff] }
 0x196   :  { %v2401_v57 = vpop.f32.mrf.mxu1  ;;  %v2291_v37 = vadd.f32 %v2290_v13, %v15526_v19  ;;  %v15546_v47 = vpack.c.bf16 %v2826_v14, %v2818_v30 }
 0x197   :  { %6374 = vmatpush2.bf16.msra.mxu1 %v12327_v3  ;;  %v15543_v22 = vpack.c.bf16 %v2827_v4, %v2819_v50  ;;  %v2292_v58 = vpop.f32.mrf.mxu0  ;;  %v12304_v3 = vcombine.high %v3344_v26, %v3348_v23 }
 0x198   :  { %6375 = vmatprep.subr.bf16.mxu1 %v12320_v40  ;;  %v2403_v25 = vpop.f32.mrf.mxu1  ;;  %20979 = vst [vmem:[#allocation31_spill] sm:$0xff] %v15546_v47  ;;  %v2402_v40 = vadd.f32 %v2401_v57, %v2289_v29  ;;  %v2293_v53 = vadd.f32 %v2292_v58, %v15517_v43  ;;  %v2945_v29 = vld [vmem:[%s20612_s3 + $0x188] sm:$0xff]  ;;  %v12042_v57 = vcombine.high %v15109_v48, %v15114_v9 }
 0x199   :  { %20978 = vst [vmem:[#allocation24_spill] sm:$0xff] %v15543_v22  ;;  %v2404_v18 = vadd.f32 %v2403_v25, %v2291_v37  ;;  %6225 = vmatprep.mubr.bf16.mxu1 %v15543_v22  ;;  %v2296_v51 = vpop.f32.mrf.mxu0  ;;  %v11913_v37 = vcombine.low %v15475_v15, %v15480_v17  ;;  %v2941_v15 = vld [vmem:[%s20612_s3 + $0x168] sm:$0xff] }
 0x19a   :  { %v2405_v35 = vpop.f32.mrf.mxu1  ;;  %v2709_v33 = vmax.f32 %v2402_v40, 0.0 }
 0x19b   :  { %6376 = vmatpush2.bf16.msra.mxu1 %v12319_v49  ;;  %v2406_v52 = vadd.f32 %v2405_v35, %v2293_v53  ;;  %v2716_v14 = vmax.f32 %v2404_v18, 0.0  ;;  %v2298_v11 = vpop.f32.mrf.mxu0  ;;  %v12303_v49 = vcombine.low %v3344_v26, %v3348_v23  ;;  %v2297_v26 = vadd.f32 %v2296_v51, %v15526_v19  ;;  %v2937_v35 = vld [vmem:[%s20612_s3 + $0x148] sm:$0xff] }
 0x19c   :  { %6377 = vmatprep.subr.bf16.mxu1 %v12312_v60  ;;  %v2409_v1 = vpop.f32.mrf.mxu1  ;;  %v2299_v50 = vadd.f32 %v2298_v11, %v15517_v43  ;;  %v2708_v60 = vmax.f32 %v2400_v59, 0.0 }
 0x19d   :  { %6226 = vmatmul.mubr.bf16.gmra.mxu1 %v15546_v47  ;;  %v2717_v12 = vmax.f32 %v2406_v52, 0.0  ;;  %v2300_v23 = vpop.f32.mrf.mxu0  ;;  %v2410_v17 = vadd.f32 %v2409_v1, %v2297_v26  ;;  %v2929_v1 = vld [vmem:[%s20612_s3 + $0x108] sm:$0xff] }
 0x19e   :  { %v2411_v4 = vpop.f32.mrf.mxu1  ;;  %v2301_v38 = vadd.f32 %v2300_v23, %v15526_v19  ;;  %v15566_v25 = vpack.c.bf16 %v2716_v14, %v2708_v60  ;;  %v11905_v14 = vcombine.low %v2945_v29, %v2949_v62 }
 0x19f   :  { %6378 = vmatpush2.bf16.msra.mxu1 %v12311_v55  ;;  %v15561_v30 = vpack.c.bf16 %v2717_v12, %v2709_v33  ;;  %v2302_v58 = vpop.f32.mrf.mxu0  ;;  %v11906_v55 = vcombine.high %v2945_v29, %v2949_v62  ;;  %v11898_v33 = vcombine.high %v2937_v35, %v2941_v15  ;;  %v2724_v26 = vmax.f32 %v2410_v17, 0.0 }
 0x1a0   :  { %6379 = vmatprep.subr.bf16.mxu1 %v12304_v3  ;;  %v2413_v13 = vpop.f32.mrf.mxu1  ;;  %20981 = vst [vmem:[#allocation27_spill] sm:$0xff] %v15566_v25  ;;  %v2412_v3 = vadd.f32 %v2411_v4, %v2299_v50  ;;  %v2303_v18 = vadd.f32 %v2302_v58, %v15517_v43 }
 0x1a1   :  { %20980 = vst [vmem:[#allocation32_spill] sm:$0xff] %v15561_v30  ;;  %v2414_v40 = vadd.f32 %v2413_v13, %v2301_v38  ;;  %6268 = vmatprep.mubr.bf16.mxu0 %v15561_v30  ;;  %v2306_v59 = vpop.f32.mrf.mxu0 }
 0x1a2   :  { %v2415_v53 = vpop.f32.mrf.mxu1  ;;  %6269 = vmatmul.mubr.bf16.vlgmr.msra.gmra.mxu0 %v15566_v25  ;;  %v2725_v12 = vmax.f32 %v2412_v3, 0.0  ;;  %v2307_v29 = vadd.f32 %v2306_v59, %v15526_v19  ;;  %v2921_v59 = vld [vmem:[%s20612_s3 + $0xc8] sm:$0xff] }
 0x1a3   :  { %6380 = vmatpush2.bf16.msra.mxu1 %v12303_v49  ;;  %v2416_v51 = vadd.f32 %v2415_v53, %v2303_v18  ;;  %6463 = vmatpush1.bf16.msra.mxu0 %v11913_v37  ;;  %v2732_v11 = vmax.f32 %v2414_v40, 0.0  ;;  %v2308_v49 = vpop.f32.mrf.mxu0  ;;  %v11897_v37 = vcombine.low %v2937_v35, %v2941_v15  ;;  %v2925_v35 = vld [vmem:[%s20612_s3 + $0xe8] sm:$0xff] }
 0x1a4   :  { %6575 = vmatprep.subr.bf16.mxu1 %v12042_v57  ;;  %v2419_v52 = vpop.f32.mrf.mxu1  ;;  %6464 = vmatprep.subr.bf16.mxu0 %v11906_v55  ;;  %v2309_v4 = vadd.f32 %v2308_v49, %v15517_v43  ;;  %v2933_v57 = vld [vmem:[%s20612_s3 + $0x128] sm:$0xff] }
 0x1a5   :  { %v2733_v50 = vmax.f32 %v2416_v51, 0.0  ;;  %v2310_v62 = vpop.f32.mrf.mxu0  ;;  %v15588_v58 = vpack.c.bf16 %v2732_v11, %v2724_v26  ;;  %v11890_v3 = vcombine.high %v2929_v1, %v2933_v57  ;;  %v2420_v15 = vadd.f32 %v2419_v52, %v2307_v29  ;;  %v2913_v52 = vld [vmem:[%s20612_s3 + $0x88] sm:$0xff] }
 0x1a6   :  { %v2421_v60 = vpop.f32.mrf.mxu1  ;;  %v2311_v38 = vadd.f32 %v2310_v62, %v15526_v19  ;;  %v11889_v49 = vcombine.low %v2929_v1, %v2933_v57  ;;  %v2917_v29 = vld [vmem:[%s20612_s3 + $0xa8] sm:$0xff] }
 0x1a7   :  { %v15585_v23 = vpack.c.bf16 %v2733_v50, %v2725_v12  ;;  %6465 = vmatpush1.bf16.msra.mxu0 %v11905_v14  ;;  %20983 = vst [vmem:[#allocation36_spill] sm:$0xff] %v15588_v58  ;;  %v2312_v55 = vpop.f32.mrf.mxu0  ;;  %v2422_v40 = vadd.f32 %v2421_v60, %v2309_v4  ;;  %v11882_v50 = vcombine.high %v2921_v59, %v2925_v35 }
 0x1a8   :  { %v2423_v13 = vpop.f32.mrf.mxu1  ;;  %6466 = vmatprep.subr.bf16.mxu0 %v11898_v33  ;;  %v2313_v53 = vadd.f32 %v2312_v55, %v15517_v43 }
 0x1a9   :  { %20982 = vst [vmem:[#allocation33_spill] sm:$0xff] %v15585_v23  ;;  %v2424_v18 = vadd.f32 %v2423_v13, %v2311_v38  ;;  %6278 = vmatprep.mubr.bf16.mxu0 %v15585_v23  ;;  %v2316_v51 = vpop.f32.mrf.mxu0  ;;  %v2741_v4 = vmax.f32 %v2422_v40, 0.0  ;;  %v2740_v38 = vmax.f32 %v2420_v15, 0.0 }
 0x1aa   :  { %v2425_v17 = vpop.f32.mrf.mxu1  ;;  %6279 = vmatmul.mubr.bf16.gmra.mxu0 %v15588_v58  ;;  %v2317_v1 = vadd.f32 %v2316_v51, %v15526_v19  ;;  %v2905_v51 = vld [vmem:[%s20612_s3 + $0x48] sm:$0xff] }
 0x1ab   :  { %v2426_v14 = vadd.f32 %v2425_v17, %v2313_v53  ;;  %6467 = vmatpush1.bf16.msra.mxu0 %v11897_v37  ;;  %v2748_v33 = vmax.f32 %v2424_v18, 0.0  ;;  %v2318_v12 = vpop.f32.mrf.mxu0  ;;  %v11874_v53 = vcombine.high %v2913_v52, %v2917_v29 }
 0x1ac   :  { %v2429_v11 = vpop.f32.mrf.mxu1  ;;  %6468 = vmatprep.subr.bf16.mxu0 %v11890_v3  ;;  %v2319_v26 = vadd.f32 %v2318_v12, %v15517_v43  ;;  %v11881_v3 = vcombine.low %v2921_v59, %v2925_v35  ;;  %v2909_v59 = vld [vmem:[%s20612_s3 + $0x68] sm:$0xff] }
 0x1ad   :  { %v2749_v60 = vmax.f32 %v2426_v14, 0.0  ;;  %v2320_v57 = vpop.f32.mrf.mxu0  ;;  %v15610_v40 = vpack.c.bf16 %v2748_v33, %v2740_v38  ;;  %v2430_v35 = vadd.f32 %v2429_v11, %v2317_v1  ;;  %v2897_v11 = vld [vmem:[%s20612_s3 + $0x8] sm:$0xff] }
 0x1ae   :  { %v2431_v62 = vpop.f32.mrf.mxu1  ;;  %v2321_v37 = vadd.f32 %v2320_v57, %v15526_v19  ;;  %v2901_v1 = vld [vmem:[%s20612_s3 + $0x28] sm:$0xff] }
 0x1af   :  { %v15607_v13 = vpack.c.bf16 %v2749_v60, %v2741_v4  ;;  %6469 = vmatpush1.bf16.msra.mxu0 %v11889_v49  ;;  %20985 = vst [vmem:[#allocation40_spill] sm:$0xff] %v15610_v40  ;;  %v2322_v18 = vpop.f32.mrf.mxu0  ;;  %v2432_v17 = vadd.f32 %v2431_v62, %v2319_v26  ;;  %v11873_v4 = vcombine.low %v2913_v52, %v2917_v29 }
 0x1b0   :  { %v2433_v55 = vpop.f32.mrf.mxu1  ;;  %6470 = vmatprep.subr.bf16.mxu0 %v11882_v50  ;;  %v2323_v12 = vadd.f32 %v2322_v18, %v15517_v43  ;;  %v11866_v62 = vcombine.high %v2905_v51, %v2909_v59  ;;  %v2756_v18 = vmax.f32 %v2430_v35, 0.0 }
 0x1b1   :  { %20984 = vst [vmem:[#allocation29_spill] sm:$0xff] %v15607_v13  ;;  %v2434_v14 = vadd.f32 %v2433_v55, %v2321_v37  ;;  %6288 = vmatprep.mubr.bf16.mxu0 %v15607_v13  ;;  %v2326_v49 = vpop.f32.mrf.mxu0  ;;  %v2757_v38 = vmax.f32 %v2432_v17, 0.0 }
 0x1b2   :  { %v2435_v15 = vpop.f32.mrf.mxu1  ;;  %6289 = vmatmul.mubr.bf16.gmra.mxu0 %v15610_v40  ;;  %v2327_v52 = vadd.f32 %v2326_v49, %v15526_v19  ;;  %v3017_v49 = vld [vmem:[%s20612_s3 + $0x3c8] sm:$0xff] }
 0x1b3   :  { %v2436_v33 = vadd.f32 %v2435_v15, %v2323_v12  ;;  %6471 = vmatpush1.bf16.msra.mxu0 %v11881_v3  ;;  %v2764_v60 = vmax.f32 %v2434_v14, 0.0  ;;  %v2328_v26 = vpop.f32.mrf.mxu0  ;;  %v11865_v14 = vcombine.low %v2905_v51, %v2909_v59  ;;  %v3021_v51 = vld [vmem:[%s20612_s3 + $0x3e8] sm:$0xff] }
 0x1b4   :  { %v2439_v50 = vpop.f32.mrf.mxu1  ;;  %6472 = vmatprep.subr.bf16.mxu0 %v11874_v53  ;;  %v2329_v37 = vadd.f32 %v2328_v26, %v15517_v43 }
 0x1b5   :  { %v2765_v57 = vmax.f32 %v2436_v33, 0.0  ;;  %v2330_v29 = vpop.f32.mrf.mxu0  ;;  %v15632_v12 = vpack.c.bf16 %v2764_v60, %v2756_v18  ;;  %v11858_v33 = vcombine.high %v2897_v11, %v2901_v1  ;;  %v2440_v59 = vadd.f32 %v2439_v50, %v2327_v52  ;;  %v3009_v50 = vld [vmem:[%s20612_s3 + $0x388] sm:$0xff] }
 0x1b6   :  { %v2441_v55 = vpop.f32.mrf.mxu1  ;;  %v2331_v53 = vadd.f32 %v2330_v29, %v15526_v19 }
 0x1b7   :  { %v15629_v3 = vpack.c.bf16 %v2765_v57, %v2757_v38  ;;  %6473 = vmatpush1.bf16.msra.mxu0 %v11873_v4  ;;  %20987 = vst [vmem:[#allocation42_spill] sm:$0xff] %v15632_v12  ;;  %v2332_v15 = vpop.f32.mrf.mxu0  ;;  %v2442_v26 = vadd.f32 %v2441_v55, %v2329_v37  ;;  %v11857_v38 = vcombine.low %v2897_v11, %v2901_v1  ;;  %v2772_v52 = vmax.f32 %v2440_v59, 0.0 }
 0x1b8   :  { %v2443_v17 = vpop.f32.mrf.mxu1  ;;  %6474 = vmatprep.subr.bf16.mxu0 %v11866_v62  ;;  %v2333_v44 = vadd.f32 %v2332_v15, %v15517_v43  ;;  %v11978_v55 = vcombine.high %v3017_v49, %v3021_v51 }
 0x1b9   :  { %20986 = vst [vmem:[#allocation41_spill] sm:$0xff] %v15629_v3  ;;  %v2444_v20 = vadd.f32 %v2443_v17, %v2331_v53  ;;  %6298 = vmatprep.mubr.bf16.mxu0 %v15629_v3  ;;  %v2336_v4 = vpop.f32.mrf.mxu0  ;;  %v2773_v18 = vmax.f32 %v2442_v26, 0.0 }
 0x1ba   :  { %v2445_v35 = vpop.f32.mrf.mxu1  ;;  %6299 = vmatmul.mubr.bf16.gmra.mxu0 %v15632_v12  ;;  %v2337_v11 = vadd.f32 %v2336_v4, %v15526_v19  ;;  %v3001_v4 = vld [vmem:[%s20612_s3 + $0x348] sm:$0xff] }
 0x1bb   :  { %v2446_v60 = vadd.f32 %v2445_v35, %v2333_v44  ;;  %6475 = vmatpush1.bf16.msra.mxu0 %v11865_v14  ;;  %v2780_v57 = vmax.f32 %v2444_v20, 0.0  ;;  %v2338_v37 = vpop.f32.mrf.mxu0  ;;  %v3013_v44 = vld [vmem:[%s20612_s3 + $0x3a8] sm:$0xff] }
 0x1bc   :  { %v2449_v62 = vpop.f32.mrf.mxu1  ;;  %6476 = vmatprep.subr.bf16.mxu0 %v11858_v33  ;;  %v2339_v53 = vadd.f32 %v2338_v37, %v15517_v43  ;;  %v11977_v33 = vcombine.low %v3017_v49, %v3021_v51  ;;  %v3005_v49 = vld [vmem:[%s20612_s3 + $0x368] sm:$0xff] }
 0x1bd   :  { %v2781_v29 = vmax.f32 %v2446_v60, 0.0  ;;  %v2340_v20 = vpop.f32.mrf.mxu0  ;;  %v15654_v26 = vpack.c.bf16 %v2780_v57, %v2772_v52  ;;  %v11970_v60 = vcombine.high %v3009_v50, %v3013_v44  ;;  %v2450_v51 = vadd.f32 %v2449_v62, %v2337_v11  ;;  %v2993_v62 = vld [vmem:[%s20612_s3 + $0x308] sm:$0xff] }
 0x1be   :  { %v2451_v17 = vpop.f32.mrf.mxu1  ;;  %v2341_v14 = vadd.f32 %v2340_v20, %v15526_v19 }
 0x1bf   :  { %v15651_v1 = vpack.c.bf16 %v2781_v29, %v2773_v18  ;;  %6477 = vmatpush1.bf16.msra.mxu0 %v11857_v38  ;;  %20989 = vst [vmem:[#allocation44_spill] sm:$0xff] %v15654_v26  ;;  %v2342_v35 = vpop.f32.mrf.mxu0  ;;  %v2452_v37 = vadd.f32 %v2451_v17, %v2339_v53  ;;  %v11969_v18 = vcombine.low %v3009_v50, %v3013_v44  ;;  %v2788_v11 = vmax.f32 %v2450_v51, 0.0 }
 0x1c0   :  { %v2453_v15 = vpop.f32.mrf.mxu1  ;;  %6478 = vmatprep.subr.bf16.mxu0 %v11978_v55  ;;  %v2343_v22 = vadd.f32 %v2342_v35, %v15517_v43  ;;  %v11962_v17 = vcombine.high %v3001_v4, %v3005_v49 }
 0x1c1   :  { %20988 = vst [vmem:[#allocation43_spill] sm:$0xff] %v15651_v1  ;;  %v2454_v47 = vadd.f32 %v2453_v15, %v2341_v14  ;;  %6308 = vmatprep.mubr.bf16.mxu0 %v15651_v1  ;;  %v2346_v38 = vpop.f32.mrf.mxu0  ;;  %v2789_v52 = vmax.f32 %v2452_v37, 0.0 }
 0x1c2   :  { %v2455_v59 = vpop.f32.mrf.mxu1  ;;  %6309 = vmatmul.mubr.bf16.gmra.mxu0 %v15654_v26  ;;  %v2347_v50 = vadd.f32 %v2346_v38, %v15526_v19  ;;  %v2985_v38 = vld [vmem:[%s20612_s3 + $0x2c8] sm:$0xff] }
 0x1c3   :  { %v2456_v57 = vadd.f32 %v2455_v59, %v2343_v22  ;;  %6479 = vmatpush2.bf16.msra.mxu0 %v11977_v33  ;;  %v2796_v29 = vmax.f32 %v2454_v47, 0.0  ;;  %v2348_v53 = vpop.f32.mrf.mxu0  ;;  %v2997_v22 = vld [vmem:[%s20612_s3 + $0x328] sm:$0xff] }
 0x1c4   :  { %v2459_v55 = vpop.f32.mrf.mxu1  ;;  %6480 = vmatprep.subr.bf16.mxu0 %v11970_v60  ;;  %v2349_v14 = vadd.f32 %v2348_v53, %v15517_v43  ;;  %v11961_v60 = vcombine.low %v3001_v4, %v3005_v49  ;;  %v2989_v4 = vld [vmem:[%s20612_s3 + $0x2e8] sm:$0xff] }
 0x1c5   :  { %v2797_v20 = vmax.f32 %v2456_v57, 0.0  ;;  %v2350_v47 = vpop.f32.mrf.mxu0  ;;  %v15676_v37 = vpack.c.bf16 %v2796_v29, %v2788_v11  ;;  %v11954_v57 = vcombine.high %v2993_v62, %v2997_v22  ;;  %v2460_v49 = vadd.f32 %v2459_v55, %v2347_v50  ;;  %v2977_v55 = vld [vmem:[%s20612_s3 + $0x288] sm:$0xff] }
 0x1c6   :  { %v2461_v15 = vpop.f32.mrf.mxu1  ;;  %v2351_v33 = vadd.f32 %v2350_v47, %v15526_v19  ;;  %v20654_v50 = vsub.s32 6, %v20975_v21 }
 0x1c7   :  { %v15673_v44 = vpack.c.bf16 %v2797_v20, %v2789_v52  ;;  %6481 = vmatpush2.bf16.msra.mxu0 %v11969_v18  ;;  %20991 = vst [vmem:[#allocation46_spill] sm:$0xff] %v15676_v37  ;;  %v2352_v59 = vpop.f32.mrf.mxu0  ;;  %v2462_v53 = vadd.f32 %v2461_v15, %v2349_v14  ;;  %v11953_v52 = vcombine.low %v2993_v62, %v2997_v22  ;;  %v2804_v62 = vmax.f32 %v2460_v49, 0.0 }
 0x1c8   :  { %v2463_v35 = vpop.f32.mrf.mxu1  ;;  %6482 = vmatprep.subr.bf16.mxu0 %v11962_v17  ;;  %v2353_v42 = vadd.f32 %v2352_v59, %v15517_v43  ;;  %v11946_v15 = vcombine.high %v2985_v38, %v2989_v4 }
 0x1c9   :  { %20990 = vst [vmem:[#allocation45_spill] sm:$0xff] %v15673_v44  ;;  %v2464_v8 = vadd.f32 %v2463_v35, %v2351_v33  ;;  %6318 = vmatprep.mubr.bf16.mxu0 %v15673_v44  ;;  %v2356_v18 = vpop.f32.mrf.mxu0  ;;  %v2805_v11 = vmax.f32 %v2462_v53, 0.0 }
 0x1ca   :  { %v2465_v51 = vpop.f32.mrf.mxu1  ;;  %6319 = vmatmul.mubr.bf16.gmra.mxu0 %v15676_v37 }
 0x1cb   :  { %v2466_v29 = vadd.f32 %v2465_v51, %v2353_v42  ;;  %6483 = vmatpush2.bf16.msra.mxu0 %v11961_v60  ;;  %v2812_v20 = vmax.f32 %v2464_v8, 0.0  ;;  %v2358_v14 = vpop.f32.mrf.mxu0  ;;  %v2981_v42 = vld [vmem:[%s20612_s3 + $0x2a8] sm:$0xff]  ;;  %v2357_v8 = vadd.f32 %v2356_v18, %v15526_v19  ;;  %v11945_v51 = vcombine.low %v2985_v38, %v2989_v4 }
 0x1cc   :  { %v2469_v17 = vpop.f32.mrf.mxu1  ;;  %6484 = vmatprep.subr.bf16.mxu0 %v11954_v57  ;;  %v2359_v33 = vadd.f32 %v2358_v14, %v15517_v43  ;;  %v11938_v59 = vcombine.high %v2977_v55, %v2981_v42  ;;  %v2973_v38 = vld [vmem:[%s20612_s3 + $0x268] sm:$0xff] }
 0x1cd   :  { %v2813_v47 = vmax.f32 %v2466_v29, 0.0  ;;  %v2360_v22 = vpop.f32.mrf.mxu0  ;;  %v15700_v29 = vpack.c.bf16 %v2812_v20, %v2804_v62  ;;  %v2470_v4 = vadd.f32 %v2469_v17, %v2357_v8 }
 0x1ce   :  { %v2471_v35 = vpop.f32.mrf.mxu1  ;;  %v2361_v57 = vadd.f32 %v2360_v22, %v15526_v19  ;;  %v2969_v19 = vld [vmem:[%s20612_s3 + $0x248] sm:$0xff] }
 0x1cf   :  { %v15697_v60 = vpack.c.bf16 %v2813_v47, %v2805_v11  ;;  %6485 = vmatpush2.bf16.msra.mxu0 %v11953_v52  ;;  %20993 = vst [vmem:[#allocation48_spill] sm:$0xff] %v15700_v29  ;;  %v2362_v14 = vpop.f32.mrf.mxu0  ;;  %v2472_v37 = vadd.f32 %v2471_v35, %v2359_v33  ;;  %v20994_v11 = vsub.s32 7, %v20975_v21  ;;  %v11937_v33 = vcombine.low %v2977_v55, %v2981_v42 }
 0x1d0   :  { %v2473_v53 = vpop.f32.mrf.mxu1  ;;  %6486 = vmatprep.subr.bf16.mxu0 %v11946_v15  ;;  %v2363_v49 = vadd.f32 %v2362_v14, %v15517_v43  ;;  %v15718_v43 = vrot.slane %v15512_v34, %v20654_v50  ;;  %v11930_v22 = vcombine.high %v2969_v19, %v2973_v38  ;;  %v2965_v14 = vld [vmem:[%s20612_s3 + $0x228] sm:$0xff] }
 0x1d1   :  { %20992 = vst [vmem:[#allocation47_spill] sm:$0xff] %v15697_v60  ;;  %v2474_v27 = vadd.f32 %v2473_v53, %v2361_v57  ;;  %6328 = vmatprep.mubr.bf16.mxu0 %v15697_v60  ;;  %v15707_v47 = vrot.slane %v15512_v34, %v20994_v11  ;;  %v2512_v52 = vpop.f32.mrf.mxu0  ;;  %v2821_v57 = vmax.f32 %v2472_v37, 0.0  ;;  %v2961_v34 = vld [vmem:[%s20612_s3 + $0x208] sm:$0xff] }
 0x1d2   :  { %v2475_v18 = vpop.f32.mrf.mxu1  ;;  %6329 = vmatmul.mubr.bf16.gmra.mxu0 %v15700_v29  ;;  %v2513_v55 = vadd.f32 %v2512_v52, %v15718_v43  ;;  %v3209_v52 = vld [vmem:[%s20612_s3 + $0x9c8] sm:$0xff] }
 0x1d3   :  { %v2476_v20 = vadd.f32 %v2475_v18, %v2363_v49  ;;  %6487 = vmatpush2.bf16.msra.mxu0 %v11945_v51  ;;  %v2828_v35 = vmax.f32 %v2474_v27, 0.0  ;;  %v2514_v62 = vpop.f32.mrf.mxu0  ;;  %v2820_v49 = vmax.f32 %v2470_v4, 0.0  ;;  %v11929_v51 = vcombine.low %v2969_v19, %v2973_v38  ;;  %v3213_v19 = vld [vmem:[%s20612_s3 + $0x9e8] sm:$0xff] }
 0x1d4   :  { %v2625_v15 = vpop.f32.mrf.mxu1  ;;  %6488 = vmatprep.subr.bf16.mxu0 %v11938_v59  ;;  %v2515_v17 = vadd.f32 %v2514_v62, %v15707_v47 }
 0x1d5   :  { %v2829_v53 = vmax.f32 %v2476_v20, 0.0  ;;  %v2516_v27 = vpop.f32.mrf.mxu0  ;;  %v15732_v18 = vpack.c.bf16 %v2828_v35, %v2820_v49  ;;  %v11922_v20 = vcombine.high %v2961_v34, %v2965_v14  ;;  %v2626_v38 = vadd.f32 %v2625_v15, %v2513_v55  ;;  %v3073_v15 = vld [vmem:[%s20612_s3 + $0x588] sm:$0xff] }
 0x1d6   :  { %v2627_v8 = vpop.f32.mrf.mxu1  ;;  %v2517_v37 = vadd.f32 %v2516_v27, %v15718_v43  ;;  %v12170_v49 = vcombine.high %v3209_v52, %v3213_v19 }
 0x1d7   :  { %v15729_v42 = vpack.c.bf16 %v2829_v53, %v2821_v57  ;;  %6489 = vmatpush2.bf16.msra.mxu0 %v11937_v33  ;;  %20996 = vst [vmem:[#allocation50_spill] sm:$0xff] %v15732_v18  ;;  %v2518_v11 = vpop.f32.mrf.mxu0  ;;  %v2628_v62 = vadd.f32 %v2627_v8, %v2515_v17  ;;  %v20997_v57 = vld [vmem:[#allocation26_spill] sm:$0xff]  ;;  %v11921_v53 = vcombine.low %v2961_v34, %v2965_v14  ;;  %v2710_v55 = vmax.f32 %v2626_v38, 0.0  ;;  %v3201_v14 = vld [vmem:[%s20612_s3 + $0x988] sm:$0xff] }
 0x1d8   :  { %v2629_v59 = vpop.f32.mrf.mxu1  ;;  %6490 = vmatprep.subr.bf16.mxu0 %v11930_v22  ;;  %v2519_v29 = vadd.f32 %v2518_v11, %v15707_v47 }
 0x1d9   :  { %20995 = vst [vmem:[#allocation49_spill] sm:$0xff] %v15729_v42  ;;  %v2630_v50 = vadd.f32 %v2629_v59, %v2517_v37  ;;  %6338 = vmatprep.mubr.bf16.mxu0 %v15729_v42  ;;  %v2522_v33 = vpop.f32.mrf.mxu0  ;;  %v2711_v27 = vmax.f32 %v2628_v62, 0.0 }
 0x1da   :  { %v2631_v4 = vpop.f32.mrf.mxu1  ;;  %6339 = vmatmul.mubr.bf16.gmra.mxu0 %v15732_v18  ;;  %v2523_v34 = vadd.f32 %v2522_v33, %v15718_v43 }
 0x1db   :  { %v2632_v35 = vadd.f32 %v2631_v4, %v2519_v29  ;;  %6491 = vmatpush2.bf16.msra.mxu0 %v11929_v51  ;;  %6494 = vmatprep.mubr.bf16.mxu0 %v20997_v57  ;;  %v2718_v17 = vmax.f32 %v2630_v50, 0.0  ;;  %v2524_v8 = vpop.f32.mrf.mxu0  ;;  %v3077_v29 = vld [vmem:[%s20612_s3 + $0x5a8] sm:$0xff] }
 0x1dc   :  { %v2635_v22 = vpop.f32.mrf.mxu1  ;;  %6492 = vmatprep.subr.bf16.mxu0 %v11922_v20  ;;  %v2525_v59 = vadd.f32 %v2524_v8, %v15707_v47  ;;  %v3205_v51 = vld [vmem:[%s20612_s3 + $0x9a8] sm:$0xff]  ;;  %v12169_v8 = vcombine.low %v3209_v52, %v3213_v19  ;;  %v12034_v33 = vcombine.high %v3073_v15, %v3077_v29  ;;  %v21000_v19 = vld [vmem:[#allocation34_spill] sm:$0xff] }
 0x1dd   :  { %v2719_v37 = vmax.f32 %v2632_v35, 0.0  ;;  %v2526_v50 = vpop.f32.mrf.mxu0  ;;  %v15761_v35 = vpack.c.bf16 %v2718_v17, %v2710_v55  ;;  %v12162_v44 = vcombine.high %v3201_v14, %v3205_v51  ;;  %v2636_v17 = vadd.f32 %v2635_v22, %v2523_v34  ;;  %v21001_v55 = vld [vmem:[#allocation35_spill] sm:$0xff] }
 0x1de   :  { %v2637_v11 = vpop.f32.mrf.mxu1  ;;  %v2527_v62 = vadd.f32 %v2526_v50, %v15718_v43  ;;  %v21002_v22 = vcombine.low %v15109_v48, %v15114_v9  ;;  %v12033_v34 = vcombine.low %v3073_v15, %v3077_v29  ;;  %v3061_v9 = vld [vmem:[%s20612_s3 + $0x528] sm:$0xff] }
 0x1df   :  { %v15758_v20 = vpack.c.bf16 %v2719_v37, %v2711_v27  ;;  %6493 = vmatpush2.bf16.msra.mxu0 %v11921_v53  ;;  %20999 = vst [vmem:[#allocation52_spill] sm:$0xff] %v15761_v35  ;;  %v2528_v38 = vpop.f32.mrf.mxu0  ;;  %v2638_v57 = vadd.f32 %v2637_v11, %v2525_v59  ;;  %v3065_v27 = vld [vmem:[%s20612_s3 + $0x548] sm:$0xff]  ;;  %v2726_v29 = vmax.f32 %v2636_v17, 0.0 }
 0x1e0   :  { %v2639_v4 = vpop.f32.mrf.mxu1  ;;  %6688 = vmatprep.subr.bf16.mxu0 %v12170_v49  ;;  %v2529_v42 = vadd.f32 %v2528_v38, %v15707_v47  ;;  %v3069_v53 = vld [vmem:[%s20612_s3 + $0x568] sm:$0xff] }
 0x1e1   :  { %20998 = vst [vmem:[#allocation51_spill] sm:$0xff] %v15758_v20  ;;  %v2640_v18 = vadd.f32 %v2639_v4, %v2527_v62  ;;  %6381 = vmatprep.mubr.bf16.mxu1 %v15758_v20  ;;  %v2532_v52 = vpop.f32.mrf.mxu0  ;;  %v3193_v49 = vld [vmem:[%s20612_s3 + $0x948] sm:$0xff]  ;;  %v12161_v4 = vcombine.low %v3201_v14, %v3205_v51  ;;  %v12026_v38 = vcombine.high %v3065_v27, %v3069_v53 }
 0x1e2   :  { %v2641_v60 = vpop.f32.mrf.mxu1  ;;  %6382 = vmatmul.mubr.bf16.vlgmr.msra.gmra.mxu1 %v15761_v35  ;;  %6495 = vmatmul.mubr.bf16.vlgmr.msra.gmra.mxu0 %v21000_v19  ;;  %v3197_v37 = vld [vmem:[%s20612_s3 + $0x968] sm:$0xff] }
 0x1e3   :  { %v2642_v59 = vadd.f32 %v2641_v60, %v2529_v42  ;;  %6504 = vmatprep.mubr.bf16.mxu0 %v21001_v55  ;;  %6576 = vmatpush1.bf16.msra.mxu1 %v21002_v22  ;;  %v2734_v50 = vmax.f32 %v2640_v18, 0.0  ;;  %v2534_v62 = vpop.f32.mrf.mxu0  ;;  %v15786_v19 = vld [vmem:[%s20612_s3 + $0x508] sm:$0xff]  ;;  %v2727_v60 = vmax.f32 %v2638_v57, 0.0  ;;  %v12154_v48 = vcombine.high %v3193_v49, %v3197_v37 }
 0x1e4   :  { %v2645_v11 = vpop.f32.mrf.mxu1  ;;  %6689 = vmatpush1.bf16.msra.mxu0 %v12169_v8  ;;  %6577 = vmatprep.subr.bf16.mxu1 %v12034_v33  ;;  %v2535_v55 = vadd.f32 %v2534_v62, %v15707_v47  ;;  %v3185_v18 = vld [vmem:[%s20612_s3 + $0x908] sm:$0xff]  ;;  %v2533_v57 = vadd.f32 %v2532_v52, %v15718_v43  ;;  %v12025_v33 = vcombine.low %v3065_v27, %v3069_v53 }
 0x1e5   :  { %v2735_v42 = vmax.f32 %v2642_v59, 0.0  ;;  %6690 = vmatprep.subr.bf16.mxu0 %v12162_v44  ;;  %v3189_v15 = vld [vmem:[%s20612_s3 + $0x928] sm:$0xff]  ;;  %v2536_v14 = vpop.f32.mrf.mxu0  ;;  %v12153_v59 = vcombine.low %v3193_v49, %v3197_v37  ;;  %v15802_v22 = vpack.c.bf16 %v2734_v50, %v2726_v29  ;;  %v12018_v20 = vcombine.high %v15786_v19, %v3061_v9 }
 0x1e6   :  { %v2647_v35 = vpop.f32.mrf.mxu1  ;;  %v2537_v44 = vadd.f32 %v2536_v14, %v15718_v43  ;;  %v12146_v24 = vcombine.high %v3185_v18, %v3189_v15  ;;  %v3049_v27 = vld [vmem:[%s20612_s3 + $0x4c8] sm:$0xff]  ;;  %v2646_v49 = vadd.f32 %v2645_v11, %v2533_v57  ;;  %v12017_v11 = vcombine.low %v15786_v19, %v3061_v9 }
 0x1e7   :  { %v15799_v51 = vpack.c.bf16 %v2735_v42, %v2727_v60  ;;  %6578 = vmatpush1.bf16.msra.mxu1 %v12033_v34  ;;  %v2538_v62 = vpop.f32.mrf.mxu0  ;;  %v2648_v17 = vadd.f32 %v2647_v35, %v2535_v55  ;;  %v3053_v53 = vld [vmem:[%s20612_s3 + $0x4e8] sm:$0xff]  ;;  %v12145_v42 = vcombine.low %v3185_v18, %v3189_v15 }
 0x1e8   :  { %v2649_v8 = vpop.f32.mrf.mxu1  ;;  %6691 = vmatpush1.bf16.msra.mxu0 %v12161_v4  ;;  %6579 = vmatprep.subr.bf16.mxu1 %v12026_v38  ;;  %v2539_v52 = vadd.f32 %v2538_v62, %v15707_v47  ;;  %v3177_v35 = vld [vmem:[%s20612_s3 + $0x8c8] sm:$0xff]  ;;  %v2742_v9 = vmax.f32 %v2646_v49, 0.0 }
 0x1e9   :  { %21003 = vst [vmem:[#allocation53_spill] sm:$0xff] %v15799_v51  ;;  %v2650_v26 = vadd.f32 %v2649_v8, %v2537_v44  ;;  %6391 = vmatprep.mubr.bf16.mxu1 %v15799_v51  ;;  %6692 = vmatprep.subr.bf16.mxu0 %v12154_v48  ;;  %v2542_v37 = vpop.f32.mrf.mxu0  ;;  %v3181_v55 = vld [vmem:[%s20612_s3 + $0x8e8] sm:$0xff]  ;;  %v12010_v48 = vcombine.high %v3049_v27, %v3053_v53  ;;  %v2743_v57 = vmax.f32 %v2648_v17, 0.0 }
 0x1ea   :  { %v2651_v60 = vpop.f32.mrf.mxu1  ;;  %6392 = vmatmul.mubr.bf16.gmra.mxu1 %v15802_v22  ;;  %6505 = vmatmul.mubr.bf16.gmra.mxu0 %v15009_v56  ;;  %v15826_v29 = vld [vmem:[%s20612_s3 + $0x488] sm:$0xff]  ;;  %v2543_v18 = vadd.f32 %v2542_v37, %v15718_v43  ;;  %v12009_v17 = vcombine.low %v3049_v27, %v3053_v53 }
 0x1eb   :  { %v2652_v34 = vadd.f32 %v2651_v60, %v2539_v52  ;;  %6514 = vmatprep.mubr.bf16.mxu0 %v15040_v54  ;;  %6580 = vmatpush1.bf16.msra.mxu1 %v12025_v33  ;;  %v2750_v4 = vmax.f32 %v2650_v26, 0.0  ;;  %v2544_v38 = vpop.f32.mrf.mxu0  ;;  %v12138_v33 = vcombine.high %v3177_v35, %v3181_v55  ;;  %v3045_v26 = vld [vmem:[%s20612_s3 + $0x4a8] sm:$0xff]  ;;  %v12137_v52 = vcombine.low %v3177_v35, %v3181_v55 }
 0x1ec   :  { %v2655_v50 = vpop.f32.mrf.mxu1  ;;  %6693 = vmatpush1.bf16.msra.mxu0 %v12153_v59  ;;  %6581 = vmatprep.subr.bf16.mxu1 %v12018_v20  ;;  %v2545_v44 = vadd.f32 %v2544_v38, %v15707_v47  ;;  %v3169_v20 = vld [vmem:[%s20612_s3 + $0x888] sm:$0xff]  ;;  %v12002_v38 = vcombine.high %v15826_v29, %v3045_v26 }
 0x1ed   :  { %v2751_v14 = vmax.f32 %v2652_v34, 0.0  ;;  %6694 = vmatprep.subr.bf16.mxu0 %v12146_v24  ;;  %v3173_v19 = vld [vmem:[%s20612_s3 + $0x8a8] sm:$0xff]  ;;  %v2546_v15 = vpop.f32.mrf.mxu0  ;;  %v15842_v60 = vpack.c.bf16 %v2750_v4, %v2742_v9  ;;  %v2656_v35 = vadd.f32 %v2655_v50, %v2543_v18  ;;  %v12001_v50 = vcombine.low %v15826_v29, %v3045_v26 }
 0x1ee   :  { %v2657_v8 = vpop.f32.mrf.mxu1  ;;  %v2547_v24 = vadd.f32 %v2546_v15, %v15718_v43  ;;  %v12130_v54 = vcombine.high %v3169_v20, %v3173_v19  ;;  %v3033_v27 = vld [vmem:[%s20612_s3 + $0x448] sm:$0xff]  ;;  %v12129_v9 = vcombine.low %v3169_v20, %v3173_v19 }
 0x1ef   :  { %v15839_v59 = vpack.c.bf16 %v2751_v14, %v2743_v57  ;;  %6582 = vmatpush1.bf16.msra.mxu1 %v12017_v11  ;;  %21005 = vst [vmem:[#allocation55_spill] sm:$0xff] %v15842_v60  ;;  %v2548_v34 = vpop.f32.mrf.mxu0  ;;  %v2658_v49 = vadd.f32 %v2657_v8, %v2545_v44  ;;  %v3037_v53 = vld [vmem:[%s20612_s3 + $0x468] sm:$0xff]  ;;  %v21007_v44 = vld [vmem:[#allocation5_spill] sm:$0xff]  ;;  %v2758_v20 = vmax.f32 %v2656_v35, 0.0 }
 0x1f0   :  { %v2659_v62 = vpop.f32.mrf.mxu1  ;;  %6695 = vmatpush1.bf16.msra.mxu0 %v12145_v42  ;;  %6583 = vmatprep.subr.bf16.mxu1 %v12010_v48  ;;  %v2549_v37 = vadd.f32 %v2548_v34, %v15707_v47  ;;  %v21006_v11 = vld [vmem:[#allocation39_spill] sm:$0xff]  ;;  %v11994_v18 = vcombine.high %v3033_v27, %v3037_v53 }
 0x1f1   :  { %21004 = vst [vmem:[#allocation54_spill] sm:$0xff] %v15839_v59  ;;  %v2660_v56 = vadd.f32 %v2659_v62, %v2547_v24  ;;  %6401 = vmatprep.mubr.bf16.mxu1 %v15839_v59  ;;  %6696 = vmatprep.subr.bf16.mxu0 %v12138_v33  ;;  %v2552_v55 = vpop.f32.mrf.mxu0  ;;  %v3161_v4 = vld [vmem:[%s20612_s3 + $0x848] sm:$0xff]  ;;  %v2759_v24 = vmax.f32 %v2658_v49, 0.0 }
 0x1f2   :  { %v2661_v57 = vpop.f32.mrf.mxu1  ;;  %6402 = vmatmul.mubr.bf16.gmra.mxu1 %v15842_v60  ;;  %6515 = vmatmul.mubr.bf16.gmra.mxu0 %v21006_v11  ;;  %v3165_v42 = vld [vmem:[%s20612_s3 + $0x868] sm:$0xff]  ;;  %v2553_v19 = vadd.f32 %v2552_v55, %v15718_v43 }
 0x1f3   :  { %v2662_v48 = vadd.f32 %v2661_v57, %v2549_v37  ;;  %6524 = vmatprep.mubr.bf16.mxu0 %v21007_v44  ;;  %6584 = vmatpush1.bf16.msra.mxu1 %v12009_v17  ;;  %v2766_v8 = vmax.f32 %v2660_v56, 0.0  ;;  %v2554_v33 = vpop.f32.mrf.mxu0  ;;  %v15866_v15 = vld [vmem:[%s20612_s3 + $0x408] sm:$0xff]  ;;  %v12122_v17 = vcombine.high %v3161_v4, %v3165_v42  ;;  %v11993_v57 = vcombine.low %v3033_v27, %v3037_v53 }
 0x1f4   :  { %v2665_v14 = vpop.f32.mrf.mxu1  ;;  %6697 = vmatpush1.bf16.msra.mxu0 %v12137_v52  ;;  %6585 = vmatprep.subr.bf16.mxu1 %v12002_v38  ;;  %v2555_v34 = vadd.f32 %v2554_v33, %v15707_v47  ;;  %v3029_v56 = vld [vmem:[%s20612_s3 + $0x428] sm:$0xff] }
 0x1f5   :  { %v2767_v62 = vmax.f32 %v2662_v48, 0.0  ;;  %6698 = vmatprep.subr.bf16.mxu0 %v12130_v54  ;;  %v3153_v29 = vld [vmem:[%s20612_s3 + $0x808] sm:$0xff]  ;;  %v2556_v52 = vpop.f32.mrf.mxu0  ;;  %v12121_v48 = vcombine.low %v3161_v4, %v3165_v42  ;;  %v15882_v33 = vpack.c.bf16 %v2766_v8, %v2758_v20  ;;  %v11986_v11 = vcombine.high %v15866_v15, %v3029_v56 }
 0x1f6   :  { %v2667_v37 = vpop.f32.mrf.mxu1  ;;  %v3157_v26 = vld [vmem:[%s20612_s3 + $0x828] sm:$0xff]  ;;  %v2557_v54 = vadd.f32 %v2556_v52, %v15718_v43  ;;  %v2666_v4 = vadd.f32 %v2665_v14, %v2553_v19  ;;  %v11985_v14 = vcombine.low %v15866_v15, %v3029_v56 }
 0x1f7   :  { %v15879_v38 = vpack.c.bf16 %v2767_v62, %v2759_v24  ;;  %6586 = vmatpush1.bf16.msra.mxu1 %v12001_v50  ;;  %21009 = vst [vmem:[#allocation57_spill] sm:$0xff] %v15882_v33  ;;  %v2558_v44 = vpop.f32.mrf.mxu0  ;;  %v12114_v60 = vcombine.high %v3153_v29, %v3157_v26  ;;  %v2668_v35 = vadd.f32 %v2667_v37, %v2555_v34  ;;  %v3145_v27 = vld [vmem:[%s20612_s3 + $0x7c8] sm:$0xff] }
 0x1f8   :  { %v2669_v49 = vpop.f32.mrf.mxu1  ;;  %6699 = vmatpush1.bf16.msra.mxu0 %v12129_v9  ;;  %6587 = vmatprep.subr.bf16.mxu1 %v11994_v18  ;;  %v2559_v55 = vadd.f32 %v2558_v44, %v15707_v47  ;;  %v3149_v53 = vld [vmem:[%s20612_s3 + $0x7e8] sm:$0xff]  ;;  %v12113_v34 = vcombine.low %v3153_v29, %v3157_v26  ;;  %v2774_v56 = vmax.f32 %v2666_v4, 0.0 }
 0x1f9   :  { %21008 = vst [vmem:[#allocation56_spill] sm:$0xff] %v15879_v38  ;;  %v2670_v59 = vadd.f32 %v2669_v49, %v2557_v54  ;;  %6411 = vmatprep.mubr.bf16.mxu1 %v15879_v38  ;;  %6700 = vmatprep.subr.bf16.mxu0 %v12122_v17  ;;  %v2562_v42 = vpop.f32.mrf.mxu0  ;;  %v3273_v44 = vld [vmem:[%s20612_s3 + $0xbc8] sm:$0xff]  ;;  %v12106_v37 = vcombine.high %v3145_v27, %v3149_v53  ;;  %v2775_v20 = vmax.f32 %v2668_v35, 0.0 }
 0x1fa   :  { %v2671_v24 = vpop.f32.mrf.mxu1  ;;  %6412 = vmatmul.mubr.bf16.gmra.mxu1 %v15882_v33  ;;  %6525 = vmatmul.mubr.bf16.gmra.mxu0 %v15143_v7  ;;  %v3277_v50 = vld [vmem:[%s20612_s3 + $0xbe8] sm:$0xff]  ;;  %v2563_v29 = vadd.f32 %v2562_v42, %v15718_v43  ;;  %v12105_v35 = vcombine.low %v3145_v27, %v3149_v53 }
 0x1fb   :  { %v2672_v8 = vadd.f32 %v2671_v24, %v2559_v55  ;;  %6534 = vmatprep.mubr.bf16.mxu0 %v15166_v39  ;;  %6588 = vmatpush1.bf16.msra.mxu1 %v11993_v57  ;;  %v2782_v18 = vmax.f32 %v2670_v59, 0.0  ;;  %v2564_v62 = vpop.f32.mrf.mxu0  ;;  %v15906_v17 = vld [vmem:[%s20612_s3 + $0x788] sm:$0xff]  ;;  %v12234_v49 = vcombine.high %v3273_v44, %v3277_v50  ;;  %v12233_v55 = vcombine.low %v3273_v44, %v3277_v50 }
 0x1fc   :  { %v2675_v9 = vpop.f32.mrf.mxu1  ;;  %6701 = vmatpush1.bf16.msra.mxu0 %v12121_v48  ;;  %6589 = vmatprep.subr.bf16.mxu1 %v11986_v11  ;;  %v2565_v52 = vadd.f32 %v2564_v62, %v15707_v47  ;;  %v3141_v59 = vld [vmem:[%s20612_s3 + $0x7a8] sm:$0xff] }
 0x1fd   :  { %v2783_v19 = vmax.f32 %v2672_v8, 0.0  ;;  %6702 = vmatprep.subr.bf16.mxu0 %v12114_v60  ;;  %v3265_v11 = vld [vmem:[%s20612_s3 + $0xb88] sm:$0xff]  ;;  %v2566_v26 = vpop.f32.mrf.mxu0  ;;  %v15922_v24 = vpack.c.bf16 %v2782_v18, %v2774_v56  ;;  %v12098_v62 = vcombine.high %v15906_v17, %v3141_v59  ;;  %v2676_v44 = vadd.f32 %v2675_v9, %v2563_v29 }
 0x1fe   :  { %v2677_v54 = vpop.f32.mrf.mxu1  ;;  %v3269_v15 = vld [vmem:[%s20612_s3 + $0xba8] sm:$0xff]  ;;  %v2567_v60 = vadd.f32 %v2566_v26, %v15718_v43  ;;  %v12097_v9 = vcombine.low %v15906_v17, %v3141_v59 }
 0x1ff   :  { %v15919_v57 = vpack.c.bf16 %v2783_v19, %v2775_v20  ;;  %6590 = vmatpush1.bf16.msra.mxu1 %v11985_v14  ;;  %21011 = vst [vmem:[#allocation59_spill] sm:$0xff] %v15922_v24  ;;  %v2568_v8 = vpop.f32.mrf.mxu0  ;;  %v12226_v39 = vcombine.high %v3265_v11, %v3269_v15  ;;  %v2678_v4 = vadd.f32 %v2677_v54, %v2565_v52  ;;  %v3129_v27 = vld [vmem:[%s20612_s3 + $0x748] sm:$0xff] }
 0x200   :  { %v2679_v48 = vpop.f32.mrf.mxu1  ;;  %6703 = vmatpush1.bf16.msra.mxu0 %v12113_v34  ;;  %6591 = vmatprep.subr.bf16.mxu1 %v12106_v37  ;;  %v2569_v42 = vadd.f32 %v2568_v8, %v15707_v47  ;;  %v3133_v53 = vld [vmem:[%s20612_s3 + $0x768] sm:$0xff]  ;;  %v12225_v54 = vcombine.low %v3265_v11, %v3269_v15  ;;  %v2790_v11 = vmax.f32 %v2676_v44, 0.0 }
 0x201   :  { %21010 = vst [vmem:[#allocation58_spill] sm:$0xff] %v15919_v57  ;;  %v2680_v7 = vadd.f32 %v2679_v48, %v2567_v60  ;;  %6421 = vmatprep.mubr.bf16.mxu1 %v15919_v57  ;;  %6704 = vmatprep.subr.bf16.mxu0 %v12234_v49  ;;  %v2572_v50 = vpop.f32.mrf.mxu0  ;;  %v3257_v14 = vld [vmem:[%s20612_s3 + $0xb48] sm:$0xff]  ;;  %v12090_v49 = vcombine.high %v3129_v27, %v3133_v53  ;;  %v2791_v29 = vmax.f32 %v2678_v4, 0.0 }
 0x202   :  { %v2681_v20 = vpop.f32.mrf.mxu1  ;;  %6422 = vmatmul.mubr.bf16.gmra.mxu1 %v15922_v24  ;;  %6535 = vmatmul.mubr.bf16.gmra.mxu0 %v15230_v41  ;;  %v3261_v18 = vld [vmem:[%s20612_s3 + $0xb68] sm:$0xff]  ;;  %v2573_v15 = vadd.f32 %v2572_v50, %v15718_v43  ;;  %v12089_v4 = vcombine.low %v3129_v27, %v3133_v53 }
 0x203   :  { %v2682_v34 = vadd.f32 %v2681_v20, %v2569_v42  ;;  %6544 = vmatprep.mubr.bf16.mxu0 %v15239_v2  ;;  %6592 = vmatpush2.bf16.msra.mxu1 %v12105_v35  ;;  %v2798_v19 = vmax.f32 %v2680_v7, 0.0  ;;  %v2574_v52 = vpop.f32.mrf.mxu0  ;;  %v15946_v56 = vld [vmem:[%s20612_s3 + $0x708] sm:$0xff]  ;;  %v12218_v35 = vcombine.high %v3257_v14, %v3261_v18  ;;  %v12217_v42 = vcombine.low %v3257_v14, %v3261_v18 }
 0x204   :  { %v2685_v37 = vpop.f32.mrf.mxu1  ;;  %6705 = vmatpush2.bf16.msra.mxu0 %v12233_v55  ;;  %6593 = vmatprep.subr.bf16.mxu1 %v12098_v62  ;;  %v2575_v60 = vadd.f32 %v2574_v52, %v15707_v47  ;;  %v3125_v7 = vld [vmem:[%s20612_s3 + $0x728] sm:$0xff] }
 0x205   :  { %v2799_v26 = vmax.f32 %v2682_v34, 0.0  ;;  %6706 = vmatprep.subr.bf16.mxu0 %v12226_v39  ;;  %v3249_v17 = vld [vmem:[%s20612_s3 + $0xb08] sm:$0xff]  ;;  %v2576_v55 = vpop.f32.mrf.mxu0  ;;  %v15962_v20 = vpack.c.bf16 %v2798_v19, %v2790_v11  ;;  %v12082_v52 = vcombine.high %v15946_v56, %v3125_v7  ;;  %v2686_v14 = vadd.f32 %v2685_v37, %v2573_v15 }
 0x206   :  { %v2687_v48 = vpop.f32.mrf.mxu1  ;;  %v3253_v59 = vld [vmem:[%s20612_s3 + $0xb28] sm:$0xff]  ;;  %v2577_v39 = vadd.f32 %v2576_v55, %v15718_v43  ;;  %v12081_v37 = vcombine.low %v15946_v56, %v3125_v7 }
 0x207   :  { %v15959_v8 = vpack.c.bf16 %v2799_v26, %v2791_v29  ;;  %6594 = vmatpush2.bf16.msra.mxu1 %v12097_v9  ;;  %21013 = vst [vmem:[#allocation61_spill] sm:$0xff] %v15962_v20  ;;  %v2578_v34 = vpop.f32.mrf.mxu0  ;;  %v12210_v2 = vcombine.high %v3249_v17, %v3253_v59  ;;  %v2688_v44 = vadd.f32 %v2687_v48, %v2575_v60  ;;  %v3113_v27 = vld [vmem:[%s20612_s3 + $0x6c8] sm:$0xff] }
 0x208   :  { %v2689_v62 = vpop.f32.mrf.mxu1  ;;  %6707 = vmatpush2.bf16.msra.mxu0 %v12225_v54  ;;  %6595 = vmatprep.subr.bf16.mxu1 %v12090_v49  ;;  %v2579_v50 = vadd.f32 %v2578_v34, %v15707_v47  ;;  %v3117_v53 = vld [vmem:[%s20612_s3 + $0x6e8] sm:$0xff]  ;;  %v12209_v48 = vcombine.low %v3249_v17, %v3253_v59  ;;  %v2806_v17 = vmax.f32 %v2686_v14, 0.0 }
 0x209   :  { %21012 = vst [vmem:[#allocation60_spill] sm:$0xff] %v15959_v8  ;;  %v2690_v41 = vadd.f32 %v2689_v62, %v2577_v39  ;;  %6431 = vmatprep.mubr.bf16.mxu1 %v15959_v8  ;;  %6708 = vmatprep.subr.bf16.mxu0 %v12218_v35  ;;  %v2582_v18 = vpop.f32.mrf.mxu0  ;;  %v3241_v9 = vld [vmem:[%s20612_s3 + $0xac8] sm:$0xff]  ;;  %v12074_v35 = vcombine.high %v3113_v27, %v3117_v53  ;;  %v2807_v15 = vmax.f32 %v2688_v44, 0.0 }
 0x20a   :  { %v2691_v29 = vpop.f32.mrf.mxu1  ;;  %6432 = vmatmul.mubr.bf16.gmra.mxu1 %v15962_v20  ;;  %6545 = vmatmul.mubr.bf16.gmra.mxu0 %v15288_v31  ;;  %v3245_v19 = vld [vmem:[%s20612_s3 + $0xae8] sm:$0xff]  ;;  %v2583_v59 = vadd.f32 %v2582_v18, %v15718_v43  ;;  %v12073_v44 = vcombine.low %v3113_v27, %v3117_v53 }
 0x20b   :  { %v2692_v54 = vadd.f32 %v2691_v29, %v2579_v50  ;;  %6554 = vmatprep.mubr.bf16.mxu0 %v15315_v32  ;;  %6596 = vmatpush2.bf16.msra.mxu1 %v12089_v4  ;;  %v2814_v26 = vmax.f32 %v2690_v41, 0.0  ;;  %v2584_v60 = vpop.f32.mrf.mxu0  ;;  %v3105_v11 = vld [vmem:[%s20612_s3 + $0x688] sm:$0xff]  ;;  %v12202_v34 = vcombine.high %v3241_v9, %v3245_v19  ;;  %v12201_v50 = vcombine.low %v3241_v9, %v3245_v19 }
 0x20c   :  { %v2695_v49 = vpop.f32.mrf.mxu1  ;;  %6709 = vmatpush2.bf16.msra.mxu0 %v12217_v42  ;;  %6597 = vmatprep.subr.bf16.mxu1 %v12082_v52  ;;  %v2585_v39 = vadd.f32 %v2584_v60, %v15707_v47  ;;  %v3109_v41 = vld [vmem:[%s20612_s3 + $0x6a8] sm:$0xff] }
 0x20d   :  { %v2815_v55 = vmax.f32 %v2692_v54, 0.0  ;;  %6710 = vmatprep.subr.bf16.mxu0 %v12210_v2  ;;  %v3233_v56 = vld [vmem:[%s20612_s3 + $0xa88] sm:$0xff]  ;;  %v2586_v4 = vpop.f32.mrf.mxu0  ;;  %v16000_v29 = vpack.c.bf16 %v2814_v26, %v2806_v17  ;;  %v12066_v60 = vcombine.high %v3105_v11, %v3109_v41  ;;  %v2696_v53 = vadd.f32 %v2695_v49, %v2583_v59 }
 0x20e   :  { %v2697_v62 = vpop.f32.mrf.mxu1  ;;  %v3237_v7 = vld [vmem:[%s20612_s3 + $0xaa8] sm:$0xff]  ;;  %v2587_v2 = vadd.f32 %v2586_v4, %v15718_v43  ;;  %v12065_v49 = vcombine.low %v3105_v11, %v3109_v41 }
 0x20f   :  { %v15997_v42 = vpack.c.bf16 %v2815_v55, %v2807_v15  ;;  %6598 = vmatpush2.bf16.msra.mxu1 %v12081_v37  ;;  %21015 = vst [vmem:[#allocation63_spill] sm:$0xff] %v16000_v29  ;;  %v2588_v54 = vpop.f32.mrf.mxu0  ;;  %v12194_v32 = vcombine.high %v3233_v56, %v3237_v7  ;;  %v2698_v31 = vadd.f32 %v2697_v62, %v2585_v39  ;;  %v3097_v43 = vld [vmem:[%s20612_s3 + $0x648] sm:$0xff]  ;;  %v2822_v59 = vmax.f32 %v2696_v53, 0.0  ;;  %v21018_v53 = vld [vmem:[#allocation2_spill] sm:$0xff] }
 0x210   :  { %v2699_v52 = vpop.f32.mrf.mxu1  ;;  %6711 = vmatpush2.bf16.msra.mxu0 %v12209_v48  ;;  %6599 = vmatprep.subr.bf16.mxu1 %v12074_v35  ;;  %v2589_v18 = vadd.f32 %v2588_v54, %v15707_v47  ;;  %v3101_v27 = vld [vmem:[%s20612_s3 + $0x668] sm:$0xff]  ;;  %v12193_v15 = vcombine.low %v3233_v56, %v3237_v7 }
 0x211   :  { %21014 = vst [vmem:[#allocation62_spill] sm:$0xff] %v15997_v42  ;;  %v2700_v14 = vadd.f32 %v2699_v52, %v2587_v2  ;;  %6441 = vmatprep.mubr.bf16.mxu1 %v15997_v42  ;;  %6712 = vmatprep.subr.bf16.mxu0 %v12202_v34  ;;  %v16010_v19 = vpop.f32.mrf.mxu0  ;;  %v3225_v47 = vld [vmem:[%s20612_s3 + $0xa48] sm:$0xff]  ;;  %v12058_v55 = vcombine.high %v3097_v43, %v3101_v27  ;;  %v2823_v39 = vmax.f32 %v2698_v31, 0.0 }
 0x212   :  { %v2701_v9 = vpop.f32.mrf.mxu1  ;;  %6442 = vmatmul.mubr.bf16.gmra.mxu1 %v16000_v29  ;;  %6555 = vmatmul.mubr.bf16.gmra.mxu0 %v15378_v36  ;;  %v3229_v37 = vld [vmem:[%s20612_s3 + $0xa68] sm:$0xff]  ;;  %v12057_v56 = vcombine.low %v3097_v43, %v3101_v27  ;;  %v2954_v43 = vld [vmem:[%s20612_s3 + $0x1d0] sm:$0xff] }
 0x213   :  { %v2702_v26 = vadd.f32 %v2701_v9, %v2589_v18  ;;  %6564 = vmatprep.mubr.bf16.mxu0 %v15389_v63  ;;  %6600 = vmatpush2.bf16.msra.mxu1 %v12073_v44  ;;  %v2830_v48 = vmax.f32 %v2700_v14, 0.0  ;;  %v16021_v35 = vpop.f32.mrf.mxu0  ;;  %v12186_v34 = vcombine.high %v3225_v47, %v3229_v37  ;;  %v3089_v17 = vld [vmem:[%s20612_s3 + $0x608] sm:$0xff]  ;;  %v12185_v52 = vcombine.low %v3225_v47, %v3229_v37  ;;  %v3408_v14 = vld [vmem:[%s20614_s4] sm:$0xff]  ;;  %v2958_v27 = vld [vmem:[%s20612_s3 + $0x1f0] sm:$0xff] }
 0x214   :  { %6713 = vmatpush2.bf16.msra.mxu0 %v12201_v50  ;;  %6601 = vmatprep.subr.bf16.mxu1 %v12066_v60  ;;  %v3093_v11 = vld [vmem:[%s20612_s3 + $0x628] sm:$0xff] }
 0x215   :  { %v2831_v62 = vmax.f32 %v2702_v26, 0.0  ;;  %6714 = vmatprep.subr.bf16.mxu0 %v12194_v32  ;;  %v16026_v4 = vpop.f32.mrf.mxu0  ;;  %v3217_v41 = vld [vmem:[%s20612_s3 + $0xa08] sm:$0xff]  ;;  %v16039_v7 = vpack.c.bf16 %v2830_v48, %v2822_v59  ;;  %v12050_v44 = vcombine.high %v3089_v17, %v3093_v11  ;;  %v12049_v9 = vcombine.low %v3089_v17, %v3093_v11  ;;  %v2946_v59 = vld [vmem:[%s20612_s3 + $0x190] sm:$0xff] }
 0x216   :  { %v3221_v31 = vld [vmem:[%s20612_s3 + $0xa28] sm:$0xff]  ;;  %v2950_v11 = vld [vmem:[%s20612_s3 + $0x1b0] sm:$0xff] }
 0x217   :  { %v16037_v32 = vpack.c.bf16 %v2831_v62, %v2823_v39  ;;  %6602 = vmatpush2.bf16.msra.mxu1 %v12065_v49  ;;  %21017 = vst [vmem:[#allocation65_spill] sm:$0xff] %v16039_v7  ;;  %v16041_v2 = vpop.f32.mrf.mxu0  ;;  %v12178_v50 = vcombine.high %v3217_v41, %v3221_v31  ;;  %v3337_v54 = vld [vmem:[%s20612_s3 + $0xdc8] sm:$0xff]  ;;  %v12177_v37 = vcombine.low %v3217_v41, %v3221_v31  ;;  %v21019_v49 = vsub.s32 0, %v20975_v21 }
 0x218   :  { %6715 = vmatpush2.bf16.msra.mxu0 %v12193_v15  ;;  %6603 = vmatprep.subr.bf16.mxu1 %v12058_v55  ;;  %v3341_v60 = vld [vmem:[%s20612_s3 + $0xde8] sm:$0xff]  ;;  %v11916_v15 = vcombine.high %v2954_v43, %v2958_v27 }
 0x219   :  { %21016 = vst [vmem:[#allocation64_spill] sm:$0xff] %v16037_v32  ;;  %6451 = vmatprep.mubr.bf16.mxu1 %v16037_v32  ;;  %6716 = vmatprep.subr.bf16.mxu0 %v12186_v34  ;;  %v16053_v18 = vpop.f32.mrf.mxu0  ;;  %v12298_v26 = vcombine.high %v3337_v54, %v3341_v60  ;;  %v16069_v48 = vrot.slane %v3408_v14, %v21019_v49  ;;  %v3329_v39 = vld [vmem:[%s20612_s3 + $0xd88] sm:$0xff]  ;;  %v21020_v34 = vsub.s32 1, %v20975_v21 }
 0x21a   :  { %6452 = vmatmul.mubr.bf16.gmra.mxu1 %v16039_v7  ;;  %6565 = vmatmul.mubr.bf16.gmra.mxu0 %v15464_v46  ;;  %v3333_v62 = vld [vmem:[%s20612_s3 + $0xda8] sm:$0xff]  ;;  %v12297_v31 = vcombine.low %v3337_v54, %v3341_v60  ;;  %v11908_v49 = vcombine.high %v2946_v59, %v2950_v11 }
 0x21b   :  { %6604 = vmatpush2.bf16.msra.mxu1 %v12057_v56  ;;  %6607 = vmatprep.mubr.bf16.mxu1 %v21018_v53  ;;  %v16065_v47 = vpop.f32.mrf.mxu0  ;;  %v16081_v17 = vrot.slane %v3408_v14, %v21020_v34  ;;  %v6045_v56 = vadd.f32 %v16010_v19, %v16069_v48  ;;  %v3325_v54 = vld [vmem:[%s20612_s3 + $0xd68] sm:$0xff]  ;;  %v11907_v34 = vcombine.low %v2946_v59, %v2950_v11  ;;  %v2934_v59 = vld [vmem:[%s20612_s3 + $0x130] sm:$0xff] }
 0x21c   :  { %6717 = vmatpush2.bf16.msra.mxu0 %v12185_v52  ;;  %6720 = vmatprep.mubr.bf16.mxu0 %v15561_v30  ;;  %v11915_v52 = vcombine.low %v2954_v43, %v2958_v27  ;;  %v2938_v43 = vld [vmem:[%s20612_s3 + $0x150] sm:$0xff] }
 0x21d   :  { %6605 = vmatprep.subr.bf16.mxu1 %v12050_v44  ;;  %6718 = vmatprep.subr.bf16.mxu0 %v12178_v50  ;;  %v16071_v55 = vpop.f32.mrf.mxu0  ;;  %v12290_v44 = vcombine.high %v3329_v39, %v3333_v62  ;;  %v6047_v19 = vadd.f32 %v16021_v35, %v16081_v17  ;;  %v2942_v27 = vld [vmem:[%s20612_s3 + $0x170] sm:$0xff] }
 0x21f   :  { %6606 = vmatpush2.bf16.msra.mxu1 %v12049_v9  ;;  %v16089_v41 = vpop.f32.mrf.mxu0  ;;  %v6157_v14 = vpop.f32.mrf.mxu1  ;;  %v21021_v9 = vld [vmem:[#allocation10_spill] sm:$0xff] }
 0x220   :  { %6719 = vmatpush2.bf16.msra.mxu0 %v12177_v37  ;;  %6801 = vmatprep.subr.bf16.mxu1 %v12298_v26  ;;  %v3321_v37 = vld [vmem:[%s20612_s3 + $0xd48] sm:$0xff]  ;;  %v16104_v60 = vadd.f32 %v6157_v14, %v6045_v56  ;;  %v6049_v56 = vadd.f32 %v16026_v4, %v16069_v48  ;;  %v2930_v4 = vld [vmem:[%s20612_s3 + $0x110] sm:$0xff] }
 0x221   :  { %6914 = vmatprep.subr.bf16.mxu0 %v11916_v15  ;;  %v16093_v50 = vpop.f32.mrf.mxu0  ;;  %v6159_v35 = vpop.f32.mrf.mxu1  ;;  %v12289_v15 = vcombine.low %v3329_v39, %v3333_v62  ;;  %v12282_v21 = vcombine.high %v3321_v37, %v3325_v54  ;;  %v3317_v39 = vld [vmem:[%s20612_s3 + $0xd28] sm:$0xff] }
 0x222   :  { %6608 = vmatmul.mubr.bf16.vlgmr.msra.gmra.mxu1 %v21021_v9  ;;  %v16119_v14 = vadd.f32 %v6159_v35, %v6047_v19  ;;  %v11900_v9 = vcombine.high %v2938_v43, %v2942_v27 }
 0x223   :  { %6721 = vmatmul.mubr.bf16.vlgmr.msra.gmra.mxu0 %v15566_v25  ;;  %6617 = vmatprep.mubr.bf16.mxu1 %v15168_v10  ;;  %v16115_v26 = vpop.f32.mrf.mxu0  ;;  %v6161_v25 = vpop.f32.mrf.mxu1 }
 0x224   :  { %6730 = vmatprep.mubr.bf16.mxu0 %v15585_v23  ;;  %6802 = vmatpush1.bf16.msra.mxu1 %v12297_v31  ;;  %v3313_v31 = vld [vmem:[%s20612_s3 + $0xd08] sm:$0xff]  ;;  %v16129_v62 = vadd.f32 %v6161_v25, %v6049_v56  ;;  %v11899_v25 = vcombine.low %v2938_v43, %v2942_v27  ;;  %v11892_v23 = vcombine.high %v2930_v4, %v2934_v59 }
 0x225   :  { %6915 = vmatpush1.bf16.msra.mxu0 %v11915_v52  ;;  %6803 = vmatprep.subr.bf16.mxu1 %v12290_v44  ;;  %v16121_v10 = vpop.f32.mrf.mxu0  ;;  %v16139_v52 = vpop.f32.mrf.mxu1  ;;  %v12281_v44 = vcombine.low %v3321_v37, %v3325_v54  ;;  %v12274_v19 = vcombine.high %v3313_v31, %v3317_v39  ;;  %v3309_v37 = vld [vmem:[%s20612_s3 + $0xce8] sm:$0xff]  ;;  %v2926_v54 = vld [vmem:[%s20612_s3 + $0xf0] sm:$0xff]  ;;  %v12273_v27 = vcombine.low %v3313_v31, %v3317_v39 }
 0x226   :  { %6916 = vmatprep.subr.bf16.mxu0 %v11908_v49  ;;  %v6055_v49 = vadd.f32 %v16053_v18, %v16069_v48  ;;  %v3301_v31 = vld [vmem:[%s20612_s3 + $0xca8] sm:$0xff] }
 0x227   :  { %v16137_v11 = vpop.f32.mrf.mxu0 }
 0x228   :  { %6804 = vmatpush1.bf16.msra.mxu1 %v12289_v15  ;;  %v6167_v56 = vpop.f32.mrf.mxu1  ;;  %v3305_v15 = vld [vmem:[%s20612_s3 + $0xcc8] sm:$0xff] }
 0x229   :  { %6917 = vmatpush1.bf16.msra.mxu0 %v11907_v34  ;;  %6805 = vmatprep.subr.bf16.mxu1 %v12282_v21  ;;  %v16143_v35 = vpop.f32.mrf.mxu0  ;;  %v6057_v21 = vadd.f32 %v16065_v47, %v16081_v17  ;;  %v16154_v18 = vadd.f32 %v6167_v56, %v6055_v49  ;;  %v11891_v34 = vcombine.low %v2930_v4, %v2934_v59  ;;  %v2918_v4 = vld [vmem:[%s20612_s3 + $0xb0] sm:$0xff] }
 0x22a   :  { %6618 = vmatmul.mubr.bf16.gmra.mxu1 %v15177_v45  ;;  %6918 = vmatprep.subr.bf16.mxu0 %v11900_v9  ;;  %v2922_v9 = vld [vmem:[%s20612_s3 + $0xd0] sm:$0xff]  ;;  %v6169_v47 = vpop.f32.mrf.mxu1  ;;  %v6059_v49 = vadd.f32 %v16071_v55, %v16069_v48 }
 0x22b   :  { %6731 = vmatmul.mubr.bf16.gmra.mxu0 %v15588_v58  ;;  %6627 = vmatprep.mubr.bf16.mxu1 %v15233_v0  ;;  %v16165_v43 = vpop.f32.mrf.mxu0  ;;  %v16169_v56 = vadd.f32 %v6169_v47, %v6057_v21  ;;  %v12266_v0 = vcombine.high %v3305_v15, %v3309_v37  ;;  %v11884_v30 = vcombine.high %v2922_v9, %v2926_v54  ;;  %v2914_v55 = vld [vmem:[%s20612_s3 + $0x90] sm:$0xff] }
 0x22c   :  { %6740 = vmatprep.mubr.bf16.mxu0 %v15607_v13  ;;  %6806 = vmatpush1.bf16.msra.mxu1 %v12281_v44  ;;  %v6171_v45 = vpop.f32.mrf.mxu1  ;;  %v3297_v44 = vld [vmem:[%s20612_s3 + $0xc88] sm:$0xff]  ;;  %v11876_v13 = vcombine.high %v2914_v55, %v2918_v4 }
 0x22d   :  { %6919 = vmatpush1.bf16.msra.mxu0 %v11899_v25  ;;  %6807 = vmatprep.subr.bf16.mxu1 %v12274_v19  ;;  %v16171_v58 = vpop.f32.mrf.mxu0  ;;  %v16179_v39 = vadd.f32 %v6171_v45, %v6059_v49  ;;  %v12265_v25 = vcombine.low %v3305_v15, %v3309_v37  ;;  %v6065_v19 = vadd.f32 %v16093_v50, %v16069_v48  ;;  %v3293_v15 = vld [vmem:[%s20612_s3 + $0xc68] sm:$0xff]  ;;  %v2910_v37 = vld [vmem:[%s20612_s3 + $0x70] sm:$0xff] }
 0x22e   :  { %6920 = vmatprep.subr.bf16.mxu0 %v11892_v23  ;;  %v16189_v59 = vpop.f32.mrf.mxu1  ;;  %v11883_v45 = vcombine.low %v2922_v9, %v2926_v54  ;;  %v12258_v21 = vcombine.high %v3297_v44, %v3301_v31  ;;  %v12257_v54 = vcombine.low %v3297_v44, %v3301_v31  ;;  %v3285_v44 = vld [vmem:[%s20612_s3 + $0xc28] sm:$0xff] }
 0x22f   :  { %v16187_v23 = vpop.f32.mrf.mxu0 }
 0x230   :  { %6808 = vmatpush1.bf16.msra.mxu1 %v12273_v27  ;;  %v3289_v27 = vld [vmem:[%s20612_s3 + $0xc48] sm:$0xff] }
 0x231   :  { %6921 = vmatpush1.bf16.msra.mxu0 %v11891_v34  ;;  %6809 = vmatprep.subr.bf16.mxu1 %v12266_v0  ;;  %v16193_v47 = vpop.f32.mrf.mxu0  ;;  %v6067_v0 = vadd.f32 %v16115_v26, %v16081_v17  ;;  %v11875_v34 = vcombine.low %v2914_v55, %v2918_v4  ;;  %v2902_v55 = vld [vmem:[%s20612_s3 + $0x30] sm:$0xff] }
 0x232   :  { %v6177_v49 = vpop.f32.mrf.mxu1  ;;  %6628 = vmatmul.mubr.bf16.gmra.mxu1 %v15242_v61  ;;  %6922 = vmatprep.subr.bf16.mxu0 %v11884_v30  ;;  %v2906_v30 = vld [vmem:[%s20612_s3 + $0x50] sm:$0xff] }
 0x233   :  { %v16204_v50 = vadd.f32 %v6177_v49, %v6065_v19  ;;  %6741 = vmatmul.mubr.bf16.gmra.mxu0 %v15610_v40  ;;  %6637 = vmatprep.mubr.bf16.mxu1 %v15299_v6  ;;  %v16215_v9 = vpop.f32.mrf.mxu0  ;;  %v6069_v19 = vadd.f32 %v16121_v10, %v16069_v48  ;;  %v12250_v6 = vcombine.high %v3289_v27, %v3293_v15  ;;  %v2898_v10 = vld [vmem:[%s20612_s3 + $0x10] sm:$0xff] }
 0x234   :  { %6750 = vmatprep.mubr.bf16.mxu0 %v15629_v3  ;;  %6810 = vmatpush1.bf16.msra.mxu1 %v12265_v25  ;;  %v6179_v26 = vpop.f32.mrf.mxu1  ;;  %v11868_v53 = vcombine.high %v2906_v30, %v2910_v37  ;;  %v3281_v25 = vld [vmem:[%s20612_s3 + $0xc08] sm:$0xff]  ;;  %v11860_v3 = vcombine.high %v2898_v10, %v2902_v55 }
 0x235   :  { %6923 = vmatpush1.bf16.msra.mxu0 %v11883_v45  ;;  %v16219_v49 = vadd.f32 %v6179_v26, %v6067_v0  ;;  %6811 = vmatprep.subr.bf16.mxu1 %v12258_v21  ;;  %v16221_v40 = vpop.f32.mrf.mxu0  ;;  %v12249_v45 = vcombine.low %v3289_v27, %v3293_v15  ;;  %v6075_v21 = vadd.f32 %v16143_v35, %v16069_v48  ;;  %v3405_v27 = vld [vmem:[%s20612_s3 + $0xfe8] sm:$0xff]  ;;  %v3022_v15 = vld [vmem:[%s20612_s3 + $0x3f0] sm:$0xff] }
 0x236   :  { %v6181_v61 = vpop.f32.mrf.mxu1  ;;  %6924 = vmatprep.subr.bf16.mxu0 %v11876_v13  ;;  %v12242_v0 = vcombine.high %v3281_v25, %v3285_v44 }
 0x237   :  { %v16229_v31 = vadd.f32 %v6181_v61, %v6069_v19  ;;  %v16237_v13 = vpop.f32.mrf.mxu0  ;;  %v11867_v61 = vcombine.low %v2906_v30, %v2910_v37  ;;  %v12241_v37 = vcombine.low %v3281_v25, %v3285_v44  ;;  %v3397_v25 = vld [vmem:[%s20612_s3 + $0xfa8] sm:$0xff] }
 0x238   :  { %6812 = vmatpush1.bf16.msra.mxu1 %v12257_v54  ;;  %v16239_v4 = vpop.f32.mrf.mxu1  ;;  %v3401_v54 = vld [vmem:[%s20612_s3 + $0xfc8] sm:$0xff] }
 0x239   :  { %6925 = vmatpush1.bf16.msra.mxu0 %v11875_v34  ;;  %6813 = vmatprep.subr.bf16.mxu1 %v12250_v6  ;;  %v6077_v6 = vadd.f32 %v16165_v43, %v16081_v17  ;;  %v11859_v34 = vcombine.low %v2898_v10, %v2902_v55  ;;  %v3014_v10 = vld [vmem:[%s20612_s3 + $0x3b0] sm:$0xff] }
 0x23a   :  { %6638 = vmatmul.mubr.bf16.gmra.mxu1 %v15318_v5  ;;  %6926 = vmatprep.subr.bf16.mxu0 %v11868_v53  ;;  %v3018_v53 = vld [vmem:[%s20612_s3 + $0x3d0] sm:$0xff] }
 0x23b   :  { %v16243_v26 = vpop.f32.mrf.mxu0  ;;  %6751 = vmatmul.mubr.bf16.gmra.mxu0 %v15632_v12  ;;  %6647 = vmatprep.mubr.bf16.mxu1 %v15380_v16  ;;  %v12362_v16 = vcombine.high %v3401_v54, %v3405_v27  ;;  %v11980_v46 = vcombine.high %v3018_v53, %v3022_v15 }
 0x23c   :  { %v6187_v19 = vpop.f32.mrf.mxu1  ;;  %6760 = vmatprep.mubr.bf16.mxu0 %v15651_v1  ;;  %6814 = vmatpush1.bf16.msra.mxu1 %v12249_v45  ;;  %v3393_v45 = vld [vmem:[%s20612_s3 + $0xf88] sm:$0xff] }
 0x23d   :  { %v16254_v35 = vadd.f32 %v6187_v19, %v6075_v21  ;;  %v16265_v30 = vpop.f32.mrf.mxu0  ;;  %v6079_v21 = vadd.f32 %v16171_v58, %v16069_v48  ;;  %6927 = vmatpush1.bf16.msra.mxu0 %v11867_v61  ;;  %6815 = vmatprep.subr.bf16.mxu1 %v12242_v0  ;;  %v3010_v58 = vld [vmem:[%s20612_s3 + $0x390] sm:$0xff]  ;;  %v12361_v61 = vcombine.low %v3401_v54, %v3405_v27  ;;  %v3389_v54 = vld [vmem:[%s20612_s3 + $0xf68] sm:$0xff] }
 0x23e   :  { %v6189_v43 = vpop.f32.mrf.mxu1  ;;  %6928 = vmatprep.subr.bf16.mxu0 %v11860_v3  ;;  %v6085_v0 = vadd.f32 %v16193_v47, %v16069_v48  ;;  %v11972_v1 = vcombine.high %v3010_v58, %v3014_v10  ;;  %v21023_v27 = vld [vmem:[#allocation44_spill] sm:$0xff]  ;;  %v12353_v7 = vcombine.low %v3393_v45, %v3397_v25 }
 0x23f   :  { %v16269_v19 = vadd.f32 %v6189_v43, %v6077_v6  ;;  %v16271_v12 = vpop.f32.mrf.mxu0  ;;  %v12354_v6 = vcombine.high %v3393_v45, %v3397_v25  ;;  %v3381_v45 = vld [vmem:[%s20612_s3 + $0xf28] sm:$0xff] }
 0x240   :  { %v6191_v5 = vpop.f32.mrf.mxu1  ;;  %6816 = vmatpush1.bf16.msra.mxu1 %v12241_v37  ;;  %v3385_v37 = vld [vmem:[%s20612_s3 + $0xf48] sm:$0xff] }
 0x241   :  { %v16279_v44 = vadd.f32 %v6191_v5, %v6079_v21  ;;  %v16287_v3 = vpop.f32.mrf.mxu0  ;;  %6929 = vmatpush1.bf16.msra.mxu0 %v11859_v34  ;;  %6817 = vmatprep.subr.bf16.mxu1 %v12362_v16  ;;  %v11979_v5 = vcombine.low %v3018_v53, %v3022_v15  ;;  %v6087_v16 = vadd.f32 %v16215_v9, %v16081_v17  ;;  %v21024_v53 = vld [vmem:[#allocation22_spill] sm:$0xff]  ;;  %v3006_v15 = vld [vmem:[%s20612_s3 + $0x370] sm:$0xff]  ;;  %v21025_v34 = vld [vmem:[#allocation45_spill] sm:$0xff] }
 0x242   :  { %21022 = vst [vmem:[#allocation66_spill] sm:$0xff] %v16287_v3  ;;  %v16289_v55 = vpop.f32.mrf.mxu1  ;;  %6648 = vmatmul.mubr.bf16.gmra.mxu1 %v15391_v28  ;;  %6930 = vmatprep.subr.bf16.mxu0 %v11980_v46  ;;  %v3002_v46 = vld [vmem:[%s20612_s3 + $0x350] sm:$0xff]  ;;  %v11971_v9 = vcombine.low %v3010_v58, %v3014_v10  ;;  %v12345_v58 = vcombine.low %v3385_v37, %v3389_v54 }
 0x243   :  { %6761 = vmatmul.mubr.bf16.gmra.mxu0 %v21023_v27  ;;  %6657 = vmatprep.mubr.bf16.mxu1 %v21024_v53  ;;  %v12346_v53 = vcombine.high %v3385_v37, %v3389_v54  ;;  %v11964_v32 = vcombine.high %v3002_v46, %v3006_v15  ;;  %v6095_v10 = vadd.f32 %v16243_v26, %v16069_v48  ;;  %v3373_v37 = vld [vmem:[%s20612_s3 + $0xee8] sm:$0xff] }
 0x244   :  { %6770 = vmatprep.mubr.bf16.mxu0 %v21025_v34  ;;  %6818 = vmatpush2.bf16.msra.mxu1 %v12361_v61  ;;  %v3377_v61 = vld [vmem:[%s20612_s3 + $0xf08] sm:$0xff]  ;;  %v6097_v26 = vadd.f32 %v16265_v30, %v16081_v17 }
 0x245   :  { %v16293_v43 = vpop.f32.mrf.mxu0  ;;  %v6197_v21 = vpop.f32.mrf.mxu1  ;;  %6931 = vmatpush2.bf16.msra.mxu0 %v11979_v5  ;;  %6819 = vmatprep.subr.bf16.mxu1 %v12354_v6  ;;  %v11963_v5 = vcombine.low %v3002_v46, %v3006_v15  ;;  %v21028_v46 = vld [vmem:[#allocation30_spill] sm:$0xff]  ;;  %v2990_v15 = vld [vmem:[%s20612_s3 + $0x2f0] sm:$0xff]  ;;  %v12337_v36 = vcombine.low %v3377_v61, %v3381_v45 }
 0x246   :  { %v16304_v47 = vadd.f32 %v6197_v21, %v6085_v0  ;;  %v6089_v0 = vadd.f32 %v16221_v40, %v16069_v48  ;;  %6932 = vmatprep.subr.bf16.mxu0 %v11972_v1  ;;  %v2998_v40 = vld [vmem:[%s20612_s3 + $0x330] sm:$0xff] }
 0x247   :  { %v6199_v28 = vpop.f32.mrf.mxu1  ;;  %v16319_v27 = vpop.f32.mrf.mxu0 }
 0x248   :  { %v16317_v21 = vadd.f32 %v6199_v28, %v6087_v16  ;;  %v2994_v28 = vld [vmem:[%s20612_s3 + $0x310] sm:$0xff]  ;;  %6820 = vmatpush2.bf16.msra.mxu1 %v12353_v7  ;;  %v3369_v7 = vld [vmem:[%s20612_s3 + $0xec8] sm:$0xff] }
 0x249   :  { %v6201_v63 = vpop.f32.mrf.mxu1  ;;  %6933 = vmatpush2.bf16.msra.mxu0 %v11971_v9  ;;  %6821 = vmatprep.subr.bf16.mxu1 %v12346_v53  ;;  %v6108_v6 = vpop.f32.mrf.mxu0  ;;  %v11956_v34 = vcombine.high %v2994_v28, %v2998_v40  ;;  %v21027_v53 = vld [vmem:[#allocation46_spill] sm:$0xff]  ;;  %v21029_v9 = vld [vmem:[#allocation47_spill] sm:$0xff]  ;;  %v11955_v30 = vcombine.low %v2994_v28, %v2998_v40  ;;  %v2982_v28 = vld [vmem:[%s20612_s3 + $0x2b0] sm:$0xff]  ;;  %v12329_v40 = vcombine.low %v3369_v7, %v3373_v37 }
 0x24a   :  { %v16327_v25 = vadd.f32 %v6201_v63, %v6089_v0  ;;  %v12338_v63 = vcombine.high %v3377_v61, %v3381_v45  ;;  %v21026_v0 = vld [vmem:[#allocation23_spill] sm:$0xff]  ;;  %6934 = vmatprep.subr.bf16.mxu0 %v11964_v32  ;;  %v2986_v32 = vld [vmem:[%s20612_s3 + $0x2d0] sm:$0xff] }
 0x24b   :  { %v16335_v1 = vpop.f32.mrf.mxu1  ;;  %6658 = vmatmul.mubr.bf16.gmra.mxu1 %v21026_v0  ;;  %6771 = vmatmul.mubr.bf16.gmra.mxu0 %v21027_v53  ;;  %v16363_v53 = vpop.f32.mrf.mxu0  ;;  %v11948_v3 = vcombine.high %v2986_v32, %v2990_v15  ;;  %v3365_v61 = vld [vmem:[%s20612_s3 + $0xea8] sm:$0xff] }
 0x24c   :  { %6667 = vmatprep.mubr.bf16.mxu1 %v21028_v46  ;;  %6780 = vmatprep.mubr.bf16.mxu0 %v21029_v9  ;;  %v12330_v46 = vcombine.high %v3369_v7, %v3373_v37  ;;  %21030 = vst [vmem:[#allocation67_spill] sm:$0xff] %v16363_v53  ;;  %v3357_v7 = vld [vmem:[%s20612_s3 + $0xe68] sm:$0xff] }
 0x24d   :  { %v6207_v16 = vpop.f32.mrf.mxu1  ;;  %6822 = vmatpush2.bf16.msra.mxu1 %v12345_v58  ;;  %6935 = vmatpush2.bf16.msra.mxu0 %v11963_v5  ;;  %v3361_v58 = vld [vmem:[%s20612_s3 + $0xe88] sm:$0xff]  ;;  %v6105_v5 = vadd.f32 %v16293_v43, %v16069_v48  ;;  %v6107_v43 = vadd.f32 %v16319_v27, %v16081_v17 }
 0x24e   :  { %v16348_v54 = vadd.f32 %v6207_v16, %v6095_v10  ;;  %v6099_v10 = vadd.f32 %v16271_v12, %v16069_v48  ;;  %6823 = vmatprep.subr.bf16.mxu1 %v12338_v63  ;;  %6936 = vmatprep.subr.bf16.mxu0 %v11956_v34  ;;  %v2978_v12 = vld [vmem:[%s20612_s3 + $0x290] sm:$0xff]  ;;  %v11947_v63 = vcombine.low %v2986_v32, %v2990_v15 }
 0x24f   :  { %v6209_v0 = vpop.f32.mrf.mxu1  ;;  %v11940_v9 = vcombine.high %v2978_v12, %v2982_v28  ;;  %v21036_v32 = vld [vmem:[#allocation24_spill] sm:$0xff]  ;;  %v12321_v53 = vcombine.low %v3361_v58, %v3365_v61  ;;  %v11939_v27 = vcombine.low %v2978_v12, %v2982_v28 }
 0x250   :  { %v16361_v16 = vadd.f32 %v6209_v0, %v6097_v26  ;;  %v6114_v0 = vpop.f32.mrf.mxu0  ;;  %v2974_v15 = vld [vmem:[%s20612_s3 + $0x270] sm:$0xff] }
 0x251   :  { %v6211_v29 = vpop.f32.mrf.mxu1  ;;  %6824 = vmatpush2.bf16.msra.mxu1 %v12337_v36  ;;  %6937 = vmatpush2.bf16.msra.mxu0 %v11955_v30  ;;  %v3353_v36 = vld [vmem:[%s20612_s3 + $0xe48] sm:$0xff]  ;;  %v21037_v30 = vld [vmem:[#allocation49_spill] sm:$0xff]  ;;  %v2966_v12 = vld [vmem:[%s20612_s3 + $0x230] sm:$0xff] }
 0x252   :  { %v16371_v45 = vadd.f32 %v6211_v29, %v6099_v10  ;;  %6825 = vmatprep.subr.bf16.mxu1 %v12330_v46  ;;  %v12322_v29 = vcombine.high %v3361_v58, %v3365_v61  ;;  %v21033_v10 = vld [vmem:[#allocation20_spill] sm:$0xff]  ;;  %6938 = vmatprep.subr.bf16.mxu0 %v11948_v3  ;;  %v3349_v58 = vld [vmem:[%s20612_s3 + $0xe28] sm:$0xff]  ;;  %v12313_v28 = vcombine.low %v3353_v36, %v3357_v7 }
 0x253   :  { %v16379_v34 = vpop.f32.mrf.mxu1  ;;  %6668 = vmatmul.mubr.bf16.gmra.mxu1 %v21033_v10  ;;  %v21035_v46 = vld [vmem:[#allocation48_spill] sm:$0xff] }
 0x254   :  { %21031 = vst [vmem:[#allocation68_spill] sm:$0xff] %v16371_v45  ;;  %21032 = vst [vmem:[#allocation69_spill] sm:$0xff] %v16379_v34  ;;  %6781 = vmatmul.mubr.bf16.gmra.mxu0 %v21035_v46  ;;  %6677 = vmatprep.mubr.bf16.mxu1 %v21036_v32  ;;  %v2970_v3 = vld [vmem:[%s20612_s3 + $0x250] sm:$0xff]  ;;  %v12314_v32 = vcombine.high %v3353_v36, %v3357_v7  ;;  %v6116_v46 = vpop.f32.mrf.mxu0  ;;  %v3345_v34 = vld [vmem:[%s20612_s3 + $0xe08] sm:$0xff] }
 0x255   :  { %v6217_v26 = vpop.f32.mrf.mxu1  ;;  %6790 = vmatprep.mubr.bf16.mxu0 %v21037_v30  ;;  %6826 = vmatpush2.bf16.msra.mxu1 %v12329_v40  ;;  %v11932_v45 = vcombine.high %v2970_v3, %v2974_v15  ;;  %v6115_v40 = vadd.f32 %v6114_v0, %v16069_v48  ;;  %v3082_v30 = vld [vmem:[%s20612_s3 + $0x5d0] sm:$0xff]  ;;  %v6117_v0 = vadd.f32 %v6116_v46, %v16081_v17  ;;  %v21041_v7 = vld [vmem:[#allocation50_spill] sm:$0xff] }
 0x256   :  { %v16392_v37 = vadd.f32 %v6217_v26, %v6105_v5  ;;  %v6109_v5 = vadd.f32 %v6108_v6, %v16069_v48  ;;  %6939 = vmatpush2.bf16.msra.mxu0 %v11947_v63  ;;  %6827 = vmatprep.subr.bf16.mxu1 %v12322_v29  ;;  %v2962_v6 = vld [vmem:[%s20612_s3 + $0x210] sm:$0xff]  ;;  %v11931_v63 = vcombine.low %v2970_v3, %v2974_v15  ;;  %v21043_v15 = vld [vmem:[#allocation26_spill] sm:$0xff] }
 0x257   :  { %v6219_v10 = vpop.f32.mrf.mxu1  ;;  %6940 = vmatprep.subr.bf16.mxu0 %v11940_v9  ;;  %v12306_v29 = vcombine.high %v3345_v34, %v3349_v58  ;;  %v3214_v3 = vld [vmem:[%s20612_s3 + $0x9f0] sm:$0xff]  ;;  %v11923_v46 = vcombine.low %v2962_v6, %v2966_v12 }
 0x258   :  { %21034 = vst [vmem:[#allocation70_spill] sm:$0xff] %v16392_v37  ;;  %v16404_v26 = vadd.f32 %v6219_v10, %v6107_v43  ;;  %v6118_v10 = vpop.f32.mrf.mxu0 }
 0x259   :  { %v6221_v37 = vpop.f32.mrf.mxu1  ;;  %6828 = vmatpush2.bf16.msra.mxu1 %v12321_v53  ;;  %v3086_v53 = vld [vmem:[%s20612_s3 + $0x5f0] sm:$0xff] }
 0x25a   :  { %v16412_v61 = vadd.f32 %v6221_v37, %v6109_v5  ;;  %6941 = vmatpush2.bf16.msra.mxu0 %v11939_v27  ;;  %6829 = vmatprep.subr.bf16.mxu1 %v12314_v32  ;;  %v21039_v37 = vld [vmem:[#allocation31_spill] sm:$0xff]  ;;  %v11924_v5 = vcombine.high %v2962_v6, %v2966_v12  ;;  %v3206_v6 = vld [vmem:[%s20612_s3 + $0x9b0] sm:$0xff]  ;;  %v12043_v12 = vcombine.low %v3082_v30, %v3086_v53 }
 0x25b   :  { %v16420_v9 = vpop.f32.mrf.mxu1  ;;  %6678 = vmatmul.mubr.bf16.gmra.mxu1 %v21039_v37  ;;  %6942 = vmatprep.subr.bf16.mxu0 %v11932_v45  ;;  %v21042_v32 = vld [vmem:[#allocation51_spill] sm:$0xff]  ;;  %v3210_v45 = vld [vmem:[%s20612_s3 + $0x9d0] sm:$0xff]  ;;  %v12305_v37 = vcombine.low %v3345_v34, %v3349_v58  ;;  %v16453_v58 = vpop.f32.mrf.mxu0 }
 0x25c   :  { %21038 = vst [vmem:[#allocation71_spill] sm:$0xff] %v16412_v61  ;;  %6791 = vmatmul.mubr.bf16.gmra.mxu0 %v21041_v7  ;;  %6833 = vmatprep.mubr.bf16.mxu1 %v21042_v32  ;;  %v12044_v32 = vcombine.high %v3082_v30, %v3086_v53  ;;  %v3078_v34 = vld [vmem:[%s20612_s3 + $0x5b0] sm:$0xff]  ;;  %v21045_v30 = vld [vmem:[#allocation34_spill] sm:$0xff] }
 0x25d   :  { %v6227_v43 = vpop.f32.mrf.mxu1  ;;  %6830 = vmatpush2.bf16.msra.mxu1 %v12313_v28  ;;  %6946 = vmatprep.mubr.bf16.mxu0 %v21043_v15  ;;  %v3074_v28 = vld [vmem:[%s20612_s3 + $0x590] sm:$0xff] }
 0x25e   :  { %v16431_v36 = vadd.f32 %v6227_v43, %v6115_v40  ;;  %v6119_v40 = vadd.f32 %v6118_v10, %v16069_v48  ;;  %6943 = vmatpush2.bf16.msra.mxu0 %v11931_v63  ;;  %6831 = vmatprep.subr.bf16.mxu1 %v12306_v29  ;;  %v3202_v48 = vld [vmem:[%s20612_s3 + $0x990] sm:$0xff]  ;;  %v12171_v29 = vcombine.low %v3210_v45, %v3214_v3 }
 0x25f   :  { %v6229_v27 = vpop.f32.mrf.mxu1  ;;  %6944 = vmatprep.subr.bf16.mxu0 %v11924_v5  ;;  %v12036_v10 = vcombine.high %v3074_v28, %v3078_v34 }
 0x260   :  { %21040 = vst [vmem:[#allocation72_spill] sm:$0xff] %v16431_v36  ;;  %v16443_v43 = vadd.f32 %v6229_v27, %v6117_v0  ;;  %v12172_v36 = vcombine.high %v3210_v45, %v3214_v3  ;;  %v21044_v0 = vld [vmem:[#allocation52_spill] sm:$0xff]  ;;  %v21046_v45 = vld [vmem:[#allocation35_spill] sm:$0xff] }
 0x261   :  { %v6231_v7 = vpop.f32.mrf.mxu1  ;;  %6832 = vmatpush2.bf16.msra.mxu1 %v12305_v37  ;;  %v12164_v37 = vcombine.high %v3202_v48, %v3206_v6  ;;  %v3070_v27 = vld [vmem:[%s20612_s3 + $0x570] sm:$0xff] }
 0x262   :  { %v16445_v61 = vadd.f32 %v6231_v7, %v6119_v40  ;;  %6945 = vmatpush2.bf16.msra.mxu0 %v11923_v46  ;;  %7027 = vmatprep.subr.bf16.mxu1 %v12044_v32  ;;  %v6270_v63 = vpop.f32.mrf.mxu0  ;;  %v3066_v7 = vld [vmem:[%s20612_s3 + $0x550] sm:$0xff]  ;;  %v6051_v32 = vadd.f32 %v16041_v2, %v16081_v17  ;;  %v12035_v46 = vcombine.low %v3074_v28, %v3078_v34 }
 0x263   :  { %7140 = vmatprep.subr.bf16.mxu0 %v12172_v36  ;;  %v16462_v5 = vadd.f32 %v6270_v63, %v16104_v60  ;;  %v3194_v60 = vld [vmem:[%s20612_s3 + $0x950] sm:$0xff]  ;;  %v12163_v63 = vcombine.low %v3202_v48, %v3206_v6  ;;  %v12027_v48 = vcombine.low %v3066_v7, %v3070_v27 }
 0x264   :  { %6834 = vmatmul.mubr.bf16.vlgmr.msra.gmra.mxu1 %v21044_v0  ;;  %v6272_v53 = vpop.f32.mrf.mxu0  ;;  %v3198_v36 = vld [vmem:[%s20612_s3 + $0x970] sm:$0xff] }
 0x265   :  { %6947 = vmatmul.mubr.bf16.vlgmr.msra.gmra.mxu0 %v21045_v30  ;;  %6843 = vmatprep.mubr.bf16.mxu1 %v15799_v51  ;;  %v16483_v3 = vadd.f32 %v6272_v53, %v16119_v14  ;;  %v12028_v51 = vcombine.high %v3066_v7, %v3070_v27  ;;  %v6164_v30 = vadd.f32 %v16139_v52, %v6051_v32  ;;  %v3058_v2 = vld [vmem:[%s20612_s3 + $0x510] sm:$0xff]  ;;  %v21047_v27 = vld [vmem:[#allocation37_spill] sm:$0xff] }
 0x266   :  { %6956 = vmatprep.mubr.bf16.mxu0 %v21046_v45  ;;  %7028 = vmatpush1.bf16.msra.mxu1 %v12043_v12  ;;  %v6274_v40 = vpop.f32.mrf.mxu0  ;;  %v12156_v15 = vcombine.high %v3194_v60, %v3198_v36  ;;  %v3062_v14 = vld [vmem:[%s20612_s3 + $0x530] sm:$0xff]  ;;  %v12155_v12 = vcombine.low %v3194_v60, %v3198_v36  ;;  %v6061_v60 = vadd.f32 %v16089_v41, %v16081_v17  ;;  %v21049_v36 = vld [vmem:[#allocation38_spill] sm:$0xff] }
 0x267   :  { %7141 = vmatpush1.bf16.msra.mxu0 %v12171_v29  ;;  %7029 = vmatprep.subr.bf16.mxu1 %v12036_v10  ;;  %v16487_v0 = vadd.f32 %v6274_v40, %v16129_v62  ;;  %v3186_v34 = vld [vmem:[%s20612_s3 + $0x910] sm:$0xff]  ;;  %v12020_v29 = vcombine.high %v3058_v2, %v3062_v14 }
 0x268   :  { %7142 = vmatprep.subr.bf16.mxu0 %v12164_v37  ;;  %v6276_v28 = vpop.f32.mrf.mxu0  ;;  %v3190_v62 = vld [vmem:[%s20612_s3 + $0x930] sm:$0xff] }
 0x269   :  { %v16501_v52 = vadd.f32 %v6276_v28, %v6164_v30  ;;  %v12148_v37 = vcombine.high %v3186_v34, %v3190_v62  ;;  %v3050_v53 = vld [vmem:[%s20612_s3 + $0x4d0] sm:$0xff] }
 0x26a   :  { %7030 = vmatpush1.bf16.msra.mxu1 %v12035_v46  ;;  %v6280_v6 = vpop.f32.mrf.mxu0  ;;  %v3054_v7 = vld [vmem:[%s20612_s3 + $0x4f0] sm:$0xff]  ;;  %v12019_v46 = vcombine.low %v3058_v2, %v3062_v14 }
 0x26b   :  { %7143 = vmatpush1.bf16.msra.mxu0 %v12163_v63  ;;  %7031 = vmatprep.subr.bf16.mxu1 %v12028_v51  ;;  %v16504_v10 = vadd.f32 %v6280_v6, %v16154_v18  ;;  %v21048_v51 = vld [vmem:[#allocation54_spill] sm:$0xff]  ;;  %v3178_v18 = vld [vmem:[%s20612_s3 + $0x8d0] sm:$0xff]  ;;  %v12147_v63 = vcombine.low %v3186_v34, %v3190_v62  ;;  %v12012_v28 = vcombine.high %v3050_v53, %v3054_v7 }
 0x26c   :  { %6844 = vmatmul.mubr.bf16.gmra.mxu1 %v15802_v22  ;;  %7144 = vmatprep.subr.bf16.mxu0 %v12156_v15  ;;  %v6282_v30 = vpop.f32.mrf.mxu0  ;;  %v3182_v15 = vld [vmem:[%s20612_s3 + $0x8f0] sm:$0xff]  ;;  %v6174_v6 = vadd.f32 %v16189_v59, %v6061_v60  ;;  %v12011_v34 = vcombine.low %v3050_v53, %v3054_v7  ;;  %v21051_v7 = vld [vmem:[#allocation39_spill] sm:$0xff] }
 0x26d   :  { %6957 = vmatmul.mubr.bf16.gmra.mxu0 %v21047_v27  ;;  %6853 = vmatprep.mubr.bf16.mxu1 %v21048_v51  ;;  %v16525_v32 = vadd.f32 %v6282_v30, %v16169_v56  ;;  %v12140_v27 = vcombine.high %v3178_v18, %v3182_v15  ;;  %v3042_v41 = vld [vmem:[%s20612_s3 + $0x490] sm:$0xff] }
 0x26e   :  { %6966 = vmatprep.mubr.bf16.mxu0 %v21049_v36  ;;  %7032 = vmatpush1.bf16.msra.mxu1 %v12027_v48  ;;  %v6284_v40 = vpop.f32.mrf.mxu0  ;;  %v3046_v56 = vld [vmem:[%s20612_s3 + $0x4b0] sm:$0xff]  ;;  %v12139_v48 = vcombine.low %v3178_v18, %v3182_v15  ;;  %v6071_v15 = vadd.f32 %v16137_v11, %v16081_v17 }
 0x26f   :  { %7145 = vmatpush1.bf16.msra.mxu0 %v12155_v12  ;;  %7033 = vmatprep.subr.bf16.mxu1 %v12020_v29  ;;  %v16529_v51 = vadd.f32 %v6284_v40, %v16179_v39  ;;  %v3170_v14 = vld [vmem:[%s20612_s3 + $0x890] sm:$0xff]  ;;  %v12004_v12 = vcombine.high %v3042_v41, %v3046_v56 }
 0x270   :  { %7146 = vmatprep.subr.bf16.mxu0 %v12148_v37  ;;  %v6286_v2 = vpop.f32.mrf.mxu0  ;;  %v3174_v39 = vld [vmem:[%s20612_s3 + $0x8b0] sm:$0xff]  ;;  %v21050_v37 = vld [vmem:[#allocation55_spill] sm:$0xff] }
 0x271   :  { %v16543_v59 = vadd.f32 %v6286_v2, %v6174_v6  ;;  %v12132_v30 = vcombine.high %v3170_v14, %v3174_v39  ;;  %v3034_v60 = vld [vmem:[%s20612_s3 + $0x450] sm:$0xff]  ;;  %v12131_v6 = vcombine.low %v3170_v14, %v3174_v39 }
 0x272   :  { %7034 = vmatpush1.bf16.msra.mxu1 %v12019_v46  ;;  %v6290_v62 = vpop.f32.mrf.mxu0  ;;  %v3038_v53 = vld [vmem:[%s20612_s3 + $0x470] sm:$0xff]  ;;  %v21052_v46 = vld [vmem:[#allocation5_spill] sm:$0xff] }
 0x273   :  { %7147 = vmatpush1.bf16.msra.mxu0 %v12147_v63  ;;  %7035 = vmatprep.subr.bf16.mxu1 %v12012_v28  ;;  %v16546_v29 = vadd.f32 %v6290_v62, %v16204_v50  ;;  %v3162_v50 = vld [vmem:[%s20612_s3 + $0x850] sm:$0xff]  ;;  %v12003_v63 = vcombine.low %v3042_v41, %v3046_v56  ;;  %v11996_v2 = vcombine.high %v3034_v60, %v3038_v53 }
 0x274   :  { %6854 = vmatmul.mubr.bf16.gmra.mxu1 %v21050_v37  ;;  %7148 = vmatprep.subr.bf16.mxu0 %v12140_v27  ;;  %v6292_v18 = vpop.f32.mrf.mxu0  ;;  %v3166_v27 = vld [vmem:[%s20612_s3 + $0x870] sm:$0xff]  ;;  %v6184_v62 = vadd.f32 %v16239_v4, %v6071_v15  ;;  %v11995_v14 = vcombine.low %v3034_v60, %v3038_v53  ;;  %v21053_v53 = vld [vmem:[#allocation3_spill] sm:$0xff]  ;;  %v21054_v15 = vld [vmem:[#allocation6_spill] sm:$0xff] }
 0x275   :  { %6967 = vmatmul.mubr.bf16.gmra.mxu0 %v21051_v7  ;;  %6863 = vmatprep.mubr.bf16.mxu1 %v15879_v38  ;;  %v16567_v40 = vadd.f32 %v6292_v18, %v16219_v49  ;;  %v12124_v7 = vcombine.high %v3162_v50, %v3166_v27  ;;  %v3026_v11 = vld [vmem:[%s20612_s3 + $0x410] sm:$0xff] }
 0x276   :  { %6976 = vmatprep.mubr.bf16.mxu0 %v21052_v46  ;;  %7036 = vmatpush1.bf16.msra.mxu1 %v12011_v34  ;;  %v6294_v28 = vpop.f32.mrf.mxu0  ;;  %v3030_v49 = vld [vmem:[%s20612_s3 + $0x430] sm:$0xff]  ;;  %v12123_v34 = vcombine.low %v3162_v50, %v3166_v27  ;;  %v6081_v27 = vadd.f32 %v16187_v23, %v16081_v17 }
 0x277   :  { %7149 = vmatpush1.bf16.msra.mxu0 %v12139_v48  ;;  %7037 = vmatprep.subr.bf16.mxu1 %v12004_v12  ;;  %v16571_v38 = vadd.f32 %v6294_v28, %v16229_v31  ;;  %v3154_v56 = vld [vmem:[%s20612_s3 + $0x810] sm:$0xff]  ;;  %v11988_v48 = vcombine.high %v3026_v11, %v3030_v49  ;;  %v11987_v28 = vcombine.low %v3026_v11, %v3030_v49 }
 0x278   :  { %7150 = vmatprep.subr.bf16.mxu0 %v12132_v30  ;;  %v6296_v41 = vpop.f32.mrf.mxu0  ;;  %v3158_v31 = vld [vmem:[%s20612_s3 + $0x830] sm:$0xff] }
 0x279   :  { %v16585_v4 = vadd.f32 %v6296_v41, %v6184_v62  ;;  %v12116_v30 = vcombine.high %v3154_v56, %v3158_v31  ;;  %v3146_v18 = vld [vmem:[%s20612_s3 + $0x7d0] sm:$0xff]  ;;  %v6194_v41 = vadd.f32 %v16289_v55, %v6081_v27  ;;  %v21056_v27 = vld [vmem:[#allocation9_spill] sm:$0xff] }
 0x27a   :  { %7038 = vmatpush1.bf16.msra.mxu1 %v12003_v63  ;;  %v6300_v39 = vpop.f32.mrf.mxu0  ;;  %v3150_v60 = vld [vmem:[%s20612_s3 + $0x7f0] sm:$0xff] }
 0x27b   :  { %7151 = vmatpush1.bf16.msra.mxu0 %v12131_v6  ;;  %7039 = vmatprep.subr.bf16.mxu1 %v11996_v2  ;;  %v16588_v12 = vadd.f32 %v6300_v39, %v16254_v35  ;;  %v3274_v35 = vld [vmem:[%s20612_s3 + $0xbd0] sm:$0xff]  ;;  %v12115_v2 = vcombine.low %v3154_v56, %v3158_v31  ;;  %v12108_v62 = vcombine.high %v3146_v18, %v3150_v60 }
 0x27c   :  { %6864 = vmatmul.mubr.bf16.gmra.mxu1 %v15882_v33  ;;  %7152 = vmatprep.subr.bf16.mxu0 %v12124_v7  ;;  %v6302_v50 = vpop.f32.mrf.mxu0  ;;  %v3278_v7 = vld [vmem:[%s20612_s3 + $0xbf0] sm:$0xff]  ;;  %v12107_v56 = vcombine.low %v3146_v18, %v3150_v60  ;;  %v21055_v60 = vld [vmem:[#allocation17_spill] sm:$0xff] }
 0x27d   :  { %6977 = vmatmul.mubr.bf16.gmra.mxu0 %v21053_v53  ;;  %6873 = vmatprep.mubr.bf16.mxu1 %v15919_v57  ;;  %v16609_v63 = vadd.f32 %v6302_v50, %v16269_v19  ;;  %v12236_v57 = vcombine.high %v3274_v35, %v3278_v7  ;;  %v3138_v23 = vld [vmem:[%s20612_s3 + $0x790] sm:$0xff] }
 0x27e   :  { %6986 = vmatprep.mubr.bf16.mxu0 %v21054_v15  ;;  %7040 = vmatpush1.bf16.msra.mxu1 %v11995_v14  ;;  %v6304_v6 = vpop.f32.mrf.mxu0  ;;  %v3142_v19 = vld [vmem:[%s20612_s3 + $0x7b0] sm:$0xff]  ;;  %v12235_v14 = vcombine.low %v3274_v35, %v3278_v7  ;;  %v6091_v7 = vadd.f32 %v16237_v13, %v16081_v17 }
 0x27f   :  { %7153 = vmatpush1.bf16.msra.mxu0 %v12123_v34  ;;  %7041 = vmatprep.subr.bf16.mxu1 %v11988_v48  ;;  %v16613_v39 = vadd.f32 %v6304_v6, %v16279_v44  ;;  %v3266_v49 = vld [vmem:[%s20612_s3 + $0xb90] sm:$0xff]  ;;  %v12100_v34 = vcombine.high %v3138_v23, %v3142_v19  ;;  %v12099_v6 = vcombine.low %v3138_v23, %v3142_v19 }
 0x280   :  { %7154 = vmatprep.subr.bf16.mxu0 %v12116_v30  ;;  %v6306_v11 = vpop.f32.mrf.mxu0  ;;  %v3270_v44 = vld [vmem:[%s20612_s3 + $0xbb0] sm:$0xff] }
 0x281   :  { %v16627_v55 = vadd.f32 %v6306_v11, %v6194_v41  ;;  %v12228_v30 = vcombine.high %v3266_v49, %v3270_v44  ;;  %v3130_v50 = vld [vmem:[%s20612_s3 + $0x750] sm:$0xff]  ;;  %v6204_v11 = vadd.f32 %v16335_v1, %v6091_v7 }
 0x282   :  { %7042 = vmatpush1.bf16.msra.mxu1 %v11987_v28  ;;  %v6310_v31 = vpop.f32.mrf.mxu0  ;;  %v3134_v18 = vld [vmem:[%s20612_s3 + $0x770] sm:$0xff] }
 0x283   :  { %7155 = vmatpush1.bf16.msra.mxu0 %v12115_v2  ;;  %7043 = vmatprep.subr.bf16.mxu1 %v12108_v62  ;;  %v16630_v48 = vadd.f32 %v6310_v31, %v16304_v47  ;;  %v3258_v47 = vld [vmem:[%s20612_s3 + $0xb50] sm:$0xff]  ;;  %v12227_v62 = vcombine.low %v3266_v49, %v3270_v44  ;;  %v12092_v41 = vcombine.high %v3130_v50, %v3134_v18 }
 0x284   :  { %6874 = vmatmul.mubr.bf16.gmra.mxu1 %v15922_v24  ;;  %7156 = vmatprep.subr.bf16.mxu0 %v12236_v57  ;;  %v6312_v35 = vpop.f32.mrf.mxu0  ;;  %v3262_v57 = vld [vmem:[%s20612_s3 + $0xb70] sm:$0xff]  ;;  %v12091_v49 = vcombine.low %v3130_v50, %v3134_v18  ;;  %v21057_v18 = vld [vmem:[#allocation18_spill] sm:$0xff] }
 0x285   :  { %6987 = vmatmul.mubr.bf16.gmra.mxu0 %v21055_v60  ;;  %6883 = vmatprep.mubr.bf16.mxu1 %v15959_v8  ;;  %v16651_v28 = vadd.f32 %v6312_v35, %v16317_v21  ;;  %v12220_v8 = vcombine.high %v3258_v47, %v3262_v57  ;;  %v3122_v13 = vld [vmem:[%s20612_s3 + $0x710] sm:$0xff] }
 0x286   :  { %6996 = vmatprep.mubr.bf16.mxu0 %v21056_v27  ;;  %7044 = vmatpush2.bf16.msra.mxu1 %v12107_v56  ;;  %v6314_v2 = vpop.f32.mrf.mxu0  ;;  %v3126_v21 = vld [vmem:[%s20612_s3 + $0x730] sm:$0xff]  ;;  %v12219_v56 = vcombine.low %v3258_v47, %v3262_v57  ;;  %v21058_v57 = vld [vmem:[#allocation66_spill] sm:$0xff] }
 0x287   :  { %7157 = vmatpush2.bf16.msra.mxu0 %v12235_v14  ;;  %7045 = vmatprep.subr.bf16.mxu1 %v12100_v34  ;;  %v16655_v31 = vadd.f32 %v6314_v2, %v16327_v25  ;;  %v3250_v19 = vld [vmem:[%s20612_s3 + $0xb10] sm:$0xff]  ;;  %v12084_v14 = vcombine.high %v3122_v13, %v3126_v21  ;;  %v6101_v7 = vadd.f32 %v21058_v57, %v16081_v17 }
 0x288   :  { %7158 = vmatprep.subr.bf16.mxu0 %v12228_v30  ;;  %v6316_v23 = vpop.f32.mrf.mxu0  ;;  %v3254_v25 = vld [vmem:[%s20612_s3 + $0xb30] sm:$0xff] }
 0x289   :  { %v16669_v1 = vadd.f32 %v6316_v23, %v6204_v11  ;;  %v12212_v30 = vcombine.high %v3250_v19, %v3254_v25  ;;  %v3114_v35 = vld [vmem:[%s20612_s3 + $0x6d0] sm:$0xff]  ;;  %v12211_v11 = vcombine.low %v3250_v19, %v3254_v25 }
 0x28a   :  { %7046 = vmatpush2.bf16.msra.mxu1 %v12099_v6  ;;  %v6320_v44 = vpop.f32.mrf.mxu0  ;;  %v3118_v50 = vld [vmem:[%s20612_s3 + $0x6f0] sm:$0xff]  ;;  %v21059_v6 = vld [vmem:[#allocation11_spill] sm:$0xff] }
 0x28b   :  { %7159 = vmatpush2.bf16.msra.mxu0 %v12227_v62  ;;  %7047 = vmatprep.subr.bf16.mxu1 %v12092_v41  ;;  %v16672_v34 = vadd.f32 %v6320_v44, %v16348_v54  ;;  %v3242_v54 = vld [vmem:[%s20612_s3 + $0xad0] sm:$0xff]  ;;  %v12083_v62 = vcombine.low %v3122_v13, %v3126_v21  ;;  %v12076_v23 = vcombine.high %v3114_v35, %v3118_v50  ;;  %v21060_v44 = vld [vmem:[#allocation69_spill] sm:$0xff] }
 0x28c   :  { %6884 = vmatmul.mubr.bf16.gmra.mxu1 %v15962_v20  ;;  %7160 = vmatprep.subr.bf16.mxu0 %v12220_v8  ;;  %v6322_v47 = vpop.f32.mrf.mxu0  ;;  %v3246_v8 = vld [vmem:[%s20612_s3 + $0xaf0] sm:$0xff] }
 0x28d   :  { %6997 = vmatmul.mubr.bf16.gmra.mxu0 %v21057_v18  ;;  %6893 = vmatprep.mubr.bf16.mxu1 %v15997_v42  ;;  %v16693_v2 = vadd.f32 %v6322_v47, %v16361_v16  ;;  %v6214_v42 = vadd.f32 %v21060_v44, %v6101_v7  ;;  %v21061_v18 = vld [vmem:[#allocation68_spill] sm:$0xff]  ;;  %v12204_v27 = vcombine.high %v3242_v54, %v3246_v8  ;;  %v21062_v47 = vld [vmem:[#allocation70_spill] sm:$0xff]  ;;  %v21063_v7 = vld [vmem:[#allocation63_spill] sm:$0xff] }
 0x28e   :  { %7006 = vmatprep.mubr.bf16.mxu0 %v21059_v6  ;;  %7048 = vmatpush2.bf16.msra.mxu1 %v12091_v49  ;;  %v6324_v41 = vpop.f32.mrf.mxu0  ;;  %v3106_v49 = vld [vmem:[%s20612_s3 + $0x690] sm:$0xff]  ;;  %v21068_v6 = vld [vmem:[#allocation71_spill] sm:$0xff] }
 0x28f   :  { %7161 = vmatpush2.bf16.msra.mxu0 %v12219_v56  ;;  %7049 = vmatprep.subr.bf16.mxu1 %v12084_v14  ;;  %v16697_v20 = vadd.f32 %v6324_v41, %v21061_v18  ;;  %v3110_v16 = vld [vmem:[%s20612_s3 + $0x6b0] sm:$0xff]  ;;  %v12075_v56 = vcombine.low %v3114_v35, %v3118_v50 }
 0x290   :  { %7162 = vmatprep.subr.bf16.mxu0 %v12212_v30  ;;  %v6326_v13 = vpop.f32.mrf.mxu0  ;;  %v3234_v21 = vld [vmem:[%s20612_s3 + $0xa90] sm:$0xff]  ;;  %v12203_v30 = vcombine.low %v3242_v54, %v3246_v8  ;;  %v12068_v18 = vcombine.high %v3106_v49, %v3110_v16 }
 0x291   :  { %v3238_v19 = vld [vmem:[%s20612_s3 + $0xab0] sm:$0xff]  ;;  %v16711_v25 = vadd.f32 %v6326_v13, %v6214_v42 }
 0x292   :  { %7050 = vmatpush2.bf16.msra.mxu1 %v12083_v62  ;;  %v6330_v14 = vpop.f32.mrf.mxu0  ;;  %v12196_v41 = vcombine.high %v3234_v21, %v3238_v19  ;;  %v3098_v44 = vld [vmem:[%s20612_s3 + $0x650] sm:$0xff]  ;;  %v21066_v62 = vld [vmem:[#allocation67_spill] sm:$0xff] }
 0x293   :  { %7163 = vmatpush2.bf16.msra.mxu0 %v12211_v11  ;;  %7051 = vmatprep.subr.bf16.mxu1 %v12076_v23  ;;  %v16714_v57 = vadd.f32 %v6330_v14, %v21062_v47  ;;  %v3102_v42 = vld [vmem:[%s20612_s3 + $0x670] sm:$0xff]  ;;  %v6111_v11 = vadd.f32 %v21066_v62, %v16081_v17  ;;  %v12067_v14 = vcombine.low %v3106_v49, %v3110_v16  ;;  %v21070_v62 = vld [vmem:[#allocation65_spill] sm:$0xff] }
 0x294   :  { %6894 = vmatmul.mubr.bf16.gmra.mxu1 %v21063_v7  ;;  %7164 = vmatprep.subr.bf16.mxu0 %v12204_v27  ;;  %v21064_v35 = vld [vmem:[#allocation16_spill] sm:$0xff]  ;;  %v6332_v54 = vpop.f32.mrf.mxu0 }
 0x295   :  { %7007 = vmatmul.mubr.bf16.gmra.mxu0 %v21064_v35  ;;  %v21065_v50 = vld [vmem:[#allocation64_spill] sm:$0xff]  ;;  %v16735_v13 = vadd.f32 %v6332_v54, %v16404_v26  ;;  %v12060_v35 = vcombine.high %v3098_v44, %v3102_v42  ;;  %v6224_v7 = vadd.f32 %v16420_v9, %v6111_v11 }
 0x296   :  { %6903 = vmatprep.mubr.bf16.mxu1 %v21065_v50  ;;  %v3226_v8 = vld [vmem:[%s20612_s3 + $0xa50] sm:$0xff]  ;;  %7052 = vmatpush2.bf16.msra.mxu1 %v12075_v56  ;;  %v6334_v47 = vpop.f32.mrf.mxu0  ;;  %v12195_v50 = vcombine.low %v3234_v21, %v3238_v19  ;;  %v12059_v21 = vcombine.low %v3098_v44, %v3102_v42  ;;  %v6233_v44 = vpop.f32.mrf.mxu1  ;;  %v21071_v42 = vld [vmem:[#allocation19_spill] sm:$0xff] }
 0x297   :  { %v3230_v27 = vld [vmem:[%s20612_s3 + $0xa70] sm:$0xff]  ;;  %7165 = vmatpush2.bf16.msra.mxu0 %v12203_v30  ;;  %7053 = vmatprep.subr.bf16.mxu1 %v12068_v18  ;;  %v16739_v60 = vadd.f32 %v6334_v47, %v21068_v6 }
 0x298   :  { %v21067_v23 = vld [vmem:[#allocation12_spill] sm:$0xff]  ;;  %7166 = vmatprep.subr.bf16.mxu0 %v12196_v41  ;;  %v12188_v24 = vcombine.high %v3226_v8, %v3230_v27  ;;  %v6336_v49 = vpop.f32.mrf.mxu0  ;;  %v12187_v30 = vcombine.low %v3226_v8, %v3230_v27  ;;  %v2955_v8 = vld [vmem:[%s20612_s3 + $0x1d8] sm:$0xff]  ;;  %v6121_v27 = vadd.f32 %v16453_v58, %v16081_v17 }
 0x299   :  { %7016 = vmatprep.mubr.bf16.mxu0 %v21067_v23  ;;  %v3090_v56 = vld [vmem:[%s20612_s3 + $0x610] sm:$0xff]  ;;  %v16753_v6 = vadd.f32 %v6336_v49, %v6224_v7 }
 0x29a   :  { %v3094_v26 = vld [vmem:[%s20612_s3 + $0x630] sm:$0xff]  ;;  %7054 = vmatpush2.bf16.msra.mxu1 %v12067_v14  ;;  %v6340_v19 = vpop.f32.mrf.mxu0 }
 0x29b   :  { %v3218_v16 = vld [vmem:[%s20612_s3 + $0xa10] sm:$0xff]  ;;  %7167 = vmatpush2.bf16.msra.mxu0 %v12195_v50  ;;  %7055 = vmatprep.subr.bf16.mxu1 %v12060_v35  ;;  %v12052_v18 = vcombine.high %v3090_v56, %v3094_v26  ;;  %v21072_v35 = vld [vmem:[#allocation2_spill] sm:$0xff] }
 0x29c   :  { %v3222_v9 = vld [vmem:[%s20612_s3 + $0xa30] sm:$0xff]  ;;  %6904 = vmatmul.mubr.bf16.gmra.mxu1 %v21070_v62  ;;  %7168 = vmatprep.subr.bf16.mxu0 %v12188_v24  ;;  %v6342_v50 = vpop.f32.mrf.mxu0  ;;  %v2959_v24 = vld [vmem:[%s20612_s3 + $0x1f8] sm:$0xff]  ;;  %v6234_v62 = vadd.f32 %v6233_v44, %v6121_v27 }
 0x29d   :  { %v21069_v41 = vld [vmem:[#allocation72_spill] sm:$0xff]  ;;  %v12180_v11 = vcombine.high %v3218_v16, %v3222_v9  ;;  %7017 = vmatmul.mubr.bf16.gmra.mxu0 %v21071_v42  ;;  %7059 = vmatprep.mubr.bf16.mxu1 %v21072_v35  ;;  %v16777_v49 = vadd.f32 %v6342_v50, %v16443_v43  ;;  %v12179_v35 = vcombine.low %v3218_v16, %v3222_v9  ;;  %v2943_v50 = vld [vmem:[%s20612_s3 + $0x178] sm:$0xff] }
 0x29e   :  { %v16756_v54 = vadd.f32 %v6340_v19, %v21069_v41  ;;  %v3338_v47 = vld [vmem:[%s20612_s3 + $0xdd0] sm:$0xff]  ;;  %7056 = vmatpush2.bf16.msra.mxu1 %v12059_v21  ;;  %v12051_v19 = vcombine.low %v3090_v56, %v3094_v26  ;;  %v6344_v41 = vpop.f32.mrf.mxu0  ;;  %v11918_v15 = vcombine.high %v2955_v8, %v2959_v24  ;;  %v2947_v56 = vld [vmem:[%s20612_s3 + $0x198] sm:$0xff] }
 0x29f   :  { %v3342_v7 = vld [vmem:[%s20612_s3 + $0xdf0] sm:$0xff]  ;;  %7169 = vmatpush2.bf16.msra.mxu0 %v12187_v30  ;;  %7057 = vmatprep.subr.bf16.mxu1 %v12052_v18  ;;  %v16780_v23 = vadd.f32 %v6344_v41, %v16445_v61  ;;  %v2951_v61 = vld [vmem:[%s20612_s3 + $0x1b8] sm:$0xff]  ;;  %v11917_v30 = vcombine.low %v2955_v8, %v2959_v24  ;;  %v21074_v18 = vld [vmem:[#allocation10_spill] sm:$0xff] }
 0x2a0   :  { %v21073_v14 = vld [vmem:[#allocation32_spill] sm:$0xff]  ;;  %v12300_v42 = vcombine.high %v3338_v47, %v3342_v7  ;;  %7170 = vmatprep.subr.bf16.mxu0 %v12180_v11  ;;  %v6346_v53 = vpop.f32.mrf.mxu0  ;;  %v12299_v9 = vcombine.low %v3338_v47, %v3342_v7  ;;  %v11910_v44 = vcombine.high %v2947_v56, %v2951_v61  ;;  %v21075_v7 = vld [vmem:[#allocation27_spill] sm:$0xff]  ;;  %v21077_v8 = vld [vmem:[#allocation33_spill] sm:$0xff] }
 0x2a1   :  { %7172 = vmatprep.mubr.bf16.mxu0 %v21073_v14  ;;  %v3330_v17 = vld [vmem:[%s20612_s3 + $0xd90] sm:$0xff]  ;;  %v16788_v58 = vadd.f32 %v6346_v53, %v6234_v62 }
 0x2a2   :  { %v3334_v43 = vld [vmem:[%s20612_s3 + $0xdb0] sm:$0xff]  ;;  %7058 = vmatpush2.bf16.msra.mxu1 %v12051_v19  ;;  %v6383_v26 = vpop.f32.mrf.mxu1  ;;  %v16796_v16 = vpop.f32.mrf.mxu0 }
 0x2a3   :  { %7171 = vmatpush2.bf16.msra.mxu0 %v12179_v35  ;;  %7253 = vmatprep.subr.bf16.mxu1 %v12300_v42  ;;  %v6384_v21 = vadd.f32 %v6383_v26, %v16462_v5  ;;  %v12292_v53 = vcombine.high %v3330_v17, %v3334_v43  ;;  %v3322_v35 = vld [vmem:[%s20612_s3 + $0xd50] sm:$0xff]  ;;  %v2939_v42 = vld [vmem:[%s20612_s3 + $0x158] sm:$0xff]  ;;  %v12291_v19 = vcombine.low %v3330_v17, %v3334_v43 }
 0x2a4   :  { %7366 = vmatprep.subr.bf16.mxu0 %v11918_v15  ;;  %v6385_v62 = vpop.f32.mrf.mxu1  ;;  %v16800_v11 = vpop.f32.mrf.mxu0  ;;  %v3326_v47 = vld [vmem:[%s20612_s3 + $0xd70] sm:$0xff] }
 0x2a5   :  { %7060 = vmatmul.mubr.bf16.vlgmr.msra.gmra.mxu1 %v21074_v18  ;;  %v21076_v5 = vld [vmem:[#allocation8_spill] sm:$0xff]  ;;  %v6386_v15 = vadd.f32 %v6385_v62, %v16483_v3  ;;  %v11909_v3 = vcombine.low %v2947_v56, %v2951_v61  ;;  %v12284_v26 = vcombine.high %v3322_v35, %v3326_v47  ;;  %v7818_v17 = vmax.f32 %v6384_v21, 0.0  ;;  %v2931_v56 = vld [vmem:[%s20612_s3 + $0x118] sm:$0xff] }
 0x2a6   :  { %7173 = vmatmul.mubr.bf16.vlgmr.msra.gmra.mxu0 %v21075_v7  ;;  %7069 = vmatprep.mubr.bf16.mxu1 %v21076_v5  ;;  %v6387_v24 = vpop.f32.mrf.mxu1  ;;  %v16818_v27 = vpop.f32.mrf.mxu0  ;;  %v11902_v7 = vcombine.high %v2939_v42, %v2943_v50  ;;  %v2935_v61 = vld [vmem:[%s20612_s3 + $0x138] sm:$0xff]  ;;  %v21079_v14 = vld [vmem:[#allocation4_spill] sm:$0xff] }
 0x2a7   :  { %7182 = vmatprep.mubr.bf16.mxu0 %v21077_v8  ;;  %7254 = vmatpush1.bf16.msra.mxu1 %v12299_v9  ;;  %v6388_v41 = vadd.f32 %v6387_v24, %v16487_v0  ;;  %v3314_v8 = vld [vmem:[%s20612_s3 + $0xd10] sm:$0xff]  ;;  %v11901_v24 = vcombine.low %v2939_v42, %v2943_v50  ;;  %v2927_v50 = vld [vmem:[%s20612_s3 + $0xf8] sm:$0xff] }
 0x2a8   :  { %7367 = vmatpush1.bf16.msra.mxu0 %v11917_v30  ;;  %7255 = vmatprep.subr.bf16.mxu1 %v12292_v53  ;;  %v6389_v62 = vpop.f32.mrf.mxu1  ;;  %v16821_v5 = vpop.f32.mrf.mxu0  ;;  %v3318_v9 = vld [vmem:[%s20612_s3 + $0xd30] sm:$0xff] }
 0x2a9   :  { %7368 = vmatprep.subr.bf16.mxu0 %v11910_v44  ;;  %v7826_v43 = vmax.f32 %v6388_v41, 0.0  ;;  %v6390_v0 = vadd.f32 %v6389_v62, %v16501_v52  ;;  %v12283_v44 = vcombine.low %v3322_v35, %v3326_v47  ;;  %v12276_v41 = vcombine.high %v3314_v8, %v3318_v9  ;;  %v3306_v35 = vld [vmem:[%s20612_s3 + $0xcd0] sm:$0xff] }
 0x2aa   :  { %v6393_v30 = vpop.f32.mrf.mxu1  ;;  %v16836_v53 = vpop.f32.mrf.mxu0  ;;  %v7819_v62 = vmax.f32 %v6386_v15, 0.0  ;;  %v3310_v47 = vld [vmem:[%s20612_s3 + $0xcf0] sm:$0xff] }
 0x2ab   :  { %7256 = vmatpush1.bf16.msra.mxu1 %v12291_v19  ;;  %v16838_v18 = vpack.c.bf16 %v7826_v43, %v7818_v17  ;;  %v7827_v21 = vmax.f32 %v6390_v0, 0.0  ;;  %v6394_v52 = vadd.f32 %v6393_v30, %v16504_v10  ;;  %v11894_v19 = vcombine.high %v2931_v56, %v2935_v61  ;;  %v21080_v42 = vld [vmem:[#allocation36_spill] sm:$0xff]  ;;  %v21081_v10 = vld [vmem:[#allocation13_spill] sm:$0xff] }
 0x2ac   :  { %7369 = vmatpush1.bf16.msra.mxu0 %v11909_v3  ;;  %7257 = vmatprep.subr.bf16.mxu1 %v12284_v26  ;;  %v6395_v33 = vpop.f32.mrf.mxu1  ;;  %v16842_v46 = vpop.f32.mrf.mxu0  ;;  %v21082_v3 = vld [vmem:[#allocation29_spill] sm:$0xff]  ;;  %v12275_v43 = vcombine.low %v3314_v8, %v3318_v9  ;;  %v12268_v30 = vcombine.high %v3306_v35, %v3310_v47  ;;  %v3302_v8 = vld [vmem:[%s20612_s3 + $0xcb0] sm:$0xff] }
 0x2ad   :  { %21078 = vst [vmem:[#allocation35_spill] sm:$0xff] %v16838_v18  ;;  %7070 = vmatmul.mubr.bf16.gmra.mxu1 %v21079_v14  ;;  %7370 = vmatprep.subr.bf16.mxu0 %v11902_v7  ;;  %v6396_v15 = vadd.f32 %v6395_v33, %v16525_v32  ;;  %v2923_v7 = vld [vmem:[%s20612_s3 + $0xd8] sm:$0xff]  ;;  %v16862_v0 = vpack.c.bf16 %v7827_v21, %v7819_v62  ;;  %v7834_v9 = vmax.f32 %v6394_v52, 0.0 }
 0x2ae   :  { %7183 = vmatmul.mubr.bf16.gmra.mxu0 %v21080_v42  ;;  %7079 = vmatprep.mubr.bf16.mxu1 %v21081_v10  ;;  %v6397_v26 = vpop.f32.mrf.mxu1  ;;  %v16860_v17 = vpop.f32.mrf.mxu0  ;;  %v11893_v32 = vcombine.low %v2931_v56, %v2935_v61  ;;  %v11886_v42 = vcombine.high %v2923_v7, %v2927_v50  ;;  %v2915_v56 = vld [vmem:[%s20612_s3 + $0x98] sm:$0xff]  ;;  %v12267_v62 = vcombine.low %v3306_v35, %v3310_v47  ;;  %v3290_v35 = vld [vmem:[%s20612_s3 + $0xc50] sm:$0xff] }
 0x2af   :  { %7192 = vmatprep.mubr.bf16.mxu0 %v21082_v3  ;;  %7258 = vmatpush1.bf16.msra.mxu1 %v12283_v44  ;;  %21083 = vst [vmem:[#allocation38_spill] sm:$0xff] %v16862_v0  ;;  %v6398_v33 = vadd.f32 %v6397_v26, %v16529_v51  ;;  %v3298_v44 = vld [vmem:[%s20612_s3 + $0xc90] sm:$0xff]  ;;  %v2919_v61 = vld [vmem:[%s20612_s3 + $0xb8] sm:$0xff]  ;;  %v21085_v0 = vld [vmem:[#allocation15_spill] sm:$0xff] }
 0x2b0   :  { %7371 = vmatpush1.bf16.msra.mxu0 %v11901_v24  ;;  %7259 = vmatprep.subr.bf16.mxu1 %v12276_v41  ;;  %v6399_v18 = vpop.f32.mrf.mxu1  ;;  %v16865_v10 = vpop.f32.mrf.mxu0  ;;  %v3294_v47 = vld [vmem:[%s20612_s3 + $0xc70] sm:$0xff] }
 0x2b1   :  { %7372 = vmatprep.subr.bf16.mxu0 %v11894_v19  ;;  %v7842_v24 = vmax.f32 %v6398_v33, 0.0  ;;  %v6400_v51 = vadd.f32 %v6399_v18, %v16543_v59  ;;  %v11885_v19 = vcombine.low %v2923_v7, %v2927_v50  ;;  %v12260_v18 = vcombine.high %v3298_v44, %v3302_v8  ;;  %v21086_v7 = vld [vmem:[#allocation40_spill] sm:$0xff]  ;;  %v2911_v50 = vld [vmem:[%s20612_s3 + $0x78] sm:$0xff] }
 0x2b2   :  { %v6403_v21 = vpop.f32.mrf.mxu1  ;;  %v16880_v41 = vpop.f32.mrf.mxu0  ;;  %v7835_v33 = vmax.f32 %v6396_v15, 0.0 }
 0x2b3   :  { %7260 = vmatpush1.bf16.msra.mxu1 %v12275_v43  ;;  %v16882_v26 = vpack.c.bf16 %v7842_v24, %v7834_v9  ;;  %v7843_v52 = vmax.f32 %v6400_v51, 0.0  ;;  %v6404_v59 = vadd.f32 %v6403_v21, %v16546_v29  ;;  %v11878_v43 = vcombine.high %v2915_v56, %v2919_v61  ;;  %v21087_v29 = vld [vmem:[#allocation14_spill] sm:$0xff] }
 0x2b4   :  { %7373 = vmatpush1.bf16.msra.mxu0 %v11893_v32  ;;  %7261 = vmatprep.subr.bf16.mxu1 %v12268_v30  ;;  %v6405_v3 = vpop.f32.mrf.mxu1  ;;  %v16886_v14 = vpop.f32.mrf.mxu0  ;;  %v21088_v32 = vld [vmem:[#allocation41_spill] sm:$0xff]  ;;  %v12259_v24 = vcombine.low %v3298_v44, %v3302_v8  ;;  %v12252_v21 = vcombine.high %v3290_v35, %v3294_v47  ;;  %v3286_v44 = vld [vmem:[%s20612_s3 + $0xc30] sm:$0xff] }
 0x2b5   :  { %21084 = vst [vmem:[#allocation55_spill] sm:$0xff] %v16882_v26  ;;  %7080 = vmatmul.mubr.bf16.gmra.mxu1 %v21085_v0  ;;  %7374 = vmatprep.subr.bf16.mxu0 %v11886_v42  ;;  %v6406_v15 = vadd.f32 %v6405_v3, %v16567_v40  ;;  %v2907_v42 = vld [vmem:[%s20612_s3 + $0x58] sm:$0xff]  ;;  %v16906_v51 = vpack.c.bf16 %v7843_v52, %v7835_v33  ;;  %v7850_v8 = vmax.f32 %v6404_v59, 0.0 }
 0x2b6   :  { %7193 = vmatmul.mubr.bf16.gmra.mxu0 %v21086_v7  ;;  %7089 = vmatprep.mubr.bf16.mxu1 %v21087_v29  ;;  %v6407_v30 = vpop.f32.mrf.mxu1  ;;  %v16904_v9 = vpop.f32.mrf.mxu0  ;;  %v11877_v3 = vcombine.low %v2915_v56, %v2919_v61  ;;  %v11870_v7 = vcombine.high %v2907_v42, %v2911_v50  ;;  %v2899_v56 = vld [vmem:[%s20612_s3 + $0x18] sm:$0xff]  ;;  %v12251_v33 = vcombine.low %v3290_v35, %v3294_v47  ;;  %v3402_v35 = vld [vmem:[%s20612_s3 + $0xfd0] sm:$0xff] }
 0x2b7   :  { %7202 = vmatprep.mubr.bf16.mxu0 %v21088_v32  ;;  %7262 = vmatpush1.bf16.msra.mxu1 %v12267_v62  ;;  %21089 = vst [vmem:[#allocation66_spill] sm:$0xff] %v16906_v51  ;;  %v6408_v40 = vadd.f32 %v6407_v30, %v16571_v38  ;;  %v3282_v62 = vld [vmem:[%s20612_s3 + $0xc10] sm:$0xff]  ;;  %v2903_v61 = vld [vmem:[%s20612_s3 + $0x38] sm:$0xff] }
 0x2b8   :  { %7375 = vmatpush1.bf16.msra.mxu0 %v11885_v19  ;;  %7263 = vmatprep.subr.bf16.mxu1 %v12260_v18  ;;  %v6409_v26 = vpop.f32.mrf.mxu1  ;;  %v16909_v29 = vpop.f32.mrf.mxu0  ;;  %v21091_v51 = vld [vmem:[#allocation28_spill] sm:$0xff] }
 0x2b9   :  { %7376 = vmatprep.subr.bf16.mxu0 %v11878_v43  ;;  %v7858_v19 = vmax.f32 %v6408_v40, 0.0  ;;  %v6410_v38 = vadd.f32 %v6409_v26, %v16585_v4  ;;  %v11869_v43 = vcombine.low %v2907_v42, %v2911_v50  ;;  %v12244_v26 = vcombine.high %v3282_v62, %v3286_v44  ;;  %v3406_v47 = vld [vmem:[%s20612_s3 + $0xff0] sm:$0xff]  ;;  %v21092_v42 = vld [vmem:[#allocation42_spill] sm:$0xff]  ;;  %v3023_v50 = vld [vmem:[%s20612_s3 + $0x3f8] sm:$0xff] }
 0x2ba   :  { %v6413_v52 = vpop.f32.mrf.mxu1  ;;  %v16924_v18 = vpop.f32.mrf.mxu0  ;;  %v7851_v40 = vmax.f32 %v6406_v15, 0.0 }
 0x2bb   :  { %7264 = vmatpush1.bf16.msra.mxu1 %v12259_v24  ;;  %v16926_v30 = vpack.c.bf16 %v7858_v19, %v7850_v8  ;;  %v7859_v59 = vmax.f32 %v6410_v38, 0.0  ;;  %v6414_v4 = vadd.f32 %v6413_v52, %v16588_v12  ;;  %v11862_v24 = vcombine.high %v2899_v56, %v2903_v61  ;;  %v21093_v12 = vld [vmem:[#allocation21_spill] sm:$0xff] }
 0x2bc   :  { %7377 = vmatpush1.bf16.msra.mxu0 %v11877_v3  ;;  %7265 = vmatprep.subr.bf16.mxu1 %v12252_v21  ;;  %v6415_v32 = vpop.f32.mrf.mxu1  ;;  %v16930_v0 = vpop.f32.mrf.mxu0  ;;  %v21094_v3 = vld [vmem:[#allocation43_spill] sm:$0xff]  ;;  %v12243_v19 = vcombine.low %v3282_v62, %v3286_v44  ;;  %v12364_v52 = vcombine.high %v3402_v35, %v3406_v47  ;;  %v3398_v62 = vld [vmem:[%s20612_s3 + $0xfb0] sm:$0xff] }
 0x2bd   :  { %21090 = vst [vmem:[#allocation69_spill] sm:$0xff] %v16926_v30  ;;  %7090 = vmatmul.mubr.bf16.gmra.mxu1 %v21091_v51  ;;  %7378 = vmatprep.subr.bf16.mxu0 %v11870_v7  ;;  %v6416_v15 = vadd.f32 %v6415_v32, %v16609_v63  ;;  %v3019_v7 = vld [vmem:[%s20612_s3 + $0x3d8] sm:$0xff]  ;;  %v16950_v38 = vpack.c.bf16 %v7859_v59, %v7851_v40  ;;  %v7866_v44 = vmax.f32 %v6414_v4, 0.0 }
 0x2be   :  { %7203 = vmatmul.mubr.bf16.gmra.mxu0 %v21092_v42  ;;  %7099 = vmatprep.mubr.bf16.mxu1 %v21093_v12  ;;  %v6417_v21 = vpop.f32.mrf.mxu1  ;;  %v16948_v8 = vpop.f32.mrf.mxu0  ;;  %v11861_v32 = vcombine.low %v2899_v56, %v2903_v61  ;;  %v11982_v42 = vcombine.high %v3019_v7, %v3023_v50  ;;  %v3011_v56 = vld [vmem:[%s20612_s3 + $0x398] sm:$0xff]  ;;  %v12363_v40 = vcombine.low %v3402_v35, %v3406_v47  ;;  %v3386_v35 = vld [vmem:[%s20612_s3 + $0xf50] sm:$0xff] }
 0x2bf   :  { %7212 = vmatprep.mubr.bf16.mxu0 %v21094_v3  ;;  %7266 = vmatpush1.bf16.msra.mxu1 %v12251_v33  ;;  %21095 = vst [vmem:[#allocation68_spill] sm:$0xff] %v16950_v38  ;;  %v6418_v63 = vadd.f32 %v6417_v21, %v16613_v39  ;;  %v3394_v33 = vld [vmem:[%s20612_s3 + $0xf90] sm:$0xff]  ;;  %v3015_v61 = vld [vmem:[%s20612_s3 + $0x3b8] sm:$0xff] }
 0x2c0   :  { %7379 = vmatpush1.bf16.msra.mxu0 %v11869_v43  ;;  %7267 = vmatprep.subr.bf16.mxu1 %v12244_v26  ;;  %v6419_v30 = vpop.f32.mrf.mxu1  ;;  %v16953_v12 = vpop.f32.mrf.mxu0  ;;  %v21097_v38 = vld [vmem:[#allocation25_spill] sm:$0xff]  ;;  %v3390_v47 = vld [vmem:[%s20612_s3 + $0xf70] sm:$0xff] }
 0x2c1   :  { %7380 = vmatprep.subr.bf16.mxu0 %v11862_v24  ;;  %v7874_v43 = vmax.f32 %v6418_v63, 0.0  ;;  %v6420_v39 = vadd.f32 %v6419_v30, %v16627_v55  ;;  %v11981_v24 = vcombine.low %v3019_v7, %v3023_v50  ;;  %v12356_v30 = vcombine.high %v3394_v33, %v3398_v62  ;;  %v21099_v7 = vld [vmem:[#allocation22_spill] sm:$0xff]  ;;  %v3007_v50 = vld [vmem:[%s20612_s3 + $0x378] sm:$0xff] }
 0x2c2   :  { %v6423_v59 = vpop.f32.mrf.mxu1  ;;  %v16968_v26 = vpop.f32.mrf.mxu0  ;;  %v7867_v63 = vmax.f32 %v6416_v15, 0.0  ;;  %v21098_v15 = vld [vmem:[#allocation44_spill] sm:$0xff] }
 0x2c3   :  { %7268 = vmatpush1.bf16.msra.mxu1 %v12243_v19  ;;  %v16970_v21 = vpack.c.bf16 %v7874_v43, %v7866_v44  ;;  %v7875_v4 = vmax.f32 %v6420_v39, 0.0  ;;  %v6424_v55 = vadd.f32 %v6423_v59, %v16630_v48  ;;  %v11974_v19 = vcombine.high %v3011_v56, %v3015_v61  ;;  %v3003_v48 = vld [vmem:[%s20612_s3 + $0x358] sm:$0xff]  ;;  %v16997_v39 = vld [vmem:[%s20612_s3 + $0xf10] sm:$0xff] }
 0x2c4   :  { %7381 = vmatpush1.bf16.msra.mxu0 %v11861_v32  ;;  %7269 = vmatprep.subr.bf16.mxu1 %v12364_v52  ;;  %v6425_v3 = vpop.f32.mrf.mxu1  ;;  %v16974_v51 = vpop.f32.mrf.mxu0  ;;  %v21100_v32 = vld [vmem:[#allocation45_spill] sm:$0xff]  ;;  %v12355_v43 = vcombine.low %v3394_v33, %v3398_v62  ;;  %v11966_v62 = vcombine.high %v3003_v48, %v3007_v50 }
 0x2c5   :  { %21096 = vst [vmem:[#allocation70_spill] sm:$0xff] %v16970_v21  ;;  %7100 = vmatmul.mubr.bf16.gmra.mxu1 %v21097_v38  ;;  %7382 = vmatprep.subr.bf16.mxu0 %v11982_v42  ;;  %v6426_v42 = vadd.f32 %v6425_v3, %v16651_v28  ;;  %v16999_v59 = vpack.c.bf16 %v7875_v4, %v7867_v63  ;;  %v2995_v4 = vld [vmem:[%s20612_s3 + $0x318] sm:$0xff] }
 0x2c6   :  { %7213 = vmatmul.mubr.bf16.gmra.mxu0 %v21098_v15  ;;  %7109 = vmatprep.mubr.bf16.mxu1 %v21099_v7  ;;  %v6427_v52 = vpop.f32.mrf.mxu1  ;;  %v16992_v44 = vpop.f32.mrf.mxu0  ;;  %v11973_v3 = vcombine.low %v3011_v56, %v3015_v61  ;;  %v12348_v21 = vcombine.high %v3386_v35, %v3390_v47 }
 0x2c7   :  { %7222 = vmatprep.mubr.bf16.mxu0 %v21100_v32  ;;  %7270 = vmatpush2.bf16.msra.mxu1 %v12363_v40  ;;  %21101 = vst [vmem:[#allocation67_spill] sm:$0xff] %v16999_v59  ;;  %v6428_v28 = vadd.f32 %v6427_v52, %v16655_v31  ;;  %v3382_v40 = vld [vmem:[%s20612_s3 + $0xf30] sm:$0xff]  ;;  %v2999_v31 = vld [vmem:[%s20612_s3 + $0x338] sm:$0xff]  ;;  %v11965_v52 = vcombine.low %v3003_v48, %v3007_v50  ;;  %v21105_v50 = vld [vmem:[#allocation30_spill] sm:$0xff] }
 0x2c8   :  { %7383 = vmatpush2.bf16.msra.mxu0 %v11981_v24  ;;  %7271 = vmatprep.subr.bf16.mxu1 %v12356_v30  ;;  %v6429_v32 = vpop.f32.mrf.mxu1  ;;  %v17005_v33 = vpop.f32.mrf.mxu0  ;;  %v7882_v24 = vmax.f32 %v6424_v55, 0.0  ;;  %v12340_v38 = vcombine.high %v16997_v39, %v3382_v40  ;;  %v3370_v55 = vld [vmem:[%s20612_s3 + $0xed0] sm:$0xff] }
 0x2c9   :  { %7384 = vmatprep.subr.bf16.mxu0 %v11974_v19  ;;  %v7890_v56 = vmax.f32 %v6428_v28, 0.0  ;;  %v6430_v61 = vadd.f32 %v6429_v32, %v16669_v1  ;;  %v12347_v19 = vcombine.low %v3386_v35, %v3390_v47  ;;  %v7883_v1 = vmax.f32 %v6426_v42, 0.0  ;;  %v21103_v32 = vld [vmem:[#allocation23_spill] sm:$0xff]  ;;  %v3374_v48 = vld [vmem:[%s20612_s3 + $0xef0] sm:$0xff]  ;;  %v2991_v28 = vld [vmem:[%s20612_s3 + $0x2f8] sm:$0xff] }
 0x2ca   :  { %v6433_v30 = vpop.f32.mrf.mxu1  ;;  %v17014_v63 = vpop.f32.mrf.mxu0  ;;  %v11958_v47 = vcombine.high %v2995_v4, %v2999_v31 }
 0x2cb   :  { %7272 = vmatpush2.bf16.msra.mxu1 %v12355_v43  ;;  %v17016_v59 = vpack.c.bf16 %v7890_v56, %v7882_v24  ;;  %v7891_v7 = vmax.f32 %v6430_v61, 0.0  ;;  %v6434_v15 = vadd.f32 %v6433_v30, %v16672_v34  ;;  %v2987_v34 = vld [vmem:[%s20612_s3 + $0x2d8] sm:$0xff]  ;;  %v12339_v56 = vcombine.low %v16997_v39, %v3382_v40  ;;  %v17045_v61 = vld [vmem:[%s20612_s3 + $0xe90] sm:$0xff] }
 0x2cc   :  { %7385 = vmatpush2.bf16.msra.mxu0 %v11973_v3  ;;  %7273 = vmatprep.subr.bf16.mxu1 %v12348_v21  ;;  %v6435_v43 = vpop.f32.mrf.mxu1  ;;  %v17024_v35 = vpop.f32.mrf.mxu0  ;;  %v21104_v21 = vld [vmem:[#allocation46_spill] sm:$0xff]  ;;  %v21106_v3 = vld [vmem:[#allocation47_spill] sm:$0xff]  ;;  %v11950_v40 = vcombine.high %v2987_v34, %v2991_v28 }
 0x2cd   :  { %21102 = vst [vmem:[#allocation71_spill] sm:$0xff] %v17016_v59  ;;  %7110 = vmatmul.mubr.bf16.gmra.mxu1 %v21103_v32  ;;  %7386 = vmatprep.subr.bf16.mxu0 %v11966_v62  ;;  %v6436_v42 = vadd.f32 %v6435_v43, %v16693_v2  ;;  %v17047_v30 = vpack.c.bf16 %v7891_v7, %v7883_v1  ;;  %v2979_v7 = vld [vmem:[%s20612_s3 + $0x298] sm:$0xff] }
 0x2ce   :  { %7223 = vmatmul.mubr.bf16.gmra.mxu0 %v21104_v21  ;;  %7119 = vmatprep.mubr.bf16.mxu1 %v21105_v50  ;;  %v6437_v62 = vpop.f32.mrf.mxu1  ;;  %v17039_v24 = vpop.f32.mrf.mxu0  ;;  %v11957_v43 = vcombine.low %v2995_v4, %v2999_v31  ;;  %v12332_v59 = vcombine.high %v3370_v55, %v3374_v48 }
 0x2cf   :  { %7232 = vmatprep.mubr.bf16.mxu0 %v21106_v3  ;;  %7274 = vmatpush2.bf16.msra.mxu1 %v12347_v19  ;;  %21107 = vst [vmem:[#allocation72_spill] sm:$0xff] %v17047_v30  ;;  %v6438_v2 = vadd.f32 %v6437_v62, %v16697_v20  ;;  %v3366_v19 = vld [vmem:[%s20612_s3 + $0xeb0] sm:$0xff]  ;;  %v2983_v20 = vld [vmem:[%s20612_s3 + $0x2b8] sm:$0xff]  ;;  %v11949_v62 = vcombine.low %v2987_v34, %v2991_v28 }
 0x2d0   :  { %7387 = vmatpush2.bf16.msra.mxu0 %v11965_v52  ;;  %7275 = vmatprep.subr.bf16.mxu1 %v12340_v38  ;;  %v6439_v3 = vpop.f32.mrf.mxu1  ;;  %v17053_v39 = vpop.f32.mrf.mxu0  ;;  %v7898_v38 = vmax.f32 %v6434_v15, 0.0  ;;  %v12324_v32 = vcombine.high %v17045_v61, %v3366_v19  ;;  %v3354_v15 = vld [vmem:[%s20612_s3 + $0xe50] sm:$0xff] }
 0x2d1   :  { %7388 = vmatprep.subr.bf16.mxu0 %v11958_v47  ;;  %v7906_v4 = vmax.f32 %v6438_v2, 0.0  ;;  %v6440_v31 = vadd.f32 %v6439_v3, %v16711_v25  ;;  %v12331_v47 = vcombine.low %v3370_v55, %v3374_v48  ;;  %v7899_v25 = vmax.f32 %v6436_v42, 0.0  ;;  %v21109_v3 = vld [vmem:[#allocation20_spill] sm:$0xff]  ;;  %v2975_v2 = vld [vmem:[%s20612_s3 + $0x278] sm:$0xff] }
 0x2d2   :  { %v6443_v52 = vpop.f32.mrf.mxu1  ;;  %v17062_v1 = vpop.f32.mrf.mxu0  ;;  %v11942_v48 = vcombine.high %v2979_v7, %v2983_v20  ;;  %v3358_v34 = vld [vmem:[%s20612_s3 + $0xe70] sm:$0xff] }
 0x2d3   :  { %7276 = vmatpush2.bf16.msra.mxu1 %v12339_v56  ;;  %v17064_v30 = vpack.c.bf16 %v7906_v4, %v7898_v38  ;;  %v7907_v50 = vmax.f32 %v6440_v31, 0.0  ;;  %v6444_v21 = vadd.f32 %v6443_v52, %v16714_v57  ;;  %v2971_v57 = vld [vmem:[%s20612_s3 + $0x258] sm:$0xff]  ;;  %v21111_v28 = vld [vmem:[#allocation24_spill] sm:$0xff]  ;;  %v12323_v4 = vcombine.low %v17045_v61, %v3366_v19 }
 0x2d4   :  { %7389 = vmatpush2.bf16.msra.mxu0 %v11957_v43  ;;  %7277 = vmatprep.subr.bf16.mxu1 %v12332_v59  ;;  %v6445_v56 = vpop.f32.mrf.mxu1  ;;  %v17072_v55 = vpop.f32.mrf.mxu0  ;;  %v21110_v59 = vld [vmem:[#allocation48_spill] sm:$0xff]  ;;  %v21112_v43 = vld [vmem:[#allocation49_spill] sm:$0xff]  ;;  %v11934_v19 = vcombine.high %v2971_v57, %v2975_v2 }
 0x2d5   :  { %21108 = vst [vmem:[#allocation73_spill] sm:$0xff] %v17064_v30  ;;  %7120 = vmatmul.mubr.bf16.gmra.mxu1 %v21109_v3  ;;  %7390 = vmatprep.subr.bf16.mxu0 %v11950_v40  ;;  %v6446_v42 = vadd.f32 %v6445_v56, %v16735_v13  ;;  %v17093_v31 = vld [vmem:[%s20612_s3 + $0xe10] sm:$0xff]  ;;  %v17095_v52 = vpack.c.bf16 %v7907_v50, %v7899_v25  ;;  %v2963_v50 = vld [vmem:[%s20612_s3 + $0x218] sm:$0xff] }
 0x2d6   :  { %7233 = vmatmul.mubr.bf16.gmra.mxu0 %v21110_v59  ;;  %7129 = vmatprep.mubr.bf16.mxu1 %v21111_v28  ;;  %v6447_v40 = vpop.f32.mrf.mxu1  ;;  %v17087_v38 = vpop.f32.mrf.mxu0  ;;  %v11941_v56 = vcombine.low %v2979_v7, %v2983_v20  ;;  %v12316_v30 = vcombine.high %v3354_v15, %v3358_v34 }
 0x2d7   :  { %7242 = vmatprep.mubr.bf16.mxu0 %v21112_v43  ;;  %7278 = vmatpush2.bf16.msra.mxu1 %v12331_v47  ;;  %21113 = vst [vmem:[#allocation74_spill] sm:$0xff] %v17095_v52  ;;  %v6448_v13 = vadd.f32 %v6447_v40, %v16739_v60  ;;  %v3350_v47 = vld [vmem:[%s20612_s3 + $0xe30] sm:$0xff]  ;;  %v2967_v60 = vld [vmem:[%s20612_s3 + $0x238] sm:$0xff]  ;;  %v11933_v40 = vcombine.low %v2971_v57, %v2975_v2  ;;  %v21117_v2 = vld [vmem:[#allocation7_spill] sm:$0xff] }
 0x2d8   :  { %7391 = vmatpush2.bf16.msra.mxu0 %v11949_v62  ;;  %7279 = vmatprep.subr.bf16.mxu1 %v12324_v32  ;;  %v6449_v43 = vpop.f32.mrf.mxu1  ;;  %v17101_v61 = vpop.f32.mrf.mxu0  ;;  %v7914_v32 = vmax.f32 %v6444_v21, 0.0  ;;  %v12308_v3 = vcombine.high %v17093_v31, %v3350_v47  ;;  %v17119_v21 = vld [vmem:[%s20612_s3 + $0x5d8] sm:$0xff]  ;;  %v11926_v57 = vcombine.high %v2963_v50, %v2967_v60 }
 0x2d9   :  { %7392 = vmatprep.subr.bf16.mxu0 %v11942_v48  ;;  %v7922_v7 = vmax.f32 %v6448_v13, 0.0  ;;  %v6450_v20 = vadd.f32 %v6449_v43, %v16753_v6  ;;  %v12315_v48 = vcombine.low %v3354_v15, %v3358_v34  ;;  %v7915_v6 = vmax.f32 %v6446_v42, 0.0  ;;  %v21115_v43 = vld [vmem:[#allocation31_spill] sm:$0xff]  ;;  %v13122_v42 = vld [vmem:[%s20614_s4] sm:$0xff] }
 0x2da   :  { %v6453_v62 = vpop.f32.mrf.mxu1  ;;  %v17110_v25 = vpop.f32.mrf.mxu0 }
 0x2db   :  { %7280 = vmatpush2.bf16.msra.mxu1 %v12323_v4  ;;  %v17112_v52 = vpack.c.bf16 %v7922_v7, %v7914_v32  ;;  %v7923_v28 = vmax.f32 %v6450_v20, 0.0  ;;  %v6454_v59 = vadd.f32 %v6453_v62, %v16756_v54  ;;  %v17127_v54 = vld [vmem:[%s20612_s3 + $0x5f8] sm:$0xff]  ;;  %v21118_v4 = vsub.s32 2, %v21117_v2 }
 0x2dc   :  { %7393 = vmatpush2.bf16.msra.mxu0 %v11941_v56  ;;  %7281 = vmatprep.subr.bf16.mxu1 %v12316_v30  ;;  %v6455_v15 = vpop.f32.mrf.mxu1  ;;  %v17122_v34 = vpop.f32.mrf.mxu0  ;;  %v17132_v30 = vld [vmem:[%s20612_s3 + $0x9d8] sm:$0xff]  ;;  %v21119_v56 = vld [vmem:[#allocation50_spill] sm:$0xff]  ;;  %v21121_v20 = vsub.s32 3, %v21117_v2  ;;  %v12046_v2 = vcombine.high %v17119_v21, %v17127_v54 }
 0x2dd   :  { %21114 = vst [vmem:[#allocation75_spill] sm:$0xff] %v17112_v52  ;;  %7130 = vmatmul.mubr.bf16.gmra.mxu1 %v21115_v43  ;;  %7394 = vmatprep.subr.bf16.mxu0 %v11934_v19  ;;  %21116 = vst [vmem:[#allocation76_spill] sm:$0xff] %v17122_v34  ;;  %v17139_v13 = vrot.slane %v13122_v42, %v21118_v4  ;;  %v21120_v19 = vld [vmem:[#allocation51_spill] sm:$0xff]  ;;  %v6456_v32 = vadd.f32 %v6455_v15, %v16777_v49  ;;  %v17147_v7 = vld [vmem:[%s20612_s3 + $0x9f8] sm:$0xff] }
 0x2de   :  { %7243 = vmatmul.mubr.bf16.gmra.mxu0 %v21119_v56  ;;  %7285 = vmatprep.mubr.bf16.mxu1 %v21120_v19  ;;  %v17151_v62 = vrot.slane %v13122_v42, %v21121_v20  ;;  %v21122_v52 = vld [vmem:[#allocation26_spill] sm:$0xff]  ;;  %v6457_v4 = vpop.f32.mrf.mxu1  ;;  %v17154_v43 = vpop.f32.mrf.mxu0  ;;  %v12307_v56 = vcombine.low %v17093_v31, %v3350_v47  ;;  %v17157_v19 = vpack.c.bf16 %v7923_v28, %v7915_v6  ;;  %v17184_v47 = vld [vmem:[%s20612_s3 + $0x9b8] sm:$0xff] }
 0x2df   :  { %7282 = vmatpush2.bf16.msra.mxu1 %v12315_v48  ;;  %7398 = vmatprep.mubr.bf16.mxu0 %v21122_v52  ;;  %21123 = vst [vmem:[#allocation26_spill] sm:$0xff] %v17154_v43  ;;  %v6458_v49 = vadd.f32 %v6457_v4, %v16780_v23  ;;  %v11925_v15 = vcombine.low %v2963_v50, %v2967_v60  ;;  %v17165_v48 = vld [vmem:[%s20612_s3 + $0x598] sm:$0xff]  ;;  %v7930_v60 = vmax.f32 %v6454_v59, 0.0  ;;  %v7931_v4 = vmax.f32 %v6456_v32, 0.0 }
 0x2e0   :  { %21124 = vst [vmem:[#allocation77_spill] sm:$0xff] %v17157_v19  ;;  %7395 = vmatpush2.bf16.msra.mxu0 %v11933_v40  ;;  %7283 = vmatprep.subr.bf16.mxu1 %v12308_v3  ;;  %v17170_v52 = vld [vmem:[%s20612_s3 + $0x5b8] sm:$0xff]  ;;  %v6459_v28 = vpop.f32.mrf.mxu1  ;;  %v17172_v31 = vpop.f32.mrf.mxu0  ;;  %v12174_v23 = vcombine.high %v17132_v30, %v17147_v7  ;;  %v6497_v50 = vadd.f32 %v16796_v16, %v17139_v13 }
 0x2e1   :  { %7396 = vmatprep.subr.bf16.mxu0 %v11926_v57  ;;  %21125 = vst [vmem:[#allocation78_spill] sm:$0xff] %v17172_v31  ;;  %v17179_v3 = vld [vmem:[%s20612_s3 + $0x998] sm:$0xff]  ;;  %v7938_v40 = vmax.f32 %v6458_v49, 0.0  ;;  %v6460_v6 = vadd.f32 %v6459_v28, %v16788_v58  ;;  %v6499_v57 = vadd.f32 %v16800_v11, %v17151_v62  ;;  %v12045_v20 = vcombine.low %v17119_v21, %v17127_v54 }
 0x2e2   :  { %v6609_v42 = vpop.f32.mrf.mxu1  ;;  %v17198_v58 = vld [vmem:[%s20612_s3 + $0x558] sm:$0xff]  ;;  %v12173_v11 = vcombine.low %v17132_v30, %v17147_v7  ;;  %v12038_v21 = vcombine.high %v17165_v48, %v17170_v52  ;;  %v12166_v54 = vcombine.high %v17179_v3, %v17184_v47  ;;  %v6501_v30 = vadd.f32 %v16818_v27, %v17139_v13  ;;  %v21127_v7 = vld [vmem:[#allocation52_spill] sm:$0xff] }
 0x2e3   :  { %7284 = vmatpush2.bf16.msra.mxu1 %v12307_v56  ;;  %v17193_v19 = vpack.c.bf16 %v7938_v40, %v7930_v60  ;;  %v7939_v31 = vmax.f32 %v6460_v6, 0.0  ;;  %v6610_v43 = vadd.f32 %v6609_v42, %v6497_v50  ;;  %v6722_v34 = vpop.f32.mrf.mxu0  ;;  %v17203_v16 = vld [vmem:[%s20612_s3 + $0x578] sm:$0xff]  ;;  %v12037_v40 = vcombine.low %v17165_v48, %v17170_v52 }
 0x2e4   :  { %7397 = vmatpush2.bf16.msra.mxu0 %v11925_v15  ;;  %7479 = vmatprep.subr.bf16.mxu1 %v12046_v2  ;;  %v6611_v59 = vpop.f32.mrf.mxu1  ;;  %v17214_v2 = vld [vmem:[%s20612_s3 + $0x958] sm:$0xff]  ;;  %v6503_v6 = vadd.f32 %v16821_v5, %v17151_v62  ;;  %v12165_v48 = vcombine.low %v17179_v3, %v17184_v47  ;;  %v12030_v42 = vcombine.high %v17198_v58, %v17203_v16 }
 0x2e5   :  { %21126 = vst [vmem:[#allocation79_spill] sm:$0xff] %v17193_v19  ;;  %7592 = vmatprep.subr.bf16.mxu0 %v12174_v23  ;;  %v17219_v56 = vld [vmem:[%s20612_s3 + $0x978] sm:$0xff]  ;;  %v17223_v32 = vadd.f32 %v6722_v34, %v6610_v43  ;;  %v6612_v49 = vadd.f32 %v6611_v59, %v6499_v57  ;;  %v6724_v15 = vpop.f32.mrf.mxu0  ;;  %v17226_v28 = vpack.c.bf16 %v7939_v31, %v7931_v4  ;;  %v21129_v23 = vld [vmem:[#allocation34_spill] sm:$0xff] }
 0x2e6   :  { %7286 = vmatmul.mubr.bf16.vlgmr.msra.gmra.mxu1 %v21127_v7  ;;  %v21130_v50 = vld [vmem:[#allocation53_spill] sm:$0xff]  ;;  %v6613_v60 = vpop.f32.mrf.mxu1  ;;  %v6541_v19 = vadd.f32 %v16992_v44, %v17139_v13 }
 0x2e7   :  { %21128 = vst [vmem:[#allocation52_spill] sm:$0xff] %v17226_v28  ;;  %7399 = vmatmul.mubr.bf16.vlgmr.msra.gmra.mxu0 %v21129_v23  ;;  %7295 = vmatprep.mubr.bf16.mxu1 %v21130_v50  ;;  %v17235_v27 = vadd.f32 %v6724_v15, %v6612_v49  ;;  %v6614_v43 = vadd.f32 %v6613_v60, %v6501_v30  ;;  %v6726_v34 = vpop.f32.mrf.mxu0  ;;  %v17240_v31 = vld [vmem:[%s20612_s3 + $0x518] sm:$0xff] }
 0x2e8   :  { %7408 = vmatprep.mubr.bf16.mxu0 %v21046_v45  ;;  %7480 = vmatpush1.bf16.msra.mxu1 %v12045_v20  ;;  %v17245_v57 = vld [vmem:[%s20612_s3 + $0x538] sm:$0xff]  ;;  %v6615_v52 = vpop.f32.mrf.mxu1  ;;  %v6507_v20 = vadd.f32 %v16836_v53, %v17139_v13  ;;  %v12158_v49 = vcombine.high %v17214_v2, %v17219_v56  ;;  %v12029_v53 = vcombine.low %v17198_v58, %v17203_v16 }
 0x2e9   :  { %v17250_v5 = vld [vmem:[%s20612_s3 + $0x918] sm:$0xff]  ;;  %7593 = vmatpush1.bf16.msra.mxu0 %v12173_v11  ;;  %7481 = vmatprep.subr.bf16.mxu1 %v12038_v21  ;;  %v17263_v4 = vadd.f32 %v6726_v34, %v6614_v43  ;;  %v6616_v59 = vadd.f32 %v6615_v52, %v6503_v6  ;;  %v6728_v30 = vpop.f32.mrf.mxu0  ;;  %v6509_v21 = vadd.f32 %v16842_v46, %v17151_v62  ;;  %v21132_v52 = vld [vmem:[#allocation54_spill] sm:$0xff] }
 0x2ea   :  { %v17255_v45 = vld [vmem:[%s20612_s3 + $0x938] sm:$0xff]  ;;  %7594 = vmatprep.subr.bf16.mxu0 %v12166_v54  ;;  %v6619_v11 = vpop.f32.mrf.mxu1  ;;  %v12157_v46 = vcombine.low %v17214_v2, %v17219_v56  ;;  %v6511_v2 = vadd.f32 %v16860_v17, %v17139_v13 }
 0x2eb   :  { %v17269_v3 = vadd.f32 %v6728_v30, %v6616_v59  ;;  %v6620_v47 = vadd.f32 %v6619_v11, %v6507_v20  ;;  %v6732_v15 = vpop.f32.mrf.mxu0  ;;  %v17276_v54 = vld [vmem:[%s20612_s3 + $0x4d8] sm:$0xff]  ;;  %v12150_v58 = vcombine.high %v17250_v5, %v17255_v45  ;;  %v12021_v20 = vcombine.low %v17240_v31, %v17245_v57 }
 0x2ec   :  { %7482 = vmatpush1.bf16.msra.mxu1 %v12037_v40  ;;  %v17281_v23 = vld [vmem:[%s20612_s3 + $0x4f8] sm:$0xff]  ;;  %v6621_v60 = vpop.f32.mrf.mxu1  ;;  %v12022_v40 = vcombine.high %v17240_v31, %v17245_v57  ;;  %v6513_v59 = vadd.f32 %v16865_v10, %v17151_v62  ;;  %v12149_v31 = vcombine.low %v17250_v5, %v17255_v45 }
 0x2ed   :  { %7595 = vmatpush1.bf16.msra.mxu0 %v12165_v48  ;;  %7483 = vmatprep.subr.bf16.mxu1 %v12030_v42  ;;  %v17292_v16 = vld [vmem:[%s20612_s3 + $0x8d8] sm:$0xff]  ;;  %v17301_v56 = vadd.f32 %v6732_v15, %v6620_v47  ;;  %v6622_v43 = vadd.f32 %v6621_v60, %v6509_v21  ;;  %v6734_v34 = vpop.f32.mrf.mxu0  ;;  %v12014_v47 = vcombine.high %v17276_v54, %v17281_v23 }
 0x2ee   :  { %v17297_v6 = vld [vmem:[%s20612_s3 + $0x8f8] sm:$0xff]  ;;  %7296 = vmatmul.mubr.bf16.gmra.mxu1 %v15802_v22  ;;  %7596 = vmatprep.subr.bf16.mxu0 %v12158_v49  ;;  %v6623_v42 = vpop.f32.mrf.mxu1  ;;  %v6517_v15 = vadd.f32 %v16880_v41, %v17139_v13  ;;  %v12013_v41 = vcombine.low %v17276_v54, %v17281_v23 }
 0x2ef   :  { %v21131_v48 = vld [vmem:[#allocation37_spill] sm:$0xff]  ;;  %7305 = vmatprep.mubr.bf16.mxu1 %v21132_v52  ;;  %v17311_v17 = vadd.f32 %v6734_v34, %v6622_v43  ;;  %v6624_v30 = vadd.f32 %v6623_v42, %v6511_v2  ;;  %v6736_v49 = vpop.f32.mrf.mxu0  ;;  %v12142_v43 = vcombine.high %v17292_v16, %v17297_v6 }
 0x2f0   :  { %7409 = vmatmul.mubr.bf16.gmra.mxu0 %v21131_v48  ;;  %7484 = vmatpush1.bf16.msra.mxu1 %v12029_v53  ;;  %v17316_v11 = vld [vmem:[%s20612_s3 + $0x498] sm:$0xff]  ;;  %v6625_v57 = vpop.f32.mrf.mxu1 }
 0x2f1   :  { %7418 = vmatprep.mubr.bf16.mxu0 %v21049_v36  ;;  %v17321_v21 = vld [vmem:[%s20612_s3 + $0x4b8] sm:$0xff]  ;;  %7597 = vmatpush1.bf16.msra.mxu0 %v12157_v46  ;;  %v17339_v53 = vadd.f32 %v6736_v49, %v6624_v30  ;;  %v6626_v60 = vadd.f32 %v6625_v57, %v6513_v59  ;;  %v6738_v2 = vpop.f32.mrf.mxu0  ;;  %v21134_v57 = vld [vmem:[#allocation56_spill] sm:$0xff] }
 0x2f2   :  { %v17326_v10 = vld [vmem:[%s20612_s3 + $0x898] sm:$0xff]  ;;  %7485 = vmatprep.subr.bf16.mxu1 %v12022_v40  ;;  %7598 = vmatprep.subr.bf16.mxu0 %v12150_v58  ;;  %v6629_v46 = vpop.f32.mrf.mxu1  ;;  %v6519_v40 = vadd.f32 %v16886_v14, %v17151_v62  ;;  %v12141_v14 = vcombine.low %v17292_v16, %v17297_v6  ;;  %v6521_v16 = vadd.f32 %v16904_v9, %v17139_v13 }
 0x2f3   :  { %v17331_v36 = vld [vmem:[%s20612_s3 + $0x8b8] sm:$0xff]  ;;  %v17345_v5 = vadd.f32 %v6738_v2, %v6626_v60  ;;  %v6630_v45 = vadd.f32 %v6629_v46, %v6517_v15  ;;  %v6742_v34 = vpop.f32.mrf.mxu0  ;;  %v12005_v15 = vcombine.low %v17316_v11, %v17321_v21  ;;  %v6523_v60 = vadd.f32 %v16909_v29, %v17151_v62 }
 0x2f4   :  { %7486 = vmatpush1.bf16.msra.mxu1 %v12021_v20  ;;  %v17352_v58 = vld [vmem:[%s20612_s3 + $0x458] sm:$0xff]  ;;  %v6631_v42 = vpop.f32.mrf.mxu1  ;;  %v12006_v20 = vcombine.high %v17316_v11, %v17321_v21  ;;  %v12134_v54 = vcombine.high %v17326_v10, %v17331_v36  ;;  %v12133_v21 = vcombine.low %v17326_v10, %v17331_v36 }
 0x2f5   :  { %v17357_v48 = vld [vmem:[%s20612_s3 + $0x478] sm:$0xff]  ;;  %7599 = vmatpush1.bf16.msra.mxu0 %v12149_v31  ;;  %7487 = vmatprep.subr.bf16.mxu1 %v12014_v47  ;;  %v17377_v6 = vadd.f32 %v6742_v34, %v6630_v45  ;;  %v6632_v30 = vadd.f32 %v6631_v42, %v6519_v40  ;;  %v6744_v49 = vpop.f32.mrf.mxu0  ;;  %v21133_v31 = vld [vmem:[#allocation39_spill] sm:$0xff]  ;;  %v6527_v42 = vadd.f32 %v16924_v18, %v17139_v13 }
 0x2f6   :  { %v17368_v23 = vld [vmem:[%s20612_s3 + $0x858] sm:$0xff]  ;;  %7306 = vmatmul.mubr.bf16.gmra.mxu1 %v21050_v37  ;;  %7600 = vmatprep.subr.bf16.mxu0 %v12142_v43  ;;  %v6633_v47 = vpop.f32.mrf.mxu1  ;;  %v11997_v18 = vcombine.low %v17352_v58, %v17357_v48 }
 0x2f7   :  { %v17373_v59 = vld [vmem:[%s20612_s3 + $0x878] sm:$0xff]  ;;  %7315 = vmatprep.mubr.bf16.mxu1 %v21134_v57  ;;  %v17387_v9 = vadd.f32 %v6744_v49, %v6632_v30  ;;  %v6634_v46 = vadd.f32 %v6633_v47, %v6521_v16  ;;  %v6746_v43 = vpop.f32.mrf.mxu0 }
 0x2f8   :  { %7419 = vmatmul.mubr.bf16.gmra.mxu0 %v21133_v31  ;;  %v21135_v2 = vld [vmem:[#allocation5_spill] sm:$0xff]  ;;  %7488 = vmatpush1.bf16.msra.mxu1 %v12013_v41  ;;  %v6635_v34 = vpop.f32.mrf.mxu1  ;;  %v11998_v41 = vcombine.high %v17352_v58, %v17357_v48  ;;  %v12126_v31 = vcombine.high %v17368_v23, %v17373_v59 }
 0x2f9   :  { %7428 = vmatprep.mubr.bf16.mxu0 %v21135_v2  ;;  %v17392_v40 = vld [vmem:[%s20612_s3 + $0x418] sm:$0xff]  ;;  %7601 = vmatpush1.bf16.msra.mxu0 %v12141_v14  ;;  %v17415_v16 = vadd.f32 %v6746_v43, %v6634_v46  ;;  %v6636_v30 = vadd.f32 %v6635_v34, %v6523_v60  ;;  %v6748_v49 = vpop.f32.mrf.mxu0  ;;  %v21138_v34 = vld [vmem:[#allocation58_spill] sm:$0xff] }
 0x2fa   :  { %v17397_v45 = vld [vmem:[%s20612_s3 + $0x438] sm:$0xff]  ;;  %7489 = vmatprep.subr.bf16.mxu1 %v12006_v20  ;;  %7602 = vmatprep.subr.bf16.mxu0 %v12134_v54  ;;  %v6639_v14 = vpop.f32.mrf.mxu1  ;;  %v6529_v20 = vadd.f32 %v16930_v0, %v17151_v62  ;;  %v12125_v54 = vcombine.low %v17368_v23, %v17373_v59 }
 0x2fb   :  { %v17402_v29 = vld [vmem:[%s20612_s3 + $0x818] sm:$0xff]  ;;  %v17421_v10 = vadd.f32 %v6748_v49, %v6636_v30  ;;  %v6640_v36 = vadd.f32 %v6639_v14, %v6527_v42  ;;  %v6752_v47 = vpop.f32.mrf.mxu0  ;;  %v11990_v2 = vcombine.high %v17392_v40, %v17397_v45  ;;  %v6533_v49 = vadd.f32 %v16953_v12, %v17151_v62 }
 0x2fc   :  { %v17407_v11 = vld [vmem:[%s20612_s3 + $0x838] sm:$0xff]  ;;  %7490 = vmatpush1.bf16.msra.mxu1 %v12005_v15  ;;  %v6641_v60 = vpop.f32.mrf.mxu1  ;;  %v6531_v15 = vadd.f32 %v16948_v8, %v17139_v13  ;;  %v6537_v12 = vadd.f32 %v16968_v26, %v17139_v13  ;;  %v6539_v26 = vadd.f32 %v16974_v51, %v17151_v62 }
 0x2fd   :  { %7603 = vmatpush1.bf16.msra.mxu0 %v12133_v21  ;;  %7491 = vmatprep.subr.bf16.mxu1 %v11998_v41  ;;  %v12118_v0 = vcombine.high %v17402_v29, %v17407_v11  ;;  %v17433_v46 = vadd.f32 %v6752_v47, %v6640_v36  ;;  %v21136_v43 = vld [vmem:[#allocation57_spill] sm:$0xff]  ;;  %v6642_v58 = vadd.f32 %v6641_v60, %v6529_v20  ;;  %v6754_v48 = vpop.f32.mrf.mxu0  ;;  %v21137_v21 = vld [vmem:[#allocation3_spill] sm:$0xff] }
 0x2fe   :  { %7316 = vmatmul.mubr.bf16.gmra.mxu1 %v21136_v43  ;;  %7604 = vmatprep.subr.bf16.mxu0 %v12126_v31  ;;  %v3147_v23 = vld [vmem:[%s20612_s3 + $0x7d8] sm:$0xff]  ;;  %v6643_v8 = vpop.f32.mrf.mxu1  ;;  %v11989_v41 = vcombine.low %v17392_v40, %v17397_v45  ;;  %v21139_v31 = vld [vmem:[#allocation6_spill] sm:$0xff]  ;;  %v12117_v40 = vcombine.low %v17402_v29, %v17407_v11 }
 0x2ff   :  { %v3151_v59 = vld [vmem:[%s20612_s3 + $0x7f8] sm:$0xff]  ;;  %7325 = vmatprep.mubr.bf16.mxu1 %v21138_v34  ;;  %v17455_v14 = vadd.f32 %v6754_v48, %v6642_v58  ;;  %v6644_v20 = vadd.f32 %v6643_v8, %v6531_v15  ;;  %v6756_v36 = vpop.f32.mrf.mxu0  ;;  %v21140_v34 = vld [vmem:[#allocation59_spill] sm:$0xff] }
 0x300   :  { %7429 = vmatmul.mubr.bf16.gmra.mxu0 %v21137_v21  ;;  %v3275_v42 = vld [vmem:[%s20612_s3 + $0xbd8] sm:$0xff]  ;;  %7492 = vmatpush1.bf16.msra.mxu1 %v11997_v18  ;;  %v6645_v45 = vpop.f32.mrf.mxu1  ;;  %v12110_v47 = vcombine.high %v3147_v23, %v3151_v59 }
 0x301   :  { %v3279_v30 = vld [vmem:[%s20612_s3 + $0xbf8] sm:$0xff]  ;;  %7438 = vmatprep.mubr.bf16.mxu0 %v21139_v31  ;;  %7605 = vmatpush1.bf16.msra.mxu0 %v12125_v54  ;;  %v17464_v21 = vadd.f32 %v6756_v36, %v6644_v20  ;;  %v6646_v18 = vadd.f32 %v6645_v45, %v6533_v49  ;;  %v6758_v15 = vpop.f32.mrf.mxu0  ;;  %v12109_v49 = vcombine.low %v3147_v23, %v3151_v59 }
 0x302   :  { %7493 = vmatprep.subr.bf16.mxu1 %v11990_v2  ;;  %v3139_v60 = vld [vmem:[%s20612_s3 + $0x798] sm:$0xff]  ;;  %7606 = vmatprep.subr.bf16.mxu0 %v12118_v0  ;;  %v12238_v58 = vcombine.high %v3275_v42, %v3279_v30  ;;  %v6649_v2 = vpop.f32.mrf.mxu1  ;;  %v12237_v31 = vcombine.low %v3275_v42, %v3279_v30  ;;  %v21142_v30 = vld [vmem:[#allocation60_spill] sm:$0xff] }
 0x303   :  { %v3143_v54 = vld [vmem:[%s20612_s3 + $0x7b8] sm:$0xff]  ;;  %v17477_v0 = vadd.f32 %v6758_v15, %v6646_v18  ;;  %v6650_v48 = vadd.f32 %v6649_v2, %v6537_v12  ;;  %v6762_v8 = vpop.f32.mrf.mxu0  ;;  %v6543_v18 = vadd.f32 %v17005_v33, %v17151_v62 }
 0x304   :  { %v3267_v29 = vld [vmem:[%s20612_s3 + $0xb98] sm:$0xff]  ;;  %7494 = vmatpush1.bf16.msra.mxu1 %v11989_v41  ;;  %v6651_v20 = vpop.f32.mrf.mxu1  ;;  %v12102_v36 = vcombine.high %v3139_v60, %v3143_v54 }
 0x305   :  { %v3271_v11 = vld [vmem:[%s20612_s3 + $0xbb8] sm:$0xff]  ;;  %7607 = vmatpush1.bf16.msra.mxu0 %v12117_v40  ;;  %7495 = vmatprep.subr.bf16.mxu1 %v12110_v47  ;;  %v17481_v28 = vadd.f32 %v6762_v8, %v6650_v48  ;;  %v6652_v51 = vadd.f32 %v6651_v20, %v6539_v26  ;;  %v6764_v41 = vpop.f32.mrf.mxu0  ;;  %v12101_v40 = vcombine.low %v3139_v60, %v3143_v54 }
 0x306   :  { %v12230_v45 = vcombine.high %v3267_v29, %v3271_v11  ;;  %7326 = vmatmul.mubr.bf16.gmra.mxu1 %v21140_v34  ;;  %7608 = vmatprep.subr.bf16.mxu0 %v12238_v58  ;;  %v3131_v23 = vld [vmem:[%s20612_s3 + $0x758] sm:$0xff]  ;;  %v6653_v44 = vpop.f32.mrf.mxu1  ;;  %v12229_v60 = vcombine.low %v3267_v29, %v3271_v11  ;;  %v6547_v20 = vadd.f32 %v17014_v63, %v17139_v13 }
 0x307   :  { %v3135_v59 = vld [vmem:[%s20612_s3 + $0x778] sm:$0xff]  ;;  %7335 = vmatprep.mubr.bf16.mxu1 %v21142_v30  ;;  %v17501_v58 = vadd.f32 %v6764_v41, %v6652_v51  ;;  %v6654_v2 = vadd.f32 %v6653_v44, %v6541_v19  ;;  %v6766_v26 = vpop.f32.mrf.mxu0  ;;  %v6549_v63 = vadd.f32 %v17024_v35, %v17151_v62 }
 0x308   :  { %v21141_v42 = vld [vmem:[#allocation17_spill] sm:$0xff]  ;;  %7496 = vmatpush2.bf16.msra.mxu1 %v12109_v49  ;;  %v6655_v54 = vpop.f32.mrf.mxu1  ;;  %v12094_v48 = vcombine.high %v3131_v23, %v3135_v59  ;;  %v12093_v44 = vcombine.low %v3131_v23, %v3135_v59 }
 0x309   :  { %7439 = vmatmul.mubr.bf16.gmra.mxu0 %v21141_v42  ;;  %v3259_v47 = vld [vmem:[%s20612_s3 + $0xb58] sm:$0xff]  ;;  %7497 = vmatprep.subr.bf16.mxu1 %v12102_v36  ;;  %v17508_v33 = vadd.f32 %v6766_v26, %v6654_v2  ;;  %v6656_v49 = vadd.f32 %v6655_v54, %v6543_v18  ;;  %v6768_v51 = vpop.f32.mrf.mxu0  ;;  %v6551_v54 = vadd.f32 %v17039_v24, %v17139_v13 }
 0x30a   :  { %v3263_v12 = vld [vmem:[%s20612_s3 + $0xb78] sm:$0xff]  ;;  %7609 = vmatpush2.bf16.msra.mxu0 %v12237_v31 }
 0x30b   :  { %v21143_v15 = vld [vmem:[#allocation9_spill] sm:$0xff]  ;;  %7610 = vmatprep.subr.bf16.mxu0 %v12230_v45  ;;  %v12222_v41 = vcombine.high %v3259_v47, %v3263_v12  ;;  %v6659_v31 = vpop.f32.mrf.mxu1  ;;  %v17521_v36 = vadd.f32 %v6768_v51, %v6656_v49  ;;  %v6772_v42 = vpop.f32.mrf.mxu0  ;;  %v12221_v18 = vcombine.low %v3259_v47, %v3263_v12  ;;  %v21145_v47 = vld [vmem:[#allocation18_spill] sm:$0xff]  ;;  %v6553_v49 = vadd.f32 %v17053_v39, %v17151_v62  ;;  %v21147_v51 = vld [vmem:[#allocation11_spill] sm:$0xff] }
 0x30c   :  { %7448 = vmatprep.mubr.bf16.mxu0 %v21143_v15  ;;  %v3123_v8 = vld [vmem:[%s20612_s3 + $0x718] sm:$0xff]  ;;  %7498 = vmatpush2.bf16.msra.mxu1 %v12101_v40  ;;  %v6660_v45 = vadd.f32 %v6659_v31, %v6547_v20  ;;  %v21146_v12 = vld [vmem:[#allocation62_spill] sm:$0xff] }
 0x30d   :  { %v3127_v19 = vld [vmem:[%s20612_s3 + $0x738] sm:$0xff]  ;;  %7499 = vmatprep.subr.bf16.mxu1 %v12094_v48  ;;  %v6661_v15 = vpop.f32.mrf.mxu1  ;;  %v6774_v40 = vpop.f32.mrf.mxu0 }
 0x30e   :  { %v3251_v29 = vld [vmem:[%s20612_s3 + $0xb18] sm:$0xff]  ;;  %7611 = vmatpush2.bf16.msra.mxu0 %v12229_v60  ;;  %v12086_v2 = vcombine.high %v3123_v8, %v3127_v19  ;;  %v17525_v30 = vadd.f32 %v6772_v42, %v6660_v45  ;;  %v6662_v35 = vadd.f32 %v6661_v15, %v6549_v63  ;;  %v12085_v60 = vcombine.low %v3123_v8, %v3127_v19 }
 0x30f   :  { %v3255_v11 = vld [vmem:[%s20612_s3 + $0xb38] sm:$0xff]  ;;  %7612 = vmatprep.subr.bf16.mxu0 %v12222_v41  ;;  %v6663_v24 = vpop.f32.mrf.mxu1  ;;  %v6776_v63 = vpop.f32.mrf.mxu0  ;;  %v6557_v15 = vadd.f32 %v17062_v1, %v17139_v13  ;;  %v6559_v1 = vadd.f32 %v17072_v55, %v17151_v62 }
 0x310   :  { %v12214_v26 = vcombine.high %v3251_v29, %v3255_v11  ;;  %v21144_v34 = vld [vmem:[#allocation61_spill] sm:$0xff]  ;;  %7500 = vmatpush2.bf16.msra.mxu1 %v12093_v44  ;;  %v17545_v41 = vadd.f32 %v6774_v40, %v6662_v35  ;;  %v6664_v31 = vadd.f32 %v6663_v24, %v6551_v54  ;;  %v12213_v8 = vcombine.low %v3251_v29, %v3255_v11 }
 0x311   :  { %7336 = vmatmul.mubr.bf16.gmra.mxu1 %v21144_v34  ;;  %v3115_v23 = vld [vmem:[%s20612_s3 + $0x6d8] sm:$0xff]  ;;  %7449 = vmatmul.mubr.bf16.gmra.mxu0 %v21145_v47  ;;  %v6665_v19 = vpop.f32.mrf.mxu1  ;;  %v6778_v35 = vpop.f32.mrf.mxu0  ;;  %v21148_v34 = vld [vmem:[#allocation63_spill] sm:$0xff] }
 0x312   :  { %v3119_v59 = vld [vmem:[%s20612_s3 + $0x6f8] sm:$0xff]  ;;  %7345 = vmatprep.mubr.bf16.mxu1 %v21146_v12  ;;  %7458 = vmatprep.mubr.bf16.mxu0 %v21147_v51  ;;  %v17552_v39 = vadd.f32 %v6776_v63, %v6664_v31  ;;  %v6666_v44 = vadd.f32 %v6665_v19, %v6553_v49  ;;  %v6561_v19 = vadd.f32 %v17087_v38, %v17139_v13 }
 0x313   :  { %v3243_v48 = vld [vmem:[%s20612_s3 + $0xad8] sm:$0xff]  ;;  %7613 = vmatpush2.bf16.msra.mxu0 %v12221_v18  ;;  %7501 = vmatprep.subr.bf16.mxu1 %v12086_v2  ;;  %v12078_v45 = vcombine.high %v3115_v23, %v3119_v59  ;;  %v6669_v2 = vpop.f32.mrf.mxu1  ;;  %v12077_v24 = vcombine.low %v3115_v23, %v3119_v59 }
 0x314   :  { %v3247_v20 = vld [vmem:[%s20612_s3 + $0xaf8] sm:$0xff]  ;;  %7614 = vmatprep.subr.bf16.mxu0 %v12214_v26  ;;  %7502 = vmatpush2.bf16.msra.mxu1 %v12085_v60  ;;  %v17565_v26 = vadd.f32 %v6778_v35, %v6666_v44  ;;  %v6670_v54 = vadd.f32 %v6669_v2, %v6557_v15  ;;  %v6782_v47 = vpop.f32.mrf.mxu0  ;;  %v6563_v44 = vadd.f32 %v17101_v61, %v17151_v62  ;;  %v21151_v35 = vld [vmem:[#allocation12_spill] sm:$0xff] }
 0x315   :  { %v3107_v42 = vld [vmem:[%s20612_s3 + $0x698] sm:$0xff]  ;;  %v12206_v40 = vcombine.high %v3243_v48, %v3247_v20  ;;  %7503 = vmatprep.subr.bf16.mxu1 %v12078_v45  ;;  %v12205_v49 = vcombine.low %v3243_v48, %v3247_v20  ;;  %v6671_v51 = vpop.f32.mrf.mxu1  ;;  %v21149_v48 = vld [vmem:[#allocation16_spill] sm:$0xff] }
 0x316   :  { %v3111_v18 = vld [vmem:[%s20612_s3 + $0x6b8] sm:$0xff]  ;;  %v17569_v12 = vadd.f32 %v6782_v47, %v6670_v54  ;;  %v6672_v55 = vadd.f32 %v6671_v51, %v6559_v1  ;;  %v6784_v60 = vpop.f32.mrf.mxu0  ;;  %v21150_v20 = vld [vmem:[#allocation64_spill] sm:$0xff]  ;;  %v6567_v51 = vadd.f32 %v17110_v25, %v17139_v13 }
 0x317   :  { %v3235_v29 = vld [vmem:[%s20612_s3 + $0xa98] sm:$0xff]  ;;  %7615 = vmatpush2.bf16.msra.mxu0 %v12213_v8  ;;  %v12070_v31 = vcombine.high %v3107_v42, %v3111_v18  ;;  %v6673_v38 = vpop.f32.mrf.mxu1  ;;  %v12069_v8 = vcombine.low %v3107_v42, %v3111_v18  ;;  %v21152_v25 = vld [vmem:[#allocation76_spill] sm:$0xff] }
 0x318   :  { %v3239_v11 = vld [vmem:[%s20612_s3 + $0xab8] sm:$0xff]  ;;  %7616 = vmatprep.subr.bf16.mxu0 %v12206_v40  ;;  %7504 = vmatpush2.bf16.msra.mxu1 %v12077_v24  ;;  %v17589_v40 = vadd.f32 %v6784_v60, %v6672_v55  ;;  %v6674_v2 = vadd.f32 %v6673_v38, %v6561_v19  ;;  %v6786_v1 = vpop.f32.mrf.mxu0  ;;  %v6569_v19 = vadd.f32 %v21152_v25, %v17151_v62 }
 0x319   :  { %v12198_v63 = vcombine.high %v3235_v29, %v3239_v11  ;;  %7346 = vmatmul.mubr.bf16.gmra.mxu1 %v21148_v34  ;;  %v3099_v23 = vld [vmem:[%s20612_s3 + $0x658] sm:$0xff]  ;;  %7459 = vmatmul.mubr.bf16.gmra.mxu0 %v21149_v48  ;;  %v12197_v42 = vcombine.low %v3235_v29, %v3239_v11  ;;  %v6675_v18 = vpop.f32.mrf.mxu1 }
 0x31a   :  { %v3103_v59 = vld [vmem:[%s20612_s3 + $0x678] sm:$0xff]  ;;  %7355 = vmatprep.mubr.bf16.mxu1 %v21150_v20  ;;  %7468 = vmatprep.mubr.bf16.mxu0 %v21151_v35  ;;  %v17596_v61 = vadd.f32 %v6786_v1, %v6674_v2  ;;  %v6676_v24 = vadd.f32 %v6675_v18, %v6563_v44  ;;  %v6788_v55 = vpop.f32.mrf.mxu0  ;;  %v21153_v20 = vld [vmem:[#allocation26_spill] sm:$0xff] }
 0x31b   :  { %v3227_v45 = vld [vmem:[%s20612_s3 + $0xa58] sm:$0xff]  ;;  %7617 = vmatpush2.bf16.msra.mxu0 %v12205_v49  ;;  %7505 = vmatprep.subr.bf16.mxu1 %v12070_v31  ;;  %v12062_v54 = vcombine.high %v3099_v23, %v3103_v59  ;;  %v6679_v31 = vpop.f32.mrf.mxu1  ;;  %v12061_v44 = vcombine.low %v3099_v23, %v3103_v59  ;;  %v6571_v34 = vadd.f32 %v21153_v20, %v17139_v13 }
 0x31c   :  { %v3231_v15 = vld [vmem:[%s20612_s3 + $0xa78] sm:$0xff]  ;;  %7618 = vmatprep.subr.bf16.mxu0 %v12198_v63  ;;  %7506 = vmatpush2.bf16.msra.mxu1 %v12069_v8  ;;  %v17609_v63 = vadd.f32 %v6788_v55, %v6676_v24  ;;  %v6680_v48 = vadd.f32 %v6679_v31, %v6567_v51  ;;  %v6792_v38 = vpop.f32.mrf.mxu0  ;;  %v21158_v51 = vld [vmem:[#allocation32_spill] sm:$0xff] }
 0x31d   :  { %v3091_v47 = vld [vmem:[%s20612_s3 + $0x618] sm:$0xff]  ;;  %v12190_v60 = vcombine.high %v3227_v45, %v3231_v15  ;;  %7507 = vmatprep.subr.bf16.mxu1 %v12062_v54  ;;  %v12189_v35 = vcombine.low %v3227_v45, %v3231_v15  ;;  %v6681_v2 = vpop.f32.mrf.mxu1  ;;  %v21155_v45 = vld [vmem:[#allocation19_spill] sm:$0xff]  ;;  %v21156_v15 = vld [vmem:[#allocation2_spill] sm:$0xff] }
 0x31e   :  { %v3095_v49 = vld [vmem:[%s20612_s3 + $0x638] sm:$0xff]  ;;  %v17613_v43 = vadd.f32 %v6792_v38, %v6680_v48  ;;  %v6682_v8 = vadd.f32 %v6681_v2, %v6569_v19  ;;  %v6794_v24 = vpop.f32.mrf.mxu0 }
 0x31f   :  { %v3219_v29 = vld [vmem:[%s20612_s3 + $0xa18] sm:$0xff]  ;;  %7619 = vmatpush2.bf16.msra.mxu0 %v12197_v42  ;;  %v12054_v1 = vcombine.high %v3091_v47, %v3095_v49  ;;  %v6683_v13 = vpop.f32.mrf.mxu1  ;;  %v12053_v20 = vcombine.low %v3091_v47, %v3095_v49  ;;  %v21157_v42 = vld [vmem:[#allocation78_spill] sm:$0xff] }
 0x320   :  { %v3223_v11 = vld [vmem:[%s20612_s3 + $0xa38] sm:$0xff]  ;;  %7620 = vmatprep.subr.bf16.mxu0 %v12190_v60  ;;  %v6573_v54 = vadd.f32 %v21157_v42, %v17151_v62  ;;  %7508 = vmatpush2.bf16.msra.mxu1 %v12061_v44  ;;  %v17627_v55 = vadd.f32 %v6794_v24, %v6682_v8  ;;  %v6684_v60 = vadd.f32 %v6683_v13, %v6571_v34  ;;  %v6796_v31 = vpop.f32.mrf.mxu0  ;;  %v21161_v42 = vld [vmem:[#allocation8_spill] sm:$0xff] }
 0x321   :  { %v12182_v18 = vcombine.high %v3219_v29, %v3223_v11  ;;  %v21154_v57 = vld [vmem:[#allocation65_spill] sm:$0xff]  ;;  %7469 = vmatmul.mubr.bf16.gmra.mxu0 %v21155_v45  ;;  %7509 = vmatprep.subr.bf16.mxu1 %v12054_v1  ;;  %v12181_v25 = vcombine.low %v3219_v29, %v3223_v11  ;;  %v6685_v19 = vpop.f32.mrf.mxu1  ;;  %v21159_v45 = vld [vmem:[#allocation10_spill] sm:$0xff] }
 0x322   :  { %7356 = vmatmul.mubr.bf16.gmra.mxu1 %v21154_v57  ;;  %v3339_v23 = vld [vmem:[%s20612_s3 + $0xdd8] sm:$0xff]  ;;  %7624 = vmatprep.mubr.bf16.mxu0 %v21158_v51  ;;  %v17629_v38 = vadd.f32 %v6796_v31, %v6684_v60  ;;  %v6686_v2 = vadd.f32 %v6685_v19, %v6573_v54  ;;  %v6798_v47 = vpop.f32.mrf.mxu0 }
 0x323   :  { %v3343_v59 = vld [vmem:[%s20612_s3 + $0xdf8] sm:$0xff]  ;;  %7511 = vmatprep.mubr.bf16.mxu1 %v21156_v15  ;;  %7621 = vmatpush2.bf16.msra.mxu0 %v12189_v35 }
 0x324   :  { %v12302_v48 = vcombine.high %v3339_v23, %v3343_v59  ;;  %7622 = vmatprep.subr.bf16.mxu0 %v12182_v18  ;;  %v13025_v62 = vld [vmem:[%s20615_s5 + $0x78] sm:$0xff]   ;;  %7510 = vmatpush2.bf16.msra.mxu1 %v12053_v20  ;;  %v17640_v29 = vadd.f32 %v6798_v47, %v6686_v2  ;;  %v6835_v11 = vpop.f32.mrf.mxu1  ;;  %v12301_v1 = vcombine.low %v3339_v23, %v3343_v59  ;;  %v13027_v59 = vld [vmem:[%s20615_s5 + $0x70] sm:$0xff]   ;;  %v21160_v20 = vld [vmem:[#allocation27_spill] sm:$0xff] }
 0x325   :  { %v3331_v49 = vld [vmem:[%s20612_s3 + $0xd98] sm:$0xff]  ;;  %v6836_v44 = vadd.f32 %v6835_v11, %v17223_v32  ;;  %v17643_v35 = vpop.f32.mrf.mxu0 }
 0x326   :  { %v3335_v34 = vld [vmem:[%s20612_s3 + $0xdb8] sm:$0xff]  ;;  %7705 = vmatprep.subr.bf16.mxu1 %v12302_v48  ;;  %v6837_v18 = vpop.f32.mrf.mxu1  ;;  %v13028_v48 = vld [vmem:[%s20615_s5 + $0x30] sm:$0xff]  }
 0x327   :  { %7623 = vmatpush2.bf16.msra.mxu0 %v12181_v25  ;;  %v12294_v8 = vcombine.high %v3331_v49, %v3335_v34  ;;  %v13026_v24 = vld [vmem:[%s20615_s5 + $0x38] sm:$0xff]   ;;  %v6838_v15 = vadd.f32 %v6837_v18, %v17235_v27  ;;  %v17650_v13 = vpop.f32.mrf.mxu0  ;;  %v12293_v31 = vcombine.low %v3331_v49, %v3335_v34  ;;  %v7820_v2 = vmax.f32 %v6836_v44, 0.0  ;;  %v13029_v34 = vld [vmem:[%s20615_s5 + $0x68] sm:$0xff]  }
 0x328   :  { %12720 = vmatprep.subr.bf16.mxu0 %v13025_v62  ;;  %v3323_v32 = vld [vmem:[%s20612_s3 + $0xd58] sm:$0xff]  ;;  %v6839_v54 = vpop.f32.mrf.mxu1 }
 0x329   :  { %v3327_v23 = vld [vmem:[%s20612_s3 + $0xd78] sm:$0xff]  ;;  %v6840_v51 = vadd.f32 %v6839_v54, %v17263_v4  ;;  %v17665_v60 = vpop.f32.mrf.mxu0  ;;  %v7821_v18 = vmax.f32 %v6838_v15, 0.0  ;;  %v21163_v54 = vld [vmem:[#allocation4_spill] sm:$0xff] }
 0x32a   :  { %7512 = vmatmul.mubr.bf16.vlgmr.msra.gmra.mxu1 %v21159_v45  ;;  %7625 = vmatmul.mubr.bf16.vlgmr.msra.gmra.mxu0 %v21160_v20  ;;  %v21162_v27 = vld [vmem:[#allocation33_spill] sm:$0xff]  ;;  %v6841_v25 = vpop.f32.mrf.mxu1  ;;  %v12286_v19 = vcombine.high %v3323_v32, %v3327_v23  ;;  %v12285_v44 = vcombine.low %v3323_v32, %v3327_v23 }
 0x32b   :  { %7521 = vmatprep.mubr.bf16.mxu1 %v21161_v42  ;;  %7634 = vmatprep.mubr.bf16.mxu0 %v21162_v27  ;;  %v7828_v47 = vmax.f32 %v6840_v51, 0.0  ;;  %v6842_v62 = vadd.f32 %v6841_v25, %v17269_v3  ;;  %v17671_v11 = vpop.f32.mrf.mxu0  ;;  %v3315_v4 = vld [vmem:[%s20612_s3 + $0xd18] sm:$0xff]  ;;  %v13031_v27 = vld [vmem:[%s20615_s5 + $0x60] sm:$0xff]  }
 0x32c   :  { %7706 = vmatpush1.bf16.msra.mxu1 %v12301_v1  ;;  %12721 = vmatpush3.bf16.msra.mxu0 %v13026_v24  ;;  %v3319_v49 = vld [vmem:[%s20612_s3 + $0xd38] sm:$0xff]  ;;  %v6845_v1 = vpop.f32.mrf.mxu1 }
 0x32d   :  { %7707 = vmatprep.subr.bf16.mxu1 %v12294_v8  ;;  %12722 = vmatprep.subr.bf16.mxu0 %v13027_v59  ;;  %v17682_v8 = vpack.c.bf16 %v7828_v47, %v7820_v2  ;;  %v7829_v3 = vmax.f32 %v6842_v62, 0.0  ;;  %v6846_v24 = vadd.f32 %v6845_v1, %v17301_v56  ;;  %v17685_v45 = vpop.f32.mrf.mxu0  ;;  %v12278_v42 = vcombine.high %v3315_v4, %v3319_v49  ;;  %v13030_v59 = vld [vmem:[%s20615_s5 + $0x28] sm:$0xff]   ;;  %v3307_v56 = vld [vmem:[%s20612_s3 + $0xcd8] sm:$0xff]  ;;  %v13032_v1 = vld [vmem:[%s20615_s5 + $0x20] sm:$0xff]  }
 0x32e   :  { %v6847_v20 = vpop.f32.mrf.mxu1  ;;  %v3311_v23 = vld [vmem:[%s20612_s3 + $0xcf8] sm:$0xff]  ;;  %v12277_v47 = vcombine.low %v3315_v4, %v3319_v49 }
 0x32f   :  { %v6848_v15 = vadd.f32 %v6847_v20, %v17311_v17  ;;  %v17692_v32 = vpop.f32.mrf.mxu0  ;;  %v17703_v51 = vpack.c.bf16 %v7829_v3, %v7821_v18  ;;  %v21165_v17 = vld [vmem:[#allocation13_spill] sm:$0xff]  ;;  %v7836_v18 = vmax.f32 %v6846_v24, 0.0  ;;  %v12269_v24 = vcombine.low %v3307_v56, %v3311_v23 }
 0x330   :  { %7708 = vmatpush1.bf16.msra.mxu1 %v12293_v31  ;;  %12723 = vmatpush3.bf16.msra.mxu0 %v13028_v48  ;;  %v21164_v31 = vld [vmem:[#allocation36_spill] sm:$0xff]  ;;  %v6849_v25 = vpop.f32.mrf.mxu1  ;;  %v3303_v4 = vld [vmem:[%s20612_s3 + $0xcb8] sm:$0xff] }
 0x331   :  { %7709 = vmatprep.subr.bf16.mxu1 %v12286_v19  ;;  %12724 = vmatprep.subr.bf16.mxu0 %v13029_v34  ;;  %v21166_v19 = vld [vmem:[#allocation29_spill] sm:$0xff]  ;;  %v6850_v48 = vadd.f32 %v6849_v25, %v17339_v53  ;;  %v17709_v2 = vpop.f32.mrf.mxu0  ;;  %v12270_v34 = vcombine.high %v3307_v56, %v3311_v23 }
 0x332   :  { %7522 = vmatmul.mubr.bf16.gmra.mxu1 %v21163_v54  ;;  %7635 = vmatmul.mubr.bf16.gmra.mxu0 %v21164_v31  ;;  %v6851_v62 = vpop.f32.mrf.mxu1  ;;  %v3299_v53 = vld [vmem:[%s20612_s3 + $0xc98] sm:$0xff] }
 0x333   :  { %7531 = vmatprep.mubr.bf16.mxu1 %v21165_v17  ;;  %7644 = vmatprep.mubr.bf16.mxu0 %v21166_v19  ;;  %v7844_v3 = vmax.f32 %v6850_v48, 0.0  ;;  %v6852_v20 = vadd.f32 %v6851_v62, %v17345_v5  ;;  %v17715_v54 = vpop.f32.mrf.mxu0  ;;  %v13033_v49 = vld [vmem:[%s20615_s5 + $0x58] sm:$0xff]   ;;  %v12262_v19 = vcombine.high %v3299_v53, %v3303_v4  ;;  %v21167_v48 = vld [vmem:[#allocation15_spill] sm:$0xff] }
 0x334   :  { %7710 = vmatpush1.bf16.msra.mxu1 %v12285_v44  ;;  %12725 = vmatpush3.bf16.msra.mxu0 %v13030_v59  ;;  %v6855_v44 = vpop.f32.mrf.mxu1  ;;  %v3295_v23 = vld [vmem:[%s20612_s3 + $0xc78] sm:$0xff] }
 0x335   :  { %7711 = vmatprep.subr.bf16.mxu1 %v12278_v42  ;;  %12726 = vmatprep.subr.bf16.mxu0 %v13031_v27  ;;  %v7837_v42 = vmax.f32 %v6848_v15, 0.0  ;;  %v17726_v59 = vpack.c.bf16 %v7844_v3, %v7836_v18  ;;  %v7845_v5 = vmax.f32 %v6852_v20, 0.0  ;;  %v6856_v31 = vadd.f32 %v6855_v44, %v17377_v6  ;;  %v17729_v17 = vpop.f32.mrf.mxu0  ;;  %v13034_v27 = vld [vmem:[%s20615_s5 + $0x18] sm:$0xff]  }
 0x336   :  { %v6857_v25 = vpop.f32.mrf.mxu1  ;;  %v3291_v6 = vld [vmem:[%s20612_s3 + $0xc58] sm:$0xff]  ;;  %v12261_v44 = vcombine.low %v3299_v53, %v3303_v4  ;;  %v13037_v4 = vld [vmem:[%s20615_s5 + $0x48] sm:$0xff]  }
 0x337   :  { %v6858_v15 = vadd.f32 %v6857_v25, %v17387_v9  ;;  %v17736_v56 = vpop.f32.mrf.mxu0  ;;  %v17747_v62 = vpack.c.bf16 %v7845_v5, %v7837_v42  ;;  %v21169_v9 = vld [vmem:[#allocation14_spill] sm:$0xff]  ;;  %v21170_v18 = vld [vmem:[#allocation41_spill] sm:$0xff]  ;;  %v12254_v25 = vcombine.high %v3291_v6, %v3295_v23  ;;  %v13036_v42 = vld [vmem:[%s20615_s5 + $0x10] sm:$0xff]   ;;  %v7852_v5 = vmax.f32 %v6856_v31, 0.0 }
 0x338   :  { %7712 = vmatpush1.bf16.msra.mxu1 %v12277_v47  ;;  %12727 = vmatpush3.bf16.msra.mxu0 %v13032_v1  ;;  %v13035_v47 = vld [vmem:[%s20615_s5 + $0x50] sm:$0xff]   ;;  %v6859_v1 = vpop.f32.mrf.mxu1  ;;  %v3287_v53 = vld [vmem:[%s20612_s3 + $0xc38] sm:$0xff]  ;;  %v12253_v31 = vcombine.low %v3291_v6, %v3295_v23 }
 0x339   :  { %7713 = vmatprep.subr.bf16.mxu1 %v12270_v34  ;;  %12728 = vmatprep.subr.bf16.mxu0 %v13033_v49  ;;  %v21168_v34 = vld [vmem:[#allocation40_spill] sm:$0xff]  ;;  %v6860_v3 = vadd.f32 %v6859_v1, %v17415_v16  ;;  %v17753_v20 = vpop.f32.mrf.mxu0  ;;  %v3283_v16 = vld [vmem:[%s20612_s3 + $0xc18] sm:$0xff] }
 0x33a   :  { %7532 = vmatmul.mubr.bf16.gmra.mxu1 %v21167_v48  ;;  %7645 = vmatmul.mubr.bf16.gmra.mxu0 %v21168_v34  ;;  %v6861_v49 = vpop.f32.mrf.mxu1  ;;  %v3407_v23 = vld [vmem:[%s20612_s3 + $0xff8] sm:$0xff] }
 0x33b   :  { %7541 = vmatprep.mubr.bf16.mxu1 %v21169_v9  ;;  %7654 = vmatprep.mubr.bf16.mxu0 %v21170_v18  ;;  %v7860_v48 = vmax.f32 %v6860_v3, 0.0  ;;  %v6862_v34 = vadd.f32 %v6861_v49, %v17421_v10  ;;  %v17759_v9 = vpop.f32.mrf.mxu0  ;;  %v12246_v49 = vcombine.high %v3283_v16, %v3287_v53 }
 0x33c   :  { %7714 = vmatpush1.bf16.msra.mxu1 %v12269_v24  ;;  %12729 = vmatpush3.bf16.msra.mxu0 %v13034_v27  ;;  %21171 = vst [vmem:[#allocation34_spill] sm:$0xff] %v17759_v9  ;;  %v6865_v24 = vpop.f32.mrf.mxu1  ;;  %v21173_v9 = vld [vmem:[#allocation28_spill] sm:$0xff] }
 0x33d   :  { %7715 = vmatprep.subr.bf16.mxu1 %v12262_v19  ;;  %12730 = vmatprep.subr.bf16.mxu0 %v13035_v47  ;;  %v7853_v19 = vmax.f32 %v6858_v15, 0.0  ;;  %v17770_v27 = vpack.c.bf16 %v7860_v48, %v7852_v5  ;;  %v7861_v10 = vmax.f32 %v6862_v34, 0.0  ;;  %v6866_v1 = vadd.f32 %v6865_v24, %v17433_v46  ;;  %v17773_v18 = vpop.f32.mrf.mxu0  ;;  %v13038_v47 = vld [vmem:[%s20615_s5 + $0x8] sm:$0xff]   ;;  %v3403_v46 = vld [vmem:[%s20612_s3 + $0xfd8] sm:$0xff] }
 0x33e   :  { %v6867_v3 = vpop.f32.mrf.mxu1  ;;  %v21176_v48 = vld [vmem:[#allocation43_spill] sm:$0xff]  ;;  %v12245_v24 = vcombine.low %v3283_v16, %v3287_v53  ;;  %v3399_v16 = vld [vmem:[%s20612_s3 + $0xfb8] sm:$0xff] }
 0x33f   :  { %21172 = vst [vmem:[#allocation53_spill] sm:$0xff] %v17770_v27  ;;  %v6868_v15 = vadd.f32 %v6867_v3, %v17455_v14  ;;  %v17780_v6 = vpop.f32.mrf.mxu0  ;;  %v21175_v14 = vld [vmem:[#allocation21_spill] sm:$0xff]  ;;  %v12366_v3 = vcombine.high %v3403_v46, %v3407_v23 }
 0x340   :  { %7716 = vmatpush1.bf16.msra.mxu1 %v12261_v44  ;;  %12731 = vmatpush3.bf16.msra.mxu0 %v13036_v42  ;;  %v13039_v44 = vld [vmem:[%s20615_s5 + $0x40] sm:$0xff]   ;;  %v6869_v5 = vpop.f32.mrf.mxu1  ;;  %v13049_v53 = vld [vmem:[%s20615_s5 + $0x178] sm:$0xff]  }
 0x341   :  { %7717 = vmatprep.subr.bf16.mxu1 %v12254_v25  ;;  %12732 = vmatprep.subr.bf16.mxu0 %v13037_v4  ;;  %v17791_v25 = vpack.c.bf16 %v7861_v10, %v7853_v19  ;;  %v21174_v42 = vld [vmem:[#allocation42_spill] sm:$0xff]  ;;  %v6870_v34 = vadd.f32 %v6869_v5, %v17464_v21  ;;  %v7868_v10 = vmax.f32 %v6866_v1, 0.0  ;;  %v3395_v21 = vld [vmem:[%s20612_s3 + $0xf98] sm:$0xff]  ;;  %v12365_v1 = vcombine.low %v3403_v46, %v3407_v23  ;;  %v21181_v23 = vld [vmem:[#allocation44_spill] sm:$0xff] }
 0x342   :  { %7542 = vmatmul.mubr.bf16.gmra.mxu1 %v21173_v9  ;;  %7655 = vmatmul.mubr.bf16.gmra.mxu0 %v21174_v42  ;;  %v17797_v9 = vpop.f32.mrf.mxu0  ;;  %v6871_v4 = vpop.f32.mrf.mxu1  ;;  %v13040_v19 = vld [vmem:[%s20615_s5] sm:$0xff]  }
 0x343   :  { %7551 = vmatprep.mubr.bf16.mxu1 %v21175_v14  ;;  %7664 = vmatprep.mubr.bf16.mxu0 %v21176_v48  ;;  %21177 = vst [vmem:[#allocation37_spill] sm:$0xff] %v17797_v9  ;;  %v7876_v42 = vmax.f32 %v6870_v34, 0.0  ;;  %v6872_v14 = vadd.f32 %v6871_v4, %v17477_v0  ;;  %v12358_v4 = vcombine.high %v3395_v21, %v3399_v16 }
 0x344   :  { %7718 = vmatpush1.bf16.msra.mxu1 %v12253_v31  ;;  %12733 = vmatpush3.bf16.msra.mxu0 %v13038_v47  ;;  %v17803_v27 = vpop.f32.mrf.mxu0  ;;  %v6875_v31 = vpop.f32.mrf.mxu1 }
 0x345   :  { %7719 = vmatprep.subr.bf16.mxu1 %v12246_v49  ;;  %21178 = vst [vmem:[#allocation54_spill] sm:$0xff] %v17803_v27  ;;  %12734 = vmatprep.subr.bf16.mxu0 %v13039_v44  ;;  %v7869_v49 = vmax.f32 %v6868_v15, 0.0  ;;  %v17814_v47 = vpack.c.bf16 %v7876_v42, %v7868_v10  ;;  %v7877_v0 = vmax.f32 %v6872_v14, 0.0  ;;  %v6876_v5 = vadd.f32 %v6875_v31, %v17481_v28  ;;  %v21180_v44 = vld [vmem:[#allocation25_spill] sm:$0xff] }
 0x346   :  { %v17817_v48 = vpop.f32.mrf.mxu0  ;;  %v6877_v34 = vpop.f32.mrf.mxu1  ;;  %v3387_v15 = vld [vmem:[%s20612_s3 + $0xf58] sm:$0xff]  ;;  %v12357_v42 = vcombine.low %v3395_v21, %v3399_v16 }
 0x347   :  { %21179 = vst [vmem:[#allocation39_spill] sm:$0xff] %v17814_v47  ;;  %v6878_v27 = vadd.f32 %v6877_v34, %v17501_v58  ;;  %v3391_v28 = vld [vmem:[%s20612_s3 + $0xf78] sm:$0xff]  ;;  %v17829_v46 = vpack.c.bf16 %v7877_v0, %v7869_v49  ;;  %v7884_v34 = vmax.f32 %v6876_v5, 0.0  ;;  %v21232_v47 = vld [vmem:[#allocation71_spill] sm:$0xff] }
 0x348   :  { %7720 = vmatpush1.bf16.msra.mxu1 %v12245_v24  ;;  %12735 = vmatpush3.bf16.msra.mxu0 %v13040_v19  ;;  %v17821_v9 = vpop.f32.mrf.mxu0  ;;  %v21182_v24 = vld [vmem:[#allocation22_spill] sm:$0xff]  ;;  %v21183_v19 = vld [vmem:[#allocation45_spill] sm:$0xff]  ;;  %v12350_v31 = vcombine.high %v3387_v15, %v3391_v28 }
 0x349   :  { %7721 = vmatprep.subr.bf16.mxu1 %v12366_v3  ;;  %12848 = vmatprep.subr.bf16.mxu0 %v13049_v53  ;;  %v6879_v3 = vpop.f32.mrf.mxu1  ;;  %v7885_v21 = vmax.f32 %v6878_v27, 0.0  ;;  %v3371_v27 = vld [vmem:[%s20612_s3 + $0xed8] sm:$0xff] }
 0x34a   :  { %7552 = vmatmul.mubr.bf16.gmra.mxu1 %v21180_v44  ;;  %7665 = vmatmul.mubr.bf16.gmra.mxu0 %v21181_v23  ;;  %v6880_v58 = vadd.f32 %v6879_v3, %v17508_v33  ;;  %v17835_v10 = vpop.f32.mrf.mxu0  ;;  %v3379_v44 = vld [vmem:[%s20612_s3 + $0xf18] sm:$0xff]  ;;  %v12349_v23 = vcombine.low %v3387_v15, %v3391_v28  ;;  %v21189_v28 = vld [vmem:[#allocation46_spill] sm:$0xff] }
 0x34b   :  { %7561 = vmatprep.mubr.bf16.mxu1 %v21182_v24  ;;  %7674 = vmatprep.mubr.bf16.mxu0 %v21183_v19  ;;  %21184 = vst [vmem:[#allocation5_spill] sm:$0xff] %v17835_v10  ;;  %v6881_v14 = vpop.f32.mrf.mxu1  ;;  %v3383_v33 = vld [vmem:[%s20612_s3 + $0xf38] sm:$0xff]  ;;  %v21187_v19 = vld [vmem:[#allocation23_spill] sm:$0xff] }
 0x34c   :  { %7722 = vmatpush2.bf16.msra.mxu1 %v12365_v1  ;;  %v7892_v53 = vmax.f32 %v6880_v58, 0.0  ;;  %v6882_v49 = vadd.f32 %v6881_v14, %v17521_v36  ;;  %v17838_v0 = vpop.f32.mrf.mxu0  ;;  %v12342_v3 = vcombine.high %v3379_v44, %v3383_v33  ;;  %v3375_v15 = vld [vmem:[%s20612_s3 + $0xef8] sm:$0xff] }
 0x34d   :  { %7723 = vmatprep.subr.bf16.mxu1 %v12358_v4  ;;  %21185 = vst [vmem:[#allocation3_spill] sm:$0xff] %v17838_v0  ;;  %v6885_v1 = vpop.f32.mrf.mxu1  ;;  %v21227_v0 = vld [vmem:[#allocation58_spill] sm:$0xff] }
 0x34e   :  { %v17846_v16 = vpack.c.bf16 %v7892_v53, %v7884_v34  ;;  %v7893_v5 = vmax.f32 %v6882_v49, 0.0  ;;  %v6886_v4 = vadd.f32 %v6885_v1, %v17525_v30  ;;  %v17849_v36 = vpop.f32.mrf.mxu0  ;;  %v21191_v34 = vld [vmem:[#allocation47_spill] sm:$0xff]  ;;  %v12341_v49 = vcombine.low %v3379_v44, %v3383_v33 }
 0x34f   :  { %v6887_v24 = vpop.f32.mrf.mxu1 }
 0x350   :  { %21186 = vst [vmem:[#allocation6_spill] sm:$0xff] %v17846_v16  ;;  %7724 = vmatpush2.bf16.msra.mxu1 %v12357_v42  ;;  %v6888_v58 = vadd.f32 %v6887_v24, %v17545_v41  ;;  %v17853_v14 = vpop.f32.mrf.mxu0  ;;  %v17861_v30 = vpack.c.bf16 %v7893_v5, %v7885_v21  ;;  %v21190_v42 = vld [vmem:[#allocation30_spill] sm:$0xff]  ;;  %v12334_v24 = vcombine.high %v3371_v27, %v3375_v15 }
 0x351   :  { %7725 = vmatprep.subr.bf16.mxu1 %v12350_v31  ;;  %v6889_v31 = vpop.f32.mrf.mxu1 }
 0x352   :  { %7562 = vmatmul.mubr.bf16.gmra.mxu1 %v21187_v19  ;;  %21188 = vst [vmem:[#allocation17_spill] sm:$0xff] %v17861_v30  ;;  %7675 = vmatmul.mubr.bf16.gmra.mxu0 %v21189_v28  ;;  %v6890_v41 = vadd.f32 %v6889_v31, %v17552_v39  ;;  %v17867_v53 = vpop.f32.mrf.mxu0  ;;  %v7900_v19 = vmax.f32 %v6886_v4, 0.0  ;;  %v3363_v28 = vld [vmem:[%s20612_s3 + $0xe98] sm:$0xff]  ;;  %v7901_v44 = vmax.f32 %v6888_v58, 0.0 }
 0x353   :  { %7571 = vmatprep.mubr.bf16.mxu1 %v21190_v42  ;;  %7684 = vmatprep.mubr.bf16.mxu0 %v21191_v34  ;;  %21192 = vst [vmem:[#allocation9_spill] sm:$0xff] %v17867_v53  ;;  %v6891_v1 = vpop.f32.mrf.mxu1  ;;  %v3367_v39 = vld [vmem:[%s20612_s3 + $0xeb8] sm:$0xff]  ;;  %v12333_v42 = vcombine.low %v3371_v27, %v3375_v15  ;;  %v21197_v27 = vld [vmem:[#allocation48_spill] sm:$0xff] }
 0x354   :  { %7726 = vmatpush2.bf16.msra.mxu1 %v12349_v23  ;;  %v7908_v16 = vmax.f32 %v6890_v41, 0.0  ;;  %v6892_v21 = vadd.f32 %v6891_v1, %v17565_v26  ;;  %v17870_v5 = vpop.f32.mrf.mxu0  ;;  %v12326_v34 = vcombine.high %v3363_v28, %v3367_v39  ;;  %v21195_v41 = vld [vmem:[#allocation20_spill] sm:$0xff]  ;;  %v3359_v58 = vld [vmem:[%s20612_s3 + $0xe78] sm:$0xff] }
 0x355   :  { %7727 = vmatprep.subr.bf16.mxu1 %v12342_v3  ;;  %21193 = vst [vmem:[#allocation18_spill] sm:$0xff] %v17870_v5  ;;  %v6895_v23 = vpop.f32.mrf.mxu1  ;;  %v21198_v15 = vld [vmem:[#allocation24_spill] sm:$0xff] }
 0x356   :  { %v17878_v33 = vpack.c.bf16 %v7908_v16, %v7900_v19  ;;  %v7909_v4 = vmax.f32 %v6892_v21, 0.0  ;;  %v6896_v3 = vadd.f32 %v6895_v23, %v17569_v12  ;;  %v17881_v26 = vpop.f32.mrf.mxu0  ;;  %v3355_v16 = vld [vmem:[%s20612_s3 + $0xe58] sm:$0xff]  ;;  %v12325_v21 = vcombine.low %v3363_v28, %v3367_v39 }
 0x357   :  { %v6897_v31 = vpop.f32.mrf.mxu1 }
 0x358   :  { %21194 = vst [vmem:[#allocation11_spill] sm:$0xff] %v17878_v33  ;;  %7728 = vmatpush2.bf16.msra.mxu1 %v12341_v49  ;;  %v6898_v1 = vadd.f32 %v6897_v31, %v17589_v40  ;;  %v17885_v5 = vpop.f32.mrf.mxu0  ;;  %v17893_v12 = vpack.c.bf16 %v7909_v4, %v7901_v44  ;;  %v12318_v31 = vcombine.high %v3355_v16, %v3359_v58 }
 0x359   :  { %7729 = vmatprep.subr.bf16.mxu1 %v12334_v24  ;;  %v6899_v49 = vpop.f32.mrf.mxu1  ;;  %v21199_v24 = vld [vmem:[#allocation49_spill] sm:$0xff] }
 0x35a   :  { %7572 = vmatmul.mubr.bf16.gmra.mxu1 %v21195_v41  ;;  %21196 = vst [vmem:[#allocation16_spill] sm:$0xff] %v17893_v12  ;;  %7685 = vmatmul.mubr.bf16.gmra.mxu0 %v21197_v27  ;;  %v6900_v40 = vadd.f32 %v6899_v49, %v17596_v61  ;;  %v17899_v19 = vpop.f32.mrf.mxu0  ;;  %v7916_v41 = vmax.f32 %v6896_v3, 0.0  ;;  %v3347_v27 = vld [vmem:[%s20612_s3 + $0xe18] sm:$0xff]  ;;  %v7917_v28 = vmax.f32 %v6898_v1, 0.0  ;;  %v21206_v1 = vld [vmem:[#allocation7_spill] sm:$0xff] }
 0x35b   :  { %7581 = vmatprep.mubr.bf16.mxu1 %v21198_v15  ;;  %7694 = vmatprep.mubr.bf16.mxu0 %v21199_v24  ;;  %21200 = vst [vmem:[#allocation12_spill] sm:$0xff] %v17899_v19  ;;  %v6901_v23 = vpop.f32.mrf.mxu1  ;;  %v3351_v61 = vld [vmem:[%s20612_s3 + $0xe38] sm:$0xff]  ;;  %v12317_v15 = vcombine.low %v3355_v16, %v3359_v58  ;;  %v21208_v58 = vld [vmem:[#allocation50_spill] sm:$0xff] }
 0x35c   :  { %7730 = vmatpush2.bf16.msra.mxu1 %v12333_v42  ;;  %v7924_v33 = vmax.f32 %v6900_v40, 0.0  ;;  %v6902_v44 = vadd.f32 %v6901_v23, %v17609_v63  ;;  %v17902_v4 = vpop.f32.mrf.mxu0  ;;  %v12310_v24 = vcombine.high %v3347_v27, %v3351_v61  ;;  %v21203_v40 = vld [vmem:[#allocation31_spill] sm:$0xff] }
 0x35d   :  { %7731 = vmatprep.subr.bf16.mxu1 %v12326_v34  ;;  %21201 = vst [vmem:[#allocation76_spill] sm:$0xff] %v17902_v4  ;;  %v6905_v42 = vpop.f32.mrf.mxu1 }
 0x35e   :  { %v17910_v39 = vpack.c.bf16 %v7924_v33, %v7916_v41  ;;  %v7925_v3 = vmax.f32 %v6902_v44, 0.0  ;;  %v6906_v34 = vadd.f32 %v6905_v42, %v17613_v43  ;;  %v17913_v63 = vpop.f32.mrf.mxu0  ;;  %v17924_v33 = vld [vmem:[%s20614_s4] sm:$0xff]  ;;  %v21207_v43 = vsub.s32 4, %v21206_v1 }
 0x35f   :  { %v6907_v49 = vpop.f32.mrf.mxu1  ;;  %21205 = vst [vmem:[#allocation19_spill] sm:$0xff] %v17924_v33  ;;  %v12309_v42 = vcombine.low %v3347_v27, %v3351_v61 }
 0x360   :  { %21202 = vst [vmem:[#allocation26_spill] sm:$0xff] %v17910_v39  ;;  %7732 = vmatpush2.bf16.msra.mxu1 %v12325_v21  ;;  %v6908_v23 = vadd.f32 %v6907_v49, %v17627_v55  ;;  %v17917_v4 = vpop.f32.mrf.mxu0  ;;  %v17919_v19 = vpack.c.bf16 %v7925_v3, %v7917_v28  ;;  %v17929_v16 = vrot.slane %v17924_v33, %v21207_v43  ;;  %v21209_v21 = vld [vmem:[#allocation51_spill] sm:$0xff]  ;;  %v21210_v55 = vld [vmem:[#allocation38_spill] sm:$0xff]  ;;  %v21212_v28 = vsub.s32 5, %v21206_v1 }
 0x361   :  { %7733 = vmatprep.subr.bf16.mxu1 %v12318_v31  ;;  %v6909_v31 = vpop.f32.mrf.mxu1  ;;  %v7932_v43 = vmax.f32 %v6906_v34, 0.0 }
 0x362   :  { %7582 = vmatmul.mubr.bf16.gmra.mxu1 %v21203_v40  ;;  %21204 = vst [vmem:[#allocation65_spill] sm:$0xff] %v17919_v19  ;;  %7695 = vmatmul.mubr.bf16.gmra.mxu0 %v21208_v58  ;;  %v6910_v41 = vadd.f32 %v6909_v31, %v17629_v38  ;;  %v17935_v44 = vpop.f32.mrf.mxu0  ;;  %v17940_v3 = vrot.slane %v17924_v33, %v21212_v28  ;;  %v13041_v40 = vld [vmem:[%s20615_s5 + $0xf8] sm:$0xff]   ;;  %v7933_v27 = vmax.f32 %v6908_v23, 0.0 }
 0x363   :  { %7737 = vmatprep.mubr.bf16.mxu1 %v21209_v21  ;;  %8561 = vmatprep.mubr.bf16.mxu0 %v21210_v55  ;;  %21211 = vst [vmem:[#allocation2_spill] sm:$0xff] %v17935_v44  ;;  %v6911_v49 = vpop.f32.mrf.mxu1  ;;  %v6949_v38 = vadd.f32 %v17643_v35, %v17929_v16  ;;  %v13050_v35 = vld [vmem:[%s20615_s5 + $0x138] sm:$0xff]   ;;  %v21221_v44 = vld [vmem:[#allocation56_spill] sm:$0xff] }
 0x364   :  { %7734 = vmatpush2.bf16.msra.mxu1 %v12317_v15  ;;  %v7940_v15 = vmax.f32 %v6910_v41, 0.0  ;;  %v6912_v58 = vadd.f32 %v6911_v49, %v17640_v29  ;;  %v17946_v21 = vpop.f32.mrf.mxu0  ;;  %v6951_v55 = vadd.f32 %v17650_v13, %v17940_v3  ;;  %v13042_v29 = vld [vmem:[%s20615_s5 + $0xb8] sm:$0xff]   ;;  %v13043_v41 = vld [vmem:[%s20615_s5 + $0xf0] sm:$0xff]   ;;  %v21216_v49 = vld [vmem:[#allocation35_spill] sm:$0xff] }
 0x365   :  { %7735 = vmatprep.subr.bf16.mxu1 %v12310_v24  ;;  %21213 = vst [vmem:[#allocation78_spill] sm:$0xff] %v17946_v21  ;;  %v7061_v24 = vpop.f32.mrf.mxu1  ;;  %v13053_v13 = vld [vmem:[%s20615_s5 + $0x170] sm:$0xff]  }
 0x366   :  { %v17950_v61 = vpack.c.bf16 %v7940_v15, %v7932_v43  ;;  %v7941_v31 = vmax.f32 %v6912_v58, 0.0  ;;  %v17954_v28 = vadd.f32 %v7061_v24, %v6949_v38  ;;  %v17956_v34 = vpop.f32.mrf.mxu0  ;;  %v21217_v15 = vld [vmem:[#allocation66_spill] sm:$0xff]  ;;  %v13057_v24 = vld [vmem:[%s20615_s5 + $0x168] sm:$0xff]  }
 0x367   :  { %v7063_v23 = vpop.f32.mrf.mxu1 }
 0x368   :  { %21214 = vst [vmem:[#allocation32_spill] sm:$0xff] %v17950_v61  ;;  %7736 = vmatpush2.bf16.msra.mxu1 %v12309_v42  ;;  %v17970_v42 = vpack.c.bf16 %v7941_v31, %v7933_v27  ;;  %v17976_v43 = vpop.f32.mrf.mxu0  ;;  %v13044_v27 = vld [vmem:[%s20615_s5 + $0xb0] sm:$0xff]  }
 0x369   :  { %12784 = vmatprep.subr.bf16.mxu1 %v13041_v40  ;;  %v17974_v40 = vadd.f32 %v7063_v23, %v6951_v55  ;;  %v17980_v58 = vpop.f32.mrf.mxu1  ;;  %v6959_v55 = vadd.f32 %v17685_v45, %v17929_v16  ;;  %v6961_v23 = vadd.f32 %v17692_v32, %v17940_v3  ;;  %v13058_v45 = vld [vmem:[%s20615_s5 + $0x128] sm:$0xff]   ;;  %v13047_v32 = vld [vmem:[%s20615_s5 + $0xe0] sm:$0xff]  }
 0x36a   :  { %21215 = vst [vmem:[#allocation10_spill] sm:$0xff] %v17970_v42  ;;  %8562 = vmatmul.mubr.bf16.vlgmr.msra.gmra.mxu0 %v21216_v49  ;;  %v17982_v38 = vpop.f32.mrf.mxu0 }
 0x36b   :  { %7738 = vmatmul.mubr.bf16.vlgmr.msra.gmra.mxu1 %v21127_v7  ;;  %8569 = vmatprep.mubr.bf16.mxu0 %v21217_v15  ;;  %v13054_v7 = vld [vmem:[%s20615_s5 + $0x130] sm:$0xff]   ;;  %v17990_v31 = vpop.f32.mrf.mxu1 }
 0x36c   :  { %7747 = vmatprep.mubr.bf16.mxu1 %v21130_v50  ;;  %12785 = vmatpush3.bf16.msra.mxu1 %v13042_v29  ;;  %v13045_v50 = vld [vmem:[%s20615_s5 + $0xe8] sm:$0xff]   ;;  %v18000_v29 = vpop.f32.mrf.mxu0 }
 0x36d   :  { %12849 = vmatpush3.bf16.msra.mxu0 %v13050_v35  ;;  %12786 = vmatprep.subr.bf16.mxu1 %v13043_v41  ;;  %v7071_v35 = vpop.f32.mrf.mxu1 }
 0x36e   :  { %12850 = vmatprep.subr.bf16.mxu0 %v13053_v13  ;;  %v18004_v49 = vadd.f32 %v7071_v35, %v6959_v55  ;;  %v18006_v41 = vpop.f32.mrf.mxu0  ;;  %v13046_v13 = vld [vmem:[%s20615_s5 + $0xa8] sm:$0xff]  }
 0x36f   :  { %v7073_v15 = vpop.f32.mrf.mxu1  ;;  %v21218_v55 = vld [vmem:[#allocation55_spill] sm:$0xff] }
 0x370   :  { %12787 = vmatpush3.bf16.msra.mxu1 %v13044_v27  ;;  %v13061_v27 = vld [vmem:[%s20615_s5 + $0x160] sm:$0xff]   ;;  %v18024_v35 = vpop.f32.mrf.mxu0 }
 0x371   :  { %12851 = vmatpush3.bf16.msra.mxu0 %v13054_v7  ;;  %12788 = vmatprep.subr.bf16.mxu1 %v13045_v50  ;;  %v18022_v7 = vadd.f32 %v7073_v15, %v6961_v23  ;;  %v21219_v50 = vld [vmem:[#allocation68_spill] sm:$0xff]  ;;  %v18028_v33 = vpop.f32.mrf.mxu1  ;;  %v6969_v15 = vadd.f32 %v17729_v17, %v17929_v16  ;;  %v13066_v17 = vld [vmem:[%s20615_s5 + $0x118] sm:$0xff]  }
 0x372   :  { %12852 = vmatprep.subr.bf16.mxu0 %v13057_v24  ;;  %8570 = vmatmul.mubr.bf16.gmra.mxu0 %v21218_v55  ;;  %v18030_v1 = vpop.f32.mrf.mxu0  ;;  %v13048_v24 = vld [vmem:[%s20615_s5 + $0xa0] sm:$0xff]  }
 0x373   :  { %7748 = vmatmul.mubr.bf16.gmra.mxu1 %v15802_v22  ;;  %8577 = vmatprep.mubr.bf16.mxu0 %v21219_v50  ;;  %v13062_v22 = vld [vmem:[%s20615_s5 + $0x120] sm:$0xff]   ;;  %v18038_v23 = vpop.f32.mrf.mxu1  ;;  %v6971_v50 = vadd.f32 %v17736_v56, %v17940_v3  ;;  %v13055_v56 = vld [vmem:[%s20615_s5 + $0xd0] sm:$0xff]  }
 0x374   :  { %7757 = vmatprep.mubr.bf16.mxu1 %v21132_v52  ;;  %12789 = vmatpush3.bf16.msra.mxu1 %v13046_v13  ;;  %v13051_v52 = vld [vmem:[%s20615_s5 + $0xd8] sm:$0xff]  }
 0x375   :  { %12853 = vmatpush3.bf16.msra.mxu0 %v13058_v45  ;;  %12790 = vmatprep.subr.bf16.mxu1 %v13047_v32  ;;  %v13065_v13 = vld [vmem:[%s20615_s5 + $0x158] sm:$0xff]   ;;  %v18048_v45 = vpop.f32.mrf.mxu0  ;;  %v7081_v55 = vpop.f32.mrf.mxu1 }
 0x376   :  { %12854 = vmatprep.subr.bf16.mxu0 %v13061_v27  ;;  %v18052_v61 = vadd.f32 %v7081_v55, %v6969_v15  ;;  %v13052_v27 = vld [vmem:[%s20615_s5 + $0x98] sm:$0xff]  }
 0x377   :  { %v18054_v32 = vpop.f32.mrf.mxu0  ;;  %v7083_v21 = vpop.f32.mrf.mxu1  ;;  %v21220_v15 = vld [vmem:[#allocation69_spill] sm:$0xff] }
 0x378   :  { %12791 = vmatpush3.bf16.msra.mxu1 %v13048_v24  ;;  %v13067_v24 = vld [vmem:[%s20615_s5 + $0x150] sm:$0xff]  }
 0x379   :  { %12855 = vmatpush3.bf16.msra.mxu0 %v13062_v22  ;;  %12792 = vmatprep.subr.bf16.mxu1 %v13051_v52  ;;  %v18070_v22 = vadd.f32 %v7083_v21, %v6971_v50  ;;  %v18072_v55 = vpop.f32.mrf.mxu0  ;;  %v21222_v52 = vld [vmem:[#allocation67_spill] sm:$0xff]  ;;  %v18076_v42 = vpop.f32.mrf.mxu1 }
 0x37a   :  { %12856 = vmatprep.subr.bf16.mxu0 %v13065_v13  ;;  %8578 = vmatmul.mubr.bf16.gmra.mxu0 %v21220_v15  ;;  %v13056_v13 = vld [vmem:[%s20615_s5 + $0x90] sm:$0xff]   ;;  %v13069_v50 = vld [vmem:[%s20615_s5 + $0x148] sm:$0xff]  }
 0x37b   :  { %7758 = vmatmul.mubr.bf16.gmra.mxu1 %v21050_v37  ;;  %8585 = vmatprep.mubr.bf16.mxu0 %v21222_v52  ;;  %v18078_v39 = vpop.f32.mrf.mxu0  ;;  %v13068_v37 = vld [vmem:[%s20615_s5 + $0x110] sm:$0xff]   ;;  %v18086_v21 = vpop.f32.mrf.mxu1  ;;  %v6981_v52 = vadd.f32 %v17780_v6, %v17940_v3  ;;  %v13063_v6 = vld [vmem:[%s20615_s5 + $0xc0] sm:$0xff]  }
 0x37c   :  { %7767 = vmatprep.mubr.bf16.mxu1 %v21221_v44  ;;  %12793 = vmatpush3.bf16.msra.mxu1 %v13052_v27  ;;  %v13059_v44 = vld [vmem:[%s20615_s5 + $0xc8] sm:$0xff]   ;;  %v6979_v27 = vadd.f32 %v17773_v18, %v17929_v16 }
 0x37d   :  { %12857 = vmatpush3.bf16.msra.mxu0 %v13066_v17  ;;  %12794 = vmatprep.subr.bf16.mxu1 %v13055_v56  ;;  %v18096_v17 = vpop.f32.mrf.mxu0  ;;  %v7091_v15 = vpop.f32.mrf.mxu1  ;;  %v13070_v18 = vld [vmem:[%s20615_s5 + $0x108] sm:$0xff]  }
 0x37e   :  { %12858 = vmatprep.subr.bf16.mxu0 %v13067_v24  ;;  %v18100_v19 = vadd.f32 %v7091_v15, %v6979_v27  ;;  %v13060_v24 = vld [vmem:[%s20615_s5 + $0x88] sm:$0xff]   ;;  %v21223_v27 = vld [vmem:[#allocation57_spill] sm:$0xff]  ;;  %v21224_v15 = vld [vmem:[#allocation70_spill] sm:$0xff] }
 0x37f   :  { %v18102_v56 = vpop.f32.mrf.mxu0  ;;  %v7093_v53 = vpop.f32.mrf.mxu1 }
 0x380   :  { %12795 = vmatpush3.bf16.msra.mxu1 %v13056_v13  ;;  %v13071_v13 = vld [vmem:[%s20615_s5 + $0x140] sm:$0xff]  }
 0x381   :  { %12859 = vmatpush3.bf16.msra.mxu0 %v13068_v37  ;;  %12796 = vmatprep.subr.bf16.mxu1 %v13059_v44  ;;  %v18118_v37 = vadd.f32 %v7093_v53, %v6981_v52  ;;  %v18120_v12 = vpop.f32.mrf.mxu0  ;;  %v21228_v44 = vld [vmem:[#allocation72_spill] sm:$0xff]  ;;  %v18124_v10 = vpop.f32.mrf.mxu1  ;;  %v13072_v53 = vld [vmem:[%s20615_s5 + $0x100] sm:$0xff]  }
 0x382   :  { %12860 = vmatprep.subr.bf16.mxu0 %v13069_v50  ;;  %8586 = vmatmul.mubr.bf16.gmra.mxu0 %v21224_v15  ;;  %21226 = vst [vmem:[#allocation8_spill] sm:$0xff] %v18120_v12  ;;  %v13064_v50 = vld [vmem:[%s20615_s5 + $0x80] sm:$0xff]  }
 0x383   :  { %7768 = vmatmul.mubr.bf16.gmra.mxu1 %v21223_v27  ;;  %21225 = vst [vmem:[#allocation27_spill] sm:$0xff] %v18118_v37  ;;  %8593 = vmatprep.mubr.bf16.mxu0 %v21228_v44  ;;  %v18126_v30 = vpop.f32.mrf.mxu0  ;;  %v18134_v52 = vpop.f32.mrf.mxu1  ;;  %v21236_v37 = vld [vmem:[#allocation74_spill] sm:$0xff] }
 0x384   :  { %7777 = vmatprep.mubr.bf16.mxu1 %v21227_v0  ;;  %21229 = vst [vmem:[#allocation33_spill] sm:$0xff] %v18126_v30  ;;  %12797 = vmatpush3.bf16.msra.mxu1 %v13060_v24  ;;  %v13073_v0 = vld [vmem:[%s20615_s5 + $0x1f8] sm:$0xff]   ;;  %v6989_v24 = vadd.f32 %v17817_v48, %v17929_v16 }
 0x385   :  { %12861 = vmatpush3.bf16.msra.mxu0 %v13070_v18  ;;  %12798 = vmatprep.subr.bf16.mxu1 %v13063_v6  ;;  %v18141_v27 = vpop.f32.mrf.mxu0  ;;  %v7101_v15 = vpop.f32.mrf.mxu1  ;;  %v6991_v18 = vadd.f32 %v17821_v9, %v17940_v3 }
 0x386   :  { %12862 = vmatprep.subr.bf16.mxu0 %v13071_v13  ;;  %21230 = vst [vmem:[#allocation4_spill] sm:$0xff] %v18141_v27  ;;  %v18145_v44 = vadd.f32 %v7101_v15, %v6989_v24  ;;  %v21231_v13 = vld [vmem:[#allocation59_spill] sm:$0xff]  ;;  %v21235_v27 = vld [vmem:[#allocation60_spill] sm:$0xff]  ;;  %v7001_v15 = vadd.f32 %v17853_v14, %v17940_v3 }
 0x387   :  { %v18147_v30 = vpop.f32.mrf.mxu0  ;;  %v7103_v6 = vpop.f32.mrf.mxu1 }
 0x388   :  { %12799 = vmatpush3.bf16.msra.mxu1 %v13064_v50  ;;  %v18151_v12 = vadd.f32 %v7103_v6, %v6991_v18  ;;  %v21240_v6 = vld [vmem:[#allocation61_spill] sm:$0xff] }
 0x389   :  { %12863 = vmatpush3.bf16.msra.mxu0 %v13072_v53  ;;  %12912 = vmatprep.subr.bf16.mxu1 %v13073_v0  ;;  %v18153_v48 = vpop.f32.mrf.mxu0  ;;  %v18157_v9 = vpop.f32.mrf.mxu1  ;;  %v6999_v53 = vadd.f32 %v17849_v36, %v17929_v16  ;;  %v21244_v36 = vld [vmem:[#allocation62_spill] sm:$0xff] }
 0x38a   :  { %8594 = vmatmul.mubr.bf16.gmra.mxu0 %v21232_v47  ;;  %21233 = vst [vmem:[#allocation36_spill] sm:$0xff] %v18151_v12  ;;  %21234 = vst [vmem:[#allocation13_spill] sm:$0xff] %v18153_v48 }
 0x38b   :  { %7778 = vmatmul.mubr.bf16.gmra.mxu1 %v21231_v13  ;;  %8601 = vmatprep.mubr.bf16.mxu0 %v21236_v37  ;;  %v18159_v24 = vpop.f32.mrf.mxu0  ;;  %v18161_v50 = vpop.f32.mrf.mxu1  ;;  %v21241_v13 = vld [vmem:[#allocation73_spill] sm:$0xff] }
 0x38c   :  { %7787 = vmatprep.mubr.bf16.mxu1 %v21235_v27  ;;  %21237 = vst [vmem:[#allocation29_spill] sm:$0xff] %v18159_v24 }
 0x38d   :  { %v18165_v0 = vpop.f32.mrf.mxu0  ;;  %v7111_v47 = vpop.f32.mrf.mxu1 }
 0x38e   :  { %21238 = vst [vmem:[#allocation15_spill] sm:$0xff] %v18165_v0  ;;  %v18169_v18 = vadd.f32 %v7111_v47, %v6999_v53  ;;  %v21245_v0 = vld [vmem:[#allocation77_spill] sm:$0xff]  ;;  %v7009_v47 = vadd.f32 %v17881_v26, %v17929_v16  ;;  %v21253_v26 = vld [vmem:[#allocation64_spill] sm:$0xff] }
 0x38f   :  { %v18171_v27 = vpop.f32.mrf.mxu0  ;;  %v7113_v37 = vpop.f32.mrf.mxu1 }
 0x390   :  { %21239 = vst [vmem:[#allocation40_spill] sm:$0xff] %v18171_v27  ;;  %v18175_v24 = vadd.f32 %v7113_v37, %v7001_v15  ;;  %v7011_v15 = vadd.f32 %v17885_v5, %v17940_v3 }
 0x391   :  { %v18177_v48 = vpop.f32.mrf.mxu0  ;;  %v18181_v12 = vpop.f32.mrf.mxu1 }
 0x392   :  { %8602 = vmatmul.mubr.bf16.gmra.mxu0 %v21241_v13  ;;  %21242 = vst [vmem:[#allocation14_spill] sm:$0xff] %v18175_v24  ;;  %21243 = vst [vmem:[#allocation41_spill] sm:$0xff] %v18177_v48  ;;  %v21249_v48 = vld [vmem:[#allocation63_spill] sm:$0xff] }
 0x393   :  { %7788 = vmatmul.mubr.bf16.gmra.mxu1 %v21240_v6  ;;  %8609 = vmatprep.mubr.bf16.mxu0 %v21245_v0  ;;  %v18183_v14 = vpop.f32.mrf.mxu0  ;;  %v18185_v53 = vpop.f32.mrf.mxu1  ;;  %v21250_v24 = vld [vmem:[#allocation75_spill] sm:$0xff] }
 0x394   :  { %7797 = vmatprep.mubr.bf16.mxu1 %v21244_v36  ;;  %21246 = vst [vmem:[#allocation28_spill] sm:$0xff] %v18183_v14  ;;  %21247 = vst [vmem:[#allocation42_spill] sm:$0xff] %v18185_v53 }
 0x395   :  { %v18189_v6 = vpop.f32.mrf.mxu0  ;;  %v7121_v13 = vpop.f32.mrf.mxu1 }
 0x396   :  { %21248 = vst [vmem:[#allocation21_spill] sm:$0xff] %v18189_v6  ;;  %v18193_v37 = vadd.f32 %v7121_v13, %v7009_v47  ;;  %v21254_v6 = vld [vmem:[#allocation52_spill] sm:$0xff]  ;;  %v7019_v13 = vadd.f32 %v17913_v63, %v17929_v16 }
 0x397   :  { %v18195_v36 = vpop.f32.mrf.mxu0  ;;  %v7123_v0 = vpop.f32.mrf.mxu1 }
 0x398   :  { %v18199_v14 = vadd.f32 %v7123_v0, %v7011_v15  ;;  %v7021_v15 = vadd.f32 %v17917_v4, %v17940_v3  ;;  %v6953_v4 = vadd.f32 %v17665_v60, %v17929_v16  ;;  %v7175_v60 = vadd.f32 %v17956_v34, %v17954_v28  ;;  %v13076_v28 = vld [vmem:[%s20615_s5 + $0x1b0] sm:$0xff]  }
 0x399   :  { %v18201_v53 = vpop.f32.mrf.mxu0  ;;  %v18205_v27 = vpop.f32.mrf.mxu1 }
 0x39a   :  { %8610 = vmatmul.mubr.bf16.gmra.mxu0 %v21250_v24  ;;  %21251 = vst [vmem:[#allocation43_spill] sm:$0xff] %v18199_v14  ;;  %21252 = vst [vmem:[#allocation25_spill] sm:$0xff] %v18201_v53  ;;  %v21257_v53 = vld [vmem:[#allocation79_spill] sm:$0xff] }
 0x39b   :  { %7798 = vmatmul.mubr.bf16.gmra.mxu1 %v21249_v48  ;;  %8617 = vmatprep.mubr.bf16.mxu0 %v21254_v6  ;;  %v18207_v5 = vpop.f32.mrf.mxu0  ;;  %v18209_v47 = vpop.f32.mrf.mxu1 }
 0x39c   :  { %7807 = vmatprep.mubr.bf16.mxu1 %v21253_v26  ;;  %21255 = vst [vmem:[#allocation44_spill] sm:$0xff] %v18207_v5 }
 0x39d   :  { %v18213_v48 = vpop.f32.mrf.mxu0  ;;  %v7131_v24 = vpop.f32.mrf.mxu1 }
 0x39e   :  { %21256 = vst [vmem:[#allocation22_spill] sm:$0xff] %v18213_v48  ;;  %v18217_v0 = vadd.f32 %v7131_v24, %v7019_v13 }
 0x39f   :  { %v18219_v26 = vpop.f32.mrf.mxu0  ;;  %v7133_v6 = vpop.f32.mrf.mxu1 }
 0x3a0   :  { %v18223_v5 = vadd.f32 %v7133_v6, %v7021_v15  ;;  %v13075_v6 = vld [vmem:[%s20615_s5 + $0x1f0] sm:$0xff]  }
 0x3a1   :  { %v18225_v14 = vpop.f32.mrf.mxu0  ;;  %v18228_v63 = vpop.f32.mrf.mxu1 }
 0x3a2   :  { %8618 = vmatmul.mubr.bf16.gmra.mxu0 %v21257_v53  ;;  %21258 = vst [vmem:[#allocation45_spill] sm:$0xff] %v18223_v5  ;;  %21259 = vst [vmem:[#allocation23_spill] sm:$0xff] %v18225_v14  ;;  %v7066_v53 = vadd.f32 %v17980_v58, %v6953_v4  ;;  %v7177_v58 = vadd.f32 %v17976_v43, %v17974_v40  ;;  %v6963_v40 = vadd.f32 %v17709_v2, %v17929_v16  ;;  %v13078_v2 = vld [vmem:[%s20615_s5 + $0x1a8] sm:$0xff]  }
 0x3a3   :  { %7808 = vmatmul.mubr.bf16.gmra.mxu1 %v21154_v57  ;;  %v18230_v48 = vpop.f32.mrf.mxu0  ;;  %v18234_v13 = vpop.f32.mrf.mxu1  ;;  %v6955_v57 = vadd.f32 %v17671_v11, %v17940_v3 }
 0x3a4   :  { %8658 = vmatprep.mubr.bf16.mxu1 %v17703_v51  ;;  %21260 = vst [vmem:[#allocation46_spill] sm:$0xff] %v18230_v48  ;;  %v13074_v51 = vld [vmem:[%s20615_s5 + $0x1b8] sm:$0xff]   ;;  %v7179_v4 = vadd.f32 %v17982_v38, %v7066_v53 }
 0x3a5   :  { %v18236_v24 = vpop.f32.mrf.mxu0  ;;  %v7068_v48 = vadd.f32 %v17990_v31, %v6955_v57  ;;  %v6965_v57 = vadd.f32 %v17715_v54, %v17940_v3  ;;  %v13079_v54 = vld [vmem:[%s20615_s5 + $0x1e0] sm:$0xff]  }
 0x3a6   :  { %21261 = vst [vmem:[#allocation30_spill] sm:$0xff] %v18236_v24  ;;  %v7287_v15 = vpop.f32.mrf.mxu1 }
 0x3a7   :  { %v18250_v24 = vpop.f32.mrf.mxu0  ;;  %v7288_v14 = vadd.f32 %v7287_v15, %v7175_v60  ;;  %v7181_v43 = vadd.f32 %v18000_v29, %v7068_v48  ;;  %v7185_v29 = vadd.f32 %v18006_v41, %v18004_v49 }
 0x3a8   :  { %v7289_v11 = vpop.f32.mrf.mxu1 }
 0x3a9   :  { %v18257_v5 = vpop.f32.mrf.mxu0  ;;  %v7290_v38 = vadd.f32 %v7289_v11, %v7177_v58  ;;  %v7822_v15 = vmax.f32 %v7288_v14, 0.0 }
 0x3aa   :  { %21262 = vst [vmem:[#allocation47_spill] sm:$0xff] %v18257_v5  ;;  %v7291_v34 = vpop.f32.mrf.mxu1 }
 0x3ab   :  { %8659 = vmatmul.mubr.bf16.vlgmr.msra.gmra.mxu1 %v17682_v8  ;;  %v13077_v8 = vld [vmem:[%s20615_s5 + $0x1e8] sm:$0xff]   ;;  %v18268_v31 = vpop.f32.mrf.mxu0  ;;  %v7823_v14 = vmax.f32 %v7290_v38, 0.0 }
 0x3ac   :  { %8666 = vmatprep.mubr.bf16.mxu1 %v17747_v62  ;;  %12913 = vmatpush3.bf16.msra.mxu1 %v13074_v51  ;;  %v7292_v62 = vadd.f32 %v7291_v34, %v7179_v4  ;;  %v7293_v53 = vpop.f32.mrf.mxu1  ;;  %v7076_v51 = vadd.f32 %v18028_v33, %v6963_v40  ;;  %v7078_v33 = vadd.f32 %v18038_v23, %v6965_v57  ;;  %v13080_v23 = vld [vmem:[%s20615_s5 + $0x1a0] sm:$0xff]  }
 0x3ad   :  { %12914 = vmatprep.subr.bf16.mxu1 %v13075_v6  ;;  %v7294_v60 = vadd.f32 %v7293_v53, %v7181_v43  ;;  %v18273_v5 = vpop.f32.mrf.mxu0 }
 0x3ae   :  { %v7830_v6 = vmax.f32 %v7292_v62, 0.0  ;;  %v7297_v48 = vpop.f32.mrf.mxu1  ;;  %v7189_v49 = vadd.f32 %v18030_v1, %v7076_v51  ;;  %v6973_v1 = vadd.f32 %v17753_v20, %v17929_v16  ;;  %v21263_v62 = vld [vmem:[#allocation34_spill] sm:$0xff]  ;;  %v13082_v20 = vld [vmem:[%s20615_s5 + $0x198] sm:$0xff]  }
 0x3af   :  { %v7831_v58 = vmax.f32 %v7294_v60, 0.0  ;;  %v7298_v41 = vadd.f32 %v7297_v48, %v7185_v29  ;;  %v6975_v57 = vadd.f32 %v21263_v62, %v17940_v3  ;;  %v13083_v48 = vld [vmem:[%s20615_s5 + $0x1d0] sm:$0xff]  }
 0x3b0   :  { %12915 = vmatpush3.bf16.msra.mxu1 %v13076_v28  ;;  %v7950_v11 = vpack.c.bf16 %v7830_v6, %v7822_v15  ;;  %v18284_v4 = vpop.f32.mrf.mxu0  ;;  %v7187_v28 = vadd.f32 %v18024_v35, %v18022_v7  ;;  %v7299_v34 = vpop.f32.mrf.mxu1  ;;  %v7191_v7 = vadd.f32 %v18048_v45, %v7078_v33  ;;  %v7086_v51 = vadd.f32 %v18076_v42, %v6973_v1  ;;  %v21266_v1 = vld [vmem:[#allocation54_spill] sm:$0xff] }
 0x3b1   :  { %12916 = vmatprep.subr.bf16.mxu1 %v13077_v8  ;;  %v7951_v40 = vpack.c.bf16 %v7831_v58, %v7823_v14  ;;  %v7838_v15 = vmax.f32 %v7298_v41, 0.0  ;;  %v7195_v45 = vadd.f32 %v18054_v32, %v18052_v61  ;;  %v7088_v42 = vadd.f32 %v18086_v21, %v6975_v57  ;;  %v13084_v21 = vld [vmem:[%s20615_s5 + $0x190] sm:$0xff]  }
 0x3b2   :  { %v18291_v8 = vpop.f32.mrf.mxu0  ;;  %v7301_v43 = vpop.f32.mrf.mxu1  ;;  %v7197_v58 = vadd.f32 %v18072_v55, %v18070_v22  ;;  %v7199_v61 = vadd.f32 %v18078_v39, %v7086_v51  ;;  %v13085_v22 = vld [vmem:[%s20615_s5 + $0x1c8] sm:$0xff]   ;;  %v21265_v55 = vld [vmem:[#allocation37_spill] sm:$0xff] }
 0x3b3   :  { %8667 = vmatmul.mubr.bf16.gmra.mxu1 %v17726_v59  ;;  %v13081_v59 = vld [vmem:[%s20615_s5 + $0x1d8] sm:$0xff]   ;;  %v7302_v35 = vadd.f32 %v7301_v43, %v7189_v49  ;;  %8755 = vmatprep.mubr.bf16.mxu0 %v7951_v40  ;;  %v6983_v39 = vadd.f32 %v21265_v55, %v17929_v16 }
 0x3b4   :  { %8674 = vmatprep.mubr.bf16.mxu1 %v17791_v25  ;;  %12917 = vmatpush3.bf16.msra.mxu1 %v13078_v2  ;;  %v7300_v25 = vadd.f32 %v7299_v34, %v7187_v28  ;;  %v18302_v38 = vpop.f32.mrf.mxu0  ;;  %v7303_v53 = vpop.f32.mrf.mxu1  ;;  %v21264_v28 = vld [vmem:[#allocation53_spill] sm:$0xff] }
 0x3b5   :  { %12918 = vmatprep.subr.bf16.mxu1 %v13079_v54  ;;  %8756 = vmatmul.mubr.bf16.vlgmr.msra.gmra.mxu0 %v7950_v11  ;;  %v7846_v6 = vmax.f32 %v7302_v35, 0.0  ;;  %v7304_v60 = vadd.f32 %v7303_v53, %v7191_v7  ;;  %v6985_v7 = vadd.f32 %v21266_v1, %v17940_v3  ;;  %v7096_v35 = vadd.f32 %v18124_v10, %v6983_v39 }
 0x3b6   :  { %v18307_v2 = vpop.f32.mrf.mxu0  ;;  %v7307_v29 = vpop.f32.mrf.mxu1  ;;  %v7839_v54 = vmax.f32 %v7300_v25, 0.0 }
 0x3b7   :  { %v7958_v33 = vpack.c.bf16 %v7846_v6, %v7838_v15  ;;  %v7847_v14 = vmax.f32 %v7304_v60, 0.0  ;;  %v7308_v32 = vadd.f32 %v7307_v29, %v7195_v45  ;;  %v7205_v15 = vadd.f32 %v18102_v56, %v18100_v19  ;;  %v13087_v60 = vld [vmem:[%s20615_s5 + $0x1c0] sm:$0xff]   ;;  %v21270_v19 = vld [vmem:[#allocation33_spill] sm:$0xff] }
 0x3b8   :  { %12919 = vmatpush3.bf16.msra.mxu1 %v13080_v23  ;;  %v18318_v11 = vpop.f32.mrf.mxu0  ;;  %v7309_v34 = vpop.f32.mrf.mxu1  ;;  %v7201_v23 = vadd.f32 %v18096_v17, %v7088_v42  ;;  %v13086_v17 = vld [vmem:[%s20615_s5 + $0x188] sm:$0xff]   ;;  %v7098_v10 = vadd.f32 %v18134_v52, %v6985_v7  ;;  %v7209_v56 = vadd.f32 %v21270_v19, %v7096_v35  ;;  %v13088_v52 = vld [vmem:[%s20615_s5 + $0x180] sm:$0xff]  }
 0x3b9   :  { %12920 = vmatprep.subr.bf16.mxu1 %v13081_v59  ;;  %v7959_v41 = vpack.c.bf16 %v7847_v14, %v7839_v54  ;;  %v7854_v62 = vmax.f32 %v7308_v32, 0.0  ;;  %v21267_v42 = vld [vmem:[#allocation27_spill] sm:$0xff]  ;;  %v21268_v54 = vld [vmem:[#allocation8_spill] sm:$0xff] }
 0x3ba   :  { %v18325_v49 = vpop.f32.mrf.mxu0  ;;  %v7311_v40 = vpop.f32.mrf.mxu1  ;;  %v21269_v14 = vld [vmem:[#allocation39_spill] sm:$0xff] }
 0x3bb   :  { %8675 = vmatmul.mubr.bf16.gmra.mxu1 %v21264_v28  ;;  %v7312_v43 = vadd.f32 %v7311_v40, %v7199_v61  ;;  %8763 = vmatprep.mubr.bf16.mxu0 %v7959_v41 }
 0x3bc   :  { %8682 = vmatprep.mubr.bf16.mxu1 %v17829_v46  ;;  %12921 = vmatpush3.bf16.msra.mxu1 %v13082_v20  ;;  %v7310_v46 = vadd.f32 %v7309_v34, %v7197_v58  ;;  %v18336_v59 = vpop.f32.mrf.mxu0  ;;  %v7313_v25 = vpop.f32.mrf.mxu1  ;;  %v21271_v34 = vld [vmem:[#allocation17_spill] sm:$0xff] }
 0x3bd   :  { %12922 = vmatprep.subr.bf16.mxu1 %v13083_v48  ;;  %8764 = vmatmul.mubr.bf16.gmra.mxu0 %v7958_v33  ;;  %v7862_v57 = vmax.f32 %v7312_v43, 0.0  ;;  %v7314_v53 = vadd.f32 %v7313_v25, %v7201_v23  ;;  %v7207_v33 = vadd.f32 %v21268_v54, %v21267_v42  ;;  %v21274_v43 = vld [vmem:[#allocation3_spill] sm:$0xff]  ;;  %v21276_v42 = vld [vmem:[#allocation36_spill] sm:$0xff]  ;;  %v21277_v54 = vld [vmem:[#allocation13_spill] sm:$0xff] }
 0x3be   :  { %v18341_v51 = vpop.f32.mrf.mxu0  ;;  %v7317_v6 = vpop.f32.mrf.mxu1  ;;  %v7855_v20 = vmax.f32 %v7310_v46, 0.0  ;;  %v6995_v1 = vadd.f32 %v21274_v43, %v17940_v3 }
 0x3bf   :  { %v7966_v45 = vpack.c.bf16 %v7862_v57, %v7854_v62  ;;  %v7863_v29 = vmax.f32 %v7314_v53, 0.0  ;;  %v7318_v28 = vadd.f32 %v7317_v6, %v7205_v15 }
 0x3c0   :  { %12923 = vmatpush3.bf16.msra.mxu1 %v13084_v21  ;;  %v18352_v48 = vpop.f32.mrf.mxu0  ;;  %v7319_v58 = vpop.f32.mrf.mxu1  ;;  %v21272_v21 = vld [vmem:[#allocation5_spill] sm:$0xff]  ;;  %v7108_v6 = vadd.f32 %v18161_v50, %v6995_v1 }
 0x3c1   :  { %12924 = vmatprep.subr.bf16.mxu1 %v13085_v22  ;;  %v7967_v32 = vpack.c.bf16 %v7863_v29, %v7855_v20  ;;  %v6993_v40 = vadd.f32 %v21272_v21, %v17929_v16  ;;  %v21273_v22 = vld [vmem:[#allocation4_spill] sm:$0xff]  ;;  %v7320_v39 = vadd.f32 %v7319_v58, %v7207_v33  ;;  %v7870_v35 = vmax.f32 %v7318_v28, 0.0  ;;  %v21280_v28 = vld [vmem:[#allocation9_spill] sm:$0xff] }
 0x3c2   :  { %v18359_v61 = vpop.f32.mrf.mxu0  ;;  %v7321_v41 = vpop.f32.mrf.mxu1  ;;  %v7211_v55 = vadd.f32 %v21273_v22, %v7098_v10  ;;  %v7217_v33 = vadd.f32 %v21277_v54, %v21276_v42  ;;  %v21282_v22 = vld [vmem:[#allocation18_spill] sm:$0xff]  ;;  %v21287_v42 = vld [vmem:[#allocation41_spill] sm:$0xff] }
 0x3c3   :  { %8683 = vmatmul.mubr.bf16.gmra.mxu1 %v21269_v14  ;;  %v7322_v23 = vadd.f32 %v7321_v41, %v7209_v56  ;;  %8771 = vmatprep.mubr.bf16.mxu0 %v7967_v32  ;;  %v7106_v25 = vadd.f32 %v18157_v9, %v6993_v40  ;;  %v21278_v14 = vld [vmem:[#allocation29_spill] sm:$0xff]  ;;  %v21279_v56 = vld [vmem:[#allocation16_spill] sm:$0xff]  ;;  %v21281_v32 = vld [vmem:[#allocation15_spill] sm:$0xff] }
 0x3c4   :  { %8690 = vmatprep.mubr.bf16.mxu1 %v21271_v34  ;;  %12925 = vmatpush3.bf16.msra.mxu1 %v13086_v17  ;;  %v18367_v46 = vpop.f32.mrf.mxu0  ;;  %v7323_v7 = vpop.f32.mrf.mxu1  ;;  %v7215_v17 = vadd.f32 %v18147_v30, %v18145_v44  ;;  %v7003_v34 = vadd.f32 %v21280_v28, %v17929_v16 }
 0x3c5   :  { %12926 = vmatprep.subr.bf16.mxu1 %v13087_v60  ;;  %8772 = vmatmul.mubr.bf16.gmra.mxu0 %v7966_v45  ;;  %v7878_v62 = vmax.f32 %v7322_v23, 0.0  ;;  %v7324_v57 = vadd.f32 %v7323_v7, %v7211_v55  ;;  %v7871_v60 = vmax.f32 %v7320_v39, 0.0  ;;  %v21275_v45 = vld [vmem:[#allocation6_spill] sm:$0xff]  ;;  %v7219_v58 = vadd.f32 %v21278_v14, %v7106_v25 }
 0x3c6   :  { %v18372_v53 = vpop.f32.mrf.mxu0  ;;  %v7327_v15 = vpop.f32.mrf.mxu1  ;;  %v7005_v55 = vadd.f32 %v21282_v22, %v17940_v3  ;;  %v7116_v23 = vadd.f32 %v18181_v12, %v7003_v34  ;;  %v21286_v12 = vld [vmem:[#allocation14_spill] sm:$0xff]  ;;  %v21291_v34 = vld [vmem:[#allocation21_spill] sm:$0xff]  ;;  %v21293_v22 = vld [vmem:[#allocation76_spill] sm:$0xff] }
 0x3c7   :  { %v7974_v10 = vpack.c.bf16 %v7878_v62, %v7870_v35  ;;  %v7879_v20 = vmax.f32 %v7324_v57, 0.0  ;;  %v7328_v19 = vadd.f32 %v7327_v15, %v7215_v17  ;;  %v21283_v35 = vld [vmem:[#allocation40_spill] sm:$0xff]  ;;  %v21284_v17 = vld [vmem:[#allocation42_spill] sm:$0xff]  ;;  %v7227_v54 = vadd.f32 %v21287_v42, %v21286_v12  ;;  %v21297_v12 = vld [vmem:[#allocation25_spill] sm:$0xff] }
 0x3c8   :  { %12927 = vmatpush3.bf16.msra.mxu1 %v13088_v52  ;;  %v7329_v9 = vpop.f32.mrf.mxu1  ;;  %v7221_v52 = vadd.f32 %v21281_v32, %v7108_v6  ;;  %v7225_v62 = vadd.f32 %v21283_v35, %v18169_v18  ;;  %v7118_v15 = vadd.f32 %v21284_v17, %v7005_v55  ;;  %v7015_v55 = vadd.f32 %v21293_v22, %v17940_v3 }
 0x3c9   :  { %v18377_v29 = vpop.f32.mrf.mxu0  ;;  %v7975_v44 = vpack.c.bf16 %v7879_v20, %v7871_v60  ;;  %v7330_v41 = vadd.f32 %v7329_v9, %v7217_v33  ;;  %v7886_v43 = vmax.f32 %v7328_v19, 0.0  ;;  %v21285_v9 = vld [vmem:[#allocation11_spill] sm:$0xff]  ;;  %v21288_v33 = vld [vmem:[#allocation28_spill] sm:$0xff]  ;;  %v21289_v19 = vld [vmem:[#allocation65_spill] sm:$0xff] }
 0x3ca   :  { %v7331_v50 = vpop.f32.mrf.mxu1  ;;  %v7229_v14 = vadd.f32 %v21288_v33, %v7116_v23  ;;  %v7231_v32 = vadd.f32 %v21291_v34, %v7118_v15  ;;  %v7128_v17 = vadd.f32 %v18209_v47, %v7015_v55 }
 0x3cb   :  { %8691 = vmatmul.mubr.bf16.gmra.mxu1 %v21275_v45  ;;  %v18384_v30 = vpop.f32.mrf.mxu0  ;;  %v7332_v21 = vadd.f32 %v7331_v50, %v7219_v58  ;;  %8779 = vmatprep.mubr.bf16.mxu0 %v7975_v44  ;;  %v7887_v6 = vmax.f32 %v7330_v41, 0.0  ;;  %v21290_v50 = vld [vmem:[#allocation12_spill] sm:$0xff] }
 0x3cc   :  { %8698 = vmatprep.mubr.bf16.mxu1 %v21279_v56  ;;  %v7333_v39 = vpop.f32.mrf.mxu1  ;;  %v7013_v28 = vadd.f32 %v21290_v50, %v17929_v16 }
 0x3cd   :  { %v18389_v40 = vpop.f32.mrf.mxu0  ;;  %8780 = vmatmul.mubr.bf16.gmra.mxu0 %v7974_v10  ;;  %v7894_v1 = vmax.f32 %v7332_v21, 0.0  ;;  %v7334_v7 = vadd.f32 %v7333_v39, %v7221_v52 }
 0x3ce   :  { %v7126_v23 = vadd.f32 %v18205_v27, %v7013_v28  ;;  %v21296_v27 = vld [vmem:[#allocation43_spill] sm:$0xff] }
 0x3cf   :  { %v18394_v25 = vpop.f32.mrf.mxu0  ;;  %v7982_v60 = vpack.c.bf16 %v7894_v1, %v7886_v43  ;;  %v7895_v20 = vmax.f32 %v7334_v7, 0.0  ;;  %v7237_v42 = vadd.f32 %v21297_v12, %v21296_v27  ;;  %v21308_v27 = vld [vmem:[#allocation46_spill] sm:$0xff] }
 0x3d1   :  { %v7337_v57 = vpop.f32.mrf.mxu1  ;;  %v18399_v45 = vpop.f32.mrf.mxu0  ;;  %v7983_v56 = vpack.c.bf16 %v7895_v20, %v7887_v6 }
 0x3d2   :  { %v7338_v58 = vadd.f32 %v7337_v57, %v7225_v62  ;;  %v7235_v62 = vadd.f32 %v18195_v36, %v18193_v37 }
 0x3d3   :  { %8699 = vmatmul.mubr.bf16.gmra.mxu1 %v21285_v9  ;;  %v7339_v10 = vpop.f32.mrf.mxu1  ;;  %v18406_v18 = vpop.f32.mrf.mxu0  ;;  %8787 = vmatprep.mubr.bf16.mxu0 %v7983_v56 }
 0x3d4   :  { %8706 = vmatprep.mubr.bf16.mxu1 %v21289_v19  ;;  %v7340_v52 = vadd.f32 %v7339_v10, %v7227_v54  ;;  %v7902_v43 = vmax.f32 %v7338_v58, 0.0  ;;  %v21295_v10 = vld [vmem:[#allocation26_spill] sm:$0xff]  ;;  %v21298_v54 = vld [vmem:[#allocation44_spill] sm:$0xff] }
 0x3d5   :  { %v7341_v44 = vpop.f32.mrf.mxu1  ;;  %v18411_v21 = vpop.f32.mrf.mxu0  ;;  %8788 = vmatmul.mubr.bf16.gmra.mxu0 %v7982_v60  ;;  %v7239_v33 = vadd.f32 %v21298_v54, %v7126_v23  ;;  %v21299_v58 = vld [vmem:[#allocation10_spill] sm:$0xff] }
 0x3d6   :  { %v7342_v41 = vadd.f32 %v7341_v44, %v7229_v14  ;;  %21292 = vst [vmem:[#allocation20_spill] sm:$0xff] %v18411_v21  ;;  %v7903_v15 = vmax.f32 %v7340_v52, 0.0  ;;  %v21300_v19 = vld [vmem:[#allocation2_spill] sm:$0xff] }
 0x3d7   :  { %v7343_v39 = vpop.f32.mrf.mxu1  ;;  %v18416_v35 = vpop.f32.mrf.mxu0  ;;  %v7023_v56 = vadd.f32 %v21300_v19, %v17929_v16  ;;  %v21301_v44 = vld [vmem:[#allocation22_spill] sm:$0xff]  ;;  %v7245_v16 = vadd.f32 %v18219_v26, %v18217_v0  ;;  %v21309_v26 = vld [vmem:[#allocation7_spill] sm:$0xff] }
 0x3d8   :  { %v7910_v1 = vmax.f32 %v7342_v41, 0.0  ;;  %v7344_v7 = vadd.f32 %v7343_v39, %v7231_v32  ;;  %21294 = vst [vmem:[#allocation48_spill] sm:$0xff] %v18416_v35  ;;  %v7241_v50 = vadd.f32 %v21301_v44, %v7128_v17  ;;  %v21303_v52 = vld [vmem:[#allocation78_spill] sm:$0xff] }
 0x3d9   :  { %v7347_v57 = vpop.f32.mrf.mxu1  ;;  %v18421_v9 = vpop.f32.mrf.mxu0  ;;  %v7025_v41 = vadd.f32 %v21303_v52, %v17940_v3  ;;  %v7136_v55 = vadd.f32 %v18228_v63, %v7023_v56  ;;  %v21305_v3 = vld [vmem:[#allocation32_spill] sm:$0xff]  ;;  %v21306_v63 = vld [vmem:[#allocation45_spill] sm:$0xff] }
 0x3da   :  { %v7990_v6 = vpack.c.bf16 %v7910_v1, %v7902_v43  ;;  %v7911_v20 = vmax.f32 %v7344_v7, 0.0  ;;  %v7348_v14 = vadd.f32 %v7347_v57, %v7235_v62 }
 0x3db   :  { %8707 = vmatmul.mubr.bf16.gmra.mxu1 %v21295_v10  ;;  %v7349_v60 = vpop.f32.mrf.mxu1  ;;  %v18428_v37 = vpop.f32.mrf.mxu0  ;;  %v7138_v62 = vadd.f32 %v18234_v13, %v7025_v41  ;;  %v21307_v10 = vld [vmem:[#allocation23_spill] sm:$0xff]  ;;  %v7249_v12 = vadd.f32 %v21308_v27, %v7136_v55 }
 0x3dc   :  { %8714 = vmatprep.mubr.bf16.mxu1 %v21299_v58  ;;  %v7991_v36 = vpack.c.bf16 %v7911_v20, %v7903_v15  ;;  %v7350_v28 = vadd.f32 %v7349_v60, %v7237_v42  ;;  %v7918_v39 = vmax.f32 %v7348_v14, 0.0  ;;  %v7247_v60 = vadd.f32 %v21307_v10, %v21306_v63  ;;  %v21311_v13 = vld [vmem:[#allocation19_spill] sm:$0xff] }
 0x3dd   :  { %v7351_v47 = vpop.f32.mrf.mxu1  ;;  %v18433_v32 = vpop.f32.mrf.mxu0 }
 0x3de   :  { %v7352_v34 = vadd.f32 %v7351_v47, %v7239_v33  ;;  %21302 = vst [vmem:[#allocation24_spill] sm:$0xff] %v18433_v32  ;;  %8795 = vmatprep.mubr.bf16.mxu0 %v7991_v36  ;;  %v7919_v57 = vmax.f32 %v7350_v28, 0.0  ;;  %v21310_v33 = vsub.s32 6, %v21309_v26  ;;  %v21312_v36 = vld [vmem:[#allocation30_spill] sm:$0xff] }
 0x3df   :  { %v7353_v22 = vpop.f32.mrf.mxu1  ;;  %8796 = vmatmul.mubr.bf16.gmra.mxu0 %v7990_v6  ;;  %v18438_v1 = vpop.f32.mrf.mxu0  ;;  %v7251_v47 = vadd.f32 %v21312_v36, %v7138_v62  ;;  %v21316_v62 = vld [vmem:[#allocation47_spill] sm:$0xff] }
 0x3e0   :  { %v7926_v23 = vmax.f32 %v7352_v34, 0.0  ;;  %v7354_v43 = vadd.f32 %v7353_v22, %v7241_v50  ;;  %21304 = vst [vmem:[#allocation49_spill] sm:$0xff] %v18438_v1  ;;  %v18454_v14 = vrot.slane %v21311_v13, %v21310_v33  ;;  %v21314_v50 = vsub.s32 7, %v21309_v26 }
 0x3e1   :  { %v18443_v20 = vpop.f32.mrf.mxu0 }
 0x3e2   :  { %v7357_v7 = vpop.f32.mrf.mxu1  ;;  %v7998_v17 = vpack.c.bf16 %v7926_v23, %v7918_v39  ;;  %v7927_v15 = vmax.f32 %v7354_v43, 0.0  ;;  %v18462_v28 = vrot.slane %v21311_v13, %v21314_v50  ;;  %v7401_v39 = vadd.f32 %v18250_v24, %v18454_v14 }
 0x3e3   :  { %8715 = vmatmul.mubr.bf16.gmra.mxu1 %v21305_v3  ;;  %v7358_v42 = vadd.f32 %v7357_v7, %v7245_v16  ;;  %v18449_v54 = vpop.f32.mrf.mxu0  ;;  %v7421_v50 = vadd.f32 %v18318_v11, %v18454_v14  ;;  %v7451_v35 = vadd.f32 %v18399_v45, %v18454_v14 }
 0x3e4   :  { %v7359_v6 = vpop.f32.mrf.mxu1  ;;  %v7999_v0 = vpack.c.bf16 %v7927_v15, %v7919_v57  ;;  %v7403_v57 = vadd.f32 %v21316_v62, %v18462_v28  ;;  %v7413_v26 = vadd.f32 %v18291_v8, %v18462_v28  ;;  %v7431_v62 = vadd.f32 %v18352_v48, %v18454_v14 }
 0x3e5   :  { %v7360_v19 = vadd.f32 %v7359_v6, %v7247_v60  ;;  %v18457_v44 = vpop.f32.mrf.mxu0  ;;  %v7934_v52 = vmax.f32 %v7358_v42, 0.0 }
 0x3e6   :  { %v7361_v58 = vpop.f32.mrf.mxu1  ;;  %21313 = vst [vmem:[#allocation31_spill] sm:$0xff] %v18457_v44  ;;  %8803 = vmatprep.mubr.bf16.mxu0 %v7999_v0 }
 0x3e7   :  { %v7362_v56 = vadd.f32 %v7361_v58, %v7249_v12  ;;  %8804 = vmatmul.mubr.bf16.gmra.mxu0 %v7998_v17  ;;  %v18464_v55 = vpop.f32.mrf.mxu0  ;;  %v7935_v23 = vmax.f32 %v7360_v19, 0.0  ;;  %v7411_v12 = vadd.f32 %v18284_v4, %v18454_v14 }
 0x3e8   :  { %v7363_v34 = vpop.f32.mrf.mxu1  ;;  %21315 = vst [vmem:[#allocation50_spill] sm:$0xff] %v18464_v55 }
 0x3e9   :  { %v7942_v41 = vmax.f32 %v7362_v56, 0.0  ;;  %v7364_v22 = vadd.f32 %v7363_v34, %v7251_v47 }
 0x3ea   :  { %v7513_v7 = vpop.f32.mrf.mxu1  ;;  %v18472_v3 = vpop.f32.mrf.mxu0 }
 0x3eb   :  { %v8006_v43 = vpack.c.bf16 %v7942_v41, %v7934_v52  ;;  %v7943_v16 = vmax.f32 %v7364_v22, 0.0  ;;  %v18470_v15 = vadd.f32 %v7513_v7, %v7401_v39  ;;  %v7423_v52 = vadd.f32 %v18325_v49, %v18462_v28 }
 0x3ec   :  { %v7515_v17 = vpop.f32.mrf.mxu1  ;;  %v18476_v10 = vpop.f32.mrf.mxu0 }
 0x3ed   :  { %v8007_v6 = vpack.c.bf16 %v7943_v16, %v7935_v23  ;;  %v18474_v63 = vadd.f32 %v7515_v17, %v7403_v57  ;;  %v7433_v17 = vadd.f32 %v18359_v61, %v18462_v28 }
 0x3ee   :  { %v18478_v60 = vpop.f32.mrf.mxu1  ;;  %v18480_v24 = vpop.f32.mrf.mxu0 }
 0x3ef   :  { %8811 = vmatprep.mubr.bf16.mxu0 %v8007_v6 }
 0x3f0   :  { %8812 = vmatmul.mubr.bf16.gmra.mxu0 %v8006_v43  ;;  %v18482_v27 = vpop.f32.mrf.mxu1  ;;  %v18486_v42 = vpop.f32.mrf.mxu0 }
 0x3f2   :  { %v7523_v0 = vpop.f32.mrf.mxu1  ;;  %v18492_v13 = vpop.f32.mrf.mxu0 }
 0x3f3   :  { %v18490_v33 = vadd.f32 %v7523_v0, %v7411_v12 }
 0x3f4   :  { %v7525_v58 = vpop.f32.mrf.mxu1  ;;  %v18496_v47 = vpop.f32.mrf.mxu0 }
 0x3f5   :  { %v18494_v36 = vadd.f32 %v7525_v58, %v7413_v26 }
 0x3f6   :  { %v18498_v19 = vpop.f32.mrf.mxu1  ;;  %v18500_v56 = vpop.f32.mrf.mxu0 }
 0x3f8   :  { %v18502_v4 = vpop.f32.mrf.mxu1  ;;  %v18506_v34 = vpop.f32.mrf.mxu0 }
 0x3fa   :  { %v7533_v8 = vpop.f32.mrf.mxu1  ;;  %v18512_v22 = vpop.f32.mrf.mxu0 }
 0x3fb   :  { %v18510_v41 = vadd.f32 %v7533_v8, %v7421_v50 }
 0x3fc   :  { %v7535_v39 = vpop.f32.mrf.mxu1  ;;  %v18516_v43 = vpop.f32.mrf.mxu0 }
 0x3fd   :  { %v18514_v23 = vadd.f32 %v7535_v39, %v7423_v52  ;;  %v7441_v52 = vadd.f32 %v18377_v29, %v18454_v14 }
 0x3fe   :  { %v18518_v16 = vpop.f32.mrf.mxu1  ;;  %v18520_v7 = vpop.f32.mrf.mxu0 }
 0x400   :  { %v18522_v11 = vpop.f32.mrf.mxu1  ;;  %v18526_v57 = vpop.f32.mrf.mxu0 }
 0x402   :  { %v7543_v49 = vpop.f32.mrf.mxu1  ;;  %v18532_v12 = vpop.f32.mrf.mxu0 }
 0x403   :  { %v18530_v6 = vadd.f32 %v7543_v49, %v7431_v62  ;;  %v7443_v62 = vadd.f32 %v18384_v30, %v18462_v28 }
 0x404   :  { %v7545_v0 = vpop.f32.mrf.mxu1  ;;  %v18536_v58 = vpop.f32.mrf.mxu0 }
 0x405   :  { %v18534_v26 = vadd.f32 %v7545_v0, %v7433_v17 }
 0x406   :  { %v18538_v50 = vpop.f32.mrf.mxu1  ;;  %v18540_v8 = vpop.f32.mrf.mxu0 }
 0x408   :  { %v18542_v48 = vpop.f32.mrf.mxu1  ;;  %v18546_v39 = vpop.f32.mrf.mxu0 }
 0x40a   :  { %v7553_v61 = vpop.f32.mrf.mxu1  ;;  %v18552_v17 = vpop.f32.mrf.mxu0 }
 0x40b   :  { %v18550_v49 = vadd.f32 %v7553_v61, %v7441_v52  ;;  %21318 = vst [vmem:[#allocation38_spill] sm:$0xff] %v18552_v17  ;;  %v7453_v52 = vadd.f32 %v18406_v18, %v18462_v28 }
 0x40c   :  { %v7555_v0 = vpop.f32.mrf.mxu1  ;;  %v18556_v44 = vpop.f32.mrf.mxu0 }
 0x40d   :  { %21317 = vst [vmem:[#allocation51_spill] sm:$0xff] %v18550_v49  ;;  %v18554_v55 = vadd.f32 %v7555_v0, %v7443_v62  ;;  %21320 = vst [vmem:[#allocation66_spill] sm:$0xff] %v18556_v44 }
 0x40e   :  { %v18558_v1 = vpop.f32.mrf.mxu1  ;;  %v18560_v32 = vpop.f32.mrf.mxu0 }
 0x40f   :  { %21319 = vst [vmem:[#allocation35_spill] sm:$0xff] %v18554_v55  ;;  %21321 = vst [vmem:[#allocation55_spill] sm:$0xff] %v18560_v32 }
 0x410   :  { %v18562_v29 = vpop.f32.mrf.mxu1  ;;  %v18566_v21 = vpop.f32.mrf.mxu0 }
 0x411   :  { %21322 = vst [vmem:[#allocation68_spill] sm:$0xff] %v18566_v21  ;;  %v7461_v21 = vadd.f32 %v18421_v9, %v18454_v14 }
 0x412   :  { %v7563_v30 = vpop.f32.mrf.mxu1  ;;  %v18572_v62 = vpop.f32.mrf.mxu0 }
 0x413   :  { %v18570_v61 = vadd.f32 %v7563_v30, %v7451_v35  ;;  %21324 = vst [vmem:[#allocation56_spill] sm:$0xff] %v18572_v62  ;;  %v7463_v35 = vadd.f32 %v18428_v37, %v18462_v28  ;;  %v7473_v37 = vadd.f32 %v18449_v54, %v18462_v28  ;;  %v7407_v54 = vadd.f32 %v18273_v5, %v18462_v28 }
 0x414   :  { %v7565_v0 = vpop.f32.mrf.mxu1  ;;  %v18576_v49 = vpop.f32.mrf.mxu0 }
 0x415   :  { %21323 = vst [vmem:[#allocation69_spill] sm:$0xff] %v18570_v61  ;;  %v18574_v17 = vadd.f32 %v7565_v0, %v7453_v52  ;;  %21326 = vst [vmem:[#allocation57_spill] sm:$0xff] %v18576_v49 }
 0x416   :  { %v18578_v32 = vpop.f32.mrf.mxu1  ;;  %v18580_v44 = vpop.f32.mrf.mxu0 }
 0x417   :  { %21325 = vst [vmem:[#allocation67_spill] sm:$0xff] %v18574_v17  ;;  %21327 = vst [vmem:[#allocation70_spill] sm:$0xff] %v18580_v44 }
 0x418   :  { %v18582_v45 = vpop.f32.mrf.mxu1  ;;  %v18586_v55 = vpop.f32.mrf.mxu0 }
 0x419   :  { %21328 = vst [vmem:[#allocation58_spill] sm:$0xff] %v18586_v55  ;;  %v7471_v55 = vadd.f32 %v18443_v20, %v18454_v14  ;;  %v7405_v20 = vadd.f32 %v18268_v31, %v18454_v14  ;;  %v7629_v31 = vadd.f32 %v18476_v10, %v18474_v63 }
 0x41a   :  { %v7573_v18 = vpop.f32.mrf.mxu1  ;;  %v18592_v52 = vpop.f32.mrf.mxu0 }
 0x41b   :  { %v18590_v30 = vadd.f32 %v7573_v18, %v7461_v21  ;;  %21330 = vst [vmem:[#allocation59_spill] sm:$0xff] %v18592_v52 }
 0x41c   :  { %v7575_v0 = vpop.f32.mrf.mxu1  ;;  %v18596_v61 = vpop.f32.mrf.mxu0 }
 0x41d   :  { %21329 = vst [vmem:[#allocation72_spill] sm:$0xff] %v18590_v30  ;;  %v18594_v62 = vadd.f32 %v7575_v0, %v7463_v35  ;;  %21332 = vst [vmem:[#allocation60_spill] sm:$0xff] %v18596_v61 }
 0x41e   :  { %v18598_v44 = vpop.f32.mrf.mxu1  ;;  %v18600_v49 = vpop.f32.mrf.mxu0 }
 0x41f   :  { %21331 = vst [vmem:[#allocation71_spill] sm:$0xff] %v18594_v62  ;;  %21333 = vst [vmem:[#allocation74_spill] sm:$0xff] %v18600_v49 }
 0x420   :  { %v18602_v9 = vpop.f32.mrf.mxu1  ;;  %v18606_v17 = vpop.f32.mrf.mxu0 }
 0x421   :  { %21334 = vst [vmem:[#allocation61_spill] sm:$0xff] %v18606_v17 }
 0x422   :  { %v7583_v21 = vpop.f32.mrf.mxu1  ;;  %v18612_v35 = vpop.f32.mrf.mxu0 }
 0x423   :  { %v18610_v18 = vadd.f32 %v7583_v21, %v7471_v55  ;;  %21336 = vst [vmem:[#allocation62_spill] sm:$0xff] %v18612_v35  ;;  %v7518_v55 = vadd.f32 %v18478_v60, %v7405_v20  ;;  %v7520_v35 = vadd.f32 %v18482_v27, %v7407_v54  ;;  %v7415_v60 = vadd.f32 %v18302_v38, %v18454_v14 }
 0x424   :  { %v7585_v0 = vpop.f32.mrf.mxu1  ;;  %v18616_v30 = vpop.f32.mrf.mxu0  ;;  %v7417_v20 = vadd.f32 %v18307_v2, %v18462_v28  ;;  %v7639_v2 = vadd.f32 %v18496_v47, %v18494_v36  ;;  %v7427_v36 = vadd.f32 %v18341_v51, %v18462_v28  ;;  %v7649_v51 = vadd.f32 %v18516_v43, %v18514_v23 }
 0x425   :  { %21335 = vst [vmem:[#allocation73_spill] sm:$0xff] %v18610_v18  ;;  %v18614_v52 = vadd.f32 %v7585_v0, %v7473_v37  ;;  %21338 = vst [vmem:[#allocation63_spill] sm:$0xff] %v18616_v30  ;;  %v7627_v0 = vadd.f32 %v18472_v3, %v18470_v15  ;;  %v7631_v30 = vadd.f32 %v18480_v24, %v7518_v55 }
 0x426   :  { %v18618_v49 = vpop.f32.mrf.mxu1  ;;  %v18620_v61 = vpop.f32.mrf.mxu0  ;;  %v7633_v15 = vadd.f32 %v18486_v42, %v7520_v35  ;;  %v7528_v10 = vadd.f32 %v18498_v19, %v7415_v60  ;;  %v7530_v42 = vadd.f32 %v18502_v4, %v7417_v20  ;;  %v7437_v23 = vadd.f32 %v18372_v53, %v18462_v28 }
 0x427   :  { %21337 = vst [vmem:[#allocation77_spill] sm:$0xff] %v18614_v52  ;;  %21339 = vst [vmem:[#allocation75_spill] sm:$0xff] %v18620_v61  ;;  %v7659_v53 = vadd.f32 %v18536_v58, %v18534_v26  ;;  %v7447_v26 = vadd.f32 %v18394_v25, %v18462_v28  ;;  %v21343_v25 = vld [vmem:[#allocation66_spill] sm:$0xff] }
 0x428   :  { %v18624_v17 = vpop.f32.mrf.mxu1  ;;  %v18626_v62 = vpop.f32.mrf.mxu0  ;;  %v7641_v19 = vadd.f32 %v18500_v56, %v7528_v10  ;;  %v7643_v4 = vadd.f32 %v18506_v34, %v7530_v42 }
 0x429   :  { %21340 = vst [vmem:[#allocation64_spill] sm:$0xff] %v18624_v17  ;;  %21341 = vst [vmem:[#allocation52_spill] sm:$0xff] %v18626_v62 }
 0x42a   :  { %v12736_v37 = vpop.f32.mrf.mxu0 }
 0x42b   :  { %v7739_v21 = vpop.f32.mrf.mxu1 }
 0x42c   :  { %v12737_v61 = vpop.f32.mrf.mxu0  ;;  %v7740_v62 = vadd.f32 %v7739_v21, %v7627_v0  ;;  %v7637_v21 = vadd.f32 %v18492_v13, %v18490_v33  ;;  %v7425_v13 = vadd.f32 %v18336_v59, %v18454_v14  ;;  %v7647_v59 = vadd.f32 %v18512_v22, %v18510_v41 }
 0x42d   :  { %v7741_v18 = vpop.f32.mrf.mxu1  ;;  %v18637_v52 = vadd.f32 %v12737_v61, %v12736_v37  ;;  %v7435_v22 = vadd.f32 %v18367_v46, %v18454_v14  ;;  %v7657_v46 = vadd.f32 %v18532_v12, %v18530_v6  ;;  %v7445_v12 = vadd.f32 %v18389_v40, %v18454_v14 }
 0x42e   :  { %v18639_v17 = vpop.f32.mrf.mxu0  ;;  %v7742_v3 = vadd.f32 %v7741_v18, %v7629_v31  ;;  %v7824_v24 = vmax.f32 %v7740_v62, 0.0  ;;  %v7538_v20 = vadd.f32 %v18518_v16, %v7425_v13  ;;  %v7560_v40 = vadd.f32 %v18562_v29, %v7447_v26  ;;  %v21347_v29 = vld [vmem:[#allocation20_spill] sm:$0xff] }
 0x42f   :  { %v7743_v5 = vpop.f32.mrf.mxu1 }
 0x430   :  { %v7744_v27 = vadd.f32 %v7743_v5, %v7631_v30  ;;  %v18646_v63 = vpop.f32.mrf.mxu0  ;;  %v7825_v18 = vmax.f32 %v7742_v3, 0.0  ;;  %v7651_v16 = vadd.f32 %v18520_v7, %v7538_v20 }
 0x431   :  { %v7745_v54 = vpop.f32.mrf.mxu1 }
 0x432   :  { %v7832_v61 = vmax.f32 %v7744_v27, 0.0  ;;  %v7746_v55 = vadd.f32 %v7745_v54, %v7633_v15  ;;  %v12742_v38 = vpop.f32.mrf.mxu0 }
 0x433   :  { %v7749_v37 = vpop.f32.mrf.mxu1 }
 0x434   :  { %v7952_v30 = vpack.c.bf16 %v7832_v61, %v7824_v24  ;;  %v7833_v35 = vmax.f32 %v7746_v55, 0.0  ;;  %v12743_v31 = vpop.f32.mrf.mxu0  ;;  %v7750_v62 = vadd.f32 %v7749_v37, %v7637_v21  ;;  %v7540_v55 = vadd.f32 %v18522_v11, %v7427_v36 }
 0x435   :  { %v7751_v0 = vpop.f32.mrf.mxu1  ;;  %v18655_v5 = vadd.f32 %v12743_v31, %v12742_v38 }
 0x436   :  { %v7953_v60 = vpack.c.bf16 %v7833_v35, %v7825_v18  ;;  %v18657_v33 = vpop.f32.mrf.mxu0  ;;  %v7752_v3 = vadd.f32 %v7751_v0, %v7639_v2  ;;  %v7840_v54 = vmax.f32 %v7750_v62, 0.0  ;;  %v7653_v11 = vadd.f32 %v18526_v57, %v7540_v55 }
 0x437   :  { %v7753_v15 = vpop.f32.mrf.mxu1  ;;  %v7548_v62 = vadd.f32 %v18538_v50, %v7435_v22  ;;  %v21342_v22 = vld [vmem:[#allocation35_spill] sm:$0xff] }
 0x438   :  { %v7754_v27 = vadd.f32 %v7753_v15, %v7641_v19  ;;  %8852 = vmatprep.mubr.bf16.mxu1 %v7953_v60  ;;  %v18664_v56 = vpop.f32.mrf.mxu0  ;;  %v7841_v21 = vmax.f32 %v7752_v3, 0.0  ;;  %v7550_v3 = vadd.f32 %v18542_v48, %v7437_v23 }
 0x439   :  { %v7755_v47 = vpop.f32.mrf.mxu1  ;;  %8853 = vmatmul.mubr.bf16.vlgmr.msra.gmra.mxu1 %v7952_v30  ;;  %v7661_v50 = vadd.f32 %v18540_v8, %v7548_v62  ;;  %v21346_v62 = vld [vmem:[#allocation38_spill] sm:$0xff] }
 0x43a   :  { %v7848_v10 = vmax.f32 %v7754_v27, 0.0  ;;  %v7756_v24 = vadd.f32 %v7755_v47, %v7643_v4  ;;  %v12748_v34 = vpop.f32.mrf.mxu0  ;;  %v7663_v48 = vadd.f32 %v18546_v39, %v7550_v3 }
 0x43b   :  { %v7759_v61 = vpop.f32.mrf.mxu1 }
 0x43c   :  { %v7960_v37 = vpack.c.bf16 %v7848_v10, %v7840_v54  ;;  %v7849_v38 = vmax.f32 %v7756_v24, 0.0  ;;  %v12749_v18 = vpop.f32.mrf.mxu0  ;;  %v7760_v30 = vadd.f32 %v7759_v61, %v7647_v59 }
 0x43d   :  { %v7761_v42 = vpop.f32.mrf.mxu1  ;;  %v18673_v35 = vadd.f32 %v12749_v18, %v12748_v34 }
 0x43e   :  { %v7961_v2 = vpack.c.bf16 %v7849_v38, %v7841_v21  ;;  %v18675_v41 = vpop.f32.mrf.mxu0  ;;  %v7762_v31 = vadd.f32 %v7761_v42, %v7649_v51  ;;  %v7856_v60 = vmax.f32 %v7760_v30, 0.0  ;;  %v7558_v21 = vadd.f32 %v18558_v1, %v7445_v12 }
 0x43f   :  { %v7763_v0 = vpop.f32.mrf.mxu1 }
 0x440   :  { %v7764_v19 = vadd.f32 %v7763_v0, %v7651_v16  ;;  %8860 = vmatprep.mubr.bf16.mxu1 %v7961_v2  ;;  %v18682_v7 = vpop.f32.mrf.mxu0  ;;  %v7857_v27 = vmax.f32 %v7762_v31, 0.0  ;;  %v21344_v31 = vld [vmem:[#allocation55_spill] sm:$0xff] }
 0x441   :  { %v7765_v43 = vpop.f32.mrf.mxu1  ;;  %8861 = vmatmul.mubr.bf16.gmra.mxu1 %v7960_v37 }
 0x442   :  { %v7864_v15 = vmax.f32 %v7764_v19, 0.0  ;;  %v7766_v13 = vadd.f32 %v7765_v43, %v7653_v11  ;;  %v12754_v57 = vpop.f32.mrf.mxu0  ;;  %v7669_v11 = vadd.f32 %v21343_v25, %v21342_v22  ;;  %v7671_v19 = vadd.f32 %v21344_v31, %v7558_v21  ;;  %v21345_v43 = vld [vmem:[#allocation51_spill] sm:$0xff] }
 0x443   :  { %v7769_v4 = vpop.f32.mrf.mxu1 }
 0x444   :  { %v7968_v36 = vpack.c.bf16 %v7864_v15, %v7856_v60  ;;  %v7865_v47 = vmax.f32 %v7766_v13, 0.0  ;;  %v12755_v54 = vpop.f32.mrf.mxu0  ;;  %v7770_v10 = vadd.f32 %v7769_v4, %v7657_v46  ;;  %v7667_v60 = vadd.f32 %v21346_v62, %v21345_v43  ;;  %v21348_v4 = vld [vmem:[#allocation68_spill] sm:$0xff] }
 0x445   :  { %v7771_v20 = vpop.f32.mrf.mxu1  ;;  %v18691_v24 = vadd.f32 %v12755_v54, %v12754_v57  ;;  %v7455_v46 = vadd.f32 %v21347_v29, %v18454_v14  ;;  %v7673_v57 = vadd.f32 %v21348_v4, %v7560_v40 }
 0x446   :  { %v7969_v59 = vpack.c.bf16 %v7865_v47, %v7857_v27  ;;  %v18693_v6 = vpop.f32.mrf.mxu0  ;;  %v7772_v34 = vadd.f32 %v7771_v20, %v7659_v53  ;;  %v7872_v37 = vmax.f32 %v7770_v10, 0.0  ;;  %v21349_v20 = vld [vmem:[#allocation48_spill] sm:$0xff] }
 0x447   :  { %v7773_v61 = vpop.f32.mrf.mxu1  ;;  %v7457_v54 = vadd.f32 %v21349_v20, %v18462_v28 }
 0x448   :  { %v7774_v55 = vadd.f32 %v7773_v61, %v7661_v50  ;;  %8868 = vmatprep.mubr.bf16.mxu1 %v7969_v59  ;;  %v18700_v8 = vpop.f32.mrf.mxu0  ;;  %v7873_v39 = vmax.f32 %v7772_v34, 0.0  ;;  %v7568_v50 = vadd.f32 %v18578_v32, %v7455_v46  ;;  %v21353_v32 = vld [vmem:[#allocation69_spill] sm:$0xff] }
 0x449   :  { %v7775_v58 = vpop.f32.mrf.mxu1  ;;  %8869 = vmatmul.mubr.bf16.gmra.mxu1 %v7968_v36 }
 0x44a   :  { %v7880_v38 = vmax.f32 %v7774_v55, 0.0  ;;  %v7776_v51 = vadd.f32 %v7775_v58, %v7663_v48  ;;  %v12760_v18 = vpop.f32.mrf.mxu0  ;;  %v7570_v48 = vadd.f32 %v18582_v45, %v7457_v54  ;;  %v21355_v45 = vld [vmem:[#allocation24_spill] sm:$0xff] }
 0x44b   :  { %v7779_v42 = vpop.f32.mrf.mxu1  ;;  %v7465_v25 = vadd.f32 %v21355_v45, %v18454_v14  ;;  %v21365_v45 = vld [vmem:[#allocation50_spill] sm:$0xff] }
 0x44c   :  { %v7976_v16 = vpack.c.bf16 %v7880_v38, %v7872_v37  ;;  %v7881_v30 = vmax.f32 %v7776_v51, 0.0  ;;  %v12761_v0 = vpop.f32.mrf.mxu0  ;;  %v7780_v36 = vadd.f32 %v7779_v42, %v7667_v60  ;;  %v21350_v37 = vld [vmem:[#allocation67_spill] sm:$0xff]  ;;  %v21351_v38 = vld [vmem:[#allocation57_spill] sm:$0xff]  ;;  %v21352_v42 = vld [vmem:[#allocation70_spill] sm:$0xff] }
 0x44d   :  { %v7781_v2 = vpop.f32.mrf.mxu1  ;;  %v18707_v23 = vadd.f32 %v12761_v0, %v12760_v18  ;;  %v7679_v51 = vadd.f32 %v21351_v38, %v21350_v37  ;;  %v7681_v18 = vadd.f32 %v21352_v42, %v7568_v50  ;;  %v7578_v46 = vadd.f32 %v18598_v44, %v7465_v25  ;;  %v21361_v44 = vld [vmem:[#allocation72_spill] sm:$0xff] }
 0x44e   :  { %v7977_v1 = vpack.c.bf16 %v7881_v30, %v7873_v39  ;;  %v18711_v13 = vpop.f32.mrf.mxu0  ;;  %v7782_v3 = vadd.f32 %v7781_v2, %v7669_v11  ;;  %v7888_v26 = vmax.f32 %v7780_v36, 0.0  ;;  %v21356_v11 = vld [vmem:[#allocation58_spill] sm:$0xff]  ;;  %v7477_v25 = vadd.f32 %v21365_v45, %v18462_v28 }
 0x44f   :  { %v7783_v15 = vpop.f32.mrf.mxu1  ;;  %v7683_v31 = vadd.f32 %v21356_v11, %v7570_v48  ;;  %v21360_v48 = vld [vmem:[#allocation74_spill] sm:$0xff] }
 0x450   :  { %v7784_v27 = vadd.f32 %v7783_v15, %v7671_v19  ;;  %8876 = vmatprep.mubr.bf16.mxu1 %v7977_v1  ;;  %v18716_v53 = vpop.f32.mrf.mxu0  ;;  %v7889_v34 = vmax.f32 %v7782_v3, 0.0  ;;  %v21357_v15 = vld [vmem:[#allocation49_spill] sm:$0xff] }
 0x451   :  { %v7785_v47 = vpop.f32.mrf.mxu1  ;;  %8877 = vmatmul.mubr.bf16.gmra.mxu1 %v7976_v16  ;;  %v21354_v16 = vld [vmem:[#allocation56_spill] sm:$0xff]  ;;  %v7467_v29 = vadd.f32 %v21357_v15, %v18462_v28 }
 0x452   :  { %v7786_v10 = vadd.f32 %v7785_v47, %v7673_v57  ;;  %v7896_v59 = vmax.f32 %v7784_v27, 0.0  ;;  %v12766_v12 = vpop.f32.mrf.mxu0  ;;  %v7677_v30 = vadd.f32 %v21354_v16, %v21353_v32 }
 0x453   :  { %v7789_v61 = vpop.f32.mrf.mxu1  ;;  %v7580_v36 = vadd.f32 %v18602_v9, %v7467_v29  ;;  %v21363_v9 = vld [vmem:[#allocation31_spill] sm:$0xff] }
 0x454   :  { %v7897_v55 = vmax.f32 %v7786_v10, 0.0  ;;  %v12767_v21 = vpop.f32.mrf.mxu0  ;;  %v7984_v2 = vpack.c.bf16 %v7896_v59, %v7888_v26  ;;  %v7790_v43 = vadd.f32 %v7789_v61, %v7677_v30  ;;  %v21358_v59 = vld [vmem:[#allocation71_spill] sm:$0xff]  ;;  %v21359_v61 = vld [vmem:[#allocation60_spill] sm:$0xff]  ;;  %v7475_v42 = vadd.f32 %v21363_v9, %v18454_v14 }
 0x455   :  { %v7791_v58 = vpop.f32.mrf.mxu1  ;;  %v18725_v40 = vadd.f32 %v12767_v21, %v12766_v12  ;;  %v7689_v12 = vadd.f32 %v21359_v61, %v21358_v59  ;;  %v21366_v14 = vld [vmem:[#allocation64_spill] sm:$0xff] }
 0x456   :  { %v7985_v39 = vpack.c.bf16 %v7897_v55, %v7889_v34  ;;  %v18729_v22 = vpop.f32.mrf.mxu0  ;;  %v7792_v19 = vadd.f32 %v7791_v58, %v7679_v51  ;;  %v7904_v54 = vmax.f32 %v7790_v43, 0.0  ;;  %v7691_v34 = vadd.f32 %v21360_v48, %v7578_v46  ;;  %v21362_v58 = vld [vmem:[#allocation59_spill] sm:$0xff] }
 0x457   :  { %v7793_v0 = vpop.f32.mrf.mxu1  ;;  %v7687_v21 = vadd.f32 %v21362_v58, %v21361_v44  ;;  %v7588_v11 = vadd.f32 %v18618_v49, %v7475_v42  ;;  %v21370_v49 = vld [vmem:[#allocation73_spill] sm:$0xff] }
 0x458   :  { %v7794_v1 = vadd.f32 %v7793_v0, %v7681_v18  ;;  %8884 = vmatprep.mubr.bf16.mxu1 %v7985_v39  ;;  %v18734_v60 = vpop.f32.mrf.mxu0  ;;  %v7905_v47 = vmax.f32 %v7792_v19, 0.0  ;;  %v21364_v18 = vld [vmem:[#allocation61_spill] sm:$0xff] }
 0x459   :  { %v7795_v62 = vpop.f32.mrf.mxu1  ;;  %8885 = vmatmul.mubr.bf16.gmra.mxu1 %v7984_v2  ;;  %v7693_v39 = vadd.f32 %v21364_v18, %v7580_v36 }
 0x45a   :  { %v7796_v4 = vadd.f32 %v7795_v62, %v7683_v31  ;;  %v7912_v57 = vmax.f32 %v7794_v1, 0.0  ;;  %v12772_v27 = vpop.f32.mrf.mxu0  ;;  %v7590_v62 = vadd.f32 %v21366_v14, %v7477_v25 }
 0x45b   :  { %v7799_v3 = vpop.f32.mrf.mxu1 }
 0x45c   :  { %v7913_v20 = vmax.f32 %v7796_v4, 0.0  ;;  %v12773_v10 = vpop.f32.mrf.mxu0  ;;  %v7992_v37 = vpack.c.bf16 %v7912_v57, %v7904_v54  ;;  %v7800_v30 = vadd.f32 %v7799_v3, %v7687_v21  ;;  %v21367_v3 = vld [vmem:[#allocation77_spill] sm:$0xff] }
 0x45d   :  { %v7801_v50 = vpop.f32.mrf.mxu1  ;;  %v18743_v55 = vadd.f32 %v12773_v10, %v12772_v27  ;;  %v21368_v27 = vld [vmem:[#allocation63_spill] sm:$0xff] }
 0x45e   :  { %v7993_v26 = vpack.c.bf16 %v7913_v20, %v7905_v47  ;;  %v18747_v51 = vpop.f32.mrf.mxu0  ;;  %v7802_v32 = vadd.f32 %v7801_v50, %v7689_v12  ;;  %v7920_v46 = vmax.f32 %v7800_v30, 0.0  ;;  %v7699_v36 = vadd.f32 %v21368_v27, %v21367_v3  ;;  %v21369_v47 = vld [vmem:[#allocation75_spill] sm:$0xff]  ;;  %v21371_v50 = vld [vmem:[#allocation62_spill] sm:$0xff]  ;;  %v21372_v12 = vld [vmem:[#allocation52_spill] sm:$0xff] }
 0x45f   :  { %v7803_v38 = vpop.f32.mrf.mxu1  ;;  %v7701_v20 = vadd.f32 %v21369_v47, %v7588_v11  ;;  %v7697_v10 = vadd.f32 %v21371_v50, %v21370_v49  ;;  %v7703_v48 = vadd.f32 %v21372_v12, %v7590_v62 }
 0x460   :  { %v7804_v16 = vadd.f32 %v7803_v38, %v7691_v34  ;;  %8892 = vmatprep.mubr.bf16.mxu1 %v7993_v26  ;;  %v18752_v0 = vpop.f32.mrf.mxu0  ;;  %v7921_v15 = vmax.f32 %v7802_v32, 0.0 }
 0x461   :  { %v7805_v2 = vpop.f32.mrf.mxu1  ;;  %8893 = vmatmul.mubr.bf16.gmra.mxu1 %v7992_v37  ;;  %v18769_v37 = vld [vmem:[%s20616_s6] ss:$0 sm:$0xff] }
 0x462   :  { %v7806_v31 = vadd.f32 %v7805_v2, %v7693_v39  ;;  %v7928_v19 = vmax.f32 %v7804_v16, 0.0  ;;  %v12778_v43 = vpop.f32.mrf.mxu0  ;;  %v8564_v16 = vadd.f32 %v18637_v52, %v18769_v37 }
 0x463   :  { %v7809_v1 = vpop.f32.mrf.mxu1 }
 0x464   :  { %v7929_v29 = vmax.f32 %v7806_v31, 0.0  ;;  %v12779_v57 = vpop.f32.mrf.mxu0  ;;  %v8000_v59 = vpack.c.bf16 %v7928_v19, %v7920_v46  ;;  %v7810_v44 = vadd.f32 %v7809_v1, %v7697_v10 }
 0x465   :  { %v7811_v4 = vpop.f32.mrf.mxu1  ;;  %v18761_v54 = vadd.f32 %v12779_v57, %v12778_v43  ;;  %v8572_v43 = vadd.f32 %v18655_v5, %v18769_v37 }
 0x466   :  { %v8001_v28 = vpack.c.bf16 %v7929_v29, %v7921_v15  ;;  %v7812_v34 = vadd.f32 %v7811_v4, %v7699_v36  ;;  %v7936_v39 = vmax.f32 %v7810_v44, 0.0  ;;  %v8580_v4 = vadd.f32 %v18673_v35, %v18769_v37 }
 0x467   :  { %v7813_v61 = vpop.f32.mrf.mxu1 }
 0x468   :  { %v7814_v26 = vadd.f32 %v7813_v61, %v7701_v20  ;;  %8900 = vmatprep.mubr.bf16.mxu1 %v8001_v28  ;;  %v7937_v42 = vmax.f32 %v7812_v34, 0.0  ;;  %v8588_v20 = vadd.f32 %v18691_v24, %v18769_v37  ;;  %v8596_v61 = vadd.f32 %v18707_v23, %v18769_v37 }
 0x469   :  { %v7815_v58 = vpop.f32.mrf.mxu1  ;;  %8901 = vmatmul.mubr.bf16.gmra.mxu1 %v8000_v59 }
 0x46a   :  { %v7816_v21 = vadd.f32 %v7815_v58, %v7703_v48  ;;  %v7944_v38 = vmax.f32 %v7814_v26, 0.0  ;;  %v8604_v58 = vadd.f32 %v18725_v40, %v18769_v37 }
 0x46b   :  { %v12800_v9 = vpop.f32.mrf.mxu1 }
 0x46c   :  { %v7945_v18 = vmax.f32 %v7816_v21, 0.0  ;;  %v8008_v45 = vpack.c.bf16 %v7944_v38, %v7936_v39  ;;  %v8612_v39 = vadd.f32 %v18743_v55, %v18769_v37 }
 0x46d   :  { %v12801_v32 = vpop.f32.mrf.mxu1 }
 0x46e   :  { %v12802_v30 = vadd.f32 %v12801_v32, %v12800_v9  ;;  %v8009_v2 = vpack.c.bf16 %v7945_v18, %v7937_v42 }
 0x46f   :  { %v18773_v25 = vpop.f32.mrf.mxu1 }
 0x470   :  { %v18775_v11 = vadd.f32 %v12802_v30, %v8564_v16  ;;  %8908 = vmatprep.mubr.bf16.mxu1 %v8009_v2 }
 0x471   :  { %v18777_v31 = vpop.f32.mrf.mxu1  ;;  %8909 = vmatmul.mubr.bf16.gmra.mxu1 %v8008_v45 }
 0x473   :  { %v12806_v19 = vpop.f32.mrf.mxu1 }
 0x475   :  { %v12807_v1 = vpop.f32.mrf.mxu1 }
 0x476   :  { %v12808_v14 = vadd.f32 %v12807_v1, %v12806_v19  ;;  %v8620_v19 = vadd.f32 %v18761_v54, %v18769_v37  ;;  %v9022_v54 = vld [vmem:[%s20617_s7 + $0x308] sm:$0xff] }
 0x477   :  { %v18781_v62 = vpop.f32.mrf.mxu1 }
 0x478   :  { %v18783_v52 = vadd.f32 %v12808_v14, %v8572_v43  ;;  %v18831_v14 = vpop.f32.mrf.mxu0 }
 0x479   :  { %v18785_v15 = vpop.f32.mrf.mxu1  ;;  %21378 = vst [vmem:[#allocation27_spill] sm:$0xff] %v18831_v14 }
 0x47b   :  { %v12812_v29 = vpop.f32.mrf.mxu1 }
 0x47d   :  { %v12813_v46 = vpop.f32.mrf.mxu1 }
 0x47e   :  { %v12814_v57 = vadd.f32 %v12813_v46, %v12812_v29  ;;  %v18833_v29 = vpop.f32.mrf.mxu0  ;;  %v9021_v46 = vld [vmem:[%s20617_s7 + $0x300] sm:$0xff] }
 0x47f   :  { %v18789_v3 = vpop.f32.mrf.mxu1  ;;  %21379 = vst [vmem:[#allocation8_spill] sm:$0xff] %v18833_v29 }
 0x480   :  { %v18791_v27 = vadd.f32 %v12814_v57, %v8580_v4  ;;  %v18835_v55 = vpop.f32.mrf.mxu0  ;;  %v9037_v4 = vld [vmem:[%s20617_s7 + $0x380] sm:$0xff] }
 0x481   :  { %v18793_v36 = vpop.f32.mrf.mxu1  ;;  %v18846_v57 = vcombine.low %v9021_v46, %v9037_v4 }
 0x483   :  { %v12818_v5 = vpop.f32.mrf.mxu1  ;;  %21380 = vst [vmem:[#allocation39_spill] sm:$0xff] %v18846_v57 }
 0x485   :  { %v12819_v47 = vpop.f32.mrf.mxu1 }
 0x486   :  { %v12820_v28 = vadd.f32 %v12819_v47, %v12818_v5  ;;  %v18848_v5 = vcombine.high %v9021_v46, %v9037_v4  ;;  %v9038_v47 = vld [vmem:[%s20617_s7 + $0x388] sm:$0xff]  ;;  %v8925_v46 = vld [vmem:[%s20617_s7] sm:$0xff] }
 0x487   :  { %v18797_v49 = vpop.f32.mrf.mxu1 }
 0x488   :  { %v18799_v50 = vadd.f32 %v12820_v28, %v8588_v20  ;;  %21381 = vst [vmem:[#allocation33_spill] sm:$0xff] %v18848_v5  ;;  %v18853_v20 = vpop.f32.mrf.mxu0  ;;  %v18855_v28 = vcombine.low %v9022_v54, %v9038_v47  ;;  %9724 = vmatprep.subr.bf16.mxu0 %v18848_v5 }
 0x489   :  { %v18801_v10 = vpop.f32.mrf.mxu1  ;;  %9725 = vmatpush1.bf16.msra.mxu0 %v18846_v57 }
 0x48a   :  { %21382 = vst [vmem:[#allocation17_spill] sm:$0xff] %v18855_v28 }
 0x48b   :  { %v12824_v35 = vpop.f32.mrf.mxu1 }
 0x48d   :  { %v12825_v59 = vpop.f32.mrf.mxu1 }
 0x48e   :  { %v12826_v12 = vadd.f32 %v12825_v59, %v12824_v35  ;;  %v18857_v35 = vcombine.high %v9022_v54, %v9038_v47  ;;  %v18863_v59 = vpop.f32.mrf.mxu0  ;;  %v8941_v47 = vld [vmem:[%s20617_s7 + $0x80] sm:$0xff] }
 0x48f   :  { %v18805_v48 = vpop.f32.mrf.mxu1 }
 0x490   :  { %v18807_v34 = vadd.f32 %v12826_v12, %v8596_v61  ;;  %21383 = vst [vmem:[#allocation5_spill] sm:$0xff] %v18857_v35  ;;  %9775 = vmatprep.subr.bf16.mxu1 %v18857_v35  ;;  %v8989_v61 = vld [vmem:[%s20617_s7 + $0x200] sm:$0xff]  ;;  %v12868_v4 = vpop.f32.mrf.mxu0 }
 0x491   :  { %v18809_v26 = vpop.f32.mrf.mxu1  ;;  %9776 = vmatpush1.bf16.msra.mxu1 %v18855_v28  ;;  %v9005_v12 = vld [vmem:[%s20617_s7 + $0x280] sm:$0xff] }
 0x492   :  { %v12870_v28 = vpop.f32.mrf.mxu0 }
 0x493   :  { %v12830_v24 = vpop.f32.mrf.mxu1 }
 0x495   :  { %v12831_v44 = vpop.f32.mrf.mxu1 }
 0x496   :  { %v12832_v21 = vadd.f32 %v12831_v44, %v12830_v24  ;;  %v8990_v24 = vld [vmem:[%s20617_s7 + $0x208] sm:$0xff]  ;;  %v18874_v44 = vcombine.low %v8989_v61, %v9005_v12 }
 0x497   :  { %v18813_v38 = vpop.f32.mrf.mxu1 }
 0x498   :  { %v18815_v9 = vadd.f32 %v12832_v21, %v8604_v58  ;;  %21384 = vst [vmem:[#allocation4_spill] sm:$0xff] %v18874_v44  ;;  %v18876_v58 = vcombine.high %v8989_v61, %v9005_v12  ;;  %v9006_v21 = vld [vmem:[%s20617_s7 + $0x288] sm:$0xff] }
 0x499   :  { %v18817_v42 = vpop.f32.mrf.mxu1  ;;  %v8926_v61 = vld [vmem:[%s20617_s7 + $0x8] sm:$0xff] }
 0x49a   :  { %21373 = vst [vmem:[#allocation79_spill] sm:$0xff] %v18815_v9  ;;  %21385 = vst [vmem:[#allocation3_spill] sm:$0xff] %v18876_v58  ;;  %9726 = vmatprep.subr.bf16.mxu0 %v18876_v58  ;;  %v8942_v12 = vld [vmem:[%s20617_s7 + $0x88] sm:$0xff] }
 0x49b   :  { %v12836_v23 = vpop.f32.mrf.mxu1  ;;  %9727 = vmatpush1.bf16.msra.mxu0 %v18874_v44  ;;  %v18927_v58 = vcombine.high %v8926_v61, %v8942_v12  ;;  %v9040_v44 = vld [vmem:[%s20617_s7 + $0x398] sm:$0xff] }
 0x49d   :  { %v12837_v18 = vpop.f32.mrf.mxu1  ;;  %21393 = vst [vmem:[#allocation18_spill] sm:$0xff] %v18927_v58 }
 0x49e   :  { %v12838_v32 = vadd.f32 %v12837_v18, %v12836_v23  ;;  %v8957_v23 = vld [vmem:[%s20617_s7 + $0x100] sm:$0xff] }
 0x49f   :  { %v18821_v16 = vpop.f32.mrf.mxu1  ;;  %v8973_v18 = vld [vmem:[%s20617_s7 + $0x180] sm:$0xff] }
 0x4a0   :  { %21374 = vst [vmem:[#allocation34_spill] sm:$0xff] %v18821_v16  ;;  %v18823_v30 = vadd.f32 %v12838_v32, %v8612_v39  ;;  %v20760_v39 = vmov 0   ;;  %v18889_v32 = vcombine.low %v8990_v24, %v9006_v21 }
 0x4a1   :  { %v18825_v2 = vpop.f32.mrf.mxu1  ;;  %9748 = vmatprep.mubr.bf16.mxu0 %v20760_v39  ;;  %9799 = vmatprep.mubr.bf16.mxu1 %v20760_v39  ;;  %v18924_v39 = vcombine.high %v8925_v46, %v8941_v47 }
 0x4a2   :  { %21375 = vst [vmem:[#allocation53_spill] sm:$0xff] %v18823_v30  ;;  %21376 = vst [vmem:[#allocation37_spill] sm:$0xff] %v18825_v2 }
 0x4a3   :  { %v12842_v40 = vpop.f32.mrf.mxu1  ;;  %21386 = vst [vmem:[#allocation6_spill] sm:$0xff] %v18889_v32  ;;  %21392 = vst [vmem:[#allocation15_spill] sm:$0xff] %v18924_v39 }
 0x4a5   :  { %v12843_v45 = vpop.f32.mrf.mxu1 }
 0x4a6   :  { %v12844_v1 = vadd.f32 %v12843_v45, %v12842_v40  ;;  %v18891_v40 = vcombine.high %v8990_v24, %v9006_v21  ;;  %v18893_v45 = vcombine.high %v8957_v23, %v8973_v18  ;;  %v18918_v24 = vcombine.low %v8957_v23, %v8973_v18  ;;  %v12871_v18 = vpop.f32.mrf.mxu0 }
 0x4a7   :  { %v18934_v23 = vcombine.low %v8926_v61, %v8942_v12 }
 0x4a8   :  { %v18829_v43 = vadd.f32 %v12844_v1, %v8620_v19  ;;  %21387 = vst [vmem:[#allocation36_spill] sm:$0xff] %v18891_v40  ;;  %21388 = vst [vmem:[#allocation13_spill] sm:$0xff] %v18893_v45  ;;  %v8958_v19 = vld [vmem:[%s20617_s7 + $0x108] sm:$0xff]  ;;  %9777 = vmatprep.subr.bf16.mxu1 %v18891_v40  ;;  %9728 = vmatprep.subr.bf16.mxu0 %v18893_v45  ;;  %v18930_v40 = vcombine.low %v8925_v46, %v8941_v47  ;;  %v18964_v45 = vpop.f32.mrf.mxu1 }
 0x4a9   :  { %v8974_v1 = vld [vmem:[%s20617_s7 + $0x188] sm:$0xff]  ;;  %21390 = vst [vmem:[#allocation16_spill] sm:$0xff] %v18918_v24  ;;  %9778 = vmatpush1.bf16.msra.mxu1 %v18889_v32  ;;  %9729 = vmatpush1.bf16.msra.mxu0 %v18918_v24  ;;  %21395 = vst [vmem:[#allocation42_spill] sm:$0xff] %v18934_v23 }
 0x4aa   :  { %21377 = vst [vmem:[#allocation54_spill] sm:$0xff] %v18829_v43  ;;  %v18905_v54 = vcombine.high %v8958_v19, %v8974_v1  ;;  %v18922_v21 = vcombine.low %v8958_v19, %v8974_v1  ;;  %21394 = vst [vmem:[#allocation40_spill] sm:$0xff] %v18930_v40  ;;  %9730 = vmatprep.subr.bf16.mxu0 %v18924_v39  ;;  %v12873_v19 = vpop.f32.mrf.mxu0  ;;  %v18981_v30 = vpop.f32.mrf.mxu1 }
 0x4ab   :  { %21396 = vst [vmem:[#allocation11_spill] sm:$0xff] %v18964_v45  ;;  %21401 = vst [vmem:[#allocation12_spill] sm:$0xff] %v18981_v30  ;;  %v12741_v45 = vadd.f32 %v18646_v63, %v18639_v17  ;;  %v12747_v63 = vadd.f32 %v18664_v56, %v18657_v33 }
 0x4ac   :  { %21389 = vst [vmem:[#allocation29_spill] sm:$0xff] %v18905_v54  ;;  %21391 = vst [vmem:[#allocation9_spill] sm:$0xff] %v18922_v21  ;;  %9779 = vmatprep.subr.bf16.mxu1 %v18905_v54  ;;  %v12874_v1 = vpop.f32.mrf.mxu0 }
 0x4ad   :  { %9780 = vmatpush1.bf16.msra.mxu1 %v18922_v21  ;;  %9731 = vmatpush1.bf16.msra.mxu0 %v18930_v40  ;;  %v9039_v40 = vld [vmem:[%s20617_s7 + $0x390] sm:$0xff]  ;;  %v9024_v21 = vld [vmem:[%s20617_s7 + $0x318] sm:$0xff] }
 0x4ae   :  { %9781 = vmatprep.subr.bf16.mxu1 %v18927_v58  ;;  %v18939_v54 = vpop.f32.mrf.mxu0  ;;  %v18973_v35 = vcombine.low %v9024_v21, %v9040_v44  ;;  %v18975_v5 = vcombine.high %v9024_v21, %v9040_v44  ;;  %v8567_v44 = vadd.f32 %v12741_v45, %v18769_v37  ;;  %v12866_v21 = vadd.f32 %v18853_v20, %v18835_v55 }
 0x4af   :  { %v12811_v55 = vadd.f32 %v18785_v15, %v18781_v62 }
 0x4b0   :  { %v18941_v24 = vpop.f32.mrf.mxu0  ;;  %21399 = vst [vmem:[#allocation28_spill] sm:$0xff] %v18973_v35  ;;  %21400 = vst [vmem:[#allocation65_spill] sm:$0xff] %v18975_v5  ;;  %v8758_v2 = vadd.f32 %v12866_v21, %v18775_v11 }
 0x4b1   :  { %9782 = vmatpush1.bf16.msra.mxu1 %v18934_v23  ;;  %v9023_v23 = vld [vmem:[%s20617_s7 + $0x310] sm:$0xff] }
 0x4b2   :  { %v18943_v46 = vpop.f32.mrf.mxu0  ;;  %v18966_v32 = vcombine.high %v9023_v23, %v9039_v40  ;;  %v18971_v57 = vcombine.low %v9023_v23, %v9039_v40  ;;  %9877 = vmatprep.subr.bf16.mxu1 %v18975_v5  ;;  %v12805_v40 = vadd.f32 %v18777_v31, %v18773_v25 }
 0x4b4   :  { %v18945_v47 = vpop.f32.mrf.mxu0  ;;  %21397 = vst [vmem:[#allocation14_spill] sm:$0xff] %v18966_v32  ;;  %21398 = vst [vmem:[#allocation41_spill] sm:$0xff] %v18971_v57  ;;  %9826 = vmatprep.subr.bf16.mxu0 %v18966_v32  ;;  %v12869_v32 = vadd.f32 %v12868_v4, %v18863_v59  ;;  %v8664_v57 = vadd.f32 %v12805_v40, %v8567_v44  ;;  %v8575_v40 = vadd.f32 %v12747_v63, %v18769_v37 }
 0x4b6   :  { %v18947_v39 = vpop.f32.mrf.mxu0  ;;  %v8761_v25 = vadd.f32 %v12869_v32, %v8664_v57  ;;  %v8672_v56 = vadd.f32 %v12811_v55, %v8575_v40 }
 0x4b8   :  { %v18949_v61 = vpop.f32.mrf.mxu0 }
 0x4ba   :  { %v18951_v12 = vpop.f32.mrf.mxu0 }
 0x4bc   :  { %v18953_v58 = vpop.f32.mrf.mxu0 }
 0x4be   :  { %v18977_v43 = vpop.f32.mrf.mxu0 }
 0x4c0   :  { %v18985_v29 = vpop.f32.mrf.mxu0 }
 0x4c2   :  { %v18993_v5 = vpop.f32.mrf.mxu0 }
 0x4c4   :  { %v18998_v16 = vpop.f32.mrf.mxu0 }
 0x4c6   :  { %v19003_v9 = vpop.f32.mrf.mxu0 }
 0x4f9   :  { %v12928_v14 = vpop.f32.mrf.mxu1 }
 0x4fb   :  { %v12929_v23 = vpop.f32.mrf.mxu1 }
 0x4fc   :  { %v12930_v30 = vadd.f32 %v12929_v23, %v12928_v14  ;;  %v12872_v14 = vadd.f32 %v12871_v18, %v12870_v28  ;;  %v12875_v23 = vadd.f32 %v12874_v1, %v12873_v19  ;;  %v12817_v28 = vadd.f32 %v18793_v36, %v18789_v3 }
 0x4fd   :  { %v12931_v35 = vpop.f32.mrf.mxu1  ;;  %v12759_v3 = vadd.f32 %v18700_v8, %v18693_v6  ;;  %v12887_v6 = vadd.f32 %v18953_v58, %v18951_v12 }
 0x4fe   :  { %v8855_v20 = vadd.f32 %v12930_v30, %v8758_v2  ;;  %v8766_v62 = vadd.f32 %v12872_v14, %v18783_v52  ;;  %v8769_v15 = vadd.f32 %v12875_v23, %v8672_v56  ;;  %v19008_v2 = vpop.f32.mrf.mxu0  ;;  %v12884_v14 = vadd.f32 %v18949_v61, %v18947_v39 }
 0x4ff   :  { %v12932_v17 = vpop.f32.mrf.mxu1  ;;  %v8591_v40 = vadd.f32 %v12759_v3, %v18769_v37  ;;  %v12829_v39 = vadd.f32 %v18809_v26, %v18805_v48  ;;  %v12771_v48 = vadd.f32 %v18734_v60, %v18729_v22 }
 0x500   :  { %v12933_v31 = vadd.f32 %v12932_v17, %v12931_v35  ;;  %v12753_v35 = vadd.f32 %v18682_v7, %v18675_v41  ;;  %v12878_v17 = vadd.f32 %v18941_v24, %v18939_v54  ;;  %v12881_v41 = vadd.f32 %v18945_v47, %v18943_v46  ;;  %v12897_v52 = vpop.f32.mrf.mxu0 }
 0x501   :  { %v12934_v45 = vpop.f32.mrf.mxu1  ;;  %v12823_v54 = vadd.f32 %v18801_v10, %v18797_v49  ;;  %v12765_v49 = vadd.f32 %v18716_v53, %v18711_v13  ;;  %v8782_v10 = vadd.f32 %v12884_v14, %v18799_v50  ;;  %v12893_v13 = vadd.f32 %v18998_v16, %v18993_v5 }
 0x502   :  { %v8858_v59 = vadd.f32 %v12933_v31, %v8761_v25  ;;  %v8583_v21 = vadd.f32 %v12753_v35, %v18769_v37  ;;  %v8774_v36 = vadd.f32 %v12878_v17, %v18791_v27 }
 0x503   :  { %v12935_v4 = vpop.f32.mrf.mxu1 }
 0x504   :  { %v8917_v44 = vpack.c.bf16 %v8858_v59, %v8855_v20  ;;  %v12936_v11 = vadd.f32 %v12935_v4, %v12934_v45  ;;  %v8680_v25 = vadd.f32 %v12817_v28, %v8583_v21  ;;  %v12898_v59 = vpop.f32.mrf.mxu0 }
 0x505   :  { %v12937_v33 = vpop.f32.mrf.mxu1 }
 0x506   :  { %9053 = vxpose.xlu0.c.b16.start [1/4] (short) (narrow) %v8917_v44, 32  ;;  %v8863_v18 = vadd.f32 %v12936_v11, %v8766_v62  ;;  %v8777_v55 = vadd.f32 %v12881_v41, %v8680_v25  ;;  %v12900_v27 = vpop.f32.mrf.mxu0  ;;  %v8688_v44 = vadd.f32 %v12823_v54, %v8591_v40  ;;  %v12899_v25 = vadd.f32 %v12898_v59, %v12897_v52 }
 0x507   :  { %v12938_v57 = vpop.f32.mrf.mxu1 }
 0x508   :  { %v12939_v30 = vadd.f32 %v12938_v57, %v12937_v33  ;;  %v8785_v11 = vadd.f32 %v12887_v6, %v8688_v44  ;;  %v12901_v35 = vpop.f32.mrf.mxu0 }
 0x509   :  { %v12940_v32 = vpop.f32.mrf.mxu1  ;;  %v12902_v40 = vadd.f32 %v12901_v35, %v12900_v27 }
 0x50a   :  { %v8866_v19 = vadd.f32 %v12939_v30, %v8769_v15  ;;  %v8599_v15 = vadd.f32 %v12765_v49, %v18769_v37  ;;  %v12890_v30 = vadd.f32 %v18985_v29, %v18977_v43  ;;  %v12903_v50 = vpop.f32.mrf.mxu0  ;;  %v12835_v43 = vadd.f32 %v18817_v42, %v18813_v38  ;;  %v21402_v38 = vld [vmem:[#allocation79_spill] sm:$0xff] }
 0x50b   :  { %v12941_v1 = vpop.f32.mrf.mxu1 }
 0x50c   :  { %v8918_v7 = vpack.c.bf16 %v8866_v19, %v8863_v18  ;;  %v12942_v31 = vadd.f32 %v12941_v1, %v12940_v32  ;;  %v8696_v28 = vadd.f32 %v12829_v39, %v8599_v15  ;;  %v8790_v26 = vadd.f32 %v12890_v30, %v18807_v34  ;;  %v12904_v17 = vpop.f32.mrf.mxu0 }
 0x50d   :  { %v12943_v63 = vpop.f32.mrf.mxu1  ;;  %v12905_v14 = vadd.f32 %v12904_v17, %v12903_v50 }
 0x50e   :  { %9054 = vxpose.xlu0.c.b16.cont [2/4] (short) (narrow) %v8918_v7, 32  ;;  %v8871_v24 = vadd.f32 %v12942_v31, %v8774_v36  ;;  %v8793_v1 = vadd.f32 %v12893_v13, %v8696_v28  ;;  %v8607_v7 = vadd.f32 %v12771_v48, %v18769_v37  ;;  %v12906_v22 = vpop.f32.mrf.mxu0  ;;  %v12777_v36 = vadd.f32 %v18752_v0, %v18747_v51 }
 0x50f   :  { %v12944_v45 = vpop.f32.mrf.mxu1 }
 0x510   :  { %v12945_v20 = vadd.f32 %v12944_v45, %v12943_v63  ;;  %v12896_v63 = vadd.f32 %v19008_v2, %v19003_v9  ;;  %v8704_v34 = vadd.f32 %v12835_v43, %v8607_v7  ;;  %v9008_v7 = vld [vmem:[%s20617_s7 + $0x298] sm:$0xff] }
 0x511   :  { %v12946_v4 = vpop.f32.mrf.mxu1 }
 0x512   :  { %v8874_v46 = vadd.f32 %v12945_v20, %v8777_v55  ;;  %v8798_v42 = vadd.f32 %v12896_v63, %v21402_v38  ;;  %v8801_v55 = vadd.f32 %v12899_v25, %v8704_v34  ;;  %v8960_v34 = vld [vmem:[%s20617_s7 + $0x118] sm:$0xff] }
 0x513   :  { %v12947_v47 = vpop.f32.mrf.mxu1 }
 0x514   :  { %v8919_v8 = vpack.c.bf16 %v8874_v46, %v8871_v24  ;;  %v12948_v33 = vadd.f32 %v12947_v47, %v12946_v4  ;;  %v12907_v4 = vpop.f32.mrf.mxu0  ;;  %v21403_v24 = vld [vmem:[#allocation34_spill] sm:$0xff]  ;;  %v21404_v46 = vld [vmem:[#allocation37_spill] sm:$0xff]  ;;  %v8615_v47 = vadd.f32 %v12777_v36, %v18769_v37  ;;  %v21412_v36 = vld [vmem:[#allocation28_spill] sm:$0xff] }
 0x515   :  { %v12949_v23 = vpop.f32.mrf.mxu1  ;;  %v12841_v9 = vadd.f32 %v21404_v46, %v21403_v24  ;;  %v8943_v24 = vld [vmem:[%s20617_s7 + $0x90] sm:$0xff]  ;;  %v8928_v46 = vld [vmem:[%s20617_s7 + $0x18] sm:$0xff] }
 0x516   :  { %9055 = vxpose.xlu0.c.b16.cont [3/4] (short) (narrow) %v8919_v8, 32  ;;  %v8879_v58 = vadd.f32 %v12948_v33, %v8782_v10  ;;  %v12909_v8 = vpop.f32.mrf.mxu0  ;;  %v21405_v33 = vld [vmem:[#allocation27_spill] sm:$0xff]  ;;  %v21407_v10 = vld [vmem:[#allocation53_spill] sm:$0xff] }
 0x517   :  { %v12950_v56 = vpop.f32.mrf.mxu1  ;;  %v8712_v51 = vadd.f32 %v12841_v9, %v8615_v47  ;;  %v8944_v9 = vld [vmem:[%s20617_s7 + $0x98] sm:$0xff] }
 0x518   :  { %v12951_v57 = vadd.f32 %v12950_v56, %v12949_v23  ;;  %v21406_v56 = vld [vmem:[#allocation8_spill] sm:$0xff]  ;;  %v12910_v39 = vpop.f32.mrf.mxu0 }
 0x519   :  { %v12952_v62 = vpop.f32.mrf.mxu1  ;;  %v12783_v49 = vadd.f32 %v21406_v56, %v21405_v33  ;;  %v12911_v50 = vadd.f32 %v12910_v39, %v12909_v8  ;;  %v9026_v8 = vld [vmem:[%s20617_s7 + $0x328] sm:$0xff]  ;;  %v8993_v56 = vld [vmem:[%s20617_s7 + $0x220] sm:$0xff] }
 0x51a   :  { %v8882_v61 = vadd.f32 %v12951_v57, %v8785_v11  ;;  %v8806_v11 = vadd.f32 %v12902_v40, %v21407_v10  ;;  %v8809_v57 = vadd.f32 %v12905_v14, %v8712_v51  ;;  %v19130_v40 = vcombine.high %v8928_v46, %v8944_v9  ;;  %v9025_v14 = vld [vmem:[%s20617_s7 + $0x320] sm:$0xff]  ;;  %v8994_v10 = vld [vmem:[%s20617_s7 + $0x228] sm:$0xff] }
 0x51b   :  { %v12953_v12 = vpop.f32.mrf.mxu1  ;;  %v8623_v13 = vadd.f32 %v12783_v49, %v18769_v37  ;;  %v8991_v37 = vld [vmem:[%s20617_s7 + $0x210] sm:$0xff]  ;;  %v9009_v49 = vld [vmem:[%s20617_s7 + $0x2a0] sm:$0xff] }
 0x51c   :  { %v8920_v53 = vpack.c.bf16 %v8882_v61, %v8879_v58  ;;  %v12954_v18 = vadd.f32 %v12953_v12, %v12952_v62  ;;  %v21408_v61 = vld [vmem:[#allocation11_spill] sm:$0xff]  ;;  %v21409_v12 = vld [vmem:[#allocation12_spill] sm:$0xff]  ;;  %v19182_v39 = vcombine.high %v8993_v56, %v9009_v49 }
 0x51d   :  { %v12955_v32 = vpop.f32.mrf.mxu1  ;;  %v12847_v27 = vadd.f32 %v21409_v12, %v21408_v61  ;;  %v8961_v61 = vld [vmem:[%s20617_s7 + $0x120] sm:$0xff] }
 0x51e   :  { %9056 = vxpose.xlu0.c.b16.end [4/4] (short) (narrow) %v8920_v53, 32  ;;  %v8887_v16 = vadd.f32 %v12954_v18, %v8790_v26  ;;  %v12908_v53 = vadd.f32 %v12907_v4, %v12906_v22  ;;  %v21410_v26 = vld [vmem:[#allocation54_spill] sm:$0xff]  ;;  %v8927_v4 = vld [vmem:[%s20617_s7 + $0x10] sm:$0xff] }
 0x51f   :  { %v12956_v19 = vpop.f32.mrf.mxu1  ;;  %v8720_v18 = vadd.f32 %v12847_v27, %v8623_v13  ;;  %v19128_v47 = vcombine.high %v8927_v4, %v8943_v24  ;;  %v19150_v51 = vcombine.low %v8927_v4, %v8943_v24  ;;  %v8977_v12 = vld [vmem:[%s20617_s7 + $0x1a0] sm:$0xff]  ;;  %v8962_v27 = vld [vmem:[%s20617_s7 + $0x128] sm:$0xff] }
 0x520   :  { %v12957_v21 = vadd.f32 %v12956_v19, %v12955_v32  ;;  %v19210_v13 = vcombine.high %v8961_v61, %v8977_v12 }
 0x521   :  { %v12958_v41 = vpop.f32.mrf.mxu1 }
 0x522   :  { %v8890_v29 = vadd.f32 %v12957_v21, %v8793_v1  ;;  %v8814_v1 = vadd.f32 %v12908_v53, %v21410_v26  ;;  %v8817_v21 = vadd.f32 %v12911_v50, %v8720_v18  ;;  %v8929_v50 = vld [vmem:[%s20617_s7 + $0x20] sm:$0xff]  ;;  %v8946_v18 = vld [vmem:[%s20617_s7 + $0xa8] sm:$0xff] }
 0x523   :  { %v12959_v5 = vpop.f32.mrf.mxu1 }
 0x524   :  { %v8921_v31 = vpack.c.bf16 %v8890_v29, %v8887_v16  ;;  %v12960_v45 = vadd.f32 %v12959_v5, %v12958_v41  ;;  %v9007_v29 = vld [vmem:[%s20617_s7 + $0x290] sm:$0xff]  ;;  %v8992_v5 = vld [vmem:[%s20617_s7 + $0x218] sm:$0xff] }
 0x525   :  { %v12961_v60 = vpop.f32.mrf.mxu1  ;;  %v19070_v63 = vcombine.high %v8991_v37, %v9007_v29  ;;  %v19072_v25 = vcombine.high %v8992_v5, %v9008_v7  ;;  %v19094_v38 = vcombine.low %v8991_v37, %v9007_v29 }
 0x526   :  { %10628 = vxpose.xlu1.c.b16.start [1/4] (short) (narrow) %v8921_v31, 32  ;;  %v8895_v2 = vadd.f32 %v12960_v45, %v8798_v42  ;;  %v8959_v31 = vld [vmem:[%s20617_s7 + $0x110] sm:$0xff]  ;;  %v8976_v45 = vld [vmem:[%s20617_s7 + $0x198] sm:$0xff]  ;;  %v19096_v42 = vcombine.low %v8992_v5, %v9008_v7 }
 0x527   :  { %v12962_v3 = vpop.f32.mrf.mxu1  ;;  %v8995_v7 = vld [vmem:[%s20617_s7 + $0x230] sm:$0xff] }
 0x528   :  { %v12963_v20 = vadd.f32 %v12962_v3, %v12961_v60  ;;  %v8975_v60 = vld [vmem:[%s20617_s7 + $0x190] sm:$0xff]  ;;  %v21411_v3 = vld [vmem:[#allocation41_spill] sm:$0xff] }
 0x529   :  { %v12964_v54 = vpop.f32.mrf.mxu1 }
 0x52a   :  { %v8898_v52 = vadd.f32 %v12963_v20, %v8801_v55  ;;  %v19100_v55 = vcombine.high %v8959_v31, %v8975_v60  ;;  %v19102_v20 = vcombine.high %v8960_v34, %v8976_v45 }
 0x52b   :  { %v12965_v59 = vpop.f32.mrf.mxu1 }
 0x52c   :  { %v8922_v6 = vpack.c.bf16 %v8898_v52, %v8895_v2  ;;  %v12966_v0 = vadd.f32 %v12965_v59, %v12964_v54  ;;  %v21413_v54 = vmov 0   ;;  %v19122_v52 = vcombine.low %v8959_v31, %v8975_v60  ;;  %v9011_v31 = vld [vmem:[%s20617_s7 + $0x2b0] sm:$0xff]  ;;  %v8996_v60 = vld [vmem:[%s20617_s7 + $0x238] sm:$0xff] }
 0x52d   :  { %v12967_v23 = vpop.f32.mrf.mxu1  ;;  %v19124_v59 = vcombine.low %v8960_v34, %v8976_v45  ;;  %v9012_v34 = vld [vmem:[%s20617_s7 + $0x2b8] sm:$0xff]  ;;  %v19290_v24 = vcombine.high %v8995_v7, %v9011_v31 }
 0x52e   :  { %10629 = vxpose.xlu1.c.b16.cont [2/4] (short) (narrow) %v8922_v6, 32  ;;  %v8903_v35 = vadd.f32 %v12966_v0, %v8806_v11  ;;  %v9041_v6 = vld [vmem:[%s20617_s7 + $0x3a0] sm:$0xff]  ;;  %v19152_v0 = vcombine.low %v8928_v46, %v8944_v9  ;;  %v9010_v11 = vld [vmem:[%s20617_s7 + $0x2a8] sm:$0xff]  ;;  %v19292_v46 = vcombine.high %v8996_v60, %v9012_v34  ;;  %v8963_v9 = vld [vmem:[%s20617_s7 + $0x130] sm:$0xff] }
 0x52f   :  { %v12968_v44 = vpop.f32.mrf.mxu1 }
 0x530   :  { %v12969_v62 = vadd.f32 %v12968_v44, %v12967_v23  ;;  %v9042_v23 = vld [vmem:[%s20617_s7 + $0x3a8] sm:$0xff]  ;;  %v19156_v44 = vcombine.high %v9025_v14, %v9041_v6 }
 0x531   :  { %v12970_v58 = vpop.f32.mrf.mxu1  ;;  %v19158_v33 = vcombine.high %v9026_v8, %v9042_v23 }
 0x532   :  { %v8906_v15 = vadd.f32 %v12969_v62, %v8809_v57  ;;  %v19176_v57 = vcombine.low %v9025_v14, %v9041_v6  ;;  %v19178_v62 = vcombine.low %v9026_v8, %v9042_v23  ;;  %v8979_v14 = vld [vmem:[%s20617_s7 + $0x1b0] sm:$0xff]  ;;  %v8964_v6 = vld [vmem:[%s20617_s7 + $0x138] sm:$0xff]  ;;  %v19312_v23 = vcombine.low %v8995_v7, %v9011_v31 }
 0x533   :  { %v12971_v30 = vpop.f32.mrf.mxu1  ;;  %v8980_v8 = vld [vmem:[%s20617_s7 + $0x1b8] sm:$0xff] }
 0x534   :  { %v8923_v32 = vpack.c.bf16 %v8906_v15, %v8903_v35  ;;  %v12972_v19 = vadd.f32 %v12971_v30, %v12970_v58  ;;  %v19184_v58 = vcombine.high %v8994_v10, %v9010_v11  ;;  %v8978_v35 = vld [vmem:[%s20617_s7 + $0x1a8] sm:$0xff]  ;;  %v19204_v15 = vcombine.low %v8993_v56, %v9009_v49 }
 0x535   :  { %v12973_v28 = vpop.f32.mrf.mxu1  ;;  %v19206_v30 = vcombine.low %v8994_v10, %v9010_v11  ;;  %v19212_v53 = vcombine.high %v8962_v27, %v8978_v35  ;;  %v19314_v56 = vcombine.low %v8996_v60, %v9012_v34  ;;  %v19318_v49 = vcombine.high %v8963_v9, %v8979_v14  ;;  %v8931_v11 = vld [vmem:[%s20617_s7 + $0x30] sm:$0xff]  ;;  %v8997_v34 = vld [vmem:[%s20617_s7 + $0x240] sm:$0xff] }
 0x536   :  { %10630 = vxpose.xlu1.c.b16.cont [3/4] (short) (narrow) %v8923_v32, 32  ;;  %v8911_v41 = vadd.f32 %v12972_v19, %v8814_v1  ;;  %v8945_v32 = vld [vmem:[%s20617_s7 + $0xa0] sm:$0xff]  ;;  %v19230_v19 = vcombine.low %v8961_v61, %v8977_v12  ;;  %v19320_v10 = vcombine.high %v8964_v6, %v8980_v8  ;;  %v8947_v61 = vld [vmem:[%s20617_s7 + $0xb0] sm:$0xff]  ;;  %v8932_v12 = vld [vmem:[%s20617_s7 + $0x38] sm:$0xff] }
 0x537   :  { %v12974_v48 = vpop.f32.mrf.mxu1  ;;  %v19236_v26 = vcombine.high %v8929_v50, %v8945_v32 }
 0x538   :  { %v12975_v17 = vadd.f32 %v12974_v48, %v12973_v28  ;;  %v8930_v28 = vld [vmem:[%s20617_s7 + $0x28] sm:$0xff]  ;;  %v19232_v48 = vcombine.low %v8962_v27, %v8978_v35  ;;  %v8948_v27 = vld [vmem:[%s20617_s7 + $0xb8] sm:$0xff]  ;;  %v19338_v35 = vcombine.low %v8963_v9, %v8979_v14  ;;  %v9013_v9 = vld [vmem:[%s20617_s7 + $0x2c0] sm:$0xff] }
 0x539   :  { %v19238_v1 = vcombine.high %v8930_v28, %v8946_v18  ;;  %v19260_v37 = vcombine.low %v8930_v28, %v8946_v18  ;;  %v19346_v28 = vcombine.high %v8932_v12, %v8948_v27  ;;  %v9029_v18 = vld [vmem:[%s20617_s7 + $0x340] sm:$0xff]  ;;  %v19368_v7 = vcombine.low %v8932_v12, %v8948_v27  ;;  %v8998_v14 = vld [vmem:[%s20617_s7 + $0x248] sm:$0xff] }
 0x53a   :  { %v8914_v43 = vadd.f32 %v12975_v17, %v8817_v21  ;;  %v9027_v21 = vld [vmem:[%s20617_s7 + $0x330] sm:$0xff]  ;;  %v8965_v27 = vld [vmem:[%s20617_s7 + $0x140] sm:$0xff] }
 0x53b   :  { %v9043_v17 = vld [vmem:[%s20617_s7 + $0x3b0] sm:$0xff]  ;;  %21415 = vst [vmem:[#allocation76_spill] sm:$0xff] %v19368_v7 }
 0x53c   :  { %v8924_v16 = vpack.c.bf16 %v8914_v43, %v8911_v41  ;;  %v9028_v41 = vld [vmem:[%s20617_s7 + $0x338] sm:$0xff]  ;;  %v19264_v29 = vcombine.high %v9027_v21, %v9043_v17  ;;  %v19284_v45 = vcombine.low %v9027_v21, %v9043_v17  ;;  %v9045_v21 = vld [vmem:[%s20617_s7 + $0x3c0] sm:$0xff]  ;;  %v9030_v17 = vld [vmem:[%s20617_s7 + $0x348] sm:$0xff] }
 0x53d   :  { %v9044_v43 = vld [vmem:[%s20617_s7 + $0x3b8] sm:$0xff]  ;;  %v19372_v31 = vcombine.high %v9029_v18, %v9045_v21 }
 0x53e   :  { %10631 = vxpose.xlu1.c.b16.end [4/4] (short) (narrow) %v8924_v16, 32  ;;  %v19258_v16 = vcombine.low %v8929_v50, %v8945_v32  ;;  %v19266_v5 = vcombine.high %v9028_v41, %v9044_v43  ;;  %v19286_v4 = vcombine.low %v9028_v41, %v9044_v43  ;;  %v19340_v50 = vcombine.low %v8964_v6, %v8980_v8  ;;  %v9046_v41 = vld [vmem:[%s20617_s7 + $0x3c8] sm:$0xff] }
 0x53f   :  { %v19344_v32 = vcombine.high %v8931_v11, %v8947_v61  ;;  %v19366_v43 = vcombine.low %v8931_v11, %v8947_v61  ;;  %21416 = vst [vmem:[#allocation26_spill] sm:$0xff] %v19372_v31  ;;  %v19374_v60 = vcombine.high %v9030_v17, %v9046_v41  ;;  %v9014_v6 = vld [vmem:[%s20617_s7 + $0x2c8] sm:$0xff]  ;;  %v19392_v8 = vcombine.low %v9029_v18, %v9045_v21 }
 0x540   :  { %v19394_v11 = vcombine.low %v9030_v17, %v9046_v41  ;;  %v19398_v61 = vcombine.high %v8997_v34, %v9013_v9  ;;  %v19400_v12 = vcombine.high %v8998_v14, %v9014_v6  ;;  %v8966_v18 = vld [vmem:[%s20617_s7 + $0x148] sm:$0xff]  ;;  %v19420_v17 = vcombine.low %v8997_v34, %v9013_v9  ;;  %v8949_v34 = vld [vmem:[%s20617_s7 + $0xc0] sm:$0xff] }
 0x541   :  { %21414 = vst [vmem:[#allocation21_spill] sm:$0xff] %v19366_v43  ;;  %21417 = vst [vmem:[#allocation43_spill] sm:$0xff] %v19374_v60  ;;  %v8982_v21 = vld [vmem:[%s20617_s7 + $0x1c8] sm:$0xff]  ;;  %v19422_v41 = vcombine.low %v8998_v14, %v9014_v6 }
 0x542   :  { %21418 = vst [vmem:[#allocation25_spill] sm:$0xff] %v19392_v8  ;;  %21419 = vst [vmem:[#allocation44_spill] sm:$0xff] %v19394_v11  ;;  %v8934_v9 = vld [vmem:[%s20617_s7 + $0x48] sm:$0xff] }
 0x543   :  { %21420 = vst [vmem:[#allocation10_spill] sm:$0xff] %v19398_v61  ;;  %21421 = vst [vmem:[#allocation2_spill] sm:$0xff] %v19400_v12  ;;  %v8950_v14 = vld [vmem:[%s20617_s7 + $0xc8] sm:$0xff] }
 0x544   :  { %21422 = vst [vmem:[#allocation22_spill] sm:$0xff] %v19420_v17  ;;  %21423 = vst [vmem:[#allocation78_spill] sm:$0xff] %v19422_v41 }
 0x574   :  { %v19077_v22 = vpop.trf.xlu0 }
 0x575   :  { %12560 = vmatmul.mubr.msk.bf16.vlgmr.msra.gmra.mxu0 %vm9709_vm0, %v19077_v22  ;;  %12562 = vmatmul.mubr.msk.bf16.vlgmr.msra.gmra.mxu1 %vm9709_vm0, %v19077_v22 }
 0x576   :  { %9827 = vmatpush1.bf16.msra.mxu0 %v21411_v3  ;;  %9878 = vmatpush1.bf16.msra.mxu1 %v21412_v36 }
 0x577   :  { %9828 = vmatprep.subr.bf16.mxu0 %v19070_v63  ;;  %9879 = vmatprep.subr.bf16.mxu1 %v19072_v25 }
 0x578   :  { %9758 = vmatprep.mubr.bf16.mxu0 %v21413_v54  ;;  %9809 = vmatprep.mubr.bf16.mxu1 %v21413_v54  ;;  %v19120_v2 = vpop.trf.xlu0 }
 0x57a   :  { %9829 = vmatpush1.bf16.msra.mxu0 %v19094_v38  ;;  %9880 = vmatpush1.bf16.msra.mxu1 %v19096_v42 }
 0x57b   :  { %9830 = vmatprep.subr.bf16.mxu0 %v19100_v55  ;;  %9881 = vmatprep.subr.bf16.mxu1 %v19102_v20 }
 0x57d   :  { %12561 = vmatmul.mubr.msk.bf16.gmra.mxu0 %vm9709_vm0, %v19120_v2  ;;  %12563 = vmatmul.mubr.msk.bf16.gmra.mxu1 %vm9709_vm0, %v19120_v2 }
 0x57e   :  { %9831 = vmatpush1.bf16.msra.mxu0 %v19122_v52  ;;  %9882 = vmatpush1.bf16.msra.mxu1 %v19124_v59 }
 0x57f   :  { %9832 = vmatprep.subr.bf16.mxu0 %v19128_v47  ;;  %9883 = vmatprep.subr.bf16.mxu1 %v19130_v40 }
 0x580   :  { %9850 = vmatprep.mubr.bf16.mxu0 %v21413_v54  ;;  %9901 = vmatprep.mubr.bf16.mxu1 %v21413_v54 }
 0x582   :  { %9833 = vmatpush1.bf16.msra.mxu0 %v19150_v51  ;;  %9884 = vmatpush1.bf16.msra.mxu1 %v19152_v0 }
 0x583   :  { %9928 = vmatprep.subr.bf16.mxu0 %v19156_v44  ;;  %9979 = vmatprep.subr.bf16.mxu1 %v19158_v33 }
 0x585   :  { %12564 = vmatmul.mubr.msk.bf16.vlgmr.msra.gmra.mxu0 %vm9709_vm0, %v19077_v22  ;;  %12566 = vmatmul.mubr.msk.bf16.vlgmr.msra.gmra.mxu1 %vm9709_vm0, %v19077_v22 }
 0x586   :  { %9929 = vmatpush1.bf16.msra.mxu0 %v19176_v57  ;;  %9980 = vmatpush1.bf16.msra.mxu1 %v19178_v62 }
 0x587   :  { %9930 = vmatprep.subr.bf16.mxu0 %v19182_v39  ;;  %9981 = vmatprep.subr.bf16.mxu1 %v19184_v58 }
 0x588   :  { %9860 = vmatprep.mubr.bf16.mxu0 %v21413_v54  ;;  %9911 = vmatprep.mubr.bf16.mxu1 %v21413_v54 }
 0x58a   :  { %9931 = vmatpush1.bf16.msra.mxu0 %v19204_v15  ;;  %9982 = vmatpush1.bf16.msra.mxu1 %v19206_v30 }
 0x58b   :  { %9932 = vmatprep.subr.bf16.mxu0 %v19210_v13  ;;  %9983 = vmatprep.subr.bf16.mxu1 %v19212_v53 }
 0x58d   :  { %12565 = vmatmul.mubr.msk.bf16.gmra.mxu0 %vm9709_vm0, %v19120_v2  ;;  %12567 = vmatmul.mubr.msk.bf16.gmra.mxu1 %vm9709_vm0, %v19120_v2 }
 0x58e   :  { %9933 = vmatpush1.bf16.msra.mxu0 %v19230_v19  ;;  %9984 = vmatpush1.bf16.msra.mxu1 %v19232_v48 }
 0x58f   :  { %9934 = vmatprep.subr.bf16.mxu0 %v19236_v26  ;;  %9985 = vmatprep.subr.bf16.mxu1 %v19238_v1 }
 0x590   :  { %9952 = vmatprep.mubr.bf16.mxu0 %v21413_v54  ;;  %10003 = vmatprep.mubr.bf16.mxu1 %v21413_v54 }
 0x592   :  { %9935 = vmatpush1.bf16.msra.mxu0 %v19258_v16  ;;  %9986 = vmatpush1.bf16.msra.mxu1 %v19260_v37 }
 0x593   :  { %10030 = vmatprep.subr.bf16.mxu0 %v19264_v29  ;;  %10081 = vmatprep.subr.bf16.mxu1 %v19266_v5 }
 0x595   :  { %12568 = vmatmul.mubr.msk.bf16.vlgmr.msra.gmra.mxu0 %vm9709_vm0, %v19077_v22  ;;  %12570 = vmatmul.mubr.msk.bf16.vlgmr.msra.gmra.mxu1 %vm9709_vm0, %v19077_v22 }
 0x596   :  { %10031 = vmatpush1.bf16.msra.mxu0 %v19284_v45  ;;  %10082 = vmatpush1.bf16.msra.mxu1 %v19286_v4 }
 0x597   :  { %10032 = vmatprep.subr.bf16.mxu0 %v19290_v24  ;;  %10083 = vmatprep.subr.bf16.mxu1 %v19292_v46 }
 0x598   :  { %9962 = vmatprep.mubr.bf16.mxu0 %v21413_v54  ;;  %10013 = vmatprep.mubr.bf16.mxu1 %v21413_v54 }
 0x59a   :  { %10033 = vmatpush1.bf16.msra.mxu0 %v19312_v23  ;;  %10084 = vmatpush1.bf16.msra.mxu1 %v19314_v56 }
 0x59b   :  { %10034 = vmatprep.subr.bf16.mxu0 %v19318_v49  ;;  %10085 = vmatprep.subr.bf16.mxu1 %v19320_v10 }
 0x59d   :  { %12569 = vmatmul.mubr.msk.bf16.gmra.mxu0 %vm9709_vm0, %v19120_v2  ;;  %12571 = vmatmul.mubr.msk.bf16.gmra.mxu1 %vm9709_vm0, %v19120_v2 }
 0x59e   :  { %10035 = vmatpush1.bf16.msra.mxu0 %v19338_v35  ;;  %10086 = vmatpush1.bf16.msra.mxu1 %v19340_v50 }
 0x59f   :  { %10036 = vmatprep.subr.bf16.mxu0 %v19344_v32  ;;  %10087 = vmatprep.subr.bf16.mxu1 %v19346_v28 }
 0x5a0   :  { %10054 = vmatprep.mubr.bf16.mxu0 %v21413_v54  ;;  %10105 = vmatprep.mubr.bf16.mxu1 %v21413_v54 }
 0x5a2   :  { %10037 = vmatpush1.bf16.msra.mxu0 %v19366_v43  ;;  %10088 = vmatpush1.bf16.msra.mxu1 %v19368_v7  ;;  %v8981_v7 = vld [vmem:[%s20617_s7 + $0x1c0] sm:$0xff] }
 0x5a3   :  { %10132 = vmatprep.subr.bf16.mxu0 %v19372_v31  ;;  %10183 = vmatprep.subr.bf16.mxu1 %v19374_v60  ;;  %v19426_v60 = vcombine.high %v8965_v27, %v8981_v7  ;;  %v19428_v31 = vcombine.high %v8966_v18, %v8982_v21  ;;  %v8933_v43 = vld [vmem:[%s20617_s7 + $0x40] sm:$0xff]  ;;  %v19446_v6 = vcombine.low %v8965_v27, %v8981_v7  ;;  %v9032_v7 = vld [vmem:[%s20617_s7 + $0x358] sm:$0xff] }
 0x5a4   :  { %v9048_v27 = vld [vmem:[%s20617_s7 + $0x3d8] sm:$0xff] }
 0x5a5   :  { %12572 = vmatmul.mubr.msk.bf16.vlgmr.msra.gmra.mxu0 %vm9709_vm0, %v19077_v22  ;;  %12574 = vmatmul.mubr.msk.bf16.vlgmr.msra.gmra.mxu1 %vm9709_vm0, %v19077_v22  ;;  %21424 = vst [vmem:[#allocation32_spill] sm:$0xff] %v19426_v60  ;;  %21425 = vst [vmem:[#allocation45_spill] sm:$0xff] %v19428_v31 }
 0x5a6   :  { %10133 = vmatpush1.bf16.msra.mxu0 %v19392_v8  ;;  %10184 = vmatpush1.bf16.msra.mxu1 %v19394_v11  ;;  %21426 = vst [vmem:[#allocation23_spill] sm:$0xff] %v19446_v6  ;;  %v19454_v11 = vcombine.high %v8934_v9, %v8950_v14  ;;  %v9031_v8 = vld [vmem:[%s20617_s7 + $0x350] sm:$0xff] }
 0x5a7   :  { %10134 = vmatprep.subr.bf16.mxu0 %v19398_v61  ;;  %10185 = vmatprep.subr.bf16.mxu1 %v19400_v12  ;;  %v19448_v12 = vcombine.low %v8966_v18, %v8982_v21  ;;  %v19452_v61 = vcombine.high %v8933_v43, %v8949_v34  ;;  %v19474_v18 = vcombine.low %v8933_v43, %v8949_v34  ;;  %v9015_v43 = vld [vmem:[%s20617_s7 + $0x2d0] sm:$0xff]  ;;  %v9000_v34 = vld [vmem:[%s20617_s7 + $0x258] sm:$0xff] }
 0x5a8   :  { %10064 = vmatprep.mubr.bf16.mxu0 %v21413_v54  ;;  %10115 = vmatprep.mubr.bf16.mxu1 %v21413_v54  ;;  %21429 = vst [vmem:[#allocation19_spill] sm:$0xff] %v19454_v11  ;;  %v19476_v21 = vcombine.low %v8934_v9, %v8950_v14  ;;  %v9016_v9 = vld [vmem:[%s20617_s7 + $0x2d8] sm:$0xff] }
 0x5a9   :  { %21427 = vst [vmem:[#allocation46_spill] sm:$0xff] %v19448_v12  ;;  %21428 = vst [vmem:[#allocation7_spill] sm:$0xff] %v19452_v61 }
 0x5aa   :  { %10135 = vmatpush1.bf16.msra.mxu0 %v19420_v17  ;;  %10186 = vmatpush1.bf16.msra.mxu1 %v19422_v41  ;;  %v9047_v41 = vld [vmem:[%s20617_s7 + $0x3d0] sm:$0xff]  ;;  %21430 = vst [vmem:[#allocation30_spill] sm:$0xff] %v19474_v18  ;;  %21431 = vst [vmem:[#allocation47_spill] sm:$0xff] %v19476_v21 }
 0x5ab   :  { %10136 = vmatprep.subr.bf16.mxu0 %v19426_v60  ;;  %10187 = vmatprep.subr.bf16.mxu1 %v19428_v31  ;;  %v19480_v31 = vcombine.high %v9031_v8, %v9047_v41  ;;  %v19482_v60 = vcombine.high %v9032_v7, %v9048_v27  ;;  %v8999_v17 = vld [vmem:[%s20617_s7 + $0x250] sm:$0xff]  ;;  %v19500_v14 = vcombine.low %v9031_v8, %v9047_v41  ;;  %v8968_v8 = vld [vmem:[%s20617_s7 + $0x158] sm:$0xff] }
 0x5ac   :  { %v8984_v41 = vld [vmem:[%s20617_s7 + $0x1d8] sm:$0xff] }
 0x5ad   :  { %12573 = vmatmul.mubr.msk.bf16.gmra.mxu0 %vm9709_vm0, %v19120_v2  ;;  %12575 = vmatmul.mubr.msk.bf16.gmra.mxu1 %vm9709_vm0, %v19120_v2  ;;  %21432 = vst [vmem:[#allocation35_spill] sm:$0xff] %v19480_v31  ;;  %21433 = vst [vmem:[#allocation66_spill] sm:$0xff] %v19482_v60 }
 0x5ae   :  { %10137 = vmatpush1.bf16.msra.mxu0 %v19446_v6  ;;  %10188 = vmatpush1.bf16.msra.mxu1 %v19448_v12  ;;  %21434 = vst [vmem:[#allocation55_spill] sm:$0xff] %v19500_v14  ;;  %v19508_v12 = vcombine.high %v9000_v34, %v9016_v9  ;;  %v8967_v6 = vld [vmem:[%s20617_s7 + $0x150] sm:$0xff] }
 0x5af   :  { %10138 = vmatprep.subr.bf16.mxu0 %v19452_v61  ;;  %10189 = vmatprep.subr.bf16.mxu1 %v19454_v11  ;;  %v19502_v11 = vcombine.low %v9032_v7, %v9048_v27  ;;  %v19506_v61 = vcombine.high %v8999_v17, %v9015_v43  ;;  %v19528_v7 = vcombine.low %v8999_v17, %v9015_v43  ;;  %v8951_v17 = vld [vmem:[%s20617_s7 + $0xd0] sm:$0xff]  ;;  %v8936_v43 = vld [vmem:[%s20617_s7 + $0x58] sm:$0xff] }
 0x5b0   :  { %10156 = vmatprep.mubr.bf16.mxu0 %v21413_v54  ;;  %10207 = vmatprep.mubr.bf16.mxu1 %v21413_v54  ;;  %21437 = vst [vmem:[#allocation20_spill] sm:$0xff] %v19508_v12  ;;  %v19530_v27 = vcombine.low %v9000_v34, %v9016_v9  ;;  %v8952_v34 = vld [vmem:[%s20617_s7 + $0xd8] sm:$0xff] }
 0x5b1   :  { %21435 = vst [vmem:[#allocation51_spill] sm:$0xff] %v19502_v11  ;;  %21436 = vst [vmem:[#allocation38_spill] sm:$0xff] %v19506_v61 }
 0x5b2   :  { %10139 = vmatpush1.bf16.msra.mxu0 %v19474_v18  ;;  %10190 = vmatpush1.bf16.msra.mxu1 %v19476_v21  ;;  %v8983_v21 = vld [vmem:[%s20617_s7 + $0x1d0] sm:$0xff]  ;;  %21438 = vst [vmem:[#allocation68_spill] sm:$0xff] %v19528_v7  ;;  %21439 = vst [vmem:[#allocation48_spill] sm:$0xff] %v19530_v27 }
 0x5b3   :  { %10234 = vmatprep.subr.bf16.mxu0 %v19480_v31  ;;  %10285 = vmatprep.subr.bf16.mxu1 %v19482_v60  ;;  %v19534_v60 = vcombine.high %v8967_v6, %v8983_v21  ;;  %v19536_v31 = vcombine.high %v8968_v8, %v8984_v41  ;;  %v8935_v18 = vld [vmem:[%s20617_s7 + $0x50] sm:$0xff]  ;;  %v19554_v9 = vcombine.low %v8967_v6, %v8983_v21  ;;  %v9034_v6 = vld [vmem:[%s20617_s7 + $0x368] sm:$0xff] }
 0x5b4   :  { %v9050_v21 = vld [vmem:[%s20617_s7 + $0x3e8] sm:$0xff] }
 0x5b5   :  { %12576 = vmatmul.mubr.msk.bf16.vlgmr.msra.gmra.mxu0 %vm9709_vm0, %v19077_v22  ;;  %12578 = vmatmul.mubr.msk.bf16.vlgmr.msra.gmra.mxu1 %vm9709_vm0, %v19077_v22  ;;  %21440 = vst [vmem:[#allocation67_spill] sm:$0xff] %v19534_v60  ;;  %21441 = vst [vmem:[#allocation57_spill] sm:$0xff] %v19536_v31 }
 0x5b6   :  { %10235 = vmatpush1.bf16.msra.mxu0 %v19500_v14  ;;  %10286 = vmatpush1.bf16.msra.mxu1 %v19502_v11  ;;  %21442 = vst [vmem:[#allocation70_spill] sm:$0xff] %v19554_v9  ;;  %v19562_v11 = vcombine.high %v8936_v43, %v8952_v34  ;;  %v9033_v14 = vld [vmem:[%s20617_s7 + $0x360] sm:$0xff] }
 0x5b7   :  { %10236 = vmatprep.subr.bf16.mxu0 %v19506_v61  ;;  %10287 = vmatprep.subr.bf16.mxu1 %v19508_v12  ;;  %v19556_v12 = vcombine.low %v8968_v8, %v8984_v41  ;;  %v19560_v61 = vcombine.high %v8935_v18, %v8951_v17  ;;  %v19582_v8 = vcombine.low %v8935_v18, %v8951_v17  ;;  %v9017_v18 = vld [vmem:[%s20617_s7 + $0x2e0] sm:$0xff]  ;;  %v9002_v17 = vld [vmem:[%s20617_s7 + $0x268] sm:$0xff] }
 0x5b8   :  { %10166 = vmatprep.mubr.bf16.mxu0 %v21413_v54  ;;  %10217 = vmatprep.mubr.bf16.mxu1 %v21413_v54  ;;  %21445 = vst [vmem:[#allocation24_spill] sm:$0xff] %v19562_v11  ;;  %v19584_v41 = vcombine.low %v8936_v43, %v8952_v34  ;;  %v9018_v43 = vld [vmem:[%s20617_s7 + $0x2e8] sm:$0xff] }
 0x5b9   :  { %21443 = vst [vmem:[#allocation69_spill] sm:$0xff] %v19556_v12  ;;  %21444 = vst [vmem:[#allocation56_spill] sm:$0xff] %v19560_v61 }
 0x5ba   :  { %10237 = vmatpush1.bf16.msra.mxu0 %v19528_v7  ;;  %10288 = vmatpush1.bf16.msra.mxu1 %v19530_v27  ;;  %v9049_v27 = vld [vmem:[%s20617_s7 + $0x3e0] sm:$0xff]  ;;  %21446 = vst [vmem:[#allocation58_spill] sm:$0xff] %v19582_v8  ;;  %21447 = vst [vmem:[#allocation49_spill] sm:$0xff] %v19584_v41 }
 0x5bb   :  { %10238 = vmatprep.subr.bf16.mxu0 %v19534_v60  ;;  %10289 = vmatprep.subr.bf16.mxu1 %v19536_v31  ;;  %v19588_v31 = vcombine.high %v9033_v14, %v9049_v27  ;;  %v19590_v60 = vcombine.high %v9034_v6, %v9050_v21  ;;  %v9001_v7 = vld [vmem:[%s20617_s7 + $0x260] sm:$0xff]  ;;  %v19608_v34 = vcombine.low %v9033_v14, %v9049_v27  ;;  %v8970_v14 = vld [vmem:[%s20617_s7 + $0x168] sm:$0xff] }
 0x5bc   :  { %v8986_v27 = vld [vmem:[%s20617_s7 + $0x1e8] sm:$0xff] }
 0x5bd   :  { %12577 = vmatmul.mubr.msk.bf16.gmra.mxu0 %vm9709_vm0, %v19120_v2  ;;  %12579 = vmatmul.mubr.msk.bf16.gmra.mxu1 %vm9709_vm0, %v19120_v2  ;;  %21448 = vst [vmem:[#allocation71_spill] sm:$0xff] %v19588_v31  ;;  %21449 = vst [vmem:[#allocation60_spill] sm:$0xff] %v19590_v60 }
 0x5be   :  { %10239 = vmatpush1.bf16.msra.mxu0 %v19554_v9  ;;  %10290 = vmatpush1.bf16.msra.mxu1 %v19556_v12  ;;  %21450 = vst [vmem:[#allocation74_spill] sm:$0xff] %v19608_v34  ;;  %v19616_v12 = vcombine.high %v9002_v17, %v9018_v43  ;;  %v8969_v9 = vld [vmem:[%s20617_s7 + $0x160] sm:$0xff] }
 0x5bf   :  { %10240 = vmatprep.subr.bf16.mxu0 %v19560_v61  ;;  %10291 = vmatprep.subr.bf16.mxu1 %v19562_v11  ;;  %v19610_v11 = vcombine.low %v9034_v6, %v9050_v21  ;;  %v19614_v61 = vcombine.high %v9001_v7, %v9017_v18  ;;  %v19636_v6 = vcombine.low %v9001_v7, %v9017_v18  ;;  %v8953_v7 = vld [vmem:[%s20617_s7 + $0xe0] sm:$0xff]  ;;  %v8938_v18 = vld [vmem:[%s20617_s7 + $0x68] sm:$0xff] }
 0x5c0   :  { %10258 = vmatprep.mubr.bf16.mxu0 %v21413_v54  ;;  %10309 = vmatprep.mubr.bf16.mxu1 %v21413_v54  ;;  %21453 = vst [vmem:[#allocation31_spill] sm:$0xff] %v19616_v12  ;;  %v19638_v21 = vcombine.low %v9002_v17, %v9018_v43  ;;  %v8954_v17 = vld [vmem:[%s20617_s7 + $0xe8] sm:$0xff] }
 0x5c1   :  { %21451 = vst [vmem:[#allocation72_spill] sm:$0xff] %v19610_v11  ;;  %21452 = vst [vmem:[#allocation59_spill] sm:$0xff] %v19614_v61 }
 0x5c2   :  { %10241 = vmatpush1.bf16.msra.mxu0 %v19582_v8  ;;  %10292 = vmatpush1.bf16.msra.mxu1 %v19584_v41  ;;  %v8985_v41 = vld [vmem:[%s20617_s7 + $0x1e0] sm:$0xff]  ;;  %21454 = vst [vmem:[#allocation61_spill] sm:$0xff] %v19636_v6  ;;  %21455 = vst [vmem:[#allocation50_spill] sm:$0xff] %v19638_v21 }
 0x5c3   :  { %10336 = vmatprep.subr.bf16.mxu0 %v19588_v31  ;;  %10387 = vmatprep.subr.bf16.mxu1 %v19590_v60  ;;  %v19642_v60 = vcombine.high %v8969_v9, %v8985_v41  ;;  %v19644_v31 = vcombine.high %v8970_v14, %v8986_v27  ;;  %v8937_v8 = vld [vmem:[%s20617_s7 + $0x60] sm:$0xff]  ;;  %v19662_v43 = vcombine.low %v8969_v9, %v8985_v41  ;;  %v9036_v9 = vld [vmem:[%s20617_s7 + $0x378] sm:$0xff] }
 0x5c4   :  { %v9052_v41 = vld [vmem:[%s20617_s7 + $0x3f8] sm:$0xff] }
 0x5c5   :  { %12580 = vmatmul.mubr.msk.bf16.vlgmr.msra.gmra.mxu0 %vm9709_vm0, %v19077_v22  ;;  %12582 = vmatmul.mubr.msk.bf16.vlgmr.msra.gmra.mxu1 %vm9709_vm0, %v19077_v22  ;;  %21456 = vst [vmem:[#allocation64_spill] sm:$0xff] %v19642_v60  ;;  %21457 = vst [vmem:[#allocation77_spill] sm:$0xff] %v19644_v31 }
 0x5c6   :  { %10337 = vmatpush1.bf16.msra.mxu0 %v19608_v34  ;;  %10388 = vmatpush1.bf16.msra.mxu1 %v19610_v11  ;;  %21458 = vst [vmem:[#allocation63_spill] sm:$0xff] %v19662_v43  ;;  %v19670_v11 = vcombine.high %v8938_v18, %v8954_v17  ;;  %v9035_v34 = vld [vmem:[%s20617_s7 + $0x370] sm:$0xff] }
 0x5c7   :  { %10338 = vmatprep.subr.bf16.mxu0 %v19614_v61  ;;  %10389 = vmatprep.subr.bf16.mxu1 %v19616_v12  ;;  %v19664_v12 = vcombine.low %v8970_v14, %v8986_v27  ;;  %v19668_v61 = vcombine.high %v8937_v8, %v8953_v7  ;;  %v19690_v14 = vcombine.low %v8937_v8, %v8953_v7  ;;  %v9019_v8 = vld [vmem:[%s20617_s7 + $0x2f0] sm:$0xff]  ;;  %v9004_v7 = vld [vmem:[%s20617_s7 + $0x278] sm:$0xff] }
 0x5c8   :  { %10268 = vmatprep.mubr.bf16.mxu0 %v21413_v54  ;;  %10319 = vmatprep.mubr.bf16.mxu1 %v21413_v54  ;;  %21461 = vst [vmem:[#allocation62_spill] sm:$0xff] %v19670_v11  ;;  %v19692_v27 = vcombine.low %v8938_v18, %v8954_v17  ;;  %v9020_v18 = vld [vmem:[%s20617_s7 + $0x2f8] sm:$0xff] }
 0x5c9   :  { %21459 = vst [vmem:[#allocation75_spill] sm:$0xff] %v19664_v12  ;;  %21460 = vst [vmem:[#allocation73_spill] sm:$0xff] %v19668_v61 }
 0x5ca   :  { %10339 = vmatpush1.bf16.msra.mxu0 %v19636_v6  ;;  %10390 = vmatpush1.bf16.msra.mxu1 %v19638_v21  ;;  %v9051_v21 = vld [vmem:[%s20617_s7 + $0x3f0] sm:$0xff]  ;;  %21462 = vst [vmem:[#allocation52_spill] sm:$0xff] %v19690_v14  ;;  %21463 = vst [vmem:[#allocation79_spill] sm:$0xff] %v19692_v27 }
 0x5cb   :  { %10340 = vmatprep.subr.bf16.mxu0 %v19642_v60  ;;  %10391 = vmatprep.subr.bf16.mxu1 %v19644_v31  ;;  %v19696_v31 = vcombine.high %v9035_v34, %v9051_v21  ;;  %v19698_v60 = vcombine.high %v9036_v9, %v9052_v41  ;;  %v9003_v6 = vld [vmem:[%s20617_s7 + $0x270] sm:$0xff]  ;;  %v19716_v17 = vcombine.low %v9035_v34, %v9051_v21  ;;  %v8972_v34 = vld [vmem:[%s20617_s7 + $0x178] sm:$0xff] }
 0x5cc   :  { %v8988_v21 = vld [vmem:[%s20617_s7 + $0x1f8] sm:$0xff] }
 0x5cd   :  { %12581 = vmatmul.mubr.msk.bf16.gmra.mxu0 %vm9709_vm0, %v19120_v2  ;;  %12583 = vmatmul.mubr.msk.bf16.gmra.mxu1 %vm9709_vm0, %v19120_v2  ;;  %21464 = vst [vmem:[#allocation34_spill] sm:$0xff] %v19696_v31  ;;  %21465 = vst [vmem:[#allocation37_spill] sm:$0xff] %v19698_v60 }
 0x5ce   :  { %10341 = vmatpush1.bf16.msra.mxu0 %v19662_v43  ;;  %10392 = vmatpush1.bf16.msra.mxu1 %v19664_v12  ;;  %v19724_v12 = vcombine.high %v9004_v7, %v9020_v18  ;;  %v8971_v43 = vld [vmem:[%s20617_s7 + $0x170] sm:$0xff] }
 0x5cf   :  { %10342 = vmatprep.subr.bf16.mxu0 %v19668_v61  ;;  %10393 = vmatprep.subr.bf16.mxu1 %v19670_v11  ;;  %v19718_v11 = vcombine.low %v9036_v9, %v9052_v41  ;;  %v19722_v61 = vcombine.high %v9003_v6, %v9019_v8  ;;  %v19744_v9 = vcombine.low %v9003_v6, %v9019_v8  ;;  %v8955_v6 = vld [vmem:[%s20617_s7 + $0xf0] sm:$0xff]  ;;  %v8940_v8 = vld [vmem:[%s20617_s7 + $0x78] sm:$0xff] }
 0x5d0   :  { %10360 = vmatprep.mubr.bf16.mxu0 %v21413_v54  ;;  %10411 = vmatprep.mubr.bf16.mxu1 %v21413_v54  ;;  %21468 = vst [vmem:[#allocation53_spill] sm:$0xff] %v19724_v12  ;;  %v19746_v41 = vcombine.low %v9004_v7, %v9020_v18  ;;  %v8956_v7 = vld [vmem:[%s20617_s7 + $0xf8] sm:$0xff] }
 0x5d1   :  { %21466 = vst [vmem:[#allocation27_spill] sm:$0xff] %v19718_v11  ;;  %21467 = vst [vmem:[#allocation8_spill] sm:$0xff] %v19722_v61 }
 0x5d2   :  { %10343 = vmatpush1.bf16.msra.mxu0 %v19690_v14  ;;  %10394 = vmatpush1.bf16.msra.mxu1 %v19692_v27  ;;  %v8987_v27 = vld [vmem:[%s20617_s7 + $0x1f0] sm:$0xff] }
 0x5d3   :  { %10438 = vmatprep.subr.bf16.mxu0 %v19696_v31  ;;  %10489 = vmatprep.subr.bf16.mxu1 %v19698_v60  ;;  %v19750_v60 = vcombine.high %v8971_v43, %v8987_v27  ;;  %v19752_v31 = vcombine.high %v8972_v34, %v8988_v21  ;;  %v8939_v14 = vld [vmem:[%s20617_s7 + $0x70] sm:$0xff]  ;;  %v19770_v18 = vcombine.low %v8971_v43, %v8987_v27 }
 0x5d4   :  { %v19786_v43 = vcombine.low %v8939_v14, %v8955_v6  ;;  %v19788_v27 = vcombine.low %v8940_v8, %v8956_v7 }
 0x5d5   :  { %12584 = vmatmul.mubr.msk.bf16.vlgmr.msra.gmra.mxu0 %vm9709_vm0, %v19077_v22  ;;  %12586 = vmatmul.mubr.msk.bf16.vlgmr.msra.gmra.mxu1 %vm9709_vm0, %v19077_v22 }
 0x5d6   :  { %10439 = vmatpush1.bf16.msra.mxu0 %v19716_v17  ;;  %10490 = vmatpush1.bf16.msra.mxu1 %v19718_v11  ;;  %v19778_v11 = vcombine.high %v8940_v8, %v8956_v7  ;;  %21469 = vst [vmem:[#allocation11_spill] sm:$0xff] %v19786_v43  ;;  %21470 = vst [vmem:[#allocation12_spill] sm:$0xff] %v19788_v27  ;;  %v21475_v8 = vld [vmem:[#allocation3_spill] sm:$0xff]  ;;  %v21476_v7 = vld [vmem:[#allocation36_spill] sm:$0xff] }
 0x5d7   :  { %10440 = vmatprep.subr.bf16.mxu0 %v19722_v61  ;;  %10491 = vmatprep.subr.bf16.mxu1 %v19724_v12  ;;  %v19772_v12 = vcombine.low %v8972_v34, %v8988_v21  ;;  %v19776_v61 = vcombine.high %v8939_v14, %v8955_v6  ;;  %v21471_v34 = vld [vmem:[#allocation33_spill] sm:$0xff]  ;;  %v21473_v14 = vld [vmem:[#allocation39_spill] sm:$0xff] }
 0x5d8   :  { %10370 = vmatprep.mubr.bf16.mxu0 %v21413_v54  ;;  %10421 = vmatprep.mubr.bf16.mxu1 %v21413_v54  ;;  %v21472_v21 = vld [vmem:[#allocation5_spill] sm:$0xff] }
 0x5d9   :  { %v21474_v6 = vld [vmem:[#allocation17_spill] sm:$0xff] }
 0x5da   :  { %10441 = vmatpush1.bf16.msra.mxu0 %v19744_v9  ;;  %10492 = vmatpush1.bf16.msra.mxu1 %v19746_v41 }
 0x5db   :  { %10442 = vmatprep.subr.bf16.mxu0 %v19750_v60  ;;  %10493 = vmatprep.subr.bf16.mxu1 %v19752_v31 }
 0x5dd   :  { %12585 = vmatmul.mubr.msk.bf16.gmra.mxu0 %vm9709_vm0, %v19120_v2  ;;  %12587 = vmatmul.mubr.msk.bf16.gmra.mxu1 %vm9709_vm0, %v19120_v2 }
 0x5de   :  { %10443 = vmatpush1.bf16.msra.mxu0 %v19770_v18  ;;  %10494 = vmatpush1.bf16.msra.mxu1 %v19772_v12 }
 0x5df   :  { %10444 = vmatprep.subr.bf16.mxu0 %v19776_v61  ;;  %10495 = vmatprep.subr.bf16.mxu1 %v19778_v11 }
 0x5e0   :  { %10462 = vmatprep.mubr.bf16.mxu0 %v21413_v54  ;;  %10513 = vmatprep.mubr.bf16.mxu1 %v21413_v54 }
 0x5e2   :  { %10445 = vmatpush1.bf16.msra.mxu0 %v19786_v43  ;;  %10496 = vmatpush1.bf16.msra.mxu1 %v19788_v27  ;;  %v21479_v27 = vld [vmem:[#allocation13_spill] sm:$0xff] }
 0x5e3   :  { %10658 = vmatprep.subr.bf16.mxu0 %v21471_v34  ;;  %10709 = vmatprep.subr.bf16.mxu1 %v21472_v21  ;;  %v21477_v34 = vld [vmem:[#allocation4_spill] sm:$0xff]  ;;  %v21478_v21 = vld [vmem:[#allocation6_spill] sm:$0xff]  ;;  %v21480_v43 = vld [vmem:[#allocation29_spill] sm:$0xff] }
 0x5e5   :  { %12588 = vmatmul.mubr.msk.bf16.vlgmr.msra.gmra.mxu0 %vm9709_vm0, %v19077_v22  ;;  %12590 = vmatmul.mubr.msk.bf16.vlgmr.msra.gmra.mxu1 %vm9709_vm0, %v19077_v22  ;;  %v21481_v22 = vld [vmem:[#allocation16_spill] sm:$0xff] }
 0x5e6   :  { %10659 = vmatpush1.bf16.msra.mxu0 %v21473_v14  ;;  %10710 = vmatpush1.bf16.msra.mxu1 %v21474_v6  ;;  %v21482_v14 = vld [vmem:[#allocation9_spill] sm:$0xff]  ;;  %v21483_v6 = vld [vmem:[#allocation15_spill] sm:$0xff] }
 0x5e7   :  { %10660 = vmatprep.subr.bf16.mxu0 %v21475_v8  ;;  %10711 = vmatprep.subr.bf16.mxu1 %v21476_v7  ;;  %v21484_v8 = vld [vmem:[#allocation18_spill] sm:$0xff]  ;;  %v19824_v7 = vpop.trf.xlu1 }
 0x5e8   :  { %10472 = vmatprep.mubr.bf16.mxu0 %v21413_v54  ;;  %10523 = vmatprep.mubr.bf16.mxu1 %v21413_v54 }
 0x5ea   :  { %10661 = vmatpush1.bf16.msra.mxu0 %v21477_v34  ;;  %10712 = vmatpush1.bf16.msra.mxu1 %v21478_v21  ;;  %v21487_v34 = vld [vmem:[#allocation14_spill] sm:$0xff] }
 0x5eb   :  { %10662 = vmatprep.subr.bf16.mxu0 %v21479_v27  ;;  %10713 = vmatprep.subr.bf16.mxu1 %v21480_v43  ;;  %v21485_v27 = vld [vmem:[#allocation40_spill] sm:$0xff]  ;;  %v21486_v43 = vld [vmem:[#allocation42_spill] sm:$0xff]  ;;  %v19840_v21 = vpop.trf.xlu1 }
 0x5ed   :  { %12589 = vmatmul.mubr.msk.bf16.gmra.mxu0 %vm9709_vm0, %v19120_v2  ;;  %12591 = vmatmul.mubr.msk.bf16.gmra.mxu1 %vm9709_vm0, %v19120_v2  ;;  %v21488_v2 = vld [vmem:[#allocation65_spill] sm:$0xff] }
 0x5ee   :  { %10663 = vmatpush1.bf16.msra.mxu0 %v21481_v22  ;;  %10714 = vmatpush1.bf16.msra.mxu1 %v21482_v14 }
 0x5ef   :  { %10664 = vmatprep.subr.bf16.mxu0 %v21483_v6  ;;  %10715 = vmatprep.subr.bf16.mxu1 %v21484_v8  ;;  %v21521_v6 = vld [vmem:[#allocation58_spill] sm:$0xff]  ;;  %v21522_v8 = vld [vmem:[#allocation49_spill] sm:$0xff] }
 0x5f0   :  { %10682 = vmatprep.mubr.bf16.mxu0 %v21413_v54  ;;  %10733 = vmatprep.mubr.bf16.mxu1 %v21413_v54 }
 0x5f2   :  { %10665 = vmatpush1.bf16.msra.mxu0 %v21485_v27  ;;  %10716 = vmatpush1.bf16.msra.mxu1 %v21486_v43 }
 0x5f3   :  { %10760 = vmatprep.subr.bf16.mxu0 %v21487_v34  ;;  %10811 = vmatprep.subr.bf16.mxu1 %v21488_v2  ;;  %v21523_v34 = vld [vmem:[#allocation71_spill] sm:$0xff]  ;;  %v21524_v2 = vld [vmem:[#allocation60_spill] sm:$0xff] }
 0x5f5   :  { %12592 = vmatmul.mubr.msk.bf16.vlgmr.msra.gmra.mxu0 %vm9709_vm0, %v19824_v7  ;;  %12594 = vmatmul.mubr.msk.bf16.vlgmr.msra.gmra.mxu1 %vm9709_vm0, %v19824_v7 }
 0x5f6   :  { %10761 = vmatpush1.bf16.msra.mxu0 %v21411_v3  ;;  %10812 = vmatpush1.bf16.msra.mxu1 %v21412_v36  ;;  %v21491_v3 = vld [vmem:[#allocation26_spill] sm:$0xff]  ;;  %v21492_v36 = vld [vmem:[#allocation43_spill] sm:$0xff] }
 0x5f7   :  { %10762 = vmatprep.subr.bf16.mxu0 %v19070_v63  ;;  %10813 = vmatprep.subr.bf16.mxu1 %v19072_v25  ;;  %v21489_v63 = vld [vmem:[#allocation21_spill] sm:$0xff]  ;;  %v21490_v25 = vld [vmem:[#allocation76_spill] sm:$0xff] }
 0x5f8   :  { %10692 = vmatprep.mubr.bf16.mxu0 %v21413_v54  ;;  %10743 = vmatprep.mubr.bf16.mxu1 %v21413_v54 }
 0x5fa   :  { %10763 = vmatpush1.bf16.msra.mxu0 %v19094_v38  ;;  %10814 = vmatpush1.bf16.msra.mxu1 %v19096_v42  ;;  %v21493_v38 = vld [vmem:[#allocation25_spill] sm:$0xff]  ;;  %v21494_v42 = vld [vmem:[#allocation44_spill] sm:$0xff] }
 0x5fb   :  { %10764 = vmatprep.subr.bf16.mxu0 %v19100_v55  ;;  %10815 = vmatprep.subr.bf16.mxu1 %v19102_v20  ;;  %v21495_v55 = vld [vmem:[#allocation10_spill] sm:$0xff] }
 0x5fc   :  { %v21496_v20 = vld [vmem:[#allocation2_spill] sm:$0xff] }
 0x5fd   :  { %12593 = vmatmul.mubr.msk.bf16.gmra.mxu0 %vm9709_vm0, %v19840_v21  ;;  %12595 = vmatmul.mubr.msk.bf16.gmra.mxu1 %vm9709_vm0, %v19840_v21 }
 0x5fe   :  { %10765 = vmatpush1.bf16.msra.mxu0 %v19122_v52  ;;  %10816 = vmatpush1.bf16.msra.mxu1 %v19124_v59  ;;  %v21497_v52 = vld [vmem:[#allocation22_spill] sm:$0xff] }
 0x5ff   :  { %10766 = vmatprep.subr.bf16.mxu0 %v19128_v47  ;;  %10817 = vmatprep.subr.bf16.mxu1 %v19130_v40  ;;  %v21498_v59 = vld [vmem:[#allocation78_spill] sm:$0xff]  ;;  %v21499_v47 = vld [vmem:[#allocation32_spill] sm:$0xff]  ;;  %v21500_v40 = vld [vmem:[#allocation45_spill] sm:$0xff] }
 0x600   :  { %10784 = vmatprep.mubr.bf16.mxu0 %v21413_v54  ;;  %10835 = vmatprep.mubr.bf16.mxu1 %v21413_v54 }
 0x602   :  { %10767 = vmatpush1.bf16.msra.mxu0 %v19150_v51  ;;  %10818 = vmatpush1.bf16.msra.mxu1 %v19152_v0  ;;  %v21501_v51 = vld [vmem:[#allocation23_spill] sm:$0xff]  ;;  %v21502_v0 = vld [vmem:[#allocation46_spill] sm:$0xff] }
 0x603   :  { %10862 = vmatprep.subr.bf16.mxu0 %v19156_v44  ;;  %10913 = vmatprep.subr.bf16.mxu1 %v19158_v33  ;;  %v21503_v44 = vld [vmem:[#allocation7_spill] sm:$0xff] }
 0x604   :  { %v21504_v33 = vld [vmem:[#allocation19_spill] sm:$0xff] }
 0x605   :  { %12596 = vmatmul.mubr.msk.bf16.vlgmr.msra.gmra.mxu0 %vm9709_vm0, %v19824_v7  ;;  %12598 = vmatmul.mubr.msk.bf16.vlgmr.msra.gmra.mxu1 %vm9709_vm0, %v19824_v7 }
 0x606   :  { %10863 = vmatpush1.bf16.msra.mxu0 %v19176_v57  ;;  %10914 = vmatpush1.bf16.msra.mxu1 %v19178_v62  ;;  %v21505_v57 = vld [vmem:[#allocation30_spill] sm:$0xff]  ;;  %v21506_v62 = vld [vmem:[#allocation47_spill] sm:$0xff] }
 0x607   :  { %10864 = vmatprep.subr.bf16.mxu0 %v19182_v39  ;;  %10915 = vmatprep.subr.bf16.mxu1 %v19184_v58  ;;  %v21507_v39 = vld [vmem:[#allocation35_spill] sm:$0xff]  ;;  %v21508_v58 = vld [vmem:[#allocation66_spill] sm:$0xff] }
 0x608   :  { %10794 = vmatprep.mubr.bf16.mxu0 %v21413_v54  ;;  %10845 = vmatprep.mubr.bf16.mxu1 %v21413_v54 }
 0x60a   :  { %10865 = vmatpush1.bf16.msra.mxu0 %v19204_v15  ;;  %10916 = vmatpush1.bf16.msra.mxu1 %v19206_v30 }
 0x60b   :  { %10866 = vmatprep.subr.bf16.mxu0 %v19210_v13  ;;  %10917 = vmatprep.subr.bf16.mxu1 %v19212_v53  ;;  %v21509_v13 = vld [vmem:[#allocation55_spill] sm:$0xff] }
 0x60c   :  { %v21510_v53 = vld [vmem:[#allocation51_spill] sm:$0xff] }
 0x60d   :  { %12597 = vmatmul.mubr.msk.bf16.gmra.mxu0 %vm9709_vm0, %v19840_v21  ;;  %12599 = vmatmul.mubr.msk.bf16.gmra.mxu1 %vm9709_vm0, %v19840_v21 }
 0x60e   :  { %10867 = vmatpush1.bf16.msra.mxu0 %v19230_v19  ;;  %10918 = vmatpush1.bf16.msra.mxu1 %v19232_v48 }
 0x60f   :  { %10868 = vmatprep.subr.bf16.mxu0 %v19236_v26  ;;  %10919 = vmatprep.subr.bf16.mxu1 %v19238_v1  ;;  %v21511_v26 = vld [vmem:[#allocation38_spill] sm:$0xff]  ;;  %v21512_v1 = vld [vmem:[#allocation20_spill] sm:$0xff] }
 0x610   :  { %10886 = vmatprep.mubr.bf16.mxu0 %v21413_v54  ;;  %10937 = vmatprep.mubr.bf16.mxu1 %v21413_v54 }
 0x612   :  { %10869 = vmatpush1.bf16.msra.mxu0 %v19258_v16  ;;  %10920 = vmatpush1.bf16.msra.mxu1 %v19260_v37 }
 0x613   :  { %10964 = vmatprep.subr.bf16.mxu0 %v19264_v29  ;;  %11015 = vmatprep.subr.bf16.mxu1 %v19266_v5  ;;  %v21513_v29 = vld [vmem:[#allocation68_spill] sm:$0xff] }
 0x614   :  { %v21514_v5 = vld [vmem:[#allocation48_spill] sm:$0xff] }
 0x615   :  { %12600 = vmatmul.mubr.msk.bf16.vlgmr.msra.gmra.mxu0 %vm9709_vm0, %v19824_v7  ;;  %12602 = vmatmul.mubr.msk.bf16.vlgmr.msra.gmra.mxu1 %vm9709_vm0, %v19824_v7 }
 0x616   :  { %10965 = vmatpush1.bf16.msra.mxu0 %v19284_v45  ;;  %11016 = vmatpush1.bf16.msra.mxu1 %v19286_v4 }
 0x617   :  { %10966 = vmatprep.subr.bf16.mxu0 %v19290_v24  ;;  %11017 = vmatprep.subr.bf16.mxu1 %v19292_v46  ;;  %v21515_v24 = vld [vmem:[#allocation67_spill] sm:$0xff]  ;;  %v21516_v46 = vld [vmem:[#allocation57_spill] sm:$0xff] }
 0x618   :  { %10896 = vmatprep.mubr.bf16.mxu0 %v21413_v54  ;;  %10947 = vmatprep.mubr.bf16.mxu1 %v21413_v54 }
 0x61a   :  { %10967 = vmatpush1.bf16.msra.mxu0 %v19312_v23  ;;  %11018 = vmatpush1.bf16.msra.mxu1 %v19314_v56 }
 0x61b   :  { %10968 = vmatprep.subr.bf16.mxu0 %v19318_v49  ;;  %11019 = vmatprep.subr.bf16.mxu1 %v19320_v10  ;;  %v21517_v49 = vld [vmem:[#allocation70_spill] sm:$0xff]  ;;  %v21518_v10 = vld [vmem:[#allocation69_spill] sm:$0xff] }
 0x61d   :  { %12601 = vmatmul.mubr.msk.bf16.gmra.mxu0 %vm9709_vm0, %v19840_v21  ;;  %12603 = vmatmul.mubr.msk.bf16.gmra.mxu1 %vm9709_vm0, %v19840_v21 }
 0x61e   :  { %10969 = vmatpush1.bf16.msra.mxu0 %v19338_v35  ;;  %11020 = vmatpush1.bf16.msra.mxu1 %v19340_v50 }
 0x61f   :  { %10970 = vmatprep.subr.bf16.mxu0 %v19344_v32  ;;  %11021 = vmatprep.subr.bf16.mxu1 %v19346_v28  ;;  %v21519_v32 = vld [vmem:[#allocation56_spill] sm:$0xff] }
 0x620   :  { %10988 = vmatprep.mubr.bf16.mxu0 %v21413_v54  ;;  %11039 = vmatprep.mubr.bf16.mxu1 %v21413_v54  ;;  %v21520_v28 = vld [vmem:[#allocation24_spill] sm:$0xff] }
 0x622   :  { %10971 = vmatpush1.bf16.msra.mxu0 %v21489_v63  ;;  %11022 = vmatpush1.bf16.msra.mxu1 %v21490_v25 }
 0x623   :  { %11066 = vmatprep.subr.bf16.mxu0 %v21491_v3  ;;  %11117 = vmatprep.subr.bf16.mxu1 %v21492_v36  ;;  %v21525_v3 = vld [vmem:[#allocation74_spill] sm:$0xff]  ;;  %v21526_v36 = vld [vmem:[#allocation72_spill] sm:$0xff] }
 0x625   :  { %12604 = vmatmul.mubr.msk.bf16.vlgmr.msra.gmra.mxu0 %vm9709_vm0, %v19824_v7  ;;  %12606 = vmatmul.mubr.msk.bf16.vlgmr.msra.gmra.mxu1 %vm9709_vm0, %v19824_v7 }
 0x626   :  { %11067 = vmatpush1.bf16.msra.mxu0 %v21493_v38  ;;  %11118 = vmatpush1.bf16.msra.mxu1 %v21494_v42 }
 0x627   :  { %11068 = vmatprep.subr.bf16.mxu0 %v21495_v55  ;;  %11119 = vmatprep.subr.bf16.mxu1 %v21496_v20  ;;  %v21527_v55 = vld [vmem:[#allocation59_spill] sm:$0xff] }
 0x628   :  { %10998 = vmatprep.mubr.bf16.mxu0 %v21413_v54  ;;  %11049 = vmatprep.mubr.bf16.mxu1 %v21413_v54  ;;  %v21528_v20 = vld [vmem:[#allocation31_spill] sm:$0xff] }
 0x62a   :  { %11069 = vmatpush1.bf16.msra.mxu0 %v21497_v52  ;;  %11120 = vmatpush1.bf16.msra.mxu1 %v21498_v59 }
 0x62b   :  { %11070 = vmatprep.subr.bf16.mxu0 %v21499_v47  ;;  %11121 = vmatprep.subr.bf16.mxu1 %v21500_v40  ;;  %v21529_v47 = vld [vmem:[#allocation61_spill] sm:$0xff]  ;;  %v21530_v40 = vld [vmem:[#allocation50_spill] sm:$0xff] }
 0x62d   :  { %12605 = vmatmul.mubr.msk.bf16.gmra.mxu0 %vm9709_vm0, %v19840_v21  ;;  %12607 = vmatmul.mubr.msk.bf16.gmra.mxu1 %vm9709_vm0, %v19840_v21 }
 0x62e   :  { %11071 = vmatpush1.bf16.msra.mxu0 %v21501_v51  ;;  %11122 = vmatpush1.bf16.msra.mxu1 %v21502_v0 }
 0x62f   :  { %11072 = vmatprep.subr.bf16.mxu0 %v21503_v44  ;;  %11123 = vmatprep.subr.bf16.mxu1 %v21504_v33  ;;  %v21531_v44 = vld [vmem:[#allocation64_spill] sm:$0xff]  ;;  %v21532_v33 = vld [vmem:[#allocation77_spill] sm:$0xff] }
 0x630   :  { %11090 = vmatprep.mubr.bf16.mxu0 %v21413_v54  ;;  %11141 = vmatprep.mubr.bf16.mxu1 %v21413_v54 }
 0x632   :  { %11073 = vmatpush1.bf16.msra.mxu0 %v21505_v57  ;;  %11124 = vmatpush1.bf16.msra.mxu1 %v21506_v62 }
 0x633   :  { %11168 = vmatprep.subr.bf16.mxu0 %v21507_v39  ;;  %11219 = vmatprep.subr.bf16.mxu1 %v21508_v58  ;;  %v21533_v39 = vld [vmem:[#allocation63_spill] sm:$0xff] }
 0x634   :  { %v21534_v58 = vld [vmem:[#allocation75_spill] sm:$0xff] }
 0x635   :  { %v9750_v15 = vpop.f32.mrf.mxu0  ;;  %v9801_v30 = vpop.f32.mrf.mxu1  ;;  %12608 = vmatmul.mubr.msk.bf16.vlgmr.msra.gmra.mxu0 %vm9709_vm0, %v19824_v7  ;;  %12610 = vmatmul.mubr.msk.bf16.vlgmr.msra.gmra.mxu1 %vm9709_vm0, %v19824_v7 }
 0x636   :  { %10532 = vst [vmem:[%s20618_s8] sm:$0xff] %v9750_v15  ;;  %10534 = vst [vmem:[%s20618_s8 + $0x10] sm:$0xff] %v9801_v30  ;;  %11169 = vmatpush1.bf16.msra.mxu0 %v21509_v13  ;;  %11220 = vmatpush1.bf16.msra.mxu1 %v21510_v53  ;;  %v21535_v13 = vld [vmem:[#allocation73_spill] sm:$0xff]  ;;  %v21536_v53 = vld [vmem:[#allocation62_spill] sm:$0xff] }
 0x637   :  { %v9752_v19 = vpop.f32.mrf.mxu0  ;;  %v9803_v48 = vpop.f32.mrf.mxu1  ;;  %11170 = vmatprep.subr.bf16.mxu0 %v21511_v26  ;;  %11221 = vmatprep.subr.bf16.mxu1 %v21512_v1  ;;  %v21537_v26 = vld [vmem:[#allocation52_spill] sm:$0xff]  ;;  %v21538_v1 = vld [vmem:[#allocation79_spill] sm:$0xff] }
 0x638   :  { %10533 = vst [vmem:[%s20618_s8 + $0x8] sm:$0xff] %v9752_v19  ;;  %10535 = vst [vmem:[%s20618_s8 + $0x18] sm:$0xff] %v9803_v48  ;;  %11100 = vmatprep.mubr.bf16.mxu0 %v21413_v54  ;;  %11151 = vmatprep.mubr.bf16.mxu1 %v21413_v54 }
 0x639   :  { %v9754_v16 = vpop.f32.mrf.mxu0  ;;  %v9805_v37 = vpop.f32.mrf.mxu1 }
 0x63a   :  { %10564 = vst [vmem:[%s20618_s8 + $0x100] sm:$0xff] %v9754_v16  ;;  %10566 = vst [vmem:[%s20618_s8 + $0x110] sm:$0xff] %v9805_v37  ;;  %11171 = vmatpush1.bf16.msra.mxu0 %v21513_v29  ;;  %11222 = vmatpush1.bf16.msra.mxu1 %v21514_v5  ;;  %v21539_v29 = vld [vmem:[#allocation34_spill] sm:$0xff]  ;;  %v21540_v5 = vld [vmem:[#allocation37_spill] sm:$0xff] }
 0x63b   :  { %v9756_v45 = vpop.f32.mrf.mxu0  ;;  %v9807_v4 = vpop.f32.mrf.mxu1  ;;  %11172 = vmatprep.subr.bf16.mxu0 %v21515_v24  ;;  %11223 = vmatprep.subr.bf16.mxu1 %v21516_v46  ;;  %v21541_v24 = vld [vmem:[#allocation27_spill] sm:$0xff] }
 0x63c   :  { %10565 = vst [vmem:[%s20618_s8 + $0x108] sm:$0xff] %v9756_v45  ;;  %10567 = vst [vmem:[%s20618_s8 + $0x118] sm:$0xff] %v9807_v4 }
 0x63d   :  { %v9760_v23 = vpop.f32.mrf.mxu0  ;;  %v9811_v56 = vpop.f32.mrf.mxu1  ;;  %12609 = vmatmul.mubr.msk.bf16.gmra.mxu0 %vm9709_vm0, %v19840_v21  ;;  %12611 = vmatmul.mubr.msk.bf16.gmra.mxu1 %vm9709_vm0, %v19840_v21 }
 0x63e   :  { %10596 = vst [vmem:[%s20618_s8 + $0x200] sm:$0xff] %v9760_v23  ;;  %10598 = vst [vmem:[%s20618_s8 + $0x210] sm:$0xff] %v9811_v56  ;;  %11173 = vmatpush1.bf16.msra.mxu0 %v21517_v49  ;;  %11224 = vmatpush1.bf16.msra.mxu1 %v21518_v10  ;;  %v21542_v56 = vld [vmem:[#allocation8_spill] sm:$0xff]  ;;  %v21543_v49 = vld [vmem:[#allocation53_spill] sm:$0xff] }
 0x63f   :  { %v9762_v35 = vpop.f32.mrf.mxu0  ;;  %v9813_v50 = vpop.f32.mrf.mxu1  ;;  %11174 = vmatprep.subr.bf16.mxu0 %v21519_v32  ;;  %11225 = vmatprep.subr.bf16.mxu1 %v21520_v28 }
 0x640   :  { %10597 = vst [vmem:[%s20618_s8 + $0x208] sm:$0xff] %v9762_v35  ;;  %10599 = vst [vmem:[%s20618_s8 + $0x218] sm:$0xff] %v9813_v50  ;;  %11192 = vmatprep.mubr.bf16.mxu0 %v21413_v54  ;;  %11243 = vmatprep.mubr.bf16.mxu1 %v21413_v54 }
 0x641   :  { %v9764_v22 = vpop.f32.mrf.mxu0  ;;  %v9815_v14 = vpop.f32.mrf.mxu1 }
 0x642   :  { %11175 = vmatpush1.bf16.msra.mxu0 %v21521_v6  ;;  %11226 = vmatpush1.bf16.msra.mxu1 %v21522_v8 }
 0x643   :  { %v9765_v27 = vpop.f32.mrf.mxu0  ;;  %v9816_v43 = vpop.f32.mrf.mxu1  ;;  %11270 = vmatprep.subr.bf16.mxu0 %v21523_v34  ;;  %11321 = vmatprep.subr.bf16.mxu1 %v21524_v2 }
 0x645   :  { %v9852_v63 = vpop.f32.mrf.mxu0  ;;  %v9903_v25 = vpop.f32.mrf.mxu1  ;;  %12612 = vmatmul.mubr.msk.bf16.vlgmr.msra.gmra.mxu0 %vm9709_vm0, %v19824_v7  ;;  %12614 = vmatmul.mubr.msk.bf16.vlgmr.msra.gmra.mxu1 %vm9709_vm0, %v19824_v7 }
 0x646   :  { %10536 = vst [vmem:[%s20618_s8 + $0x20] sm:$0xff] %v9852_v63  ;;  %10538 = vst [vmem:[%s20618_s8 + $0x30] sm:$0xff] %v9903_v25  ;;  %11271 = vmatpush1.bf16.msra.mxu0 %v21525_v3  ;;  %11322 = vmatpush1.bf16.msra.mxu1 %v21526_v36 }
 0x647   :  { %v9854_v38 = vpop.f32.mrf.mxu0  ;;  %v9905_v42 = vpop.f32.mrf.mxu1  ;;  %11272 = vmatprep.subr.bf16.mxu0 %v21527_v55  ;;  %11323 = vmatprep.subr.bf16.mxu1 %v21528_v20 }
 0x648   :  { %10537 = vst [vmem:[%s20618_s8 + $0x28] sm:$0xff] %v9854_v38  ;;  %10539 = vst [vmem:[%s20618_s8 + $0x38] sm:$0xff] %v9905_v42  ;;  %11202 = vmatprep.mubr.bf16.mxu0 %v21413_v54  ;;  %11253 = vmatprep.mubr.bf16.mxu1 %v21413_v54 }
 0x649   :  { %v9856_v52 = vpop.f32.mrf.mxu0  ;;  %v9907_v59 = vpop.f32.mrf.mxu1 }
 0x64a   :  { %10568 = vst [vmem:[%s20618_s8 + $0x120] sm:$0xff] %v9856_v52  ;;  %10570 = vst [vmem:[%s20618_s8 + $0x130] sm:$0xff] %v9907_v59  ;;  %11273 = vmatpush1.bf16.msra.mxu0 %v21529_v47  ;;  %11324 = vmatpush1.bf16.msra.mxu1 %v21530_v40 }
 0x64b   :  { %v9858_v51 = vpop.f32.mrf.mxu0  ;;  %v9909_v0 = vpop.f32.mrf.mxu1  ;;  %11274 = vmatprep.subr.bf16.mxu0 %v21531_v44  ;;  %11325 = vmatprep.subr.bf16.mxu1 %v21532_v33 }
 0x64c   :  { %10569 = vst [vmem:[%s20618_s8 + $0x128] sm:$0xff] %v9858_v51  ;;  %10571 = vst [vmem:[%s20618_s8 + $0x138] sm:$0xff] %v9909_v0 }
 0x64d   :  { %v9862_v57 = vpop.f32.mrf.mxu0  ;;  %v9913_v62 = vpop.f32.mrf.mxu1  ;;  %12613 = vmatmul.mubr.msk.bf16.gmra.mxu0 %vm9709_vm0, %v19840_v21  ;;  %12615 = vmatmul.mubr.msk.bf16.gmra.mxu1 %vm9709_vm0, %v19840_v21 }
 0x64e   :  { %10600 = vst [vmem:[%s20618_s8 + $0x220] sm:$0xff] %v9862_v57  ;;  %10602 = vst [vmem:[%s20618_s8 + $0x230] sm:$0xff] %v9913_v62  ;;  %11275 = vmatpush1.bf16.msra.mxu0 %v21533_v39  ;;  %11326 = vmatpush1.bf16.msra.mxu1 %v21534_v58 }
 0x64f   :  { %v9864_v15 = vpop.f32.mrf.mxu0  ;;  %v9915_v30 = vpop.f32.mrf.mxu1  ;;  %11276 = vmatprep.subr.bf16.mxu0 %v21535_v13  ;;  %11327 = vmatprep.subr.bf16.mxu1 %v21536_v53 }
 0x650   :  { %10601 = vst [vmem:[%s20618_s8 + $0x228] sm:$0xff] %v9864_v15  ;;  %10603 = vst [vmem:[%s20618_s8 + $0x238] sm:$0xff] %v9915_v30  ;;  %11294 = vmatprep.mubr.bf16.mxu0 %v21413_v54  ;;  %11345 = vmatprep.mubr.bf16.mxu1 %v21413_v54 }
 0x651   :  { %v9866_v19 = vpop.f32.mrf.mxu0  ;;  %v9917_v48 = vpop.f32.mrf.mxu1 }
 0x652   :  { %11277 = vmatpush1.bf16.msra.mxu0 %v21537_v26  ;;  %11328 = vmatpush1.bf16.msra.mxu1 %v21538_v1 }
 0x653   :  { %v9867_v16 = vpop.f32.mrf.mxu0  ;;  %v9918_v37 = vpop.f32.mrf.mxu1  ;;  %11372 = vmatprep.subr.bf16.mxu0 %v21539_v29  ;;  %11423 = vmatprep.subr.bf16.mxu1 %v21540_v5 }
 0x655   :  { %v9954_v45 = vpop.f32.mrf.mxu0  ;;  %v10005_v4 = vpop.f32.mrf.mxu1  ;;  %12616 = vmatmul.mubr.msk.bf16.vlgmr.msra.gmra.mxu0 %vm9709_vm0, %v19824_v7  ;;  %12618 = vmatmul.mubr.msk.bf16.vlgmr.msra.gmra.mxu1 %vm9709_vm0, %v19824_v7 }
 0x656   :  { %10540 = vst [vmem:[%s20618_s8 + $0x40] sm:$0xff] %v9954_v45  ;;  %10542 = vst [vmem:[%s20618_s8 + $0x50] sm:$0xff] %v10005_v4  ;;  %11373 = vmatpush1.bf16.msra.mxu0 %v19716_v17  ;;  %11424 = vmatpush1.bf16.msra.mxu1 %v21541_v24 }
 0x657   :  { %v9956_v46 = vpop.f32.mrf.mxu0  ;;  %v10007_v23 = vpop.f32.mrf.mxu1  ;;  %11374 = vmatprep.subr.bf16.mxu0 %v21542_v56  ;;  %11425 = vmatprep.subr.bf16.mxu1 %v21543_v49 }
 0x658   :  { %10541 = vst [vmem:[%s20618_s8 + $0x48] sm:$0xff] %v9956_v46  ;;  %10543 = vst [vmem:[%s20618_s8 + $0x58] sm:$0xff] %v10007_v23  ;;  %11304 = vmatprep.mubr.bf16.mxu0 %v21413_v54  ;;  %11355 = vmatprep.mubr.bf16.mxu1 %v21413_v54 }
 0x659   :  { %v9958_v17 = vpop.f32.mrf.mxu0  ;;  %v10009_v10 = vpop.f32.mrf.mxu1 }
 0x65a   :  { %10572 = vst [vmem:[%s20618_s8 + $0x140] sm:$0xff] %v9958_v17  ;;  %10574 = vst [vmem:[%s20618_s8 + $0x150] sm:$0xff] %v10009_v10  ;;  %11375 = vmatpush1.bf16.msra.mxu0 %v19744_v9  ;;  %11426 = vmatpush1.bf16.msra.mxu1 %v19746_v41  ;;  %v21544_v41 = vld [vmem:[#allocation11_spill] sm:$0xff] }
 0x65b   :  { %v9960_v35 = vpop.f32.mrf.mxu0  ;;  %v10011_v50 = vpop.f32.mrf.mxu1  ;;  %11376 = vmatprep.subr.bf16.mxu0 %v19750_v60  ;;  %11427 = vmatprep.subr.bf16.mxu1 %v19752_v31 }
 0x65c   :  { %10573 = vst [vmem:[%s20618_s8 + $0x148] sm:$0xff] %v9960_v35  ;;  %10575 = vst [vmem:[%s20618_s8 + $0x158] sm:$0xff] %v10011_v50 }
 0x65d   :  { %v9964_v32 = vpop.f32.mrf.mxu0  ;;  %v10015_v28 = vpop.f32.mrf.mxu1  ;;  %12617 = vmatmul.mubr.msk.bf16.gmra.mxu0 %vm9709_vm0, %v19840_v21  ;;  %12619 = vmatmul.mubr.msk.bf16.gmra.mxu1 %vm9709_vm0, %v19840_v21 }
 0x65e   :  { %10604 = vst [vmem:[%s20618_s8 + $0x240] sm:$0xff] %v9964_v32  ;;  %10606 = vst [vmem:[%s20618_s8 + $0x250] sm:$0xff] %v10015_v28  ;;  %11377 = vmatpush1.bf16.msra.mxu0 %v19770_v18  ;;  %11428 = vmatpush1.bf16.msra.mxu1 %v19772_v12  ;;  %v21545_v18 = vld [vmem:[#allocation12_spill] sm:$0xff] }
 0x65f   :  { %v9966_v31 = vpop.f32.mrf.mxu0  ;;  %v10017_v60 = vpop.f32.mrf.mxu1  ;;  %11378 = vmatprep.subr.bf16.mxu0 %v19776_v61  ;;  %11429 = vmatprep.subr.bf16.mxu1 %v19778_v11 }
 0x660   :  { %10605 = vst [vmem:[%s20618_s8 + $0x248] sm:$0xff] %v9966_v31  ;;  %10607 = vst [vmem:[%s20618_s8 + $0x258] sm:$0xff] %v10017_v60  ;;  %11396 = vmatprep.mubr.bf16.mxu0 %v21413_v54  ;;  %11447 = vmatprep.mubr.bf16.mxu1 %v21413_v54 }
 0x661   :  { %v9968_v9 = vpop.f32.mrf.mxu0  ;;  %v10019_v12 = vpop.f32.mrf.mxu1 }
 0x662   :  { %11379 = vmatpush1.bf16.msra.mxu0 %v21544_v41  ;;  %11430 = vmatpush1.bf16.msra.mxu1 %v21545_v18 }
 0x663   :  { %v9969_v61 = vpop.f32.mrf.mxu0  ;;  %v10020_v11 = vpop.f32.mrf.mxu1 }
 0x665   :  { %v10056_v22 = vpop.f32.mrf.mxu0  ;;  %v10107_v14 = vpop.f32.mrf.mxu1  ;;  %12620 = vmatmul.mubr.msk.bf16.vlgmr.msra.gmra.mxu0 %vm9709_vm0, %v19824_v7  ;;  %12622 = vmatmul.mubr.msk.bf16.vlgmr.msra.gmra.mxu1 %vm9709_vm0, %v19824_v7 }
 0x666   :  { %10544 = vst [vmem:[%s20618_s8 + $0x60] sm:$0xff] %v10056_v22  ;;  %10546 = vst [vmem:[%s20618_s8 + $0x70] sm:$0xff] %v10107_v14  ;;  %11406 = vmatprep.mubr.bf16.mxu0 %v21413_v54  ;;  %11457 = vmatprep.mubr.bf16.mxu1 %v21413_v54 }
 0x667   :  { %v10058_v6 = vpop.f32.mrf.mxu0  ;;  %v10109_v8 = vpop.f32.mrf.mxu1 }
 0x668   :  { %10545 = vst [vmem:[%s20618_s8 + $0x68] sm:$0xff] %v10058_v6  ;;  %10547 = vst [vmem:[%s20618_s8 + $0x78] sm:$0xff] %v10109_v8 }
 0x669   :  { %v10060_v7 = vpop.f32.mrf.mxu0  ;;  %v10111_v27 = vpop.f32.mrf.mxu1 }
 0x66a   :  { %10576 = vst [vmem:[%s20618_s8 + $0x160] sm:$0xff] %v10060_v7  ;;  %10578 = vst [vmem:[%s20618_s8 + $0x170] sm:$0xff] %v10111_v27 }
 0x66b   :  { %v10062_v54 = vpop.f32.mrf.mxu0  ;;  %v10113_v43 = vpop.f32.mrf.mxu1 }
 0x66c   :  { %10577 = vst [vmem:[%s20618_s8 + $0x168] sm:$0xff] %v10062_v54  ;;  %10579 = vst [vmem:[%s20618_s8 + $0x178] sm:$0xff] %v10113_v43 }
 0x66d   :  { %v10066_v34 = vpop.f32.mrf.mxu0  ;;  %v10117_v2 = vpop.f32.mrf.mxu1  ;;  %12621 = vmatmul.mubr.msk.bf16.gmra.mxu0 %vm9709_vm0, %v19840_v21  ;;  %12623 = vmatmul.mubr.msk.bf16.gmra.mxu1 %vm9709_vm0, %v19840_v21 }
 0x66e   :  { %10608 = vst [vmem:[%s20618_s8 + $0x260] sm:$0xff] %v10066_v34  ;;  %10610 = vst [vmem:[%s20618_s8 + $0x270] sm:$0xff] %v10117_v2 }
 0x66f   :  { %v10068_v63 = vpop.f32.mrf.mxu0  ;;  %v10119_v25 = vpop.f32.mrf.mxu1 }
 0x670   :  { %10609 = vst [vmem:[%s20618_s8 + $0x268] sm:$0xff] %v10068_v63  ;;  %10611 = vst [vmem:[%s20618_s8 + $0x278] sm:$0xff] %v10119_v25 }
 0x671   :  { %v10070_v3 = vpop.f32.mrf.mxu0  ;;  %v10121_v21 = vpop.f32.mrf.mxu1 }
 0x673   :  { %v10071_v36 = vpop.f32.mrf.mxu0  ;;  %v10122_v38 = vpop.f32.mrf.mxu1 }
 0x675   :  { %v10158_v42 = vpop.f32.mrf.mxu0  ;;  %v10209_v55 = vpop.f32.mrf.mxu1 }
 0x676   :  { %10548 = vst [vmem:[%s20618_s8 + $0x80] sm:$0xff] %v10158_v42  ;;  %10550 = vst [vmem:[%s20618_s8 + $0x90] sm:$0xff] %v10209_v55 }
 0x677   :  { %v10160_v20 = vpop.f32.mrf.mxu0  ;;  %v10211_v52 = vpop.f32.mrf.mxu1 }
 0x678   :  { %10549 = vst [vmem:[%s20618_s8 + $0x88] sm:$0xff] %v10160_v20  ;;  %10551 = vst [vmem:[%s20618_s8 + $0x98] sm:$0xff] %v10211_v52 }
 0x679   :  { %v10162_v59 = vpop.f32.mrf.mxu0  ;;  %v10213_v47 = vpop.f32.mrf.mxu1 }
 0x67a   :  { %10580 = vst [vmem:[%s20618_s8 + $0x180] sm:$0xff] %v10162_v59  ;;  %10582 = vst [vmem:[%s20618_s8 + $0x190] sm:$0xff] %v10213_v47 }
 0x67b   :  { %v10164_v40 = vpop.f32.mrf.mxu0  ;;  %v10215_v51 = vpop.f32.mrf.mxu1 }
 0x67c   :  { %10581 = vst [vmem:[%s20618_s8 + $0x188] sm:$0xff] %v10164_v40  ;;  %10583 = vst [vmem:[%s20618_s8 + $0x198] sm:$0xff] %v10215_v51 }
 0x67d   :  { %v10168_v0 = vpop.f32.mrf.mxu0  ;;  %v10219_v44 = vpop.f32.mrf.mxu1 }
 0x67e   :  { %10612 = vst [vmem:[%s20618_s8 + $0x280] sm:$0xff] %v10168_v0  ;;  %10614 = vst [vmem:[%s20618_s8 + $0x290] sm:$0xff] %v10219_v44 }
 0x67f   :  { %v10170_v33 = vpop.f32.mrf.mxu0  ;;  %v10221_v57 = vpop.f32.mrf.mxu1 }
 0x680   :  { %10613 = vst [vmem:[%s20618_s8 + $0x288] sm:$0xff] %v10170_v33  ;;  %10615 = vst [vmem:[%s20618_s8 + $0x298] sm:$0xff] %v10221_v57 }
 0x681   :  { %v10172_v62 = vpop.f32.mrf.mxu0  ;;  %v10223_v39 = vpop.f32.mrf.mxu1 }
 0x683   :  { %v10173_v58 = vpop.f32.mrf.mxu0  ;;  %v10224_v15 = vpop.f32.mrf.mxu1 }
 0x685   :  { %v10260_v30 = vpop.f32.mrf.mxu0  ;;  %v10311_v13 = vpop.f32.mrf.mxu1 }
 0x686   :  { %10552 = vst [vmem:[%s20618_s8 + $0xa0] sm:$0xff] %v10260_v30  ;;  %10554 = vst [vmem:[%s20618_s8 + $0xb0] sm:$0xff] %v10311_v13 }
 0x687   :  { %v10262_v53 = vpop.f32.mrf.mxu0  ;;  %v10313_v19 = vpop.f32.mrf.mxu1 }
 0x688   :  { %10553 = vst [vmem:[%s20618_s8 + $0xa8] sm:$0xff] %v10262_v53  ;;  %10555 = vst [vmem:[%s20618_s8 + $0xb8] sm:$0xff] %v10313_v19 }
 0x689   :  { %v10264_v48 = vpop.f32.mrf.mxu0  ;;  %v10315_v26 = vpop.f32.mrf.mxu1 }
 0x68a   :  { %10584 = vst [vmem:[%s20618_s8 + $0x1a0] sm:$0xff] %v10264_v48  ;;  %10586 = vst [vmem:[%s20618_s8 + $0x1b0] sm:$0xff] %v10315_v26 }
 0x68b   :  { %v10266_v1 = vpop.f32.mrf.mxu0  ;;  %v10317_v16 = vpop.f32.mrf.mxu1 }
 0x68c   :  { %10585 = vst [vmem:[%s20618_s8 + $0x1a8] sm:$0xff] %v10266_v1  ;;  %10587 = vst [vmem:[%s20618_s8 + $0x1b8] sm:$0xff] %v10317_v16 }
 0x68d   :  { %v10270_v37 = vpop.f32.mrf.mxu0  ;;  %v10321_v29 = vpop.f32.mrf.mxu1 }
 0x68e   :  { %10616 = vst [vmem:[%s20618_s8 + $0x2a0] sm:$0xff] %v10270_v37  ;;  %10618 = vst [vmem:[%s20618_s8 + $0x2b0] sm:$0xff] %v10321_v29 }
 0x68f   :  { %v10272_v5 = vpop.f32.mrf.mxu0  ;;  %v10323_v45 = vpop.f32.mrf.mxu1 }
 0x690   :  { %10617 = vst [vmem:[%s20618_s8 + $0x2a8] sm:$0xff] %v10272_v5  ;;  %10619 = vst [vmem:[%s20618_s8 + $0x2b8] sm:$0xff] %v10323_v45 }
 0x691   :  { %v10274_v4 = vpop.f32.mrf.mxu0  ;;  %v10325_v24 = vpop.f32.mrf.mxu1 }
 0x693   :  { %v10275_v46 = vpop.f32.mrf.mxu0  ;;  %v10326_v23 = vpop.f32.mrf.mxu1 }
 0x695   :  { %v10362_v56 = vpop.f32.mrf.mxu0  ;;  %v10413_v49 = vpop.f32.mrf.mxu1 }
 0x696   :  { %10556 = vst [vmem:[%s20618_s8 + $0xc0] sm:$0xff] %v10362_v56  ;;  %10558 = vst [vmem:[%s20618_s8 + $0xd0] sm:$0xff] %v10413_v49 }
 0x697   :  { %v10364_v17 = vpop.f32.mrf.mxu0  ;;  %v10415_v10 = vpop.f32.mrf.mxu1 }
 0x698   :  { %10557 = vst [vmem:[%s20618_s8 + $0xc8] sm:$0xff] %v10364_v17  ;;  %10559 = vst [vmem:[%s20618_s8 + $0xd8] sm:$0xff] %v10415_v10 }
 0x699   :  { %v10366_v35 = vpop.f32.mrf.mxu0  ;;  %v10417_v50 = vpop.f32.mrf.mxu1 }
 0x69a   :  { %10588 = vst [vmem:[%s20618_s8 + $0x1c0] sm:$0xff] %v10366_v35  ;;  %10590 = vst [vmem:[%s20618_s8 + $0x1d0] sm:$0xff] %v10417_v50 }
 0x69b   :  { %v10368_v32 = vpop.f32.mrf.mxu0  ;;  %v10419_v28 = vpop.f32.mrf.mxu1 }
 0x69c   :  { %10589 = vst [vmem:[%s20618_s8 + $0x1c8] sm:$0xff] %v10368_v32  ;;  %10591 = vst [vmem:[%s20618_s8 + $0x1d8] sm:$0xff] %v10419_v28 }
 0x69d   :  { %v10372_v31 = vpop.f32.mrf.mxu0  ;;  %v10423_v60 = vpop.f32.mrf.mxu1 }
 0x69e   :  { %10620 = vst [vmem:[%s20618_s8 + $0x2c0] sm:$0xff] %v10372_v31  ;;  %10622 = vst [vmem:[%s20618_s8 + $0x2d0] sm:$0xff] %v10423_v60 }
 0x69f   :  { %v10374_v9 = vpop.f32.mrf.mxu0  ;;  %v10425_v12 = vpop.f32.mrf.mxu1 }
 0x6a0   :  { %10621 = vst [vmem:[%s20618_s8 + $0x2c8] sm:$0xff] %v10374_v9  ;;  %10623 = vst [vmem:[%s20618_s8 + $0x2d8] sm:$0xff] %v10425_v12 }
 0x6a1   :  { %v10376_v41 = vpop.f32.mrf.mxu0  ;;  %v10427_v18 = vpop.f32.mrf.mxu1 }
 0x6a3   :  { %v10377_v61 = vpop.f32.mrf.mxu0  ;;  %v10428_v11 = vpop.f32.mrf.mxu1 }
 0x6a5   :  { %v10464_v22 = vpop.f32.mrf.mxu0  ;;  %v10515_v14 = vpop.f32.mrf.mxu1 }
 0x6a6   :  { %10560 = vst [vmem:[%s20618_s8 + $0xe0] sm:$0xff] %v10464_v22  ;;  %10562 = vst [vmem:[%s20618_s8 + $0xf0] sm:$0xff] %v10515_v14 }
 0x6a7   :  { %v10466_v6 = vpop.f32.mrf.mxu0  ;;  %v10517_v8 = vpop.f32.mrf.mxu1 }
 0x6a8   :  { %10561 = vst [vmem:[%s20618_s8 + $0xe8] sm:$0xff] %v10466_v6  ;;  %10563 = vst [vmem:[%s20618_s8 + $0xf8] sm:$0xff] %v10517_v8 }
 0x6a9   :  { %v10468_v7 = vpop.f32.mrf.mxu0  ;;  %v10519_v27 = vpop.f32.mrf.mxu1 }
 0x6aa   :  { %10592 = vst [vmem:[%s20618_s8 + $0x1e0] sm:$0xff] %v10468_v7  ;;  %10594 = vst [vmem:[%s20618_s8 + $0x1f0] sm:$0xff] %v10519_v27 }
 0x6ab   :  { %v10470_v54 = vpop.f32.mrf.mxu0  ;;  %v10521_v43 = vpop.f32.mrf.mxu1 }
 0x6ac   :  { %10593 = vst [vmem:[%s20618_s8 + $0x1e8] sm:$0xff] %v10470_v54  ;;  %10595 = vst [vmem:[%s20618_s8 + $0x1f8] sm:$0xff] %v10521_v43 }
 0x6ad   :  { %v10474_v34 = vpop.f32.mrf.mxu0  ;;  %v10525_v2 = vpop.f32.mrf.mxu1 }
 0x6ae   :  { %10624 = vst [vmem:[%s20618_s8 + $0x2e0] sm:$0xff] %v10474_v34  ;;  %10626 = vst [vmem:[%s20618_s8 + $0x2f0] sm:$0xff] %v10525_v2 }
 0x6af   :  { %v10476_v63 = vpop.f32.mrf.mxu0  ;;  %v10527_v25 = vpop.f32.mrf.mxu1 }
 0x6b0   :  { %10625 = vst [vmem:[%s20618_s8 + $0x2e8] sm:$0xff] %v10476_v63  ;;  %10627 = vst [vmem:[%s20618_s8 + $0x2f8] sm:$0xff] %v10527_v25 }
 0x6b1   :  { %v10478_v3 = vpop.f32.mrf.mxu0  ;;  %v10529_v21 = vpop.f32.mrf.mxu1 }
 0x6b3   :  { %v10479_v36 = vpop.f32.mrf.mxu0  ;;  %v10530_v38 = vpop.f32.mrf.mxu1 }
 0x6b5   :  { %v10684_v42 = vpop.f32.mrf.mxu0  ;;  %v10735_v55 = vpop.f32.mrf.mxu1 }
 0x6b6   :  { %12624 = vst [vmem:[%s20618_s8 + $0x300] sm:$0xff] %v10684_v42  ;;  %12626 = vst [vmem:[%s20618_s8 + $0x310] sm:$0xff] %v10735_v55 }
 0x6b7   :  { %v10686_v20 = vpop.f32.mrf.mxu0  ;;  %v10737_v52 = vpop.f32.mrf.mxu1 }
 0x6b8   :  { %12625 = vst [vmem:[%s20618_s8 + $0x308] sm:$0xff] %v10686_v20  ;;  %12627 = vst [vmem:[%s20618_s8 + $0x318] sm:$0xff] %v10737_v52 }
 0x6b9   :  { %v10688_v59 = vpop.f32.mrf.mxu0  ;;  %v10739_v47 = vpop.f32.mrf.mxu1 }
 0x6ba   :  { %12656 = vst [vmem:[%s20618_s8 + $0x400] sm:$0xff] %v10688_v59  ;;  %12658 = vst [vmem:[%s20618_s8 + $0x410] sm:$0xff] %v10739_v47 }
 0x6bb   :  { %v10690_v40 = vpop.f32.mrf.mxu0  ;;  %v10741_v51 = vpop.f32.mrf.mxu1 }
 0x6bc   :  { %12657 = vst [vmem:[%s20618_s8 + $0x408] sm:$0xff] %v10690_v40  ;;  %12659 = vst [vmem:[%s20618_s8 + $0x418] sm:$0xff] %v10741_v51 }
 0x6bd   :  { %v10694_v0 = vpop.f32.mrf.mxu0  ;;  %v10745_v44 = vpop.f32.mrf.mxu1 }
 0x6be   :  { %12688 = vst [vmem:[%s20618_s8 + $0x500] sm:$0xff] %v10694_v0  ;;  %12690 = vst [vmem:[%s20618_s8 + $0x510] sm:$0xff] %v10745_v44 }
 0x6bf   :  { %v10696_v33 = vpop.f32.mrf.mxu0  ;;  %v10747_v57 = vpop.f32.mrf.mxu1 }
 0x6c0   :  { %12689 = vst [vmem:[%s20618_s8 + $0x508] sm:$0xff] %v10696_v33  ;;  %12691 = vst [vmem:[%s20618_s8 + $0x518] sm:$0xff] %v10747_v57 }
 0x6c1   :  { %v10698_v62 = vpop.f32.mrf.mxu0  ;;  %v10749_v39 = vpop.f32.mrf.mxu1 }
 0x6c3   :  { %v10699_v58 = vpop.f32.mrf.mxu0  ;;  %v10750_v15 = vpop.f32.mrf.mxu1 }
 0x6c5   :  { %v10786_v30 = vpop.f32.mrf.mxu0  ;;  %v10837_v13 = vpop.f32.mrf.mxu1 }
 0x6c6   :  { %12628 = vst [vmem:[%s20618_s8 + $0x320] sm:$0xff] %v10786_v30  ;;  %12630 = vst [vmem:[%s20618_s8 + $0x330] sm:$0xff] %v10837_v13 }
 0x6c7   :  { %v10788_v53 = vpop.f32.mrf.mxu0  ;;  %v10839_v19 = vpop.f32.mrf.mxu1 }
 0x6c8   :  { %12629 = vst [vmem:[%s20618_s8 + $0x328] sm:$0xff] %v10788_v53  ;;  %12631 = vst [vmem:[%s20618_s8 + $0x338] sm:$0xff] %v10839_v19 }
 0x6c9   :  { %v10790_v48 = vpop.f32.mrf.mxu0  ;;  %v10841_v26 = vpop.f32.mrf.mxu1 }
 0x6ca   :  { %12660 = vst [vmem:[%s20618_s8 + $0x420] sm:$0xff] %v10790_v48  ;;  %12662 = vst [vmem:[%s20618_s8 + $0x430] sm:$0xff] %v10841_v26 }
 0x6cb   :  { %v10792_v1 = vpop.f32.mrf.mxu0  ;;  %v10843_v16 = vpop.f32.mrf.mxu1 }
 0x6cc   :  { %12661 = vst [vmem:[%s20618_s8 + $0x428] sm:$0xff] %v10792_v1  ;;  %12663 = vst [vmem:[%s20618_s8 + $0x438] sm:$0xff] %v10843_v16 }
 0x6cd   :  { %v10796_v37 = vpop.f32.mrf.mxu0  ;;  %v10847_v29 = vpop.f32.mrf.mxu1 }
 0x6ce   :  { %12692 = vst [vmem:[%s20618_s8 + $0x520] sm:$0xff] %v10796_v37  ;;  %12694 = vst [vmem:[%s20618_s8 + $0x530] sm:$0xff] %v10847_v29 }
 0x6cf   :  { %v10798_v5 = vpop.f32.mrf.mxu0  ;;  %v10849_v45 = vpop.f32.mrf.mxu1 }
 0x6d0   :  { %12693 = vst [vmem:[%s20618_s8 + $0x528] sm:$0xff] %v10798_v5  ;;  %12695 = vst [vmem:[%s20618_s8 + $0x538] sm:$0xff] %v10849_v45 }
 0x6d1   :  { %v10800_v4 = vpop.f32.mrf.mxu0  ;;  %v10851_v24 = vpop.f32.mrf.mxu1 }
 0x6d3   :  { %v10801_v46 = vpop.f32.mrf.mxu0  ;;  %v10852_v23 = vpop.f32.mrf.mxu1 }
 0x6d5   :  { %v10888_v56 = vpop.f32.mrf.mxu0  ;;  %v10939_v49 = vpop.f32.mrf.mxu1 }
 0x6d6   :  { %12632 = vst [vmem:[%s20618_s8 + $0x340] sm:$0xff] %v10888_v56  ;;  %12634 = vst [vmem:[%s20618_s8 + $0x350] sm:$0xff] %v10939_v49 }
 0x6d7   :  { %v10890_v17 = vpop.f32.mrf.mxu0  ;;  %v10941_v10 = vpop.f32.mrf.mxu1 }
 0x6d8   :  { %12633 = vst [vmem:[%s20618_s8 + $0x348] sm:$0xff] %v10890_v17  ;;  %12635 = vst [vmem:[%s20618_s8 + $0x358] sm:$0xff] %v10941_v10 }
 0x6d9   :  { %v10892_v35 = vpop.f32.mrf.mxu0  ;;  %v10943_v50 = vpop.f32.mrf.mxu1 }
 0x6da   :  { %12664 = vst [vmem:[%s20618_s8 + $0x440] sm:$0xff] %v10892_v35  ;;  %12666 = vst [vmem:[%s20618_s8 + $0x450] sm:$0xff] %v10943_v50 }
 0x6db   :  { %v10894_v32 = vpop.f32.mrf.mxu0  ;;  %v10945_v28 = vpop.f32.mrf.mxu1 }
 0x6dc   :  { %12665 = vst [vmem:[%s20618_s8 + $0x448] sm:$0xff] %v10894_v32  ;;  %12667 = vst [vmem:[%s20618_s8 + $0x458] sm:$0xff] %v10945_v28 }
 0x6dd   :  { %v10898_v31 = vpop.f32.mrf.mxu0  ;;  %v10949_v60 = vpop.f32.mrf.mxu1 }
 0x6de   :  { %12696 = vst [vmem:[%s20618_s8 + $0x540] sm:$0xff] %v10898_v31  ;;  %12698 = vst [vmem:[%s20618_s8 + $0x550] sm:$0xff] %v10949_v60 }
 0x6df   :  { %v10900_v9 = vpop.f32.mrf.mxu0  ;;  %v10951_v12 = vpop.f32.mrf.mxu1 }
 0x6e0   :  { %12697 = vst [vmem:[%s20618_s8 + $0x548] sm:$0xff] %v10900_v9  ;;  %12699 = vst [vmem:[%s20618_s8 + $0x558] sm:$0xff] %v10951_v12 }
 0x6e1   :  { %v10902_v41 = vpop.f32.mrf.mxu0  ;;  %v10953_v18 = vpop.f32.mrf.mxu1 }
 0x6e3   :  { %v10903_v61 = vpop.f32.mrf.mxu0  ;;  %v10954_v11 = vpop.f32.mrf.mxu1 }
 0x6e5   :  { %v10990_v22 = vpop.f32.mrf.mxu0  ;;  %v11041_v14 = vpop.f32.mrf.mxu1 }
 0x6e6   :  { %12636 = vst [vmem:[%s20618_s8 + $0x360] sm:$0xff] %v10990_v22  ;;  %12638 = vst [vmem:[%s20618_s8 + $0x370] sm:$0xff] %v11041_v14 }
 0x6e7   :  { %v10992_v6 = vpop.f32.mrf.mxu0  ;;  %v11043_v8 = vpop.f32.mrf.mxu1 }
 0x6e8   :  { %12637 = vst [vmem:[%s20618_s8 + $0x368] sm:$0xff] %v10992_v6  ;;  %12639 = vst [vmem:[%s20618_s8 + $0x378] sm:$0xff] %v11043_v8 }
 0x6e9   :  { %v10994_v7 = vpop.f32.mrf.mxu0  ;;  %v11045_v27 = vpop.f32.mrf.mxu1 }
 0x6ea   :  { %12668 = vst [vmem:[%s20618_s8 + $0x460] sm:$0xff] %v10994_v7  ;;  %12670 = vst [vmem:[%s20618_s8 + $0x470] sm:$0xff] %v11045_v27 }
 0x6eb   :  { %v10996_v54 = vpop.f32.mrf.mxu0  ;;  %v11047_v43 = vpop.f32.mrf.mxu1 }
 0x6ec   :  { %12669 = vst [vmem:[%s20618_s8 + $0x468] sm:$0xff] %v10996_v54  ;;  %12671 = vst [vmem:[%s20618_s8 + $0x478] sm:$0xff] %v11047_v43 }
 0x6ed   :  { %v11000_v34 = vpop.f32.mrf.mxu0  ;;  %v11051_v2 = vpop.f32.mrf.mxu1 }
 0x6ee   :  { %12700 = vst [vmem:[%s20618_s8 + $0x560] sm:$0xff] %v11000_v34  ;;  %12702 = vst [vmem:[%s20618_s8 + $0x570] sm:$0xff] %v11051_v2 }
 0x6ef   :  { %v11002_v63 = vpop.f32.mrf.mxu0  ;;  %v11053_v25 = vpop.f32.mrf.mxu1 }
 0x6f0   :  { %12701 = vst [vmem:[%s20618_s8 + $0x568] sm:$0xff] %v11002_v63  ;;  %12703 = vst [vmem:[%s20618_s8 + $0x578] sm:$0xff] %v11053_v25 }
 0x6f1   :  { %v11004_v3 = vpop.f32.mrf.mxu0  ;;  %v11055_v21 = vpop.f32.mrf.mxu1 }
 0x6f3   :  { %v11005_v36 = vpop.f32.mrf.mxu0  ;;  %v11056_v38 = vpop.f32.mrf.mxu1 }
 0x6f5   :  { %v11092_v42 = vpop.f32.mrf.mxu0  ;;  %v11143_v55 = vpop.f32.mrf.mxu1 }
 0x6f6   :  { %12640 = vst [vmem:[%s20618_s8 + $0x380] sm:$0xff] %v11092_v42  ;;  %12642 = vst [vmem:[%s20618_s8 + $0x390] sm:$0xff] %v11143_v55 }
 0x6f7   :  { %v11094_v20 = vpop.f32.mrf.mxu0  ;;  %v11145_v52 = vpop.f32.mrf.mxu1 }
 0x6f8   :  { %12641 = vst [vmem:[%s20618_s8 + $0x388] sm:$0xff] %v11094_v20  ;;  %12643 = vst [vmem:[%s20618_s8 + $0x398] sm:$0xff] %v11145_v52 }
 0x6f9   :  { %v11096_v59 = vpop.f32.mrf.mxu0  ;;  %v11147_v47 = vpop.f32.mrf.mxu1 }
 0x6fa   :  { %12672 = vst [vmem:[%s20618_s8 + $0x480] sm:$0xff] %v11096_v59  ;;  %12674 = vst [vmem:[%s20618_s8 + $0x490] sm:$0xff] %v11147_v47 }
 0x6fb   :  { %v11098_v40 = vpop.f32.mrf.mxu0  ;;  %v11149_v51 = vpop.f32.mrf.mxu1 }
 0x6fc   :  { %12673 = vst [vmem:[%s20618_s8 + $0x488] sm:$0xff] %v11098_v40  ;;  %12675 = vst [vmem:[%s20618_s8 + $0x498] sm:$0xff] %v11149_v51 }
 0x6fd   :  { %v11102_v0 = vpop.f32.mrf.mxu0  ;;  %v11153_v44 = vpop.f32.mrf.mxu1 }
 0x6fe   :  { %12704 = vst [vmem:[%s20618_s8 + $0x580] sm:$0xff] %v11102_v0  ;;  %12706 = vst [vmem:[%s20618_s8 + $0x590] sm:$0xff] %v11153_v44 }
 0x6ff   :  { %v11104_v33 = vpop.f32.mrf.mxu0  ;;  %v11155_v57 = vpop.f32.mrf.mxu1 }
 0x700   :  { %12705 = vst [vmem:[%s20618_s8 + $0x588] sm:$0xff] %v11104_v33  ;;  %12707 = vst [vmem:[%s20618_s8 + $0x598] sm:$0xff] %v11155_v57 }
 0x701   :  { %v11106_v62 = vpop.f32.mrf.mxu0  ;;  %v11157_v39 = vpop.f32.mrf.mxu1 }
 0x703   :  { %v11107_v58 = vpop.f32.mrf.mxu0  ;;  %v11158_v15 = vpop.f32.mrf.mxu1 }
 0x705   :  { %v11194_v30 = vpop.f32.mrf.mxu0  ;;  %v11245_v13 = vpop.f32.mrf.mxu1 }
 0x706   :  { %12644 = vst [vmem:[%s20618_s8 + $0x3a0] sm:$0xff] %v11194_v30  ;;  %12646 = vst [vmem:[%s20618_s8 + $0x3b0] sm:$0xff] %v11245_v13 }
 0x707   :  { %v11196_v53 = vpop.f32.mrf.mxu0  ;;  %v11247_v19 = vpop.f32.mrf.mxu1 }
 0x708   :  { %12645 = vst [vmem:[%s20618_s8 + $0x3a8] sm:$0xff] %v11196_v53  ;;  %12647 = vst [vmem:[%s20618_s8 + $0x3b8] sm:$0xff] %v11247_v19 }
 0x709   :  { %v11198_v48 = vpop.f32.mrf.mxu0  ;;  %v11249_v26 = vpop.f32.mrf.mxu1 }
 0x70a   :  { %12676 = vst [vmem:[%s20618_s8 + $0x4a0] sm:$0xff] %v11198_v48  ;;  %12678 = vst [vmem:[%s20618_s8 + $0x4b0] sm:$0xff] %v11249_v26 }
 0x70b   :  { %v11200_v1 = vpop.f32.mrf.mxu0  ;;  %v11251_v16 = vpop.f32.mrf.mxu1 }
 0x70c   :  { %12677 = vst [vmem:[%s20618_s8 + $0x4a8] sm:$0xff] %v11200_v1  ;;  %12679 = vst [vmem:[%s20618_s8 + $0x4b8] sm:$0xff] %v11251_v16 }
 0x70d   :  { %v11204_v37 = vpop.f32.mrf.mxu0  ;;  %v11255_v29 = vpop.f32.mrf.mxu1 }
 0x70e   :  { %12708 = vst [vmem:[%s20618_s8 + $0x5a0] sm:$0xff] %v11204_v37  ;;  %12710 = vst [vmem:[%s20618_s8 + $0x5b0] sm:$0xff] %v11255_v29 }
 0x70f   :  { %v11206_v5 = vpop.f32.mrf.mxu0  ;;  %v11257_v45 = vpop.f32.mrf.mxu1 }
 0x710   :  { %12709 = vst [vmem:[%s20618_s8 + $0x5a8] sm:$0xff] %v11206_v5  ;;  %12711 = vst [vmem:[%s20618_s8 + $0x5b8] sm:$0xff] %v11257_v45 }
 0x711   :  { %v11208_v4 = vpop.f32.mrf.mxu0  ;;  %v11259_v24 = vpop.f32.mrf.mxu1 }
 0x713   :  { %v11209_v46 = vpop.f32.mrf.mxu0  ;;  %v11260_v23 = vpop.f32.mrf.mxu1 }
 0x715   :  { %v11296_v56 = vpop.f32.mrf.mxu0  ;;  %v11347_v49 = vpop.f32.mrf.mxu1 }
 0x716   :  { %12648 = vst [vmem:[%s20618_s8 + $0x3c0] sm:$0xff] %v11296_v56  ;;  %12650 = vst [vmem:[%s20618_s8 + $0x3d0] sm:$0xff] %v11347_v49 }
 0x717   :  { %v11298_v17 = vpop.f32.mrf.mxu0  ;;  %v11349_v10 = vpop.f32.mrf.mxu1 }
 0x718   :  { %12649 = vst [vmem:[%s20618_s8 + $0x3c8] sm:$0xff] %v11298_v17  ;;  %12651 = vst [vmem:[%s20618_s8 + $0x3d8] sm:$0xff] %v11349_v10 }
 0x719   :  { %v11300_v35 = vpop.f32.mrf.mxu0  ;;  %v11351_v50 = vpop.f32.mrf.mxu1 }
 0x71a   :  { %12680 = vst [vmem:[%s20618_s8 + $0x4c0] sm:$0xff] %v11300_v35  ;;  %12682 = vst [vmem:[%s20618_s8 + $0x4d0] sm:$0xff] %v11351_v50 }
 0x71b   :  { %v11302_v32 = vpop.f32.mrf.mxu0  ;;  %v11353_v28 = vpop.f32.mrf.mxu1 }
 0x71c   :  { %12681 = vst [vmem:[%s20618_s8 + $0x4c8] sm:$0xff] %v11302_v32  ;;  %12683 = vst [vmem:[%s20618_s8 + $0x4d8] sm:$0xff] %v11353_v28 }
 0x71d   :  { %v11306_v31 = vpop.f32.mrf.mxu0  ;;  %v11357_v60 = vpop.f32.mrf.mxu1 }
 0x71e   :  { %12712 = vst [vmem:[%s20618_s8 + $0x5c0] sm:$0xff] %v11306_v31  ;;  %12714 = vst [vmem:[%s20618_s8 + $0x5d0] sm:$0xff] %v11357_v60 }
 0x71f   :  { %v11308_v9 = vpop.f32.mrf.mxu0  ;;  %v11359_v12 = vpop.f32.mrf.mxu1 }
 0x720   :  { %12713 = vst [vmem:[%s20618_s8 + $0x5c8] sm:$0xff] %v11308_v9  ;;  %12715 = vst [vmem:[%s20618_s8 + $0x5d8] sm:$0xff] %v11359_v12 }
 0x721   :  { %v11310_v41 = vpop.f32.mrf.mxu0  ;;  %v11361_v18 = vpop.f32.mrf.mxu1 }
 0x723   :  { %v11311_v61 = vpop.f32.mrf.mxu0  ;;  %v11362_v11 = vpop.f32.mrf.mxu1 }
 0x725   :  { %v11398_v22 = vpop.f32.mrf.mxu0  ;;  %v11449_v14 = vpop.f32.mrf.mxu1 }
 0x726   :  { %12652 = vst [vmem:[%s20618_s8 + $0x3e0] sm:$0xff] %v11398_v22  ;;  %12654 = vst [vmem:[%s20618_s8 + $0x3f0] sm:$0xff] %v11449_v14 }
 0x727   :  { %v11400_v6 = vpop.f32.mrf.mxu0  ;;  %v11451_v8 = vpop.f32.mrf.mxu1 }
 0x728   :  { %12653 = vst [vmem:[%s20618_s8 + $0x3e8] sm:$0xff] %v11400_v6  ;;  %12655 = vst [vmem:[%s20618_s8 + $0x3f8] sm:$0xff] %v11451_v8 }
 0x729   :  { %v11402_v7 = vpop.f32.mrf.mxu0  ;;  %v11453_v27 = vpop.f32.mrf.mxu1 }
 0x72a   :  { %12684 = vst [vmem:[%s20618_s8 + $0x4e0] sm:$0xff] %v11402_v7  ;;  %12686 = vst [vmem:[%s20618_s8 + $0x4f0] sm:$0xff] %v11453_v27 }
 0x72b   :  { %v11404_v54 = vpop.f32.mrf.mxu0  ;;  %v11455_v43 = vpop.f32.mrf.mxu1 }
 0x72c   :  { %12685 = vst [vmem:[%s20618_s8 + $0x4e8] sm:$0xff] %v11404_v54  ;;  %12687 = vst [vmem:[%s20618_s8 + $0x4f8] sm:$0xff] %v11455_v43 }
 0x72d   :  { %v11408_v34 = vpop.f32.mrf.mxu0  ;;  %v11459_v2 = vpop.f32.mrf.mxu1 }
 0x72e   :  { %12716 = vst [vmem:[%s20618_s8 + $0x5e0] sm:$0xff] %v11408_v34  ;;  %12718 = vst [vmem:[%s20618_s8 + $0x5f0] sm:$0xff] %v11459_v2 }
 0x72f   :  { %v11410_v63 = vpop.f32.mrf.mxu0  ;;  %v11461_v25 = vpop.f32.mrf.mxu1 }
 0x730   :  { %12717 = vst [vmem:[%s20618_s8 + $0x5e8] sm:$0xff] %v11410_v63  ;;  %12719 = vst [vmem:[%s20618_s8 + $0x5f8] sm:$0xff] %v11461_v25 }
 0x731   :  { %v11412_v3 = vpop.f32.mrf.mxu0  ;;  %v11463_v21 = vpop.f32.mrf.mxu1 }
 0x733   :  { %v11413_v36 = vpop.f32.mrf.mxu0  ;;  %v11464_v38 = vpop.f32.mrf.mxu1 }

</bundles_post_ra>
